<compile_context>
chip_gen: v7x
topology: tpu7x:2x2x1
jax: 0.10.0
libtpu: 0.0.40
codegen_flags: <defaults>
</compile_context>

<pallas_src>
import functools

import numpy as np
import jax
import jax.numpy as jnp
from jax.experimental import pallas as pl
from jax.experimental.pallas import tpu as pltpu


# ------------------------------ helpers ------------------------------------

def _whole_spec(shape):
    nd = len(shape)
    return pl.BlockSpec(shape, lambda *_: (0,) * nd)


_ARBITRARY = pltpu.CompilerParams(dimension_semantics=("arbitrary",))
_PARALLEL = pltpu.CompilerParams(dimension_semantics=("parallel",))


# ------------------------------ Pallas kernels ------------------------------

def _linear_bn_relu_kernel(z_ref, w_ref, b_ref, o_ref, *, S, C, n):
    """Linear (bf16 matmul, f32 acc) + training-mode BatchNorm + ReLU.

    Output columns are (spatial, channel) ordered, i.e. already NHWC-flat:
    channel c lives in columns {s*C + c : s in [0, S)}.
    """
    a = z_ref[...].astype(jnp.bfloat16)
    acc = jnp.dot(a, w_ref[...], preferred_element_type=jnp.float32) + b_ref[...]
    col_sum = jnp.sum(acc, axis=0, keepdims=True)            # [1, S*C]
    col_ss = jnp.sum(acc * acc, axis=0, keepdims=True)        # [1, S*C]
    ch_sum = col_sum[:, 0:C]
    ch_ss = col_ss[:, 0:C]
    for s in range(1, S):                                     # C-aligned lane slices
        ch_sum = ch_sum + col_sum[:, s * C:(s + 1) * C]
        ch_ss = ch_ss + col_ss[:, s * C:(s + 1) * C]
    inv_n = 1.0 / n
    mean = ch_sum * inv_n
    var = ch_ss * inv_n - mean * mean
    inv = jax.lax.rsqrt(var + 1e-5)
    mean_f = jnp.concatenate([mean] * S, axis=1)              # [1, S*C]
    inv_f = jnp.concatenate([inv] * S, axis=1)                # [1, S*C]
    o_ref[...] = jnp.maximum((acc - mean_f) * inv_f, 0.0).astype(o_ref.dtype)


def _deconv_bn_relu_kernel(t_ref, w_ref, o_ref, *, cout, n):
    """4-phase ConvTranspose2d(4,2,1) as ONE deep-K matmul, fused with
    training-mode BatchNorm + ReLU.  Output: [B*H*W, 4*Cout] (phase-major)."""
    acc = jnp.dot(t_ref[...], w_ref[...],
                  preferred_element_type=jnp.float32)          # [M, 4*Cout]
    col_sum = jnp.sum(acc, axis=0, keepdims=True)              # [1, 4*Cout]
    col_ss = jnp.sum(acc * acc, axis=0, keepdims=True)         # [1, 4*Cout]
    ch_sum = col_sum[:, 0:cout]
    ch_ss = col_ss[:, 0:cout]
    for p in range(1, 4):                                      # fold 4 phase blocks
        ch_sum = ch_sum + col_sum[:, p * cout:(p + 1) * cout]
        ch_ss = ch_ss + col_ss[:, p * cout:(p + 1) * cout]
    inv_n = 1.0 / n
    mean = ch_sum * inv_n
    var = ch_ss * inv_n - mean * mean
    inv = jax.lax.rsqrt(var + 1e-5)
    mean_f = jnp.concatenate([mean] * 4, axis=1)               # [1, 4*Cout]
    inv_f = jnp.concatenate([inv] * 4, axis=1)
    o_ref[...] = jnp.maximum((acc - mean_f) * inv_f, 0.0).astype(o_ref.dtype)


def _deconv_tanh_kernel(t_ref, w_ref, o_ref):
    """4-phase ConvTranspose2d(4,2,1) (single deep-K dot) fused with tanh.
    Weight N-dim is zero-padded to 128 so the store is lane-dense."""
    acc = jnp.dot(t_ref[...], w_ref[...], preferred_element_type=jnp.float32)
    o_ref[...] = jnp.tanh(acc).astype(o_ref.dtype)


# ------------------------------ wrappers ------------------------------------

def linear_bn_relu(z, w_bf16, b_f32, *, S, C):
    B = z.shape[0]
    N = S * C
    kernel = functools.partial(_linear_bn_relu_kernel, S=S, C=C, n=float(B * S))
    return pl.pallas_call(
        kernel,
        out_shape=jax.ShapeDtypeStruct((B, N), jnp.bfloat16),
        grid=(1,),
        in_specs=[_whole_spec(z.shape), _whole_spec(w_bf16.shape),
                  _whole_spec(b_f32.shape)],
        out_specs=_whole_spec((B, N)),
        compiler_params=_ARBITRARY,
    )(z, w_bf16, b_f32)


def deconv4x4s2_bn_relu(taps, wblk, *, n):
    # TODO(synk): on v7x a parallel M split would need a 2-pass (stats, then
    # normalize) structure because BN stats must cover the whole batch; kept
    # whole-block here.
    M, K = taps.shape
    N = wblk.shape[1]
    cout = N // 4
    kernel = functools.partial(_deconv_bn_relu_kernel, cout=cout, n=float(n))
    return pl.pallas_call(
        kernel,
        out_shape=jax.ShapeDtypeStruct((M, N), jnp.bfloat16),
        grid=(1,),
        in_specs=[_whole_spec((M, K)), _whole_spec((K, N))],
        out_specs=_whole_spec((M, N)),
        compiler_params=_ARBITRARY,
    )(taps, wblk)


def deconv4x4s2_tanh(taps, wblk):
    M, K = taps.shape
    N = wblk.shape[1]
    # Parallel M grid so v7x's second TensorCore is used (no cross-row deps).
    nm = 2 if (M % 2 == 0 and (M // 2) % 8 == 0) else 1
    bm = M // nm
    return pl.pallas_call(
        _deconv_tanh_kernel,
        out_shape=jax.ShapeDtypeStruct((M, N), jnp.float32),
        grid=(nm,),
        in_specs=[pl.BlockSpec((bm, K), lambda i: (i, 0)),
                  pl.BlockSpec((K, N), lambda i: (0, 0))],
        out_specs=pl.BlockSpec((bm, N), lambda i: (i, 0)),
        compiler_params=_PARALLEL,
    )(taps, wblk)


# ------------------------------ XLA glue ------------------------------------

def _build_taps(x_nhwc):
    """[B,H,W,C] -> [B*H*W, 9*C]: the 3x3 shifted tap windows (zero-padded
    borders) concatenated along the lane axis for one deep-K matmul."""
    B, H, W, C = x_nhwc.shape
    xp = jnp.pad(x_nhwc, ((0, 0), (1, 1), (1, 1), (0, 0)))
    slabs = [xp[:, dy:dy + H, dx:dx + W, :].reshape(B * H * W, C)
             for dy in range(3) for dx in range(3)]
    return jnp.concatenate(slabs, axis=1)


def _interleave_phases(out4, B, H, W, C):
    """[B*H*W, 4*C] (phase p = r*2 + s blocks) -> [B, 2H, 2W, C]."""
    y = out4.reshape(B, H, W, 2, 2, C)
    y = jnp.transpose(y, (0, 1, 3, 2, 4, 5))
    return y.reshape(B, 2 * H, 2 * W, C)


# ------------------------------ weight packing -------------------------------

# For output phase row r (oh = 2i + r):  padded tap row dy -> kernel row kh.
#   r=0: dy=0 (offset -1) -> kh=3 ; dy=1 (offset 0) -> kh=1
#   r=1: dy=1 (offset 0)  -> kh=2 ; dy=2 (offset +1) -> kh=0
_KH = ({0: 3, 1: 1}, {1: 2, 2: 0})


def _pack_deconv_weight(w, n_pad=None):
    """w: [Cin, Cout, 4, 4] (PyTorch ConvTranspose2d layout) ->
    [9*Cin, N] bf16 block weight for the fused deep-K 4-phase matmul, where
    N = max(4*Cout, n_pad) (zero-padded columns for lane-dense stores)."""
    w = np.asarray(w, np.float32)
    cin, cout = w.shape[0], w.shape[1]
    n_out = 4 * cout if n_pad is None else max(4 * cout, n_pad)
    blk = np.zeros((9, cin, n_out), np.float32)
    for dy in range(3):
        for dx in range(3):
            t = dy * 3 + dx
            for r in range(2):
                kh = _KH[r].get(dy)
                if kh is None:
                    continue
                for s in range(2):
                    kw = _KH[s].get(dx)
                    if kw is None:
                        continue
                    p = r * 2 + s
                    blk[t, :, p * cout:(p + 1) * cout] = w[:, :, kh, kw]
    return jnp.asarray(blk.reshape(9 * cin, n_out), jnp.bfloat16)


# --------------------------------- forward ----------------------------------

def _forward(params, z_in, *, f_size, max_ch):
    B = z_in.shape[0]
    S = f_size * f_size
    # Linear + BN + ReLU (fused) -> NHWC-flat [B, S*max_ch] bf16
    h = linear_bn_relu(z_in, params["lin_w"], params["lin_b"], S=S, C=max_ch)
    x = h.reshape(B, f_size, f_size, max_ch)
    # hidden ConvTranspose2d(4,2,1)+BN+ReLU layers (one fused kernel each)
    for layer in params["convs"]:
        Bc, H, W, _ = x.shape
        cout = layer["w"].shape[1] // 4            # static (from array shape)
        taps = _build_taps(x)                      # [B*H*W, 9*Cin]
        out4 = deconv4x4s2_bn_relu(taps, layer["w"], n=Bc * 4 * H * W)
        x = _interleave_phases(out4, Bc, H, W, cout)
    # final ConvTranspose2d(4,2,1) + tanh (fused, lane-dense padded output)
    Bc, H, W, _ = x.shape
    taps = _build_taps(x)
    out_pad = deconv4x4s2_tanh(taps, params["final_w"])   # [B*H*W, 128] f32
    out4 = out_pad[:, :4 * 3]                             # drop zero pad lanes
    x = _interleave_phases(out4, Bc, H, W, 3)
    return jnp.transpose(x, (0, 3, 1, 2))   # NCHW to match the PyTorch module


# --------------------------------- model ------------------------------------

class GModelPallas:
    """Pallas TPU port of G_Model (default use_sm_bn=False branch)."""
    # TODO(synk): SelfModulatedBatchNormalization (use_sm_bn=True) branch not
    # implemented; the PyTorch default is use_sm_bn=False.
    # TODO(synk): weight slabs are held whole in VMEM; for much larger img_dim
    # the deconv kernels need K (tap) / N (Cout) grid blocking — especially on
    # v7x (64 MiB physical / 32 MiB default scoped VMEM).

    def __init__(self, key, img_dim=32, z_dim=32):
        self.img_dim = img_dim
        self.z_dim = z_dim
        self.max_ch = img_dim * 8
        self.num_layers = int(np.log2(img_dim)) - 3
        self.f_size = img_dim // 2 ** (self.num_layers + 1)

        keys = jax.random.split(key, self.num_layers + 2)
        S, C = self.f_size ** 2, self.max_ch
        # nn.Linear(z_dim, S*C); PyTorch column index = c*S + s (because of the
        # later .view(B, C, f, f)).  Permute columns once to (s, c) order so
        # the kernel's output is already NHWC-flat.
        lin_w = jax.random.normal(keys[0], (z_dim, C * S), jnp.float32) * 0.02
        lin_b = jnp.zeros((C * S,), jnp.float32)
        lin_w = lin_w.reshape(z_dim, C, S).transpose(0, 2, 1).reshape(z_dim, S * C)
        lin_b = lin_b.reshape(C, S).T.reshape(1, S * C)
        params = {
            "lin_w": lin_w.astype(jnp.bfloat16),
            "lin_b": lin_b.astype(jnp.float32),
            "convs": [],
        }
        in_ch = C
        for i in range(self.num_layers):
            out_ch = C // 2 ** (i + 1)
            w = jax.random.normal(keys[1 + i], (in_ch, out_ch, 4, 4),
                                  jnp.float32) * 0.02
            params["convs"].append({"w": _pack_deconv_weight(w)})
            in_ch = out_ch
        w = jax.random.normal(keys[-1], (in_ch, 3, 4, 4), jnp.float32) * 0.02
        params["final_w"] = _pack_deconv_weight(w, n_pad=128)
        self.params = params
        self._fwd = jax.jit(functools.partial(_forward, f_size=self.f_size,
                                              max_ch=self.max_ch))

    def __call__(self, z_in):
        return self._fwd(self.params, z_in)


if __name__ == "__main__":
    key = jax.random.PRNGKey(0)
    pkey, xkey = jax.random.split(key)
    batch, img_dim, z_dim = 2, 32, 32
    model = GModelPallas(pkey, img_dim=img_dim, z_dim=z_dim)
    z_in = jax.random.normal(xkey, (batch, z_dim), jnp.float32)
    out = model(z_in)
    out = jax.block_until_ready(out)
    assert out.shape == (batch, 3, img_dim, img_dim), out.shape
    assert bool(jnp.all(jnp.isfinite(out)))
    print("KERNEL_OK")
</pallas_src>

<mosaic_0001>
module attributes {stable_mosaic.version = 11 : i64} {
  func.func @_linear_bn_relu_kernel(%arg0: i32, %arg1: memref<2x32xf32, #tpu.memory_space<vmem>>, %arg2: memref<32x4096xbf16, #tpu.memory_space<vmem>>, %arg3: memref<1x4096xf32, #tpu.memory_space<vmem>>, %arg4: memref<2x4096xbf16, #tpu.memory_space<vmem>>) attributes {dimension_semantics = [#tpu.dimension_semantics<arbitrary>], iteration_bounds = array<i64: 1>, scalar_prefetch = 0 : i64, scratch_operands = 0 : i64, tpu.core_type = #tpu.core_type<tc>, window_params = [{pipeline_mode = #tpu.pipeline_mode<synchronous>, transform_indices = @transform_0, window_bounds = array<i64: 2, 32>}, {pipeline_mode = #tpu.pipeline_mode<synchronous>, transform_indices = @transform_1, window_bounds = array<i64: 32, 4096>}, {pipeline_mode = #tpu.pipeline_mode<synchronous>, transform_indices = @transform_2, window_bounds = array<i64: 1, 4096>}, {pipeline_mode = #tpu.pipeline_mode<synchronous>, transform_indices = @transform_3, window_bounds = array<i64: 2, 4096>}]} {
    %c0 = arith.constant 0 : index
    %c0_0 = arith.constant 0 : index
    %0 = vector.load %arg1[%c0, %c0_0] : memref<2x32xf32, #tpu.memory_space<vmem>>, vector<2x32xf32>
    %1 = arith.truncf %0 : vector<2x32xf32> to vector<2x32xbf16>
    %c0_1 = arith.constant 0 : index
    %c0_2 = arith.constant 0 : index
    %2 = vector.load %arg2[%c0_1, %c0_2] : memref<32x4096xbf16, #tpu.memory_space<vmem>>, vector<32x4096xbf16>
    %cst = arith.constant dense<0.000000e+00> : vector<2x4096xf32>
    %3 = tpu.matmul %1, %2, %cst {dimension_numbers = #tpu.dot_dimension_numbers<[1], [0], [0], [1], [0, 0, 1, 1], [], []>} : vector<2x32xbf16>, vector<32x4096xbf16>, vector<2x4096xf32> -> vector<2x4096xf32>
    %c0_3 = arith.constant 0 : index
    %c0_4 = arith.constant 0 : index
    %4 = vector.load %arg3[%c0_3, %c0_4] : memref<1x4096xf32, #tpu.memory_space<vmem>>, vector<1x4096xf32>
    %5 = vector.broadcast %4 : vector<1x4096xf32> to vector<2x4096xf32>
    %6 = arith.addf %3, %5 : vector<2x4096xf32>
    %cst_5 = arith.constant dense<0.000000e+00> : vector<4096xf32>
    %7 = vector.multi_reduction <add>, %6, %cst_5 [0] : vector<2x4096xf32> to vector<4096xf32>
    %8 = vector.shape_cast %7 : vector<4096xf32> to vector<1x4096xf32>
    %9 = arith.mulf %6, %6 : vector<2x4096xf32>
    %cst_6 = arith.constant dense<0.000000e+00> : vector<4096xf32>
    %10 = vector.multi_reduction <add>, %9, %cst_6 [0] : vector<2x4096xf32> to vector<4096xf32>
    %11 = vector.shape_cast %10 : vector<4096xf32> to vector<1x4096xf32>
    %12 = vector.extract_strided_slice %8 {offsets = [0, 0], sizes = [1, 256], strides = [1, 1]} : vector<1x4096xf32> to vector<1x256xf32>
    %13 = vector.extract_strided_slice %11 {offsets = [0, 0], sizes = [1, 256], strides = [1, 1]} : vector<1x4096xf32> to vector<1x256xf32>
    %14 = vector.extract_strided_slice %8 {offsets = [0, 256], sizes = [1, 256], strides = [1, 1]} : vector<1x4096xf32> to vector<1x256xf32>
    %15 = arith.addf %12, %14 : vector<1x256xf32>
    %16 = vector.extract_strided_slice %11 {offsets = [0, 256], sizes = [1, 256], strides = [1, 1]} : vector<1x4096xf32> to vector<1x256xf32>
    %17 = arith.addf %13, %16 : vector<1x256xf32>
    %18 = vector.extract_strided_slice %8 {offsets = [0, 512], sizes = [1, 256], strides = [1, 1]} : vector<1x4096xf32> to vector<1x256xf32>
    %19 = arith.addf %15, %18 : vector<1x256xf32>
    %20 = vector.extract_strided_slice %11 {offsets = [0, 512], sizes = [1, 256], strides = [1, 1]} : vector<1x4096xf32> to vector<1x256xf32>
    %21 = arith.addf %17, %20 : vector<1x256xf32>
    %22 = vector.extract_strided_slice %8 {offsets = [0, 768], sizes = [1, 256], strides = [1, 1]} : vector<1x4096xf32> to vector<1x256xf32>
    %23 = arith.addf %19, %22 : vector<1x256xf32>
    %24 = vector.extract_strided_slice %11 {offsets = [0, 768], sizes = [1, 256], strides = [1, 1]} : vector<1x4096xf32> to vector<1x256xf32>
    %25 = arith.addf %21, %24 : vector<1x256xf32>
    %26 = vector.extract_strided_slice %8 {offsets = [0, 1024], sizes = [1, 256], strides = [1, 1]} : vector<1x4096xf32> to vector<1x256xf32>
    %27 = arith.addf %23, %26 : vector<1x256xf32>
    %28 = vector.extract_strided_slice %11 {offsets = [0, 1024], sizes = [1, 256], strides = [1, 1]} : vector<1x4096xf32> to vector<1x256xf32>
    %29 = arith.addf %25, %28 : vector<1x256xf32>
    %30 = vector.extract_strided_slice %8 {offsets = [0, 1280], sizes = [1, 256], strides = [1, 1]} : vector<1x4096xf32> to vector<1x256xf32>
    %31 = arith.addf %27, %30 : vector<1x256xf32>
    %32 = vector.extract_strided_slice %11 {offsets = [0, 1280], sizes = [1, 256], strides = [1, 1]} : vector<1x4096xf32> to vector<1x256xf32>
    %33 = arith.addf %29, %32 : vector<1x256xf32>
    %34 = vector.extract_strided_slice %8 {offsets = [0, 1536], sizes = [1, 256], strides = [1, 1]} : vector<1x4096xf32> to vector<1x256xf32>
    %35 = arith.addf %31, %34 : vector<1x256xf32>
    %36 = vector.extract_strided_slice %11 {offsets = [0, 1536], sizes = [1, 256], strides = [1, 1]} : vector<1x4096xf32> to vector<1x256xf32>
    %37 = arith.addf %33, %36 : vector<1x256xf32>
    %38 = vector.extract_strided_slice %8 {offsets = [0, 1792], sizes = [1, 256], strides = [1, 1]} : vector<1x4096xf32> to vector<1x256xf32>
    %39 = arith.addf %35, %38 : vector<1x256xf32>
    %40 = vector.extract_strided_slice %11 {offsets = [0, 1792], sizes = [1, 256], strides = [1, 1]} : vector<1x4096xf32> to vector<1x256xf32>
    %41 = arith.addf %37, %40 : vector<1x256xf32>
    %42 = vector.extract_strided_slice %8 {offsets = [0, 2048], sizes = [1, 256], strides = [1, 1]} : vector<1x4096xf32> to vector<1x256xf32>
    %43 = arith.addf %39, %42 : vector<1x256xf32>
    %44 = vector.extract_strided_slice %11 {offsets = [0, 2048], sizes = [1, 256], strides = [1, 1]} : vector<1x4096xf32> to vector<1x256xf32>
    %45 = arith.addf %41, %44 : vector<1x256xf32>
    %46 = vector.extract_strided_slice %8 {offsets = [0, 2304], sizes = [1, 256], strides = [1, 1]} : vector<1x4096xf32> to vector<1x256xf32>
    %47 = arith.addf %43, %46 : vector<1x256xf32>
    %48 = vector.extract_strided_slice %11 {offsets = [0, 2304], sizes = [1, 256], strides = [1, 1]} : vector<1x4096xf32> to vector<1x256xf32>
    %49 = arith.addf %45, %48 : vector<1x256xf32>
    %50 = vector.extract_strided_slice %8 {offsets = [0, 2560], sizes = [1, 256], strides = [1, 1]} : vector<1x4096xf32> to vector<1x256xf32>
    %51 = arith.addf %47, %50 : vector<1x256xf32>
    %52 = vector.extract_strided_slice %11 {offsets = [0, 2560], sizes = [1, 256], strides = [1, 1]} : vector<1x4096xf32> to vector<1x256xf32>
    %53 = arith.addf %49, %52 : vector<1x256xf32>
    %54 = vector.extract_strided_slice %8 {offsets = [0, 2816], sizes = [1, 256], strides = [1, 1]} : vector<1x4096xf32> to vector<1x256xf32>
    %55 = arith.addf %51, %54 : vector<1x256xf32>
    %56 = vector.extract_strided_slice %11 {offsets = [0, 2816], sizes = [1, 256], strides = [1, 1]} : vector<1x4096xf32> to vector<1x256xf32>
    %57 = arith.addf %53, %56 : vector<1x256xf32>
    %58 = vector.extract_strided_slice %8 {offsets = [0, 3072], sizes = [1, 256], strides = [1, 1]} : vector<1x4096xf32> to vector<1x256xf32>
    %59 = arith.addf %55, %58 : vector<1x256xf32>
    %60 = vector.extract_strided_slice %11 {offsets = [0, 3072], sizes = [1, 256], strides = [1, 1]} : vector<1x4096xf32> to vector<1x256xf32>
    %61 = arith.addf %57, %60 : vector<1x256xf32>
    %62 = vector.extract_strided_slice %8 {offsets = [0, 3328], sizes = [1, 256], strides = [1, 1]} : vector<1x4096xf32> to vector<1x256xf32>
    %63 = arith.addf %59, %62 : vector<1x256xf32>
    %64 = vector.extract_strided_slice %11 {offsets = [0, 3328], sizes = [1, 256], strides = [1, 1]} : vector<1x4096xf32> to vector<1x256xf32>
    %65 = arith.addf %61, %64 : vector<1x256xf32>
    %66 = vector.extract_strided_slice %8 {offsets = [0, 3584], sizes = [1, 256], strides = [1, 1]} : vector<1x4096xf32> to vector<1x256xf32>
    %67 = arith.addf %63, %66 : vector<1x256xf32>
    %68 = vector.extract_strided_slice %11 {offsets = [0, 3584], sizes = [1, 256], strides = [1, 1]} : vector<1x4096xf32> to vector<1x256xf32>
    %69 = arith.addf %65, %68 : vector<1x256xf32>
    %70 = vector.extract_strided_slice %8 {offsets = [0, 3840], sizes = [1, 256], strides = [1, 1]} : vector<1x4096xf32> to vector<1x256xf32>
    %71 = arith.addf %67, %70 : vector<1x256xf32>
    %72 = vector.extract_strided_slice %11 {offsets = [0, 3840], sizes = [1, 256], strides = [1, 1]} : vector<1x4096xf32> to vector<1x256xf32>
    %73 = arith.addf %69, %72 : vector<1x256xf32>
    %cst_7 = arith.constant 3.125000e-02 : f32
    %74 = vector.broadcast %cst_7 : f32 to vector<1x256xf32>
    %75 = arith.mulf %71, %74 : vector<1x256xf32>
    %cst_8 = arith.constant 3.125000e-02 : f32
    %76 = vector.broadcast %cst_8 : f32 to vector<1x256xf32>
    %77 = arith.mulf %73, %76 : vector<1x256xf32>
    %78 = arith.mulf %75, %75 : vector<1x256xf32>
    %79 = arith.subf %77, %78 : vector<1x256xf32>
    %cst_9 = arith.constant 9.99999974E-6 : f32
    %80 = vector.broadcast %cst_9 : f32 to vector<1x256xf32>
    %81 = arith.addf %79, %80 : vector<1x256xf32>
    %82 = math.rsqrt %81 : vector<1x256xf32>
    %83 = tpu.concatenate %75, %75, %75, %75, %75, %75, %75, %75, %75, %75, %75, %75, %75, %75, %75, %75 in 1 : vector<1x256xf32>, vector<1x256xf32>, vector<1x256xf32>, vector<1x256xf32>, vector<1x256xf32>, vector<1x256xf32>, vector<1x256xf32>, vector<1x256xf32>, vector<1x256xf32>, vector<1x256xf32>, vector<1x256xf32>, vector<1x256xf32>, vector<1x256xf32>, vector<1x256xf32>, vector<1x256xf32>, vector<1x256xf32> -> vector<1x4096xf32>
    %84 = tpu.concatenate %82, %82, %82, %82, %82, %82, %82, %82, %82, %82, %82, %82, %82, %82, %82, %82 in 1 : vector<1x256xf32>, vector<1x256xf32>, vector<1x256xf32>, vector<1x256xf32>, vector<1x256xf32>, vector<1x256xf32>, vector<1x256xf32>, vector<1x256xf32>, vector<1x256xf32>, vector<1x256xf32>, vector<1x256xf32>, vector<1x256xf32>, vector<1x256xf32>, vector<1x256xf32>, vector<1x256xf32>, vector<1x256xf32> -> vector<1x4096xf32>
    %85 = vector.broadcast %83 : vector<1x4096xf32> to vector<2x4096xf32>
    %86 = arith.subf %6, %85 : vector<2x4096xf32>
    %87 = vector.broadcast %84 : vector<1x4096xf32> to vector<2x4096xf32>
    %88 = arith.mulf %86, %87 : vector<2x4096xf32>
    %cst_10 = arith.constant 0.000000e+00 : f32
    %89 = vector.broadcast %cst_10 : f32 to vector<2x4096xf32>
    %90 = arith.maximumf %88, %89 : vector<2x4096xf32>
    %91 = arith.truncf %90 : vector<2x4096xf32> to vector<2x4096xbf16>
    %c0_11 = arith.constant 0 : index
    %c0_12 = arith.constant 0 : index
    %92 = vector.load %arg4[%c0_11, %c0_12] : memref<2x4096xbf16, #tpu.memory_space<vmem>>, vector<2x4096xbf16>
    tpu.vector_store %arg4[%c0_11, %c0_12], %91 {strides = array<i32>} : memref<2x4096xbf16, #tpu.memory_space<vmem>>, vector<2x4096xbf16>,
    return
  }
  func.func @transform_0(%arg0: i32) -> (i32, i32) {
    %c0_i32 = arith.constant 0 : i32
    %c0_i32_0 = arith.constant 0 : i32
    %c0_i32_1 = arith.constant 0 : i32
    return %c0_i32, %c0_i32_0 : i32, i32
  }
  func.func @transform_1(%arg0: i32) -> (i32, i32) {
    %c0_i32 = arith.constant 0 : i32
    %c0_i32_0 = arith.constant 0 : i32
    %c0_i32_1 = arith.constant 0 : i32
    return %c0_i32, %c0_i32_0 : i32, i32
  }
  func.func @transform_2(%arg0: i32) -> (i32, i32) {
    %c0_i32 = arith.constant 0 : i32
    %c0_i32_0 = arith.constant 0 : i32
    %c0_i32_1 = arith.constant 0 : i32
    return %c0_i32, %c0_i32_0 : i32, i32
  }
  func.func @transform_3(%arg0: i32) -> (i32, i32) {
    %c0_i32 = arith.constant 0 : i32
    %c0_i32_0 = arith.constant 0 : i32
    %c0_i32_1 = arith.constant 0 : i32
    return %c0_i32, %c0_i32_0 : i32, i32
  }
}

module attributes {stable_mosaic.version = 11 : i64} {
  func.func @_deconv_bn_relu_kernel(%arg0: i32, %arg1: memref<32x2304xbf16, #tpu.memory_space<vmem>>, %arg2: memref<2304x512xbf16, #tpu.memory_space<vmem>>, %arg3: memref<32x512xbf16, #tpu.memory_space<vmem>>) attributes {dimension_semantics = [#tpu.dimension_semantics<arbitrary>], iteration_bounds = array<i64: 1>, scalar_prefetch = 0 : i64, scratch_operands = 0 : i64, tpu.core_type = #tpu.core_type<tc>, window_params = [{pipeline_mode = #tpu.pipeline_mode<synchronous>, transform_indices = @transform_0, window_bounds = array<i64: 32, 2304>}, {pipeline_mode = #tpu.pipeline_mode<synchronous>, transform_indices = @transform_1, window_bounds = array<i64: 2304, 512>}, {pipeline_mode = #tpu.pipeline_mode<synchronous>, transform_indices = @transform_2, window_bounds = array<i64: 32, 512>}]} {
    %c0 = arith.constant 0 : index
    %c0_0 = arith.constant 0 : index
    %0 = vector.load %arg1[%c0, %c0_0] : memref<32x2304xbf16, #tpu.memory_space<vmem>>, vector<32x2304xbf16>
    %c0_1 = arith.constant 0 : index
    %c0_2 = arith.constant 0 : index
    %1 = vector.load %arg2[%c0_1, %c0_2] : memref<2304x512xbf16, #tpu.memory_space<vmem>>, vector<2304x512xbf16>
    %cst = arith.constant dense<0.000000e+00> : vector<32x512xf32>
    %2 = tpu.matmul %0, %1, %cst {dimension_numbers = #tpu.dot_dimension_numbers<[1], [0], [0], [1], [0, 0, 1, 1], [], []>} : vector<32x2304xbf16>, vector<2304x512xbf16>, vector<32x512xf32> -> vector<32x512xf32>
    %cst_3 = arith.constant dense<0.000000e+00> : vector<512xf32>
    %3 = vector.multi_reduction <add>, %2, %cst_3 [0] : vector<32x512xf32> to vector<512xf32>
    %4 = vector.shape_cast %3 : vector<512xf32> to vector<1x512xf32>
    %5 = arith.mulf %2, %2 : vector<32x512xf32>
    %cst_4 = arith.constant dense<0.000000e+00> : vector<512xf32>
    %6 = vector.multi_reduction <add>, %5, %cst_4 [0] : vector<32x512xf32> to vector<512xf32>
    %7 = vector.shape_cast %6 : vector<512xf32> to vector<1x512xf32>
    %8 = vector.extract_strided_slice %4 {offsets = [0, 0], sizes = [1, 128], strides = [1, 1]} : vector<1x512xf32> to vector<1x128xf32>
    %9 = vector.extract_strided_slice %7 {offsets = [0, 0], sizes = [1, 128], strides = [1, 1]} : vector<1x512xf32> to vector<1x128xf32>
    %10 = vector.extract_strided_slice %4 {offsets = [0, 128], sizes = [1, 128], strides = [1, 1]} : vector<1x512xf32> to vector<1x128xf32>
    %11 = arith.addf %8, %10 : vector<1x128xf32>
    %12 = vector.extract_strided_slice %7 {offsets = [0, 128], sizes = [1, 128], strides = [1, 1]} : vector<1x512xf32> to vector<1x128xf32>
    %13 = arith.addf %9, %12 : vector<1x128xf32>
    %14 = vector.extract_strided_slice %4 {offsets = [0, 256], sizes = [1, 128], strides = [1, 1]} : vector<1x512xf32> to vector<1x128xf32>
    %15 = arith.addf %11, %14 : vector<1x128xf32>
    %16 = vector.extract_strided_slice %7 {offsets = [0, 256], sizes = [1, 128], strides = [1, 1]} : vector<1x512xf32> to vector<1x128xf32>
    %17 = arith.addf %13, %16 : vector<1x128xf32>
    %18 = vector.extract_strided_slice %4 {offsets = [0, 384], sizes = [1, 128], strides = [1, 1]} : vector<1x512xf32> to vector<1x128xf32>
    %19 = arith.addf %15, %18 : vector<1x128xf32>
    %20 = vector.extract_strided_slice %7 {offsets = [0, 384], sizes = [1, 128], strides = [1, 1]} : vector<1x512xf32> to vector<1x128xf32>
    %21 = arith.addf %17, %20 : vector<1x128xf32>
    %cst_5 = arith.constant 7.812500e-03 : f32
    %22 = vector.broadcast %cst_5 : f32 to vector<1x128xf32>
    %23 = arith.mulf %19, %22 : vector<1x128xf32>
    %cst_6 = arith.constant 7.812500e-03 : f32
    %24 = vector.broadcast %cst_6 : f32 to vector<1x128xf32>
    %25 = arith.mulf %21, %24 : vector<1x128xf32>
    %26 = arith.mulf %23, %23 : vector<1x128xf32>
    %27 = arith.subf %25, %26 : vector<1x128xf32>
    %cst_7 = arith.constant 9.99999974E-6 : f32
    %28 = vector.broadcast %cst_7 : f32 to vector<1x128xf32>
    %29 = arith.addf %27, %28 : vector<1x128xf32>
    %30 = math.rsqrt %29 : vector<1x128xf32>
    %31 = tpu.concatenate %23, %23, %23, %23 in 1 : vector<1x128xf32>, vector<1x128xf32>, vector<1x128xf32>, vector<1x128xf32> -> vector<1x512xf32>
    %32 = tpu.concatenate %30, %30, %30, %30 in 1 : vector<1x128xf32>, vector<1x128xf32>, vector<1x128xf32>, vector<1x128xf32> -> vector<1x512xf32>
    %33 = vector.broadcast %31 : vector<1x512xf32> to vector<32x512xf32>
    %34 = arith.subf %2, %33 : vector<32x512xf32>
    %35 = vector.broadcast %32 : vector<1x512xf32> to vector<32x512xf32>
    %36 = arith.mulf %34, %35 : vector<32x512xf32>
    %cst_8 = arith.constant 0.000000e+00 : f32
    %37 = vector.broadcast %cst_8 : f32 to vector<32x512xf32>
    %38 = arith.maximumf %36, %37 : vector<32x512xf32>
    %39 = arith.truncf %38 : vector<32x512xf32> to vector<32x512xbf16>
    %c0_9 = arith.constant 0 : index
    %c0_10 = arith.constant 0 : index
    %40 = vector.load %arg3[%c0_9, %c0_10] : memref<32x512xbf16, #tpu.memory_space<vmem>>, vector<32x512xbf16>
    tpu.vector_store %arg3[%c0_9, %c0_10], %39 {strides = array<i32>} : memref<32x512xbf16, #tpu.memory_space<vmem>>, vector<32x512xbf16>,
    return
  }
  func.func @transform_0(%arg0: i32) -> (i32, i32) {
    %c0_i32 = arith.constant 0 : i32
    %c0_i32_0 = arith.constant 0 : i32
    %c0_i32_1 = arith.constant 0 : i32
    return %c0_i32, %c0_i32_0 : i32, i32
  }
  func.func @transform_1(%arg0: i32) -> (i32, i32) {
    %c0_i32 = arith.constant 0 : i32
    %c0_i32_0 = arith.constant 0 : i32
    %c0_i32_1 = arith.constant 0 : i32
    return %c0_i32, %c0_i32_0 : i32, i32
  }
  func.func @transform_2(%arg0: i32) -> (i32, i32) {
    %c0_i32 = arith.constant 0 : i32
    %c0_i32_0 = arith.constant 0 : i32
    %c0_i32_1 = arith.constant 0 : i32
    return %c0_i32, %c0_i32_0 : i32, i32
  }
}

module attributes {stable_mosaic.version = 11 : i64} {
  func.func @_deconv_bn_relu_kernel(%arg0: i32, %arg1: memref<128x1152xbf16, #tpu.memory_space<vmem>>, %arg2: memref<1152x256xbf16, #tpu.memory_space<vmem>>, %arg3: memref<128x256xbf16, #tpu.memory_space<vmem>>) attributes {dimension_semantics = [#tpu.dimension_semantics<arbitrary>], iteration_bounds = array<i64: 1>, scalar_prefetch = 0 : i64, scratch_operands = 0 : i64, tpu.core_type = #tpu.core_type<tc>, window_params = [{pipeline_mode = #tpu.pipeline_mode<synchronous>, transform_indices = @transform_0, window_bounds = array<i64: 128, 1152>}, {pipeline_mode = #tpu.pipeline_mode<synchronous>, transform_indices = @transform_1, window_bounds = array<i64: 1152, 256>}, {pipeline_mode = #tpu.pipeline_mode<synchronous>, transform_indices = @transform_2, window_bounds = array<i64: 128, 256>}]} {
    %c0 = arith.constant 0 : index
    %c0_0 = arith.constant 0 : index
    %0 = vector.load %arg1[%c0, %c0_0] : memref<128x1152xbf16, #tpu.memory_space<vmem>>, vector<128x1152xbf16>
    %c0_1 = arith.constant 0 : index
    %c0_2 = arith.constant 0 : index
    %1 = vector.load %arg2[%c0_1, %c0_2] : memref<1152x256xbf16, #tpu.memory_space<vmem>>, vector<1152x256xbf16>
    %cst = arith.constant dense<0.000000e+00> : vector<128x256xf32>
    %2 = tpu.matmul %0, %1, %cst {dimension_numbers = #tpu.dot_dimension_numbers<[1], [0], [0], [1], [0, 0, 1, 1], [], []>} : vector<128x1152xbf16>, vector<1152x256xbf16>, vector<128x256xf32> -> vector<128x256xf32>
    %cst_3 = arith.constant dense<0.000000e+00> : vector<256xf32>
    %3 = vector.multi_reduction <add>, %2, %cst_3 [0] : vector<128x256xf32> to vector<256xf32>
    %4 = vector.shape_cast %3 : vector<256xf32> to vector<1x256xf32>
    %5 = arith.mulf %2, %2 : vector<128x256xf32>
    %cst_4 = arith.constant dense<0.000000e+00> : vector<256xf32>
    %6 = vector.multi_reduction <add>, %5, %cst_4 [0] : vector<128x256xf32> to vector<256xf32>
    %7 = vector.shape_cast %6 : vector<256xf32> to vector<1x256xf32>
    %8 = vector.extract_strided_slice %4 {offsets = [0, 0], sizes = [1, 64], strides = [1, 1]} : vector<1x256xf32> to vector<1x64xf32>
    %9 = vector.extract_strided_slice %7 {offsets = [0, 0], sizes = [1, 64], strides = [1, 1]} : vector<1x256xf32> to vector<1x64xf32>
    %10 = vector.extract_strided_slice %4 {offsets = [0, 64], sizes = [1, 64], strides = [1, 1]} : vector<1x256xf32> to vector<1x64xf32>
    %11 = arith.addf %8, %10 : vector<1x64xf32>
    %12 = vector.extract_strided_slice %7 {offsets = [0, 64], sizes = [1, 64], strides = [1, 1]} : vector<1x256xf32> to vector<1x64xf32>
    %13 = arith.addf %9, %12 : vector<1x64xf32>
    %14 = vector.extract_strided_slice %4 {offsets = [0, 128], sizes = [1, 64], strides = [1, 1]} : vector<1x256xf32> to vector<1x64xf32>
    %15 = arith.addf %11, %14 : vector<1x64xf32>
    %16 = vector.extract_strided_slice %7 {offsets = [0, 128], sizes = [1, 64], strides = [1, 1]} : vector<1x256xf32> to vector<1x64xf32>
    %17 = arith.addf %13, %16 : vector<1x64xf32>
    %18 = vector.extract_strided_slice %4 {offsets = [0, 192], sizes = [1, 64], strides = [1, 1]} : vector<1x256xf32> to vector<1x64xf32>
    %19 = arith.addf %15, %18 : vector<1x64xf32>
    %20 = vector.extract_strided_slice %7 {offsets = [0, 192], sizes = [1, 64], strides = [1, 1]} : vector<1x256xf32> to vector<1x64xf32>
    %21 = arith.addf %17, %20 : vector<1x64xf32>
    %cst_5 = arith.constant 0.001953125 : f32
    %22 = vector.broadcast %cst_5 : f32 to vector<1x64xf32>
    %23 = arith.mulf %19, %22 : vector<1x64xf32>
    %cst_6 = arith.constant 0.001953125 : f32
    %24 = vector.broadcast %cst_6 : f32 to vector<1x64xf32>
    %25 = arith.mulf %21, %24 : vector<1x64xf32>
    %26 = arith.mulf %23, %23 : vector<1x64xf32>
    %27 = arith.subf %25, %26 : vector<1x64xf32>
    %cst_7 = arith.constant 9.99999974E-6 : f32
    %28 = vector.broadcast %cst_7 : f32 to vector<1x64xf32>
    %29 = arith.addf %27, %28 : vector<1x64xf32>
    %30 = math.rsqrt %29 : vector<1x64xf32>
    %31 = tpu.concatenate %23, %23, %23, %23 in 1 : vector<1x64xf32>, vector<1x64xf32>, vector<1x64xf32>, vector<1x64xf32> -> vector<1x256xf32>
    %32 = tpu.concatenate %30, %30, %30, %30 in 1 : vector<1x64xf32>, vector<1x64xf32>, vector<1x64xf32>, vector<1x64xf32> -> vector<1x256xf32>
    %33 = vector.broadcast %31 : vector<1x256xf32> to vector<128x256xf32>
    %34 = arith.subf %2, %33 : vector<128x256xf32>
    %35 = vector.broadcast %32 : vector<1x256xf32> to vector<128x256xf32>
    %36 = arith.mulf %34, %35 : vector<128x256xf32>
    %cst_8 = arith.constant 0.000000e+00 : f32
    %37 = vector.broadcast %cst_8 : f32 to vector<128x256xf32>
    %38 = arith.maximumf %36, %37 : vector<128x256xf32>
    %39 = arith.truncf %38 : vector<128x256xf32> to vector<128x256xbf16>
    %c0_9 = arith.constant 0 : index
    %c0_10 = arith.constant 0 : index
    %40 = vector.load %arg3[%c0_9, %c0_10] : memref<128x256xbf16, #tpu.memory_space<vmem>>, vector<128x256xbf16>
    tpu.vector_store %arg3[%c0_9, %c0_10], %39 {strides = array<i32>} : memref<128x256xbf16, #tpu.memory_space<vmem>>, vector<128x256xbf16>,
    return
  }
  func.func @transform_0(%arg0: i32) -> (i32, i32) {
    %c0_i32 = arith.constant 0 : i32
    %c0_i32_0 = arith.constant 0 : i32
    %c0_i32_1 = arith.constant 0 : i32
    return %c0_i32, %c0_i32_0 : i32, i32
  }
  func.func @transform_1(%arg0: i32) -> (i32, i32) {
    %c0_i32 = arith.constant 0 : i32
    %c0_i32_0 = arith.constant 0 : i32
    %c0_i32_1 = arith.constant 0 : i32
    return %c0_i32, %c0_i32_0 : i32, i32
  }
  func.func @transform_2(%arg0: i32) -> (i32, i32) {
    %c0_i32 = arith.constant 0 : i32
    %c0_i32_0 = arith.constant 0 : i32
    %c0_i32_1 = arith.constant 0 : i32
    return %c0_i32, %c0_i32_0 : i32, i32
  }
}

module attributes {stable_mosaic.version = 11 : i64} {
  func.func @_deconv_tanh_kernel(%arg0: i32, %arg1: memref<256x576xbf16, #tpu.memory_space<vmem>>, %arg2: memref<576x128xbf16, #tpu.memory_space<vmem>>, %arg3: memref<256x128xf32, #tpu.memory_space<vmem>>) attributes {dimension_semantics = [#tpu.dimension_semantics<parallel>], iteration_bounds = array<i64: 2>, scalar_prefetch = 0 : i64, scratch_operands = 0 : i64, tpu.core_type = #tpu.core_type<tc>, window_params = [{transform_indices = @transform_0, window_bounds = array<i64: 256, 576>}, {pipeline_mode = #tpu.pipeline_mode<synchronous>, transform_indices = @transform_1, window_bounds = array<i64: 576, 128>}, {transform_indices = @transform_2, window_bounds = array<i64: 256, 128>}]} {
    %c0 = arith.constant 0 : index
    %c0_0 = arith.constant 0 : index
    %0 = vector.load %arg1[%c0, %c0_0] : memref<256x576xbf16, #tpu.memory_space<vmem>>, vector<256x576xbf16>
    %c0_1 = arith.constant 0 : index
    %c0_2 = arith.constant 0 : index
    %1 = vector.load %arg2[%c0_1, %c0_2] : memref<576x128xbf16, #tpu.memory_space<vmem>>, vector<576x128xbf16>
    %cst = arith.constant dense<0.000000e+00> : vector<256x128xf32>
    %2 = tpu.matmul %0, %1, %cst {dimension_numbers = #tpu.dot_dimension_numbers<[1], [0], [0], [1], [0, 0, 1, 1], [], []>} : vector<256x576xbf16>, vector<576x128xbf16>, vector<256x128xf32> -> vector<256x128xf32>
    %3 = math.tanh %2 : vector<256x128xf32>
    %c0_3 = arith.constant 0 : index
    %c0_4 = arith.constant 0 : index
    %4 = vector.load %arg3[%c0_3, %c0_4] : memref<256x128xf32, #tpu.memory_space<vmem>>, vector<256x128xf32>
    tpu.vector_store %arg3[%c0_3, %c0_4], %3 {strides = array<i32>} : memref<256x128xf32, #tpu.memory_space<vmem>>, vector<256x128xf32>,
    return
  }
  func.func @transform_0(%arg0: i32) -> (i32, i32) {
    %c0_i32 = arith.constant 0 : i32
    %c0_i32_0 = arith.constant 0 : i32
    return %arg0, %c0_i32 : i32, i32
  }
  func.func @transform_1(%arg0: i32) -> (i32, i32) {
    %c0_i32 = arith.constant 0 : i32
    %c0_i32_0 = arith.constant 0 : i32
    %c0_i32_1 = arith.constant 0 : i32
    return %c0_i32, %c0_i32_0 : i32, i32
  }
  func.func @transform_2(%arg0: i32) -> (i32, i32) {
    %c0_i32 = arith.constant 0 : i32
    %c0_i32_0 = arith.constant 0 : i32
    return %arg0, %c0_i32 : i32, i32
  }
}

</mosaic_0001>

<bundles_post_ra>
// kernel: _forward.4
= control target key start
LH: loop header
LB: loop body
LE: loop exit
PB: predicated region body
PF: predicated region fallthrough
CT: control target
= control target key end

     0   :  { %8 = vsyncpa [#allocation3], 0  ;;  %s3164_s0 = inlined_call_operand.hbm [shape: f32[2,32], index: 0, kind: input, shape index: {}]   ;;  %s3165_s1 = inlined_call_operand.hbm [shape: bf16[32,4096], index: 1, kind: input, shape index: {}]   ;;  %s3166_s2 = inlined_call_operand.hbm [shape: f32[1,4096], index: 2, kind: input, shape index: {}]   ;;  %s3167_s3 = inlined_call_operand.vmem [shape: bf16[2,4096], index: 3, kind: output, shape index: {}]  }
   0x1   :  { %9 = vsyncpa [#allocation5], 0  ;;  %s2382_s12 = smov [#allocation4]   ;;  %s2312_s16 = scalar_lea.hbm %s3165_s1, 8192 }
   0x2   :  { %s25_s13 = sshll.u32 %s2382_s12, 4  ;;  %p2313_p0 = scmp.ne.s32.totalorder %s3165_s1, %s2312_s16  ;;  %s26_s13 = int_to_ptr.vmem [resolvable:$true] %s25_s13 }
   0x3   :  { %p2316_p1 = scmp.lt.u32.totalorder %s2312_s16, %s3165_s1 }
   0x5   :  { %p2318_p2 = pnand %p2316_p1, %p2313_p0 }
   0x7   :  { %2321 = shalt.err (!%p2318_p2)
}
   0x8   :  { %s2322_s21 = scalar_lea.vmem %s26_s13, 8192  ;;  %p2327_p4 = scmp.lt.s32.totalorder %s26_s13, %s26_s13 }
   0x9   :  { %p2323_p3 = scmp.ne.s32.totalorder %s26_s13, %s2322_s21  ;;  %p2328_p5 = scmp.lt.s32.totalorder %s2322_s21, %s2322_s21 }
   0xb   :  { %p2329_p6 = por %p2328_p5, %p2327_p4 }
   0xd   :  { %p2330_p7 = pnand %p2329_p6, %p2323_p3 }
   0xf   :  { %2333 = shalt.err (!%p2330_p7)
}
  0x10   :  { %s2383_s22 = smov 2048   ;;  %s2384_s23 = smov 128  }
  0x11   :  { %31 = dma.hbm_to_vmem [thread:$0]  %s3165_s1, 8192, %s26_s13, [#allocation5], %s2383_s22, %s2383_s22, %s2384_s23  }
  0x12   :  { %s2385_s26 = smov [#allocation2]   ;;  %s2386_s28 = smov [#allocation6]  }
  0x13   :  { %s16_s27 = sshll.u32 %s2385_s26, 4  ;;  %s38_s29 = sshll.u32 %s2386_s28, 4  ;;  %s17_s27 = int_to_ptr.vmem [resolvable:$true] %s16_s27  ;;  %s39_s29 = int_to_ptr.vmem [resolvable:$true] %s38_s29 }
  0x14   :  { %s2334_s5 = scalar_lea.hbm %s3164_s0, 32 }
  0x15   :  { %p2335_p8 = scmp.ne.s32.totalorder %s3164_s0, %s2334_s5  ;;  %p2338_p9 = scmp.lt.u32.totalorder %s2334_s5, %s3164_s0 }
  0x17   :  { %p2340_p10 = pnand %p2338_p9, %p2335_p8 }
  0x19   :  { %2343 = shalt.err (!%p2340_p10)
}
  0x1a   :  { %s2344_s1 = scalar_lea.vmem %s17_s27, 32  ;;  %p2349_p12 = scmp.lt.s32.totalorder %s17_s27, %s17_s27 }
  0x1b   :  { %p2345_p11 = scmp.ne.s32.totalorder %s17_s27, %s2344_s1  ;;  %p2350_p13 = scmp.lt.s32.totalorder %s2344_s1, %s2344_s1 }
  0x1d   :  { %p2351_p0 = por %p2350_p13, %p2349_p12 }
  0x1f   :  { %p2352_p1 = pnand %p2351_p0, %p2345_p11 }
  0x21   :  { %2355 = shalt.err (!%p2352_p1)
}
  0x22   :  { %19 = dma.hbm_to_vmem [thread:$0]  %s3164_s0, 32, %s17_s27, [#allocation3]  }
  0x23   :  { %s2356_s14 = scalar_lea.hbm %s3166_s2, 512 }
  0x24   :  { %p2357_p2 = scmp.ne.s32.totalorder %s3166_s2, %s2356_s14  ;;  %p2360_p3 = scmp.lt.u32.totalorder %s2356_s14, %s3166_s2 }
  0x26   :  { %p2362_p4 = pnand %p2360_p3, %p2357_p2 }
  0x28   :  { %2365 = shalt.err (!%p2362_p4)
}
  0x29   :  { %s2366_s19 = scalar_lea.vmem %s39_s29, 512  ;;  %p2371_p6 = scmp.lt.s32.totalorder %s39_s29, %s39_s29 }
  0x2a   :  { %p2367_p5 = scmp.ne.s32.totalorder %s39_s29, %s2366_s19  ;;  %p2372_p7 = scmp.lt.s32.totalorder %s2366_s19, %s2366_s19 }
  0x2c   :  { %p2373_p8 = por %p2372_p7, %p2371_p6 }
  0x2e   :  { %p2374_p9 = pnand %p2373_p8, %p2367_p5 }
  0x30   :  { %2377 = shalt.err (!%p2374_p9)
}
  0x31   :  { %41 = dma.hbm_to_vmem [thread:$0]  %s3166_s2, 512, %s39_s29, [#allocation5]  }
  0x32   :  { %2378 = dma.done.wait [#allocation3], 32  }
  0x33   :  { %2379 = vsyncadd [#allocation3], 4294967264 }
  0x34   :  { %2380 = dma.done.wait [#allocation5], 8704  }
  0x35   :  { %2381 = vsyncadd [#allocation5], 4294958592  ;;  %v2387_v0 = vmov 0   ;;  %v54_v1 = vld [vmem:[#allocation4] sm:$0xff]  ;;  %v55_v3 = vld [vmem:[#allocation4 + $0x8] sm:$0xff]  ;;  %vm606_vm0 = vcmask 261120  }
  0x36   :  { %642 = vmatprep.mubr.bf16.mxu0 %v2387_v0  ;;  %683 = vmatprep.mubr.bf16.mxu1 %v2387_v0  ;;  %v70_v2 = vld [vmem:[#allocation4 + $0x80] sm:$0xff]  ;;  %v71_v5 = vld [vmem:[#allocation4 + $0x88] sm:$0xff]  ;;  %v56_v15 = vld [vmem:[#allocation4 + $0x10] sm:$0xff]  ;;  %vm1266_vm1 = vcmask 1041408  }
  0x37   :  { %v2206_v4 = vcombine.high %v54_v1, %v70_v2  ;;  %v2205_v6 = vcombine.low %v54_v1, %v70_v2  ;;  %v86_v7 = vld [vmem:[#allocation4 + $0x100] sm:$0xff]  ;;  %v2208_v9 = vcombine.high %v55_v3, %v71_v5  ;;  %v2207_v10 = vcombine.low %v55_v3, %v71_v5  ;;  %v87_v12 = vld [vmem:[#allocation4 + $0x108] sm:$0xff]  ;;  %v72_v16 = vld [vmem:[#allocation4 + $0x90] sm:$0xff] }
  0x38   :  { %v102_v8 = vld [vmem:[#allocation4 + $0x180] sm:$0xff]  ;;  %v103_v13 = vld [vmem:[#allocation4 + $0x188] sm:$0xff]  ;;  %v57_v17 = vld [vmem:[#allocation4 + $0x18] sm:$0xff]  ;;  %v2210_v22 = vcombine.high %v56_v15, %v72_v16  ;;  %v2209_v29 = vcombine.low %v56_v15, %v72_v16 }
  0x39   :  { %v2238_v11 = vcombine.high %v86_v7, %v102_v8  ;;  %610 = vmatprep.subr.bf16.mxu0 %v2206_v4  ;;  %v2240_v14 = vcombine.high %v87_v12, %v103_v13  ;;  %651 = vmatprep.subr.bf16.mxu1 %v2208_v9  ;;  %v2237_v18 = vcombine.low %v86_v7, %v102_v8  ;;  %v52_v19 = vld [vmem:[#allocation2] sm:$0x3]  ;;  %v88_v24 = vld [vmem:[#allocation4 + $0x110] sm:$0xff]  ;;  %v58_v33 = vld [vmem:[#allocation4 + $0x20] sm:$0xff] }
  0x3a   :  { %611 = vmatpush1.bf16.msra.mxu0 %v2205_v6  ;;  %v73_v20 = vld [vmem:[#allocation4 + $0x98] sm:$0xff]  ;;  %652 = vmatpush1.bf16.msra.mxu1 %v2207_v10  ;;  %v2239_v21 = vcombine.low %v87_v12, %v103_v13  ;;  %v104_v25 = vld [vmem:[#allocation4 + $0x190] sm:$0xff]  ;;  %v2447_v26 = vpack.c.bf16 %v52_v19, %v52_v19  ;;  %v74_v34 = vld [vmem:[#allocation4 + $0xa0] sm:$0xff] }
  0x3b   :  { %612 = vmatprep.subr.bf16.mxu0 %v2238_v11  ;;  %653 = vmatprep.subr.bf16.mxu1 %v2240_v14  ;;  %v2212_v23 = vcombine.high %v57_v17, %v73_v20  ;;  %v89_v27 = vld [vmem:[#allocation4 + $0x118] sm:$0xff]  ;;  %v2211_v30 = vcombine.low %v57_v17, %v73_v20  ;;  %v2242_v31 = vcombine.high %v88_v24, %v104_v25  ;;  %v59_v35 = vld [vmem:[#allocation4 + $0x28] sm:$0xff]  ;;  %v90_v41 = vld [vmem:[#allocation4 + $0x120] sm:$0xff] }
  0x3c   :  { %v105_v28 = vld [vmem:[#allocation4 + $0x198] sm:$0xff]  ;;  %v75_v36 = vld [vmem:[#allocation4 + $0xa8] sm:$0xff]  ;;  %v2241_v37 = vcombine.low %v88_v24, %v104_v25  ;;  %v2214_v39 = vcombine.high %v58_v33, %v74_v34  ;;  %v106_v42 = vld [vmem:[#allocation4 + $0x1a0] sm:$0xff]  ;;  %v2213_v45 = vcombine.low %v58_v33, %v74_v34 }
  0x3d   :  { %v2244_v32 = vcombine.high %v89_v27, %v105_v28  ;;  %v2243_v38 = vcombine.low %v89_v27, %v105_v28  ;;  %v2216_v40 = vcombine.high %v59_v35, %v75_v36  ;;  %v91_v43 = vld [vmem:[#allocation4 + $0x128] sm:$0xff]  ;;  %v2215_v46 = vcombine.low %v59_v35, %v75_v36  ;;  %v60_v49 = vld [vmem:[#allocation4 + $0x30] sm:$0xff]  ;;  %v61_v51 = vld [vmem:[#allocation4 + $0x38] sm:$0xff] }
  0x3e   :  { %613 = vmatpush1.bf16.msra.mxu0 %v2237_v18  ;;  %654 = vmatpush1.bf16.msra.mxu1 %v2239_v21  ;;  %v107_v44 = vld [vmem:[#allocation4 + $0x1a8] sm:$0xff]  ;;  %v2246_v47 = vcombine.high %v90_v41, %v106_v42  ;;  %v76_v50 = vld [vmem:[#allocation4 + $0xb0] sm:$0xff]  ;;  %v77_v52 = vld [vmem:[#allocation4 + $0xb8] sm:$0xff]  ;;  %v2245_v53 = vcombine.low %v90_v41, %v106_v42 }
  0x3f   :  { %692 = vmatprep.subr.bf16.mxu0 %v2210_v22  ;;  %733 = vmatprep.subr.bf16.mxu1 %v2212_v23  ;;  %v2248_v48 = vcombine.high %v91_v43, %v107_v44  ;;  %v2247_v54 = vcombine.low %v91_v43, %v107_v44  ;;  %v2218_v55 = vcombine.high %v60_v49, %v76_v50  ;;  %v92_v57 = vld [vmem:[#allocation4 + $0x130] sm:$0xff]  ;;  %v93_v59 = vld [vmem:[#allocation4 + $0x138] sm:$0xff]  ;;  %v62_v2 = vld [vmem:[#allocation4 + $0x40] sm:$0xff] }
  0x40   :  { %v2220_v56 = vcombine.high %v61_v51, %v77_v52  ;;  %v108_v58 = vld [vmem:[#allocation4 + $0x1b0] sm:$0xff]  ;;  %v109_v60 = vld [vmem:[#allocation4 + $0x1b8] sm:$0xff]  ;;  %v2217_v61 = vcombine.low %v60_v49, %v76_v50  ;;  %v2219_v62 = vcombine.low %v61_v51, %v77_v52  ;;  %v78_v3 = vld [vmem:[#allocation4 + $0xc0] sm:$0xff] }
  0x41   :  { %2269 = vmatmul.mubr.msk.bf16.vlgmr.msra.gmra.mrb[0].mxu0 %vm606_vm0, %v2447_v26  ;;  %2270 = vmatmul.mubr.msk.bf16.vlgmr.msra.gmra.mrb[0].mxu1 %vm606_vm0, %v2447_v26  ;;  %v2250_v63 = vcombine.high %v92_v57, %v108_v58  ;;  %v2252_v1 = vcombine.high %v93_v59, %v109_v60  ;;  %v63_v4 = vld [vmem:[#allocation4 + $0x48] sm:$0xff]  ;;  %v2249_v6 = vcombine.low %v92_v57, %v108_v58  ;;  %v94_v10 = vld [vmem:[#allocation4 + $0x140] sm:$0xff]  ;;  %v64_v18 = vld [vmem:[#allocation4 + $0x50] sm:$0xff] }
  0x42   :  { %693 = vmatpush1.bf16.msra.mxu0 %v2209_v29  ;;  %734 = vmatpush1.bf16.msra.mxu1 %v2211_v30  ;;  %v79_v5 = vld [vmem:[#allocation4 + $0xc8] sm:$0xff]  ;;  %v2251_v7 = vcombine.low %v93_v59, %v109_v60  ;;  %v2222_v8 = vcombine.high %v62_v2, %v78_v3  ;;  %v110_v11 = vld [vmem:[#allocation4 + $0x1c0] sm:$0xff]  ;;  %v2221_v14 = vcombine.low %v62_v2, %v78_v3  ;;  %v80_v19 = vld [vmem:[#allocation4 + $0xd0] sm:$0xff] }
  0x43   :  { %694 = vmatprep.subr.bf16.mxu0 %v2242_v31  ;;  %735 = vmatprep.subr.bf16.mxu1 %v2244_v32  ;;  %v2224_v9 = vcombine.high %v63_v4, %v79_v5  ;;  %v95_v12 = vld [vmem:[#allocation4 + $0x148] sm:$0xff]  ;;  %v2223_v15 = vcombine.low %v63_v4, %v79_v5  ;;  %v2254_v16 = vcombine.high %v94_v10, %v110_v11  ;;  %v65_v20 = vld [vmem:[#allocation4 + $0x58] sm:$0xff]  ;;  %v96_v27 = vld [vmem:[#allocation4 + $0x150] sm:$0xff] }
  0x44   :  { %724 = vmatprep.mubr.bf16.mxu0 %v2387_v0  ;;  %765 = vmatprep.mubr.bf16.mxu1 %v2387_v0  ;;  %v111_v13 = vld [vmem:[#allocation4 + $0x1c8] sm:$0xff]  ;;  %v81_v21 = vld [vmem:[#allocation4 + $0xd8] sm:$0xff]  ;;  %v2253_v22 = vcombine.low %v94_v10, %v110_v11  ;;  %v2226_v24 = vcombine.high %v64_v18, %v80_v19  ;;  %v112_v28 = vld [vmem:[#allocation4 + $0x1d0] sm:$0xff]  ;;  %v2225_v31 = vcombine.low %v64_v18, %v80_v19 }
  0x45   :  { %v2256_v17 = vcombine.high %v95_v12, %v111_v13  ;;  %v2255_v23 = vcombine.low %v95_v12, %v111_v13  ;;  %v2228_v25 = vcombine.high %v65_v20, %v81_v21  ;;  %v97_v29 = vld [vmem:[#allocation4 + $0x158] sm:$0xff]  ;;  %v2227_v32 = vcombine.low %v65_v20, %v81_v21  ;;  %v66_v35 = vld [vmem:[#allocation4 + $0x60] sm:$0xff]  ;;  %v68_v51 = vld [vmem:[#allocation4 + $0x70] sm:$0xff] }
  0x46   :  { %695 = vmatpush1.bf16.msra.mxu0 %v2241_v37  ;;  %736 = vmatpush1.bf16.msra.mxu1 %v2243_v38  ;;  %v113_v30 = vld [vmem:[#allocation4 + $0x1d8] sm:$0xff]  ;;  %v2258_v33 = vcombine.high %v96_v27, %v112_v28  ;;  %v82_v36 = vld [vmem:[#allocation4 + $0xe0] sm:$0xff]  ;;  %v67_v37 = vld [vmem:[#allocation4 + $0x68] sm:$0xff] }
  0x47   :  { %774 = vmatprep.subr.bf16.mxu0 %v2214_v39  ;;  %815 = vmatprep.subr.bf16.mxu1 %v2216_v40  ;;  %v2260_v34 = vcombine.high %v97_v29, %v113_v30  ;;  %v83_v38 = vld [vmem:[#allocation4 + $0xe8] sm:$0xff]  ;;  %v2257_v39 = vcombine.low %v96_v27, %v112_v28  ;;  %v2259_v40 = vcombine.low %v97_v29, %v113_v30  ;;  %v98_v43 = vld [vmem:[#allocation4 + $0x160] sm:$0xff]  ;;  %v84_v52 = vld [vmem:[#allocation4 + $0xf0] sm:$0xff] }
  0x48   :  { %v2230_v41 = vcombine.high %v66_v35, %v82_v36  ;;  %v2232_v42 = vcombine.high %v67_v37, %v83_v38  ;;  %v114_v44 = vld [vmem:[#allocation4 + $0x1e0] sm:$0xff]  ;;  %v2234_v57 = vcombine.high %v68_v51, %v84_v52  ;;  %v100_v59 = vld [vmem:[#allocation4 + $0x170] sm:$0xff] }
  0x49   :  { %2271 = vmatmul.mubr.msk.bf16.vlgmr.msra.gmra.mrb[4].mxu0 %vm606_vm0, %v2447_v26  ;;  %2272 = vmatmul.mubr.msk.bf16.vlgmr.msra.gmra.mrb[4].mxu1 %vm606_vm0, %v2447_v26  ;;  %v2262_v49 = vcombine.high %v98_v43, %v114_v44  ;;  %v116_v60 = vld [vmem:[#allocation4 + $0x1f0] sm:$0xff]  ;;  %v2503_v10 = vld [vmem:[#allocation6] sm:$0xff] }
  0x4a   :  { %775 = vmatpush1.bf16.msra.mxu0 %v2213_v45  ;;  %816 = vmatpush1.bf16.msra.mxu1 %v2215_v46  ;;  %v99_v45 = vld [vmem:[#allocation4 + $0x168] sm:$0xff]  ;;  %v2266_v2 = vcombine.high %v100_v59, %v116_v60  ;;  %v2265_v4 = vcombine.low %v100_v59, %v116_v60 }
  0x4b   :  { %776 = vmatprep.subr.bf16.mxu0 %v2246_v47  ;;  %817 = vmatprep.subr.bf16.mxu1 %v2248_v48  ;;  %v115_v46 = vld [vmem:[#allocation4 + $0x1e8] sm:$0xff]  ;;  %v2229_v47 = vcombine.low %v66_v35, %v82_v36  ;;  %v2231_v48 = vcombine.low %v67_v37, %v83_v38 }
  0x4c   :  { %806 = vmatprep.mubr.bf16.mxu0 %v2387_v0  ;;  %847 = vmatprep.mubr.bf16.mxu1 %v2387_v0  ;;  %v2264_v50 = vcombine.high %v99_v45, %v115_v46 }
  0x4e   :  { %777 = vmatpush1.bf16.msra.mxu0 %v2245_v53  ;;  %818 = vmatpush1.bf16.msra.mxu1 %v2247_v54  ;;  %v69_v53 = vld [vmem:[#allocation4 + $0x78] sm:$0xff] }
  0x4f   :  { %856 = vmatprep.subr.bf16.mxu0 %v2218_v55  ;;  %897 = vmatprep.subr.bf16.mxu1 %v2220_v56  ;;  %v85_v54 = vld [vmem:[#allocation4 + $0xf8] sm:$0xff]  ;;  %v2261_v55 = vcombine.low %v98_v43, %v114_v44  ;;  %v2263_v56 = vcombine.low %v99_v45, %v115_v46 }
  0x50   :  { %v2236_v58 = vcombine.high %v69_v53, %v85_v54 }
  0x51   :  { %2273 = vmatmul.mubr.msk.bf16.vlgmr.msra.gmra.mrb[8].mxu0 %vm606_vm0, %v2447_v26  ;;  %2274 = vmatmul.mubr.msk.bf16.vlgmr.msra.gmra.mrb[8].mxu1 %vm606_vm0, %v2447_v26 }
  0x52   :  { %857 = vmatpush1.bf16.msra.mxu0 %v2217_v61  ;;  %898 = vmatpush1.bf16.msra.mxu1 %v2219_v62  ;;  %v101_v61 = vld [vmem:[#allocation4 + $0x178] sm:$0xff] }
  0x53   :  { %858 = vmatprep.subr.bf16.mxu0 %v2250_v63  ;;  %899 = vmatprep.subr.bf16.mxu1 %v2252_v1  ;;  %v117_v62 = vld [vmem:[#allocation4 + $0x1f8] sm:$0xff]  ;;  %v2233_v63 = vcombine.low %v68_v51, %v84_v52  ;;  %v2235_v1 = vcombine.low %v69_v53, %v85_v54 }
  0x54   :  { %888 = vmatprep.mubr.bf16.mxu0 %v2387_v0  ;;  %929 = vmatprep.mubr.bf16.mxu1 %v2387_v0  ;;  %v2268_v3 = vcombine.high %v101_v61, %v117_v62  ;;  %v2267_v5 = vcombine.low %v101_v61, %v117_v62 }
  0x56   :  { %859 = vmatpush1.bf16.msra.mxu0 %v2249_v6  ;;  %900 = vmatpush1.bf16.msra.mxu1 %v2251_v7  ;;  %v126_v6 = vlaneseq }
  0x57   :  { %938 = vmatprep.subr.bf16.mxu0 %v2222_v8  ;;  %979 = vmatprep.subr.bf16.mxu1 %v2224_v9 }
  0x58   :  { %v2495_v7 = vshrl.u32 %v126_v6, 7 }
  0x59   :  { %2275 = vmatmul.mubr.msk.bf16.vlgmr.msra.gmra.mrb[12].mxu0 %vm606_vm0, %v2447_v26  ;;  %2276 = vmatmul.mubr.msk.bf16.vlgmr.msra.gmra.mrb[12].mxu1 %vm606_vm0, %v2447_v26 }
  0x5a   :  { %939 = vmatpush1.bf16.msra.mxu0 %v2221_v14  ;;  %980 = vmatpush1.bf16.msra.mxu1 %v2223_v15  ;;  %3179 = vst [vmem:[#allocation9_spill] sm:$0xff] %v2495_v7  ;;  %v2498_v8 = vsub.s32 0, %v2495_v7  ;;  %v2501_v9 = vsub.s32 2, %v2495_v7  ;;  %v2509_v11 = vsub.s32 3, %v2495_v7  ;;  %v2512_v12 = vsub.s32 4, %v2495_v7  ;;  %v2523_v15 = vld [vmem:[#allocation6 + $0x8] sm:$0xff] }
  0x5b   :  { %940 = vmatprep.subr.bf16.mxu0 %v2254_v16  ;;  %981 = vmatprep.subr.bf16.mxu1 %v2256_v17  ;;  %v2518_v13 = vsub.s32 5, %v2495_v7  ;;  %v2521_v14 = vsub.s32 7, %v2495_v7 }
  0x5c   :  { %970 = vmatprep.mubr.bf16.mxu0 %v2387_v0  ;;  %1011 = vmatprep.mubr.bf16.mxu1 %v2387_v0  ;;  %v129_v16 = vrot.slane %v2503_v10, %v2498_v8  ;;  %v137_v17 = vrot.slane %v2503_v10, %v2501_v9  ;;  %v141_v19 = vrot.slane %v2503_v10, %v2509_v11 }
  0x5d   :  { %v145_v20 = vrot.slane %v2503_v10, %v2512_v12  ;;  %v169_v27 = vrot.slane %v2523_v15, %v2501_v9  ;;  %v173_v29 = vrot.slane %v2523_v15, %v2509_v11 }
  0x5e   :  { %941 = vmatpush1.bf16.msra.mxu0 %v2253_v22  ;;  %982 = vmatpush1.bf16.msra.mxu1 %v2255_v23  ;;  %v2537_v22 = vld [vmem:[#allocation6 + $0x10] sm:$0xff]  ;;  %v149_v23 = vrot.slane %v2503_v10, %v2518_v13 }
  0x5f   :  { %1020 = vmatprep.subr.bf16.mxu0 %v2226_v24  ;;  %1061 = vmatprep.subr.bf16.mxu1 %v2228_v25  ;;  %v157_v24 = vrot.slane %v2503_v10, %v2521_v14  ;;  %v161_v25 = vrot.slane %v2523_v15, %v2498_v8 }
  0x61   :  { %2277 = vmatmul.mubr.msk.bf16.vlgmr.msra.gmra.mrb[16].mxu0 %vm606_vm0, %v2447_v26  ;;  %2278 = vmatmul.mubr.msk.bf16.vlgmr.msra.gmra.mrb[16].mxu1 %vm606_vm0, %v2447_v26 }
  0x62   :  { %1021 = vmatpush1.bf16.msra.mxu0 %v2225_v31  ;;  %1062 = vmatpush1.bf16.msra.mxu1 %v2227_v32  ;;  %v2555_v32 = vld [vmem:[#allocation6 + $0x18] sm:$0xff] }
  0x63   :  { %1022 = vmatprep.subr.bf16.mxu0 %v2258_v33  ;;  %1063 = vmatprep.subr.bf16.mxu1 %v2260_v34 }
  0x64   :  { %1052 = vmatprep.mubr.bf16.mxu0 %v2387_v0  ;;  %1093 = vmatprep.mubr.bf16.mxu1 %v2387_v0 }
  0x66   :  { %1023 = vmatpush1.bf16.msra.mxu0 %v2257_v39  ;;  %1064 = vmatpush1.bf16.msra.mxu1 %v2259_v40 }
  0x67   :  { %1102 = vmatprep.subr.bf16.mxu0 %v2230_v41  ;;  %1143 = vmatprep.subr.bf16.mxu1 %v2232_v42 }
  0x69   :  { %2279 = vmatmul.mubr.msk.bf16.vlgmr.msra.gmra.mrb[20].mxu0 %vm606_vm0, %v2447_v26  ;;  %2280 = vmatmul.mubr.msk.bf16.vlgmr.msra.gmra.mrb[20].mxu1 %vm606_vm0, %v2447_v26 }
  0x6a   :  { %1103 = vmatpush1.bf16.msra.mxu0 %v2229_v47  ;;  %1144 = vmatpush1.bf16.msra.mxu1 %v2231_v48 }
  0x6b   :  { %1104 = vmatprep.subr.bf16.mxu0 %v2262_v49  ;;  %1145 = vmatprep.subr.bf16.mxu1 %v2264_v50 }
  0x6c   :  { %1134 = vmatprep.mubr.bf16.mxu0 %v2387_v0  ;;  %1175 = vmatprep.mubr.bf16.mxu1 %v2387_v0 }
  0x6e   :  { %1105 = vmatpush1.bf16.msra.mxu0 %v2261_v55  ;;  %1146 = vmatpush1.bf16.msra.mxu1 %v2263_v56 }
  0x6f   :  { %1184 = vmatprep.subr.bf16.mxu0 %v2234_v57  ;;  %1225 = vmatprep.subr.bf16.mxu1 %v2236_v58 }
  0x71   :  { %2281 = vmatmul.mubr.msk.bf16.vlgmr.msra.gmra.mrb[24].mxu0 %vm606_vm0, %v2447_v26  ;;  %2282 = vmatmul.mubr.msk.bf16.vlgmr.msra.gmra.mrb[24].mxu1 %vm606_vm0, %v2447_v26 }
  0x72   :  { %1185 = vmatpush1.bf16.msra.mxu0 %v2233_v63  ;;  %1226 = vmatpush1.bf16.msra.mxu1 %v2235_v1 }
  0x73   :  { %1186 = vmatprep.subr.bf16.mxu0 %v2266_v2  ;;  %1227 = vmatprep.subr.bf16.mxu1 %v2268_v3 }
  0x74   :  { %1216 = vmatprep.mubr.bf16.mxu0 %v2387_v0  ;;  %1257 = vmatprep.mubr.bf16.mxu1 %v2387_v0  ;;  %v2506_v0 = vsub.s32 1, %v2495_v7 }
  0x76   :  { %1187 = vmatpush1.bf16.msra.mxu0 %v2265_v4  ;;  %1228 = vmatpush1.bf16.msra.mxu1 %v2267_v5  ;;  %v133_v18 = vrot.slane %v2503_v10, %v2506_v0  ;;  %v165_v28 = vrot.slane %v2523_v15, %v2506_v0 }
  0x79   :  { %2283 = vmatmul.mubr.msk.bf16.vlgmr.msra.gmra.mrb[28].mxu0 %vm606_vm0, %v2447_v26  ;;  %2284 = vmatmul.mubr.msk.bf16.vlgmr.msra.gmra.mrb[28].mxu1 %vm606_vm0, %v2447_v26  ;;  %v2515_v26 = vsub.s32 6, %v2495_v7 }
  0x7b   :  { %v153_v21 = vrot.slane %v2503_v10, %v2515_v26 }
 0x114   :  { %v644_v41 = vpop.f32.mrb[0].mxu0  ;;  %v685_v47 = vpop.f32.mrb[0].mxu1 }
 0x115   :  { %v2581_v46 = vadd.f32 %v644_v41, %v129_v16  ;;  %v646_v48 = vpop.f32.mrb[1].mxu0  ;;  %v2589_v52 = vadd.f32 %v685_v47, %v137_v17  ;;  %v687_v54 = vpop.f32.mrb[1].mxu1 }
 0x116   :  { %v2591_v53 = vadd.f32 %v646_v48, %v133_v18  ;;  %v648_v55 = vpop.f32.mrb[2].mxu0  ;;  %v2601_v60 = vadd.f32 %v687_v54, %v141_v19  ;;  %v689_v61 = vpop.f32.mrb[2].mxu1 }
 0x117   :  { %v1267_v58 = vsel %vm1266_vm1, %v2581_v46, 0.0  ;;  %v1491_v59 = vmul.f32 %v2581_v46, %v2581_v46  ;;  %v649_v62 = vpop.f32.mrb[3].mxu0  ;;  %v1281_v2 = vsel %vm1266_vm1, %v2589_v52, 0.0  ;;  %v1493_v3 = vmul.f32 %v2589_v52, %v2589_v52  ;;  %v690_v5 = vpop.f32.mrb[3].mxu1 }
 0x118   :  { %3180 = vst [vmem:[#allocation10_spill] sm:$0xff] %v2591_v53  ;;  %3181 = vst [vmem:[#allocation11_spill] sm:$0xff] %v2601_v60  ;;  %v1268_v1 = vrot.slane %v1267_v58, 4  ;;  %v1274_v4 = vsel %vm1266_vm1, %v2591_v53, 0.0  ;;  %v1282_v16 = vrot.slane %v1281_v2, 4  ;;  %v1492_v18 = vmul.f32 %v2591_v53, %v2591_v53 }
 0x119   :  { %v1523_v6 = vsel %vm1266_vm1, %v1491_v59, 0.0  ;;  %v1275_v17 = vrot.slane %v1274_v4, 4  ;;  %v1537_v47 = vsel %vm1266_vm1, %v1493_v3, 0.0  ;;  %v1288_v48 = vsel %vm1266_vm1, %v2601_v60, 0.0 }
 0x11a   :  { %v1269_v19 = vadd.f32 %v1268_v1, %v1267_v58  ;;  %v1524_v41 = vrot.slane %v1523_v6, 4  ;;  %v1283_v54 = vadd.f32 %v1282_v16, %v1281_v2  ;;  %v1538_v55 = vrot.slane %v1537_v47, 4 }
 0x11b   :  { %v1276_v61 = vadd.f32 %v1275_v17, %v1274_v4  ;;  %v1530_v62 = vsel %vm1266_vm1, %v1492_v18, 0.0  ;;  %v1289_v57 = vrot.slane %v1288_v48, 4  ;;  %v1494_v58 = vmul.f32 %v2601_v60, %v2601_v60 }
 0x11c   :  { %v1270_v5 = vrot.slane %v1269_v19, 2  ;;  %v1525_v63 = vadd.f32 %v1524_v41, %v1523_v6  ;;  %v1531_v59 = vrot.slane %v1530_v62, 4  ;;  %v726_v56 = vpop.f32.mrb[4].mxu0  ;;  %v1284_v51 = vrot.slane %v1283_v54, 2  ;;  %v767_v1 = vpop.f32.mrb[4].mxu1 }
 0x11d   :  { %v1539_v50 = vadd.f32 %v1538_v55, %v1537_v47  ;;  %v1277_v49 = vrot.slane %v1276_v61, 2  ;;  %v728_v3 = vpop.f32.mrb[5].mxu0  ;;  %v1290_v16 = vadd.f32 %v1289_v57, %v1288_v48  ;;  %v769_v4 = vpop.f32.mrb[5].mxu1  ;;  %v1544_v41 = vsel %vm1266_vm1, %v1494_v58, 0.0 }
 0x11e   :  { %v1271_v45 = vadd.f32 %v1270_v5, %v1269_v19  ;;  %v1526_v44 = vrot.slane %v1525_v63, 2  ;;  %v1532_v2 = vadd.f32 %v1531_v59, %v1530_v62  ;;  %v730_v17 = vpop.f32.mrb[6].mxu0  ;;  %v1285_v18 = vadd.f32 %v1284_v51, %v1283_v54  ;;  %v771_v42 = vpop.f32.mrb[6].mxu1 }
 0x11f   :  { %v1540_v43 = vrot.slane %v1539_v50, 2  ;;  %v1278_v6 = vadd.f32 %v1277_v49, %v1276_v61  ;;  %v731_v40 = vpop.f32.mrb[7].mxu0  ;;  %v1291_v38 = vrot.slane %v1290_v16, 2  ;;  %v772_v37 = vpop.f32.mrb[7].mxu1  ;;  %v1545_v5 = vrot.slane %v1544_v41, 4 }
 0x120   :  { %v1272_v47 = vrot.slane %v1271_v45, 1  ;;  %v1527_v55 = vadd.f32 %v1526_v44, %v1525_v63  ;;  %v1533_v39 = vrot.slane %v1532_v2, 2  ;;  %v1286_v36 = vrot.slane %v1285_v18, 1 }
 0x121   :  { %v1541_v35 = vadd.f32 %v1540_v43, %v1539_v50  ;;  %v1279_v19 = vrot.slane %v1278_v6, 1  ;;  %v1292_v59 = vadd.f32 %v1291_v38, %v1290_v16  ;;  %v1546_v61 = vadd.f32 %v1545_v5, %v1544_v41 }
 0x122   :  { %v1273_v62 = vadd.f32 %v1272_v47, %v1271_v45  ;;  %v1528_v57 = vrot.slane %v1527_v55, 1  ;;  %v1534_v48 = vadd.f32 %v1533_v39, %v1532_v2  ;;  %v1287_v51 = vadd.f32 %v1286_v36, %v1285_v18 }
 0x123   :  { %v1542_v54 = vrot.slane %v1541_v35, 1  ;;  %v1280_v49 = vadd.f32 %v1279_v19, %v1278_v6  ;;  %v1293_v40 = vrot.slane %v1292_v59, 1  ;;  %v2624_v44 = vadd.f32 %v726_v56, %v145_v20 }
 0x124   :  { %v1529_v58 = vadd.f32 %v1528_v57, %v1527_v55  ;;  %v1535_v42 = vrot.slane %v1534_v48, 1  ;;  %v808_v37 = vpop.f32.mrb[8].mxu0  ;;  %v2626_v50 = vadd.f32 %v1287_v51, %v1273_v62  ;;  %v1547_v45 = vrot.slane %v1546_v61, 2  ;;  %v2633_v38 = vpop.f32.mrb[8].mxu1 }
 0x125   :  { %v1543_v43 = vadd.f32 %v1542_v54, %v1541_v35  ;;  %v2631_v36 = vadd.f32 %v767_v1, %v153_v21  ;;  %v2635_v39 = vpop.f32.mrb[9].mxu0  ;;  %v1294_v2 = vadd.f32 %v1293_v40, %v1292_v59  ;;  %v1295_v20 = vsel %vm1266_vm1, %v2624_v44, 0.0  ;;  %v2641_v56 = vpop.f32.mrb[9].mxu1 }
 0x126   :  { %v1536_v63 = vadd.f32 %v1535_v42, %v1534_v48  ;;  %v1495_v35 = vmul.f32 %v2624_v44, %v2624_v44  ;;  %v812_v16 = vpop.f32.mrb[10].mxu0  ;;  %v1548_v18 = vadd.f32 %v1547_v45, %v1546_v61  ;;  %v1296_v21 = vrot.slane %v1295_v20, 4  ;;  %v853_v6 = vpop.f32.mrb[10].mxu1 }
 0x127   :  { %v2643_v17 = vadd.f32 %v1543_v43, %v1529_v58  ;;  %v1309_v1 = vsel %vm1266_vm1, %v2631_v36, 0.0  ;;  %v813_v41 = vpop.f32.mrb[11].mxu0  ;;  %v2647_v47 = vadd.f32 %v1294_v2, %v1280_v49  ;;  %v1497_v5 = vmul.f32 %v2631_v36, %v2631_v36  ;;  %v854_v62 = vpop.f32.mrb[11].mxu1 }
 0x128   :  { %v1551_v55 = vsel %vm1266_vm1, %v1495_v35, 0.0  ;;  %v1310_v19 = vrot.slane %v1309_v1, 4  ;;  %v1549_v57 = vrot.slane %v1548_v18, 1  ;;  %v1297_v48 = vadd.f32 %v1296_v21, %v1295_v20 }
 0x129   :  { %v1552_v59 = vrot.slane %v1551_v55, 4  ;;  %v2655_v51 = vadd.f32 %v728_v3, %v149_v23  ;;  %v1565_v61 = vsel %vm1266_vm1, %v1497_v5, 0.0  ;;  %v2661_v49 = vadd.f32 %v769_v4, %v157_v24 }
 0x12a   :  { %v1311_v54 = vadd.f32 %v1310_v19, %v1309_v1  ;;  %v2666_v58 = vadd.f32 %v808_v37, %v161_v25  ;;  %v1550_v42 = vadd.f32 %v1549_v57, %v1548_v18  ;;  %v1298_v40 = vrot.slane %v1297_v48, 2 }
 0x12b   :  { %3182 = vst [vmem:[#allocation12_spill] sm:$0xff] %v2655_v51  ;;  %3183 = vst [vmem:[#allocation13_spill] sm:$0xff] %v2661_v49  ;;  %v1553_v43 = vadd.f32 %v1552_v59, %v1551_v55  ;;  %v1566_v45 = vrot.slane %v1565_v61, 4  ;;  %v1302_v23 = vsel %vm1266_vm1, %v2655_v51, 0.0  ;;  %v1496_v3 = vmul.f32 %v2655_v51, %v2655_v51 }
 0x12c   :  { %v1312_v2 = vrot.slane %v1311_v54, 2  ;;  %v1316_v10 = vsel %vm1266_vm1, %v2661_v49, 0.0  ;;  %v2674_v24 = vpop.f32.mrb[12].mxu0  ;;  %v2676_v4 = vadd.f32 %v1550_v42, %v1536_v63  ;;  %v1299_v25 = vadd.f32 %v1298_v40, %v1297_v48  ;;  %v2678_v35 = vpop.f32.mrb[12].mxu1 }
 0x12d   :  { %v1554_v37 = vrot.slane %v1553_v43, 2  ;;  %v1567_v20 = vadd.f32 %v1566_v45, %v1565_v61  ;;  %v2680_v16 = vpop.f32.mrb[13].mxu0  ;;  %v1303_v21 = vrot.slane %v1302_v23, 4  ;;  %v1558_v1 = vsel %vm1266_vm1, %v1496_v3, 0.0  ;;  %v2683_v41 = vpop.f32.mrb[13].mxu1 }
 0x12e   :  { %v1313_v18 = vadd.f32 %v1312_v2, %v1311_v54  ;;  %v1317_v6 = vrot.slane %v1316_v10, 4  ;;  %v894_v55 = vpop.f32.mrb[14].mxu0  ;;  %v1300_v19 = vrot.slane %v1299_v25, 1  ;;  %v1559_v63 = vrot.slane %v1558_v1, 4  ;;  %v935_v57 = vpop.f32.mrb[14].mxu1 }
 0x12f   :  { %v1555_v5 = vadd.f32 %v1554_v37, %v1553_v43  ;;  %v1568_v62 = vrot.slane %v1567_v20, 2  ;;  %v895_v48 = vpop.f32.mrb[15].mxu0  ;;  %v1304_v61 = vadd.f32 %v1303_v21, %v1302_v23  ;;  %v1498_v40 = vmul.f32 %v2661_v49, %v2661_v49  ;;  %v936_v54 = vpop.f32.mrb[15].mxu1 }
 0x130   :  { %v1314_v59 = vrot.slane %v1313_v18, 1  ;;  %v1318_v42 = vadd.f32 %v1317_v6, %v1316_v10  ;;  %v1301_v45 = vadd.f32 %v1300_v19, %v1299_v25  ;;  %v1560_v34 = vadd.f32 %v1559_v63, %v1558_v1 }
 0x131   :  { %v1556_v2 = vrot.slane %v1555_v5, 1  ;;  %v1569_v3 = vadd.f32 %v1568_v62, %v1567_v20  ;;  %v1305_v31 = vrot.slane %v1304_v61, 2  ;;  %v1572_v43 = vsel %vm1266_vm1, %v1498_v40, 0.0 }
 0x132   :  { %v1315_v33 = vadd.f32 %v1314_v59, %v1313_v18  ;;  %v1319_v55 = vrot.slane %v1318_v42, 2  ;;  %v1751_v57 = vadd.f32 %v2626_v50, %v1301_v45  ;;  %v1561_v30 = vrot.slane %v1560_v34, 2 }
 0x133   :  { %v1557_v37 = vadd.f32 %v1556_v2, %v1555_v5  ;;  %v1570_v48 = vrot.slane %v1569_v3, 1  ;;  %v1306_v23 = vadd.f32 %v1305_v31, %v1304_v61  ;;  %v1573_v21 = vrot.slane %v1572_v43, 4 }
 0x134   :  { %v1320_v10 = vadd.f32 %v1319_v55, %v1318_v42  ;;  %v1323_v6 = vsel %vm1266_vm1, %v2666_v58, 0.0  ;;  %v2691_v25 = vpop.f32.mrb[16].mxu0  ;;  %v2694_v1 = vadd.f32 %v1751_v57, %v1315_v33  ;;  %v1562_v19 = vadd.f32 %v1561_v30, %v1560_v34  ;;  %v2696_v62 = vpop.f32.mrb[16].mxu1 }
 0x135   :  { %v1753_v20 = vadd.f32 %v2643_v17, %v1557_v37  ;;  %v1571_v18 = vadd.f32 %v1570_v48, %v1569_v3  ;;  %v2698_v5 = vpop.f32.mrb[17].mxu0  ;;  %v1307_v50 = vrot.slane %v1306_v23, 1  ;;  %v1574_v31 = vadd.f32 %v1573_v21, %v1572_v43  ;;  %v2700_v61 = vpop.f32.mrb[17].mxu1 }
 0x136   :  { %v1321_v63 = vrot.slane %v1320_v10, 1  ;;  %v1324_v59 = vrot.slane %v1323_v6, 4  ;;  %v976_v42 = vpop.f32.mrb[18].mxu0  ;;  %v1563_v54 = vrot.slane %v1562_v19, 1  ;;  %v1499_v17 = vmul.f32 %v2666_v58, %v2666_v58  ;;  %v1017_v33 = vpop.f32.mrb[18].mxu1 }
 0x137   :  { %v2702_v40 = vadd.f32 %v1753_v20, %v1571_v18  ;;  %v2710_v30 = vadd.f32 %v2633_v38, %v169_v27  ;;  %v977_v34 = vpop.f32.mrb[19].mxu0  ;;  %v1308_v45 = vadd.f32 %v1307_v50, %v1306_v23  ;;  %v1575_v3 = vrot.slane %v1574_v31, 2  ;;  %v1018_v43 = vpop.f32.mrb[19].mxu1 }
 0x138   :  { %v1322_v2 = vadd.f32 %v1321_v63, %v1320_v10  ;;  %v1325_v55 = vadd.f32 %v1324_v59, %v1323_v6  ;;  %v1564_v37 = vadd.f32 %v1563_v54, %v1562_v19  ;;  %v1579_v57 = vsel %vm1266_vm1, %v1499_v17, 0.0 }
 0x139   :  { %3184 = vst [vmem:[#allocation14_spill] sm:$0xff] %v2710_v30  ;;  %v1337_v48 = vsel %vm1266_vm1, %v2710_v30, 0.0  ;;  %v1501_v21 = vmul.f32 %v2710_v30, %v2710_v30  ;;  %v1752_v20 = vadd.f32 %v2647_v47, %v1308_v45  ;;  %v1576_v27 = vadd.f32 %v1575_v3, %v1574_v31 }
 0x13a   :  { %v1326_v38 = vrot.slane %v1325_v55, 2  ;;  %v1580_v18 = vrot.slane %v1579_v57, 4  ;;  %v1754_v23 = vadd.f32 %v2676_v4, %v1564_v37  ;;  %v1338_v10 = vrot.slane %v1337_v48, 4 }
 0x13b   :  { %v1593_v6 = vsel %vm1266_vm1, %v1501_v21, 0.0  ;;  %v2724_v19 = vadd.f32 %v2635_v39, %v165_v28  ;;  %v1577_v50 = vrot.slane %v1576_v27, 1  ;;  %v2726_v63 = vadd.f32 %v1752_v20, %v1322_v2 }
 0x13c   :  { %v1327_v59 = vadd.f32 %v1326_v38, %v1325_v55  ;;  %v1581_v42 = vadd.f32 %v1580_v18, %v1579_v57  ;;  %v2728_v47 = vpop.f32.mrb[20].mxu0  ;;  %v1339_v31 = vadd.f32 %v1338_v10, %v1337_v48  ;;  %v1594_v54 = vrot.slane %v1593_v6, 4  ;;  %v2734_v33 = vpop.f32.mrb[20].mxu1 }
 0x13d   :  { %3185 = vst [vmem:[#allocation15_spill] sm:$0xff] %v2724_v19  ;;  %v1330_v4 = vsel %vm1266_vm1, %v2724_v19, 0.0  ;;  %v1500_v17 = vmul.f32 %v2724_v19, %v2724_v19  ;;  %v2736_v34 = vpop.f32.mrb[21].mxu0  ;;  %v1578_v28 = vadd.f32 %v1577_v50, %v1576_v27  ;;  %v2738_v3 = vpop.f32.mrb[21].mxu1  ;;  %v2745_v48 = vadd.f32 %v2641_v56, %v173_v29 }
 0x13e   :  { %v1328_v39 = vrot.slane %v1327_v59, 1  ;;  %v1582_v45 = vrot.slane %v1581_v42, 2  ;;  %v1331_v2 = vrot.slane %v1330_v4, 4  ;;  %v1058_v55 = vpop.f32.mrb[22].mxu0  ;;  %v1340_v43 = vrot.slane %v1339_v31, 2  ;;  %v1099_v21 = vpop.f32.mrb[22].mxu1 }
 0x13f   :  { %v1595_v37 = vadd.f32 %v1594_v54, %v1593_v6  ;;  %v1586_v57 = vsel %vm1266_vm1, %v1500_v17, 0.0  ;;  %3186 = vst [vmem:[#allocation16_spill] sm:$0xff] %v2745_v48  ;;  %v1059_v20 = vpop.f32.mrb[23].mxu0  ;;  %v1758_v38 = vadd.f32 %v1754_v23, %v1578_v28  ;;  %v1100_v50 = vpop.f32.mrb[23].mxu1  ;;  %v1344_v6 = vsel %vm1266_vm1, %v2745_v48, 0.0 }
 0x140   :  { %v1329_v27 = vadd.f32 %v1328_v39, %v1327_v59  ;;  %v1583_v18 = vadd.f32 %v1582_v45, %v1581_v42  ;;  %v1332_v10 = vadd.f32 %v1331_v2, %v1330_v4  ;;  %v1341_v7 = vadd.f32 %v1340_v43, %v1339_v31 }
 0x141   :  { %v1596_v19 = vrot.slane %v1595_v37, 2  ;;  %v1587_v55 = vrot.slane %v1586_v57, 4  ;;  %v1345_v51 = vrot.slane %v1344_v6, 4  ;;  %v1502_v23 = vmul.f32 %v2745_v48, %v2745_v48 }
 0x142   :  { %v1584_v54 = vrot.slane %v1583_v18, 1  ;;  %v1759_v17 = vadd.f32 %v2694_v1, %v1329_v27  ;;  %v1333_v49 = vrot.slane %v1332_v10, 2  ;;  %v1342_v29 = vrot.slane %v1341_v7, 1 }
 0x143   :  { %v1597_v56 = vadd.f32 %v1596_v19, %v1595_v37  ;;  %v1588_v21 = vadd.f32 %v1587_v55, %v1586_v57  ;;  %v1346_v4 = vadd.f32 %v1345_v51, %v1344_v6  ;;  %v3187_v31 = vrot.slane %v2523_v15, %v2512_v12 }
 0x144   :  { %v1585_v59 = vadd.f32 %v1584_v54, %v1583_v18  ;;  %v1334_v42 = vadd.f32 %v1333_v49, %v1332_v10  ;;  %v2758_v39 = vpop.f32.mrb[24].mxu0  ;;  %v1343_v1 = vadd.f32 %v1342_v29, %v1341_v7  ;;  %v1600_v19 = vsel %vm1266_vm1, %v1502_v23, 0.0  ;;  %v2761_v43 = vpop.f32.mrb[24].mxu1 }
 0x145   :  { %v2756_v28 = vadd.f32 %v2674_v24, %v3187_v31  ;;  %v1598_v45 = vrot.slane %v1597_v56, 1  ;;  %v1589_v2 = vrot.slane %v1588_v21, 2  ;;  %v2763_v37 = vpop.f32.mrb[25].mxu0  ;;  %v1347_v57 = vrot.slane %v1346_v4, 2  ;;  %v2766_v27 = vpop.f32.mrb[25].mxu1 }
 0x146   :  { %v1761_v49 = vadd.f32 %v2702_v40, %v1585_v59  ;;  %v1335_v51 = vrot.slane %v1334_v42, 1  ;;  %v1601_v20 = vrot.slane %v1600_v19, 4  ;;  %v1140_v24 = vpop.f32.mrb[26].mxu0  ;;  %v2768_v10 = vadd.f32 %v1759_v17, %v1343_v1  ;;  %v1181_v55 = vpop.f32.mrb[26].mxu1 }
 0x147   :  { %3188 = vst [vmem:[#allocation17_spill] sm:$0xff] %v2756_v28  ;;  %v1599_v18 = vadd.f32 %v1598_v45, %v1597_v56  ;;  %v1590_v7 = vadd.f32 %v1589_v2, %v1588_v21  ;;  %v1351_v50 = vsel %vm1266_vm1, %v2756_v28, 0.0  ;;  %v1141_v6 = vpop.f32.mrb[27].mxu0  ;;  %v1348_v29 = vadd.f32 %v1347_v57, %v1346_v4  ;;  %v1182_v40 = vpop.f32.mrb[27].mxu1 }
 0x148   :  { %v1336_v54 = vadd.f32 %v1335_v51, %v1334_v42  ;;  %v1602_v23 = vadd.f32 %v1601_v20, %v1600_v19  ;;  %v1352_v31 = vrot.slane %v1351_v50, 4  ;;  %v1503_v24 = vmul.f32 %v2756_v28, %v2756_v28 }
 0x149   :  { %v2772_v59 = vadd.f32 %v1761_v49, %v1599_v18  ;;  %v1591_v48 = vrot.slane %v1590_v7, 1  ;;  %v3189_v17 = vrot.slane %v2523_v15, %v2515_v26  ;;  %v1349_v1 = vrot.slane %v1348_v29, 1 }
 0x14a   :  { %v1760_v21 = vadd.f32 %v2726_v63, %v1336_v54  ;;  %v1603_v42 = vrot.slane %v1602_v23, 2  ;;  %v1353_v4 = vadd.f32 %v1352_v31, %v1351_v50  ;;  %v1607_v2 = vsel %vm1266_vm1, %v1503_v24, 0.0 }
 0x14b   :  { %v2780_v56 = vadd.f32 %v2678_v35, %v3189_v17  ;;  %v1592_v45 = vadd.f32 %v1591_v48, %v1590_v7  ;;  %v1350_v51 = vadd.f32 %v1349_v1, %v1348_v29  ;;  %v1608_v18 = vrot.slane %v1607_v2, 4 }
 0x14c   :  { %v1604_v57 = vadd.f32 %v1603_v42, %v1602_v23  ;;  %v1354_v20 = vrot.slane %v1353_v4, 2  ;;  %v2788_v35 = vpop.f32.mrb[28].mxu0  ;;  %v3191_v48 = vrot.slane %v2523_v15, %v2518_v13  ;;  %v2797_v50 = vpop.f32.mrb[28].mxu1 }
 0x14d   :  { %3190 = vst [vmem:[#allocation18_spill] sm:$0xff] %v2780_v56  ;;  %v1365_v19 = vsel %vm1266_vm1, %v2780_v56, 0.0  ;;  %v1505_v49 = vmul.f32 %v2780_v56, %v2780_v56  ;;  %v1762_v55 = vadd.f32 %v1758_v38, %v1592_v45  ;;  %v2799_v54 = vpop.f32.mrb[29].mxu0  ;;  %v1764_v23 = vadd.f32 %v1760_v21, %v1350_v51  ;;  %v2801_v24 = vpop.f32.mrb[29].mxu1 }
 0x14e   :  { %v1366_v63 = vrot.slane %v1365_v19, 4  ;;  %v2795_v7 = vadd.f32 %v2680_v16, %v3191_v48  ;;  %v1605_v29 = vrot.slane %v1604_v57, 1  ;;  %v1355_v31 = vadd.f32 %v1354_v20, %v1353_v4  ;;  %v1222_v38 = vpop.f32.mrb[30].mxu0  ;;  %v1263_v45 = vpop.f32.mrb[30].mxu1 }
 0x14f   :  { %v1621_v6 = vsel %vm1266_vm1, %v1505_v49, 0.0  ;;  %v1609_v40 = vadd.f32 %v1608_v18, %v1607_v2  ;;  %v1223_v49 = vpop.f32.mrb[31].mxu0  ;;  %v1264_v21 = vpop.f32.mrb[31].mxu1 }
 0x150   :  { %3192 = vst [vmem:[#allocation19_spill] sm:$0xff] %v2795_v7  ;;  %v1367_v17 = vadd.f32 %v1366_v63, %v1365_v19  ;;  %v1622_v1 = vrot.slane %v1621_v6, 4  ;;  %v1358_v42 = vsel %vm1266_vm1, %v2795_v7, 0.0  ;;  %v1504_v16 = vmul.f32 %v2795_v7, %v2795_v7 }
 0x151   :  { %v1606_v48 = vadd.f32 %v1605_v29, %v1604_v57  ;;  %v1356_v60 = vrot.slane %v1355_v31, 1  ;;  %v1610_v53 = vrot.slane %v1609_v40, 2  ;;  %v1359_v56 = vrot.slane %v1358_v42, 4 }
 0x152   :  { %v1368_v4 = vrot.slane %v1367_v17, 2  ;;  %v1623_v2 = vadd.f32 %v1622_v1, %v1621_v6  ;;  %v1614_v51 = vsel %vm1266_vm1, %v1504_v16, 0.0  ;;  %v3193_v19 = vrot.slane %v2523_v15, %v2521_v14 }
 0x153   :  { %v1766_v18 = vadd.f32 %v1762_v55, %v1606_v48  ;;  %v1357_v63 = vadd.f32 %v1356_v60, %v1355_v31  ;;  %v1611_v38 = vadd.f32 %v1610_v53, %v1609_v40  ;;  %v1360_v45 = vadd.f32 %v1359_v56, %v1358_v42 }
 0x154   :  { %v2812_v20 = vadd.f32 %v2683_v41, %v3193_v19  ;;  %v1369_v49 = vadd.f32 %v1368_v4, %v1367_v17  ;;  %v1624_v57 = vrot.slane %v1623_v2, 2  ;;  %v1615_v29 = vrot.slane %v1614_v51, 4 }
 0x155   :  { %v1612_v7 = vrot.slane %v1611_v38, 1  ;;  %v1767_v6 = vadd.f32 %v2768_v10, %v1357_v63  ;;  %v1361_v1 = vrot.slane %v1360_v45, 2  ;;  %v3194_v55 = vrot.slane %v2537_v22, %v2498_v8 }
 0x156   :  { %v1372_v21 = vsel %vm1266_vm1, %v2812_v20, 0.0  ;;  %v1370_v28 = vrot.slane %v1369_v49, 1  ;;  %v1625_v15 = vadd.f32 %v1624_v57, %v1623_v2  ;;  %v1616_v30 = vadd.f32 %v1615_v29, %v1614_v51 }
 0x157   :  { %v1373_v16 = vrot.slane %v1372_v21, 4  ;;  %v1506_v41 = vmul.f32 %v2812_v20, %v2812_v20  ;;  %v1613_v60 = vadd.f32 %v1612_v7, %v1611_v38  ;;  %v1362_v53 = vadd.f32 %v1361_v1, %v1360_v45 }
 0x158   :  { %v2823_v31 = vadd.f32 %v2691_v25, %v3194_v55  ;;  %v1371_v40 = vadd.f32 %v1370_v28, %v1369_v49  ;;  %v1626_v17 = vrot.slane %v1625_v15, 1  ;;  %v1617_v10 = vrot.slane %v1616_v30, 2 }
 0x159   :  { %v1374_v56 = vadd.f32 %v1373_v16, %v1372_v21  ;;  %v1628_v42 = vsel %vm1266_vm1, %v1506_v41, 0.0  ;;  %v1769_v48 = vadd.f32 %v2772_v59, %v1613_v60  ;;  %v1363_v4 = vrot.slane %v1362_v53, 1 }
 0x15a   :  { %v1629_v51 = vrot.slane %v1628_v42, 4  ;;  %v1627_v19 = vadd.f32 %v1626_v17, %v1625_v15  ;;  %v1771_v7 = vadd.f32 %v1767_v6, %v1371_v40  ;;  %v1618_v63 = vadd.f32 %v1617_v10, %v1616_v30 }
 0x15b   :  { %v1375_v2 = vrot.slane %v1374_v56, 2  ;;  %v1379_v38 = vsel %vm1266_vm1, %v2823_v31, 0.0  ;;  %v1364_v45 = vadd.f32 %v1363_v4, %v1362_v53  ;;  %v1507_v21 = vmul.f32 %v2823_v31, %v2823_v31 }
 0x15c   :  { %v1630_v25 = vadd.f32 %v1629_v51, %v1628_v42  ;;  %v1380_v29 = vrot.slane %v1379_v38, 4  ;;  %v1773_v28 = vadd.f32 %v1769_v48, %v1627_v19  ;;  %v1619_v49 = vrot.slane %v1618_v63, 1 }
 0x15d   :  { %v1376_v57 = vadd.f32 %v1375_v2, %v1374_v56  ;;  %v3195_v59 = vrot.slane %v2537_v22, %v2501_v9  ;;  %v1768_v6 = vadd.f32 %v1764_v23, %v1364_v45  ;;  %v1635_v60 = vsel %vm1266_vm1, %v1507_v21, 0.0 }
 0x15e   :  { %v1631_v16 = vrot.slane %v1630_v25, 2  ;;  %v1381_v15 = vadd.f32 %v1380_v29, %v1379_v38  ;;  %v1620_v41 = vadd.f32 %v1619_v49, %v1618_v63  ;;  %v1636_v10 = vrot.slane %v1635_v60, 4 }
 0x15f   :  { %v2835_v1 = vadd.f32 %v2696_v62, %v3195_v59  ;;  %v1377_v30 = vrot.slane %v1376_v57, 1  ;;  %v3196_v48 = vrot.slane %v2537_v22, %v2506_v0 }
 0x160   :  { %v1632_v40 = vadd.f32 %v1631_v16, %v1630_v25  ;;  %v1382_v17 = vrot.slane %v1381_v15, 2  ;;  %v1770_v42 = vadd.f32 %v1766_v18, %v1620_v41  ;;  %v1637_v63 = vadd.f32 %v1636_v10, %v1635_v60 }
 0x161   :  { %v1393_v53 = vsel %vm1266_vm1, %v2835_v1, 0.0  ;;  %v1509_v56 = vmul.f32 %v2835_v1, %v2835_v1  ;;  %v1378_v55 = vadd.f32 %v1377_v30, %v1376_v57  ;;  %v2847_v4 = vadd.f32 %v2698_v5, %v3196_v48 }
 0x162   :  { %v1394_v62 = vrot.slane %v1393_v53, 4  ;;  %v1633_v2 = vrot.slane %v1632_v40, 1  ;;  %v1383_v19 = vadd.f32 %v1382_v17, %v1381_v15  ;;  %v1638_v49 = vrot.slane %v1637_v63, 2 }
 0x163   :  { %v1649_v23 = vsel %vm1266_vm1, %v1509_v56, 0.0  ;;  %v1772_v51 = vadd.f32 %v1768_v6, %v1378_v55  ;;  %v1386_v57 = vsel %vm1266_vm1, %v2847_v4, 0.0  ;;  %v1508_v18 = vmul.f32 %v2847_v4, %v2847_v4 }
 0x164   :  { %v1395_v38 = vadd.f32 %v1394_v62, %v1393_v53  ;;  %v1650_v45 = vrot.slane %v1649_v23, 4  ;;  %v1634_v25 = vadd.f32 %v1633_v2, %v1632_v40  ;;  %v1384_v29 = vrot.slane %v1383_v19, 1 }
 0x165   :  { %v1387_v21 = vrot.slane %v1386_v57, 4  ;;  %v1642_v5 = vsel %vm1266_vm1, %v1508_v18, 0.0  ;;  %v3197_v6 = vrot.slane %v2537_v22, %v2509_v11  ;;  %v1639_v60 = vadd.f32 %v1638_v49, %v1637_v63 }
 0x166   :  { %v1396_v59 = vrot.slane %v1395_v38, 2  ;;  %v1651_v30 = vadd.f32 %v1650_v45, %v1649_v23  ;;  %v1774_v15 = vadd.f32 %v1770_v42, %v1634_v25  ;;  %v1385_v41 = vadd.f32 %v1384_v29, %v1383_v19 }
 0x167   :  { %v2858_v16 = vadd.f32 %v2700_v61, %v3197_v6  ;;  %v1388_v53 = vadd.f32 %v1387_v21, %v1386_v57  ;;  %v1643_v40 = vrot.slane %v1642_v5, 4  ;;  %v1640_v10 = vrot.slane %v1639_v60, 1 }
 0x168   :  { %v1397_v56 = vadd.f32 %v1396_v59, %v1395_v38  ;;  %v1652_v55 = vrot.slane %v1651_v30, 2  ;;  %v1775_v62 = vadd.f32 %v1771_v7, %v1385_v41  ;;  %v3198_v38 = vrot.slane %v2537_v22, %v2512_v12 }
 0x169   :  { %v1400_v17 = vsel %vm1266_vm1, %v2858_v16, 0.0  ;;  %v1389_v23 = vrot.slane %v1388_v53, 2  ;;  %v1644_v18 = vadd.f32 %v1643_v40, %v1642_v5  ;;  %v1510_v61 = vmul.f32 %v2858_v16, %v2858_v16 }
 0x16a   :  { %v1401_v48 = vrot.slane %v1400_v17, 4  ;;  %v1398_v2 = vrot.slane %v1397_v56, 1  ;;  %v1653_v45 = vadd.f32 %v1652_v55, %v1651_v30  ;;  %v1641_v42 = vadd.f32 %v1640_v10, %v1639_v60 }
 0x16b   :  { %v1390_v19 = vadd.f32 %v1389_v23, %v1388_v53  ;;  %v2868_v57 = vadd.f32 %v2728_v47, %v3198_v38  ;;  %v1645_v7 = vrot.slane %v1644_v18, 2  ;;  %v1656_v49 = vsel %vm1266_vm1, %v1510_v61, 0.0 }
 0x16c   :  { %v1402_v63 = vadd.f32 %v1401_v48, %v1400_v17  ;;  %v1399_v25 = vadd.f32 %v1398_v2, %v1397_v56  ;;  %v1654_v29 = vrot.slane %v1653_v45, 1  ;;  %v1777_v21 = vadd.f32 %v1773_v28, %v1641_v42 }
 0x16d   :  { %v1391_v59 = vrot.slane %v1390_v19, 1  ;;  %v1657_v5 = vrot.slane %v1656_v49, 4  ;;  %v1646_v60 = vadd.f32 %v1645_v7, %v1644_v18  ;;  %v1407_v53 = vsel %vm1266_vm1, %v2868_v57, 0.0 }
 0x16e   :  { %v1403_v30 = vrot.slane %v1402_v63, 2  ;;  %v1655_v6 = vadd.f32 %v1654_v29, %v1653_v45  ;;  %v1779_v41 = vadd.f32 %v1775_v62, %v1399_v25  ;;  %v1408_v47 = vrot.slane %v1407_v53, 4 }
 0x16f   :  { %v1392_v55 = vadd.f32 %v1391_v59, %v1390_v19  ;;  %v1658_v17 = vadd.f32 %v1657_v5, %v1656_v49  ;;  %v1647_v56 = vrot.slane %v1646_v60, 1  ;;  %v1511_v23 = vmul.f32 %v2868_v57, %v2868_v57 }
 0x170   :  { %v1404_v40 = vadd.f32 %v1403_v30, %v1402_v63  ;;  %v1781_v10 = vadd.f32 %v1777_v21, %v1655_v6  ;;  %v3199_v28 = vrot.slane %v2537_v22, %v2515_v26  ;;  %v1409_v18 = vadd.f32 %v1408_v47, %v1407_v53 }
 0x171   :  { %v1776_v62 = vadd.f32 %v1772_v51, %v1392_v55  ;;  %v1659_v45 = vrot.slane %v1658_v17, 2  ;;  %v1648_v61 = vadd.f32 %v1647_v56, %v1646_v60  ;;  %v1663_v42 = vsel %vm1266_vm1, %v1511_v23, 0.0 }
 0x172   :  { %v2879_v48 = vadd.f32 %v2734_v33, %v3199_v28  ;;  %v1405_v2 = vrot.slane %v1404_v40, 1  ;;  %v1410_v29 = vrot.slane %v1409_v18, 2  ;;  %v1664_v7 = vrot.slane %v1663_v42, 4 }
 0x173   :  { %v1660_v25 = vadd.f32 %v1659_v45, %v1658_v17  ;;  %v1778_v49 = vadd.f32 %v1774_v15, %v1648_v61  ;;  %v3200_v21 = vrot.slane %v2537_v22, %v2518_v13 }
 0x174   :  { %v1421_v19 = vsel %vm1266_vm1, %v2879_v48, 0.0  ;;  %v1513_v63 = vmul.f32 %v2879_v48, %v2879_v48  ;;  %v1406_v38 = vadd.f32 %v1405_v2, %v1404_v40  ;;  %v1411_v6 = vadd.f32 %v1410_v29, %v1409_v18 }
 0x175   :  { %v1422_v33 = vrot.slane %v1421_v19, 4  ;;  %v2891_v59 = vadd.f32 %v2736_v34, %v3200_v21  ;;  %v1661_v30 = vrot.slane %v1660_v25, 1  ;;  %v1665_v60 = vadd.f32 %v1664_v7, %v1663_v42 }
 0x176   :  { %v1677_v51 = vsel %vm1266_vm1, %v1513_v63, 0.0  ;;  %v1780_v5 = vadd.f32 %v1776_v62, %v1406_v38  ;;  %v1412_v47 = vrot.slane %v1411_v6, 1  ;;  %v3201_v62 = vrot.slane %v2537_v22, %v2521_v14 }
 0x177   :  { %v1423_v53 = vadd.f32 %v1422_v33, %v1421_v19  ;;  %v1678_v55 = vrot.slane %v1677_v51, 4  ;;  %v1414_v40 = vsel %vm1266_vm1, %v2891_v59, 0.0  ;;  %v1512_v15 = vmul.f32 %v2891_v59, %v2891_v59 }
 0x178   :  { %v1662_v17 = vadd.f32 %v1661_v30, %v1660_v25  ;;  %v1666_v56 = vrot.slane %v1665_v60, 2  ;;  %v1415_v23 = vrot.slane %v1414_v40, 4  ;;  %v2902_v45 = vadd.f32 %v2738_v3, %v3201_v62 }
 0x179   :  { %v1424_v28 = vrot.slane %v1423_v53, 2  ;;  %v1679_v2 = vadd.f32 %v1678_v55, %v1677_v51  ;;  %v1670_v34 = vsel %vm1266_vm1, %v1512_v15, 0.0  ;;  %v1413_v61 = vadd.f32 %v1412_v47, %v1411_v6 }
 0x17a   :  { %v1782_v18 = vadd.f32 %v1778_v49, %v1662_v17  ;;  %v1667_v42 = vadd.f32 %v1666_v56, %v1665_v60  ;;  %v1416_v19 = vadd.f32 %v1415_v23, %v1414_v40  ;;  %v1671_v25 = vrot.slane %v1670_v34, 4 }
 0x17b   :  { %v1425_v63 = vadd.f32 %v1424_v28, %v1423_v53  ;;  %v1680_v38 = vrot.slane %v1679_v2, 2  ;;  %v1428_v29 = vsel %vm1266_vm1, %v2902_v45, 0.0  ;;  %v1783_v33 = vadd.f32 %v1779_v41, %v1413_v61 }
 0x17c   :  { %v1668_v7 = vrot.slane %v1667_v42, 1  ;;  %v1417_v51 = vrot.slane %v1416_v19, 2  ;;  %v1429_v21 = vrot.slane %v1428_v29, 4  ;;  %v1672_v22 = vadd.f32 %v1671_v25, %v1670_v34 }
 0x17d   :  { %v1426_v30 = vrot.slane %v1425_v63, 1  ;;  %v1681_v55 = vadd.f32 %v1680_v38, %v1679_v2  ;;  %v1514_v3 = vmul.f32 %v2902_v45, %v2902_v45  ;;  %v3202_v53 = vrot.slane %v2555_v32, %v2498_v8 }
 0x17e   :  { %v1669_v49 = vadd.f32 %v1668_v7, %v1667_v42  ;;  %v1418_v6 = vadd.f32 %v1417_v51, %v1416_v19  ;;  %v1430_v60 = vadd.f32 %v1429_v21, %v1428_v29  ;;  %v1673_v41 = vrot.slane %v1672_v22, 2 }
 0x17f   :  { %v2912_v40 = vadd.f32 %v2758_v39, %v3202_v53  ;;  %v1427_v15 = vadd.f32 %v1426_v30, %v1425_v63  ;;  %v1682_v17 = vrot.slane %v1681_v55, 1  ;;  %v1684_v47 = vsel %vm1266_vm1, %v1514_v3, 0.0 }
 0x180   :  { %v1785_v56 = vadd.f32 %v1781_v10, %v1669_v49  ;;  %v1419_v23 = vrot.slane %v1418_v6, 1  ;;  %v1431_v28 = vrot.slane %v1430_v60, 2  ;;  %v1685_v2 = vrot.slane %v1684_v47, 4 }
 0x181   :  { %v1683_v34 = vadd.f32 %v1682_v17, %v1681_v55  ;;  %v1787_v62 = vadd.f32 %v1783_v33, %v1427_v15  ;;  %v1674_v61 = vadd.f32 %v1673_v41, %v1672_v22  ;;  %v1435_v42 = vsel %vm1266_vm1, %v2912_v40, 0.0 }
 0x182   :  { %v1420_v19 = vadd.f32 %v1419_v23, %v1418_v6  ;;  %v1432_v38 = vadd.f32 %v1431_v28, %v1430_v60  ;;  %v1686_v25 = vadd.f32 %v1685_v2, %v1684_v47  ;;  %v1436_v39 = vrot.slane %v1435_v42, 4 }
 0x183   :  { %v1789_v29 = vadd.f32 %v1785_v56, %v1683_v34  ;;  %v1675_v63 = vrot.slane %v1674_v61, 1  ;;  %v1515_v7 = vmul.f32 %v2912_v40, %v2912_v40  ;;  %v3203_v10 = vrot.slane %v2555_v32, %v2501_v9 }
 0x184   :  { %v1784_v33 = vadd.f32 %v1780_v5, %v1420_v19  ;;  %v1433_v21 = vrot.slane %v1432_v38, 1  ;;  %v1687_v30 = vrot.slane %v1686_v25, 2  ;;  %v1437_v55 = vadd.f32 %v1436_v39, %v1435_v42 }
 0x185   :  { %v2923_v51 = vadd.f32 %v2761_v43, %v3203_v10  ;;  %v1676_v22 = vadd.f32 %v1675_v63, %v1674_v61  ;;  %v1691_v3 = vsel %vm1266_vm1, %v1515_v7, 0.0  ;;  %v3204_v41 = vrot.slane %v2555_v32, %v2506_v0 }
 0x186   :  { %v1434_v60 = vadd.f32 %v1433_v21, %v1432_v38  ;;  %v1688_v53 = vadd.f32 %v1687_v30, %v1686_v25  ;;  %v1438_v15 = vrot.slane %v1437_v55, 2  ;;  %v1692_v9 = vrot.slane %v1691_v3, 4 }
 0x187   :  { %v1449_v49 = vsel %vm1266_vm1, %v2923_v51, 0.0  ;;  %v1517_v6 = vmul.f32 %v2923_v51, %v2923_v51  ;;  %v1786_v17 = vadd.f32 %v1782_v18, %v1676_v22  ;;  %v2935_v47 = vadd.f32 %v2763_v37, %v3204_v41 }
 0x188   :  { %v1450_v43 = vrot.slane %v1449_v49, 4  ;;  %v1689_v56 = vrot.slane %v1688_v53, 1  ;;  %v1788_v23 = vadd.f32 %v1784_v33, %v1434_v60  ;;  %v1439_v28 = vadd.f32 %v1438_v15, %v1437_v55 }
 0x189   :  { %v1705_v5 = vsel %vm1266_vm1, %v1517_v6, 0.0  ;;  %v1693_v2 = vadd.f32 %v1692_v9, %v1691_v3  ;;  %v1442_v42 = vsel %vm1266_vm1, %v2935_v47, 0.0  ;;  %v1516_v18 = vmul.f32 %v2935_v47, %v2935_v47 }
 0x18a   :  { %v1451_v34 = vadd.f32 %v1450_v43, %v1449_v49  ;;  %v1706_v61 = vrot.slane %v1705_v5, 4  ;;  %v1690_v19 = vadd.f32 %v1689_v56, %v1688_v53  ;;  %v1440_v38 = vrot.slane %v1439_v28, 1 }
 0x18b   :  { %v1694_v25 = vrot.slane %v1693_v2, 2  ;;  %v1443_v39 = vrot.slane %v1442_v42, 4  ;;  %v1698_v37 = vsel %vm1266_vm1, %v1516_v18, 0.0  ;;  %v3205_v7 = vrot.slane %v2555_v32, %v2509_v11 }
 0x18c   :  { %v1452_v0 = vrot.slane %v1451_v34, 2  ;;  %v1707_v63 = vadd.f32 %v1706_v61, %v1705_v5  ;;  %v1790_v33 = vadd.f32 %v1786_v17, %v1690_v19  ;;  %v1441_v21 = vadd.f32 %v1440_v38, %v1439_v28 }
 0x18d   :  { %v2946_v10 = vadd.f32 %v2766_v27, %v3205_v7  ;;  %v1695_v30 = vadd.f32 %v1694_v25, %v1693_v2  ;;  %v1444_v55 = vadd.f32 %v1443_v39, %v1442_v42  ;;  %v1699_v49 = vrot.slane %v1698_v37, 4 }
 0x18e   :  { %v1453_v22 = vadd.f32 %v1452_v0, %v1451_v34  ;;  %v1708_v3 = vrot.slane %v1707_v63, 2  ;;  %v1791_v53 = vadd.f32 %v1787_v62, %v1441_v21  ;;  %v3206_v28 = vrot.slane %v2555_v32, %v2512_v12 }
 0x18f   :  { %v1456_v6 = vsel %vm1266_vm1, %v2946_v10, 0.0  ;;  %v1696_v60 = vrot.slane %v1695_v30, 1  ;;  %v1445_v15 = vrot.slane %v1444_v55, 2  ;;  %v1700_v11 = vadd.f32 %v1699_v49, %v1698_v37 }
 0x190   :  { %v1457_v9 = vrot.slane %v1456_v6, 4  ;;  %v1454_v43 = vrot.slane %v1453_v22, 1  ;;  %v1709_v5 = vadd.f32 %v1708_v3, %v1707_v63  ;;  %v1518_v27 = vmul.f32 %v2946_v10, %v2946_v10 }
 0x191   :  { %v1697_v17 = vadd.f32 %v1696_v60, %v1695_v30  ;;  %v1446_v41 = vadd.f32 %v1445_v15, %v1444_v55  ;;  %v2956_v2 = vadd.f32 %v2788_v35, %v3206_v28  ;;  %v1701_v62 = vrot.slane %v1700_v11, 2 }
 0x192   :  { %v1458_v56 = vadd.f32 %v1457_v9, %v1456_v6  ;;  %v1455_v34 = vadd.f32 %v1454_v43, %v1453_v22  ;;  %v1710_v61 = vrot.slane %v1709_v5, 1  ;;  %v1712_v42 = vsel %vm1266_vm1, %v1518_v27, 0.0 }
 0x193   :  { %v1793_v18 = vadd.f32 %v1789_v29, %v1697_v17  ;;  %v1447_v19 = vrot.slane %v1446_v41, 1  ;;  %v1713_v25 = vrot.slane %v1712_v42, 4  ;;  %v1702_v63 = vadd.f32 %v1701_v62, %v1700_v11 }
 0x194   :  { %v1459_v38 = vrot.slane %v1458_v56, 2  ;;  %v1711_v39 = vadd.f32 %v1710_v61, %v1709_v5  ;;  %v1795_v0 = vadd.f32 %v1791_v53, %v1455_v34  ;;  %v1463_v37 = vsel %vm1266_vm1, %v2956_v2, 0.0 }
 0x195   :  { %v1448_v7 = vadd.f32 %v1447_v19, %v1446_v41  ;;  %v1714_v21 = vadd.f32 %v1713_v25, %v1712_v42  ;;  %v1464_v35 = vrot.slane %v1463_v37, 4  ;;  %v1703_v55 = vrot.slane %v1702_v63, 1 }
 0x196   :  { %v1460_v12 = vadd.f32 %v1459_v38, %v1458_v56  ;;  %v1797_v30 = vadd.f32 %v1793_v18, %v1711_v39  ;;  %v1519_v22 = vmul.f32 %v2956_v2, %v2956_v2  ;;  %v3207_v29 = vrot.slane %v2555_v32, %v2515_v26 }
 0x197   :  { %v1792_v49 = vadd.f32 %v1788_v23, %v1448_v7  ;;  %v1715_v60 = vrot.slane %v1714_v21, 2  ;;  %v1465_v53 = vadd.f32 %v1464_v35, %v1463_v37  ;;  %v1704_v15 = vadd.f32 %v1703_v55, %v1702_v63 }
 0x198   :  { %v2967_v3 = vadd.f32 %v2797_v50, %v3207_v29  ;;  %v1461_v6 = vrot.slane %v1460_v12, 1  ;;  %v1719_v9 = vsel %vm1266_vm1, %v1519_v22, 0.0  ;;  %v3208_v56 = vrot.slane %v2555_v32, %v2518_v13 }
 0x199   :  { %v1716_v27 = vadd.f32 %v1715_v60, %v1714_v21  ;;  %v1466_v17 = vrot.slane %v1465_v53, 2  ;;  %v1720_v26 = vrot.slane %v1719_v9, 4  ;;  %v1794_v41 = vadd.f32 %v1790_v33, %v1704_v15 }
 0x19a   :  { %v1477_v43 = vsel %vm1266_vm1, %v2967_v3, 0.0  ;;  %v1521_v5 = vmul.f32 %v2967_v3, %v2967_v3  ;;  %v1462_v11 = vadd.f32 %v1461_v6, %v1460_v12  ;;  %v2979_v28 = vadd.f32 %v2799_v54, %v3208_v56 }
 0x19b   :  { %v1478_v50 = vrot.slane %v1477_v43, 4  ;;  %v1717_v34 = vrot.slane %v1716_v27, 1  ;;  %v1467_v62 = vadd.f32 %v1466_v17, %v1465_v53  ;;  %v1721_v42 = vadd.f32 %v1720_v26, %v1719_v9 }
 0x19c   :  { %v1733_v23 = vsel %vm1266_vm1, %v1521_v5, 0.0  ;;  %v1796_v61 = vadd.f32 %v1792_v49, %v1462_v11  ;;  %v1470_v38 = vsel %vm1266_vm1, %v2979_v28, 0.0  ;;  %v1520_v33 = vmul.f32 %v2979_v28, %v2979_v28 }
 0x19d   :  { %v1479_v18 = vadd.f32 %v1478_v50, %v1477_v43  ;;  %v1734_v19 = vrot.slane %v1733_v23, 4  ;;  %v1718_v25 = vadd.f32 %v1717_v34, %v1716_v27  ;;  %v1468_v39 = vrot.slane %v1467_v62, 1 }
 0x19e   :  { %v1722_v63 = vrot.slane %v1721_v42, 2  ;;  %v1471_v37 = vrot.slane %v1470_v38, 4  ;;  %v1726_v54 = vsel %vm1266_vm1, %v1520_v33, 0.0  ;;  %v3209_v12 = vrot.slane %v2555_v32, %v2521_v14 }
 0x19f   :  { %v1480_v13 = vrot.slane %v1479_v18, 2  ;;  %v1735_v7 = vadd.f32 %v1734_v19, %v1733_v23  ;;  %v1798_v35 = vadd.f32 %v1794_v41, %v1718_v25  ;;  %v1469_v55 = vadd.f32 %v1468_v39, %v1467_v62 }
 0x1a0   :  { %v2990_v21 = vadd.f32 %v2801_v24, %v3209_v12  ;;  %v1723_v22 = vadd.f32 %v1722_v63, %v1721_v42  ;;  %v1472_v29 = vadd.f32 %v1471_v37, %v1470_v38  ;;  %v1727_v60 = vrot.slane %v1726_v54, 4 }
 0x1a1   :  { %v1481_v49 = vadd.f32 %v1480_v13, %v1479_v18  ;;  %v1736_v6 = vrot.slane %v1735_v7, 2  ;;  %v1799_v9 = vadd.f32 %v1795_v0, %v1469_v55 }
 0x1a2   :  { %v1484_v53 = vsel %vm1266_vm1, %v2990_v21, 0.0  ;;  %v1724_v15 = vrot.slane %v1723_v22, 1  ;;  %v1473_v43 = vrot.slane %v1472_v29, 2  ;;  %v1728_v14 = vadd.f32 %v1727_v60, %v1726_v54 }
 0x1a3   :  { %v1485_v5 = vrot.slane %v1484_v53, 4  ;;  %v1482_v11 = vrot.slane %v1481_v49, 1  ;;  %v1737_v27 = vadd.f32 %v1736_v6, %v1735_v7  ;;  %v1522_v32 = vmul.f32 %v2990_v21, %v2990_v21 }
 0x1a4   :  { %v1725_v24 = vadd.f32 %v1724_v15, %v1723_v22  ;;  %v1474_v17 = vadd.f32 %v1473_v43, %v1472_v29  ;;  %v1729_v23 = vrot.slane %v1728_v14, 2 }
 0x1a5   :  { %v1486_v26 = vadd.f32 %v1485_v5, %v1484_v53  ;;  %v1483_v41 = vadd.f32 %v1482_v11, %v1481_v49  ;;  %v1738_v50 = vrot.slane %v1737_v27, 1  ;;  %v1740_v56 = vsel %vm1266_vm1, %v1522_v32, 0.0  ;;  %v3210_v5 = vld [vmem:[#allocation14_spill] sm:$0xff] }
 0x1a6   :  { %v1801_v34 = vadd.f32 %v1797_v30, %v1725_v24  ;;  %v1475_v62 = vrot.slane %v1474_v17, 1  ;;  %v1741_v0 = vrot.slane %v1740_v56, 4  ;;  %v1730_v38 = vadd.f32 %v1729_v23, %v1728_v14 }
 0x1a7   :  { %v1487_v42 = vrot.slane %v1486_v26, 2  ;;  %v1739_v18 = vadd.f32 %v1738_v50, %v1737_v27  ;;  %v1803_v19 = vadd.f32 %v1799_v9, %v1483_v41  ;;  %v3211_v27 = vld [vmem:[#allocation17_spill] sm:$0xff] }
 0x1a8   :  { %v1476_v33 = vadd.f32 %v1475_v62, %v1474_v17  ;;  %v1742_v39 = vadd.f32 %v1741_v0, %v1740_v56  ;;  %v1731_v13 = vrot.slane %v1730_v38, 1  ;;  %v3214_v0 = vld [vmem:[#allocation11_spill] sm:$0xff] }
 0x1a9   :  { %v1488_v25 = vadd.f32 %v1487_v42, %v1486_v26  ;;  %v1805_v63 = vadd.f32 %v1801_v34, %v1739_v18  ;;  %v1807_v37 = vmul.f32 0.03125, %v1803_v19  ;;  %v3215_v18 = vld [vmem:[#allocation12_spill] sm:$0xff]  ;;  %v3216_v19 = vld [vmem:[#allocation13_spill] sm:$0xff] }
 0x1aa   :  { %v1800_v7 = vadd.f32 %v1796_v61, %v1476_v33  ;;  %v1743_v12 = vrot.slane %v1742_v39, 2  ;;  %v1732_v30 = vadd.f32 %v1731_v13, %v1730_v38  ;;  %v3217_v38 = vld [vmem:[#allocation15_spill] sm:$0xff] }
 0x1ab   :  { %v1489_v54 = vrot.slane %v1488_v25, 1  ;;  %v1809_v55 = vmul.f32 0.03125, %v1805_v63  ;;  %v1811_v22 = vmul.f32 %v1807_v37, %v1807_v37  ;;  %v2998_v29 = vrot.slane %v1807_v37, %v2498_v8  ;;  %v3219_v63 = vld [vmem:[#allocation19_spill] sm:$0xff] }
 0x1ac   :  { %v1744_v6 = vadd.f32 %v1743_v12, %v1742_v39  ;;  %v1802_v26 = vadd.f32 %v1798_v35, %v1732_v30  ;;  %v3213_v35 = vld [vmem:[#allocation10_spill] sm:$0xff] }
 0x1ad   :  { %v1490_v49 = vadd.f32 %v1489_v54, %v1488_v25  ;;  %v1813_v60 = vsub.f32 %v1809_v55, %v1811_v22  ;;  %v1827_v53 = vsub.f32 %v2581_v46, %v2998_v29  ;;  %v1829_v15 = vsub.f32 %v2589_v52, %v2998_v29  ;;  %v3212_v46 = vld [vmem:[#allocation18_spill] sm:$0xff]  ;;  %v3218_v25 = vld [vmem:[#allocation16_spill] sm:$0xff] }
 0x1ae   :  { %v1831_v61 = vsub.f32 %v2624_v44, %v2998_v29  ;;  %v1833_v9 = vsub.f32 %v2631_v36, %v2998_v29  ;;  %v1835_v43 = vsub.f32 %v2666_v58, %v2998_v29  ;;  %v1837_v11 = vsub.f32 %v3210_v5, %v2998_v29 }
 0x1af   :  { %v1839_v14 = vsub.f32 %v3211_v27, %v2998_v29  ;;  %v1815_v32 = vadd.f32 1e-05, %v1813_v60  ;;  %v1841_v24 = vsub.f32 %v3212_v46, %v2998_v29  ;;  %v1843_v52 = vsub.f32 %v2823_v31, %v2998_v29 }
 0x1b0   :  { %v1845_v44 = vsub.f32 %v2835_v1, %v2998_v29  ;;  %v1847_v36 = vsub.f32 %v2868_v57, %v2998_v29  ;;  %v1849_v58 = vsub.f32 %v2879_v48, %v2998_v29  ;;  %v1857_v17 = vsub.f32 %v2967_v3, %v2998_v29 }
 0x1b1   :  { %2308 = vrsqrt.f32 %v1815_v32  ;;  %v1745_v41 = vrot.slane %v1744_v6, 1  ;;  %v1804_v50 = vadd.f32 %v1800_v7, %v1490_v49  ;;  %v1851_v23 = vsub.f32 %v2912_v40, %v2998_v29 }
 0x1b2   :  { %v1853_v31 = vsub.f32 %v2923_v51, %v2998_v29  ;;  %v1855_v1 = vsub.f32 %v2956_v2, %v2998_v29 }
 0x1b3   :  { %v1746_v57 = vadd.f32 %v1745_v41, %v1744_v6  ;;  %v1808_v56 = vmul.f32 0.03125, %v1804_v50 }
 0x1b5   :  { %v1806_v34 = vadd.f32 %v1802_v26, %v1746_v57  ;;  %v1812_v48 = vmul.f32 %v1808_v56, %v1808_v56  ;;  %v3033_v62 = vrot.slane %v1808_v56, %v2498_v8 }
 0x1b7   :  { %v1810_v3 = vmul.f32 0.03125, %v1806_v34  ;;  %v1828_v42 = vsub.f32 %v3213_v35, %v3033_v62  ;;  %v1830_v40 = vsub.f32 %v3214_v0, %v3033_v62  ;;  %v1832_v51 = vsub.f32 %v3215_v18, %v3033_v62 }
 0x1b8   :  { %v1834_v2 = vsub.f32 %v3216_v19, %v3033_v62  ;;  %v1836_v33 = vsub.f32 %v3217_v38, %v3033_v62  ;;  %v1838_v39 = vsub.f32 %v3218_v25, %v3033_v62  ;;  %v1840_v37 = vsub.f32 %v3219_v63, %v3033_v62 }
 0x1b9   :  { %v1814_v13 = vsub.f32 %v1810_v3, %v1812_v48  ;;  %v1842_v7 = vsub.f32 %v2812_v20, %v3033_v62  ;;  %v1844_v54 = vsub.f32 %v2847_v4, %v3033_v62  ;;  %v1846_v12 = vsub.f32 %v2858_v16, %v3033_v62 }
 0x1ba   :  { %v1848_v55 = vsub.f32 %v2891_v59, %v3033_v62  ;;  %v1850_v22 = vsub.f32 %v2902_v45, %v3033_v62  ;;  %v1852_v29 = vsub.f32 %v2935_v47, %v3033_v62  ;;  %v1854_v30 = vsub.f32 %v2946_v10, %v3033_v62 }
 0x1bb   :  { %v2309_v49 = vpop.eup %2308  ;;  %v1816_v20 = vadd.f32 1e-05, %v1814_v13  ;;  %v1856_v4 = vsub.f32 %v2979_v28, %v3033_v62  ;;  %v1858_v16 = vsub.f32 %v2990_v21, %v3033_v62  ;;  %v2388_v59 = vmov 1966171168  }
 0x1bc   :  { %v1862_v6 = vrot.slane %v2309_v49, %v2498_v8  ;;  %v2000_v60 = vunpack.c.l.s4 %v2388_v59 }
 0x1bd   :  { %2310 = vrsqrt.f32 %v1816_v20 }
 0x1be   :  { %v3068_v45 = vmul.f32 %v1862_v6, %v1827_v53  ;;  %v3070_v5 = vmul.f32 %v1862_v6, %v1829_v15  ;;  %v3072_v47 = vmul.f32 %v1862_v6, %v1831_v61  ;;  %v3074_v10 = vmul.f32 %v1862_v6, %v1833_v9 }
 0x1bf   :  { %v3076_v27 = vmul.f32 %v1862_v6, %v1835_v43  ;;  %v3078_v32 = vmul.f32 %v1862_v6, %v1837_v11  ;;  %v3080_v28 = vmul.f32 %v1862_v6, %v1839_v14  ;;  %v3082_v21 = vmul.f32 %v1862_v6, %v1841_v24  ;;  %v3220_v24 = vld [vmem:[#allocation9_spill] sm:$0xff] }
 0x1c0   :  { %v3084_v46 = vmul.f32 %v1862_v6, %v1843_v52  ;;  %v3086_v26 = vmul.f32 %v1862_v6, %v1845_v44  ;;  %v3088_v53 = vmul.f32 %v1862_v6, %v1847_v36  ;;  %v3090_v15 = vmul.f32 %v1862_v6, %v1849_v58 }
 0x1c1   :  { %v3092_v61 = vmul.f32 %v1862_v6, %v1857_v17  ;;  %v2001_v9 = vunpack.c.0.s8 %v2000_v60  ;;  %v3094_v41 = vmul.f32 %v1862_v6, %v1851_v23  ;;  %v3096_v43 = vmul.f32 %v1862_v6, %v1853_v31 }
 0x1c2   :  { %v1899_v11 = vmax.f32 %v3068_v45, 0.0  ;;  %v3099_v14 = vmul.f32 %v1862_v6, %v1855_v1  ;;  %v1901_v44 = vmax.f32 %v3070_v5, 0.0  ;;  %v1903_v36 = vmax.f32 %v3072_v47, 0.0 }
 0x1c3   :  { %v3102_v52 = vsub.s32 %v2001_v9, %v3220_v24  ;;  %v1905_v58 = vmax.f32 %v3074_v10, 0.0  ;;  %v1907_v17 = vmax.f32 %v3076_v27, 0.0  ;;  %v1909_v23 = vmax.f32 %v3078_v32, 0.0 }
 0x1c4   :  { %v1911_v31 = vmax.f32 %v3080_v28, 0.0  ;;  %v1913_v57 = vmax.f32 %v3082_v21, 0.0  ;;  %v1915_v1 = vmax.f32 %v3084_v46, 0.0  ;;  %v1917_v56 = vmax.f32 %v3086_v26, 0.0 }
 0x1c5   :  { %v1919_v34 = vmax.f32 %v3088_v53, 0.0  ;;  %v1921_v48 = vmax.f32 %v3090_v15, 0.0  ;;  %v1929_v3 = vmax.f32 %v3092_v61, 0.0  ;;  %v1923_v35 = vmax.f32 %v3094_v41, 0.0 }
 0x1c6   :  { %v1925_v0 = vmax.f32 %v3096_v43, 0.0  ;;  %v1927_v18 = vmax.f32 %v3099_v14, 0.0 }
 0x1c7   :  { %v2311_v50 = vpop.eup %2310 }
 0x1c8   :  { %v1866_v62 = vrot.slane %v2311_v50, %v2498_v8 }
 0x1ca   :  { %v1868_v19 = vmul.f32 %v1866_v62, %v1828_v42  ;;  %v1870_v38 = vmul.f32 %v1866_v62, %v1830_v40  ;;  %v1872_v25 = vmul.f32 %v1866_v62, %v1832_v51  ;;  %v1874_v63 = vmul.f32 %v1866_v62, %v1834_v2 }
 0x1cb   :  { %v1876_v13 = vmul.f32 %v1866_v62, %v1836_v33  ;;  %v1878_v49 = vmul.f32 %v1866_v62, %v1838_v39  ;;  %v1880_v20 = vmul.f32 %v1866_v62, %v1840_v37  ;;  %v1882_v6 = vmul.f32 %v1866_v62, %v1842_v7 }
 0x1cc   :  { %v1884_v59 = vmul.f32 %v1866_v62, %v1844_v54  ;;  %v1886_v60 = vmul.f32 %v1866_v62, %v1846_v12  ;;  %v1888_v45 = vmul.f32 %v1866_v62, %v1848_v55  ;;  %v1890_v8 = vmul.f32 %v1866_v62, %v1850_v22 }
 0x1cd   :  { %v1892_v5 = vmul.f32 %v1866_v62, %v1852_v29  ;;  %v1894_v47 = vmul.f32 %v1866_v62, %v1854_v30  ;;  %v1896_v10 = vmul.f32 %v1866_v62, %v1856_v4  ;;  %v1898_v27 = vmul.f32 %v1866_v62, %v1858_v16 }
 0x1ce   :  { %v1900_v32 = vmax.f32 %v1868_v19, 0.0  ;;  %v1902_v28 = vmax.f32 %v1870_v38, 0.0  ;;  %v1904_v21 = vmax.f32 %v1872_v25, 0.0  ;;  %v1906_v46 = vmax.f32 %v1874_v63, 0.0 }
 0x1cf   :  { %v1908_v42 = vmax.f32 %v1876_v13, 0.0  ;;  %v1910_v40 = vmax.f32 %v1878_v49, 0.0  ;;  %v1912_v51 = vmax.f32 %v1880_v20, 0.0  ;;  %v1914_v2 = vmax.f32 %v1882_v6, 0.0 }
 0x1d0   :  { %v1916_v33 = vmax.f32 %v1884_v59, 0.0  ;;  %v1918_v39 = vmax.f32 %v1886_v60, 0.0  ;;  %v1920_v37 = vmax.f32 %v1888_v45, 0.0  ;;  %v1922_v7 = vmax.f32 %v1890_v8, 0.0 }
 0x1d1   :  { %v1924_v54 = vmax.f32 %v1892_v5, 0.0  ;;  %v1926_v12 = vmax.f32 %v1894_v47, 0.0  ;;  %v1928_v55 = vmax.f32 %v1896_v10, 0.0  ;;  %v1930_v22 = vmax.f32 %v1898_v27, 0.0 }
 0x1d2   :  { %v2285_v29 = vpack.c.bf16 %v1900_v32, %v1899_v11  ;;  %v2286_v30 = vpack.c.bf16 %v1902_v28, %v1901_v44  ;;  %v2287_v4 = vpack.c.bf16 %v1904_v21, %v1903_v36  ;;  %v2288_v16 = vpack.c.bf16 %v1906_v46, %v1905_v58 }
 0x1d3   :  { %v2289_v26 = vpack.c.bf16 %v1908_v42, %v1907_v17  ;;  %v2290_v53 = vpack.c.bf16 %v1910_v40, %v1909_v23  ;;  %v2291_v15 = vpack.c.bf16 %v1912_v51, %v1911_v31  ;;  %v2292_v9 = vpack.c.bf16 %v1914_v2, %v1913_v57 }
 0x1d4   :  { %v2005_v24 = vrot.slane %v2285_v29, %v3102_v52  ;;  %v2012_v50 = vrot.slane %v2286_v30, %v3102_v52  ;;  %v2019_v62 = vrot.slane %v2287_v4, %v3102_v52  ;;  %v2026_v19 = vrot.slane %v2288_v16, %v3102_v52 }
 0x1d5   :  { %v2054_v38 = vrot.slane %v2289_v26, %v3102_v52  ;;  %v2061_v25 = vrot.slane %v2290_v53, %v3102_v52  ;;  %v2068_v11 = vrot.slane %v2291_v15, %v3102_v52  ;;  %v2075_v44 = vrot.slane %v2292_v9, %v3102_v52 }
 0x1d6   :  { %v2027_v36 = vcombine.low %v2005_v24, %v2012_v50  ;;  %v2028_v58 = vcombine.low %v2019_v62, %v2026_v19  ;;  %v2293_v17 = vpack.c.bf16 %v1916_v33, %v1915_v1  ;;  %v2294_v23 = vpack.c.bf16 %v1918_v39, %v1917_v56 }
 0x1d7   :  { %v2076_v31 = vcombine.low %v2054_v38, %v2061_v25  ;;  %v2077_v57 = vcombine.low %v2068_v11, %v2075_v44  ;;  %v2295_v63 = vpack.c.bf16 %v1920_v37, %v1919_v34  ;;  %v2296_v13 = vpack.c.bf16 %v1922_v7, %v1921_v48 }
 0x1d8   :  { %v2035_v49 = vrot.slane %v2027_v36, %v3102_v52  ;;  %v2042_v20 = vrot.slane %v2028_v58, %v3102_v52  ;;  %v2103_v6 = vrot.slane %v2293_v17, %v3102_v52  ;;  %v2110_v59 = vrot.slane %v2294_v23, %v3102_v52 }
 0x1d9   :  { %v2084_v60 = vrot.slane %v2076_v31, %v3102_v52  ;;  %v2091_v45 = vrot.slane %v2077_v57, %v3102_v52  ;;  %v2117_v8 = vrot.slane %v2295_v63, %v3102_v52  ;;  %v2124_v1 = vrot.slane %v2296_v13, %v3102_v52 }
 0x1da   :  { %v2043_v56 = vcombine.low %v2035_v49, %v2042_v20  ;;  %v2125_v5 = vcombine.low %v2103_v6, %v2110_v59  ;;  %v2297_v34 = vpack.c.bf16 %v1924_v54, %v1923_v35  ;;  %v2298_v48 = vpack.c.bf16 %v1926_v12, %v1925_v0 }
 0x1db   :  { %v2092_v47 = vcombine.low %v2084_v60, %v2091_v45  ;;  %v2126_v10 = vcombine.low %v2117_v8, %v2124_v1  ;;  %v2299_v27 = vpack.c.bf16 %v1928_v55, %v1927_v18  ;;  %v2300_v32 = vpack.c.bf16 %v1930_v22, %v1929_v3 }
 0x1dc   :  { %v2133_v28 = vrot.slane %v2125_v5, %v3102_v52  ;;  %v2152_v21 = vrot.slane %v2297_v34, %v3102_v52  ;;  %v2159_v46 = vrot.slane %v2298_v48, %v3102_v52  ;;  %2195 = vst [vmem:[%s3167_s3] sm:$0xff] %v2043_v56 }
 0x1dd   :  { %v2140_v41 = vrot.slane %v2126_v10, %v3102_v52  ;;  %v2166_v43 = vrot.slane %v2299_v27, %v3102_v52  ;;  %v2173_v14 = vrot.slane %v2300_v32, %v3102_v52  ;;  %2196 = vst [vmem:[%s3167_s3 + $0x8] sm:$0xff] %v2092_v47 }
 0x1de   :  { %v2174_v61 = vcombine.low %v2152_v21, %v2159_v46 }
 0x1df   :  { %v2141_v3 = vcombine.low %v2133_v28, %v2140_v41  ;;  %v2175_v35 = vcombine.low %v2166_v43, %v2173_v14 }
 0x1e0   :  { %v2182_v0 = vrot.slane %v2174_v61, %v3102_v52 }
 0x1e1   :  { %v2189_v18 = vrot.slane %v2175_v35, %v3102_v52  ;;  %2197 = vst [vmem:[%s3167_s3 + $0x10] sm:$0xff] %v2141_v3 }
 0x1e3   :  { %v2190_v42 = vcombine.low %v2182_v0, %v2189_v18 }
 0x1e5   :  { %2198 = vst [vmem:[%s3167_s3 + $0x18] sm:$0xff] %v2190_v42 }
 0x1e6   :  { %2203 = vsyncpa [#allocation3], 1 }
 0x1e7   :  { %2204 = vsyncpa [#allocation5], 1 }

// kernel: _forward.6
= control target key start
LH: loop header
LB: loop body
LE: loop exit
PB: predicated region body
PF: predicated region fallthrough
CT: control target
= control target key end

     0   :  { %vm2037_vm0 = vcmask 523264   ;;  %s4172_s1 = inlined_call_operand.vmem [shape: bf16[1152,256], index: 1, kind: input, shape index: {}]   ;;  %s4173_s0 = inlined_call_operand.vmem [shape: bf16[128,1152], index: 0, kind: input, shape index: {}]   ;;  %s4174_s2 = inlined_call_operand.vmem [shape: bf16[128,256], index: 2, kind: output, shape index: {}]  }
   0x1   :  { %v2674_v0 = vld [vmem:[%s4172_s1 + $0x4] ss:$8 sps:$4 sm:$0xff]   ;;  %v2678_v2 = vld [vmem:[%s4172_s1] ss:$8 sps:$4 sm:$0xff]   ;;  %v2680_v4 = vld [vmem:[%s4172_s1 + $0x14] ss:$8 sps:$4 sm:$0xff]  }
   0x2   :  { %v2676_v1 = vld [vmem:[%s4172_s1 + $0x204] ss:$8 sps:$4 sm:$0xff]   ;;  %1324 = vmatprep.subr.bf16.mxu1 %v2674_v0  ;;  %v2679_v3 = vld [vmem:[%s4172_s1 + $0x200] ss:$8 sps:$4 sm:$0xff]   ;;  %v2682_v5 = vld [vmem:[%s4172_s1 + $0x214] ss:$8 sps:$4 sm:$0xff]  }
   0x3   :  { %1550 = vmatprep.subr.bf16.mxu0 %v2676_v1  ;;  %1325 = vmatpush1.bf16.msra.mxu1 %v2678_v2  ;;  %v2684_v6 = vld [vmem:[%s4172_s1 + $0x10] ss:$8 sps:$4 sm:$0xff]   ;;  %v2686_v8 = vld [vmem:[%s4172_s1 + $0x24] ss:$8 sps:$4 sm:$0xff]   ;;  %v2690_v10 = vld [vmem:[%s4172_s1 + $0x20] ss:$8 sps:$4 sm:$0xff]  }
   0x4   :  { %1551 = vmatpush1.bf16.msra.mxu0 %v2679_v3  ;;  %1326 = vmatprep.subr.bf16.mxu1 %v2680_v4  ;;  %v2685_v7 = vld [vmem:[%s4172_s1 + $0x210] ss:$8 sps:$4 sm:$0xff]   ;;  %v2688_v9 = vld [vmem:[%s4172_s1 + $0x224] ss:$8 sps:$4 sm:$0xff]   ;;  %v2691_v11 = vld [vmem:[%s4172_s1 + $0x220] ss:$8 sps:$4 sm:$0xff]  }
   0x5   :  { %1552 = vmatprep.subr.bf16.mxu0 %v2682_v5  ;;  %v2692_v12 = vld [vmem:[%s4172_s1 + $0x34] ss:$8 sps:$4 sm:$0xff]   ;;  %v2696_v14 = vld [vmem:[%s4172_s1 + $0x30] ss:$8 sps:$4 sm:$0xff]   ;;  %v2698_v16 = vld [vmem:[%s4172_s1 + $0x44] ss:$8 sps:$4 sm:$0xff]  }
   0x6   :  { %v2694_v13 = vld [vmem:[%s4172_s1 + $0x234] ss:$8 sps:$4 sm:$0xff]   ;;  %v2697_v15 = vld [vmem:[%s4172_s1 + $0x230] ss:$8 sps:$4 sm:$0xff]   ;;  %v2700_v17 = vld [vmem:[%s4172_s1 + $0x244] ss:$8 sps:$4 sm:$0xff]  }
   0x7   :  { %1327 = vmatpush1.bf16.msra.mxu1 %v2684_v6  ;;  %v2702_v18 = vld [vmem:[%s4172_s1 + $0x40] ss:$8 sps:$4 sm:$0xff]   ;;  %v2704_v20 = vld [vmem:[%s4172_s1 + $0x54] ss:$8 sps:$4 sm:$0xff]   ;;  %v2708_v22 = vld [vmem:[%s4172_s1 + $0x50] ss:$8 sps:$4 sm:$0xff]  }
   0x8   :  { %1553 = vmatpush1.bf16.msra.mxu0 %v2685_v7  ;;  %1328 = vmatprep.subr.bf16.mxu1 %v2686_v8  ;;  %v2703_v19 = vld [vmem:[%s4172_s1 + $0x240] ss:$8 sps:$4 sm:$0xff]   ;;  %v2706_v21 = vld [vmem:[%s4172_s1 + $0x254] ss:$8 sps:$4 sm:$0xff]   ;;  %v2709_v23 = vld [vmem:[%s4172_s1 + $0x250] ss:$8 sps:$4 sm:$0xff]  }
   0x9   :  { %1554 = vmatprep.subr.bf16.mxu0 %v2688_v9  ;;  %v2710_v24 = vld [vmem:[%s4172_s1 + $0x64] ss:$8 sps:$4 sm:$0xff]   ;;  %v2714_v26 = vld [vmem:[%s4172_s1 + $0x60] ss:$8 sps:$4 sm:$0xff]   ;;  %v2716_v28 = vld [vmem:[%s4172_s1 + $0x74] ss:$8 sps:$4 sm:$0xff]  }
   0xa   :  { %v2712_v25 = vld [vmem:[%s4172_s1 + $0x264] ss:$8 sps:$4 sm:$0xff]   ;;  %v2715_v27 = vld [vmem:[%s4172_s1 + $0x260] ss:$8 sps:$4 sm:$0xff]   ;;  %v2718_v29 = vld [vmem:[%s4172_s1 + $0x274] ss:$8 sps:$4 sm:$0xff]  }
   0xb   :  { %1329 = vmatpush1.bf16.msra.mxu1 %v2690_v10  ;;  %v2720_v30 = vld [vmem:[%s4172_s1 + $0x70] ss:$8 sps:$4 sm:$0xff]   ;;  %v2722_v32 = vld [vmem:[%s4172_s1 + $0x84] ss:$8 sps:$4 sm:$0xff]   ;;  %v2726_v34 = vld [vmem:[%s4172_s1 + $0x80] ss:$8 sps:$4 sm:$0xff]  }
   0xc   :  { %1555 = vmatpush1.bf16.msra.mxu0 %v2691_v11  ;;  %1330 = vmatprep.subr.bf16.mxu1 %v2692_v12  ;;  %v2721_v31 = vld [vmem:[%s4172_s1 + $0x270] ss:$8 sps:$4 sm:$0xff]   ;;  %v2724_v33 = vld [vmem:[%s4172_s1 + $0x284] ss:$8 sps:$4 sm:$0xff]   ;;  %v2727_v35 = vld [vmem:[%s4172_s1 + $0x280] ss:$8 sps:$4 sm:$0xff]  }
   0xd   :  { %1556 = vmatprep.subr.bf16.mxu0 %v2694_v13  ;;  %v2728_v36 = vld [vmem:[%s4172_s1 + $0x94] ss:$8 sps:$4 sm:$0xff]   ;;  %v2732_v38 = vld [vmem:[%s4172_s1 + $0x90] ss:$8 sps:$4 sm:$0xff]   ;;  %v2734_v40 = vld [vmem:[%s4172_s1 + $0xa4] ss:$8 sps:$4 sm:$0xff]  }
   0xe   :  { %v2730_v37 = vld [vmem:[%s4172_s1 + $0x294] ss:$8 sps:$4 sm:$0xff]   ;;  %v2733_v39 = vld [vmem:[%s4172_s1 + $0x290] ss:$8 sps:$4 sm:$0xff]   ;;  %v2736_v41 = vld [vmem:[%s4172_s1 + $0x2a4] ss:$8 sps:$4 sm:$0xff]  }
   0xf   :  { %1331 = vmatpush1.bf16.msra.mxu1 %v2696_v14  ;;  %v2738_v42 = vld [vmem:[%s4172_s1 + $0xa0] ss:$8 sps:$4 sm:$0xff]   ;;  %v2740_v44 = vld [vmem:[%s4172_s1 + $0xb4] ss:$8 sps:$4 sm:$0xff]   ;;  %v2744_v46 = vld [vmem:[%s4172_s1 + $0xb0] ss:$8 sps:$4 sm:$0xff]  }
  0x10   :  { %1557 = vmatpush1.bf16.msra.mxu0 %v2697_v15  ;;  %1332 = vmatprep.subr.bf16.mxu1 %v2698_v16  ;;  %v2739_v43 = vld [vmem:[%s4172_s1 + $0x2a0] ss:$8 sps:$4 sm:$0xff]   ;;  %v2742_v45 = vld [vmem:[%s4172_s1 + $0x2b4] ss:$8 sps:$4 sm:$0xff]   ;;  %v2745_v47 = vld [vmem:[%s4172_s1 + $0x2b0] ss:$8 sps:$4 sm:$0xff]  }
  0x11   :  { %1558 = vmatprep.subr.bf16.mxu0 %v2700_v17  ;;  %v2746_v48 = vld [vmem:[%s4172_s1 + $0xc4] ss:$8 sps:$4 sm:$0xff]   ;;  %v2775_v51 = vld [vmem:[%s4173_s0 + $0x14] ss:$36 sps:$4 sm:$0xff]   ;;  %v2750_v52 = vld [vmem:[%s4172_s1 + $0xc0] ss:$8 sps:$4 sm:$0xff]  }
  0x12   :  { %v2772_v49 = vld [vmem:[%s4173_s0 + $0x4] ss:$36 sps:$4 sm:$0xff]   ;;  %1582 = vmatprep.mubr.bf16.mxu0 %v2775_v51  ;;  %v2752_v54 = vld [vmem:[%s4172_s1 + $0xd4] ss:$8 sps:$4 sm:$0xff]   ;;  %v2756_v56 = vld [vmem:[%s4172_s1 + $0xd0] ss:$8 sps:$4 sm:$0xff]  }
  0x13   :  { %1333 = vmatpush1.bf16.msra.mxu1 %v2702_v18  ;;  %v2748_v50 = vld [vmem:[%s4172_s1 + $0x2c4] ss:$8 sps:$4 sm:$0xff]   ;;  %1356 = vmatprep.mubr.bf16.mxu1 %v2772_v49  ;;  %v2751_v53 = vld [vmem:[%s4172_s1 + $0x2c0] ss:$8 sps:$4 sm:$0xff]   ;;  %v2754_v55 = vld [vmem:[%s4172_s1 + $0x2d4] ss:$8 sps:$4 sm:$0xff]  }
  0x14   :  { %1559 = vmatpush1.bf16.msra.mxu0 %v2703_v19  ;;  %1334 = vmatprep.subr.bf16.mxu1 %v2704_v20  ;;  %v2757_v57 = vld [vmem:[%s4172_s1 + $0x2d0] ss:$8 sps:$4 sm:$0xff]   ;;  %v2758_v58 = vld [vmem:[%s4172_s1 + $0xe4] ss:$8 sps:$4 sm:$0xff]   ;;  %v2762_v60 = vld [vmem:[%s4172_s1 + $0xe0] ss:$8 sps:$4 sm:$0xff]  }
  0x15   :  { %1560 = vmatprep.subr.bf16.mxu0 %v2706_v21  ;;  %v2760_v59 = vld [vmem:[%s4172_s1 + $0x2e4] ss:$8 sps:$4 sm:$0xff]   ;;  %v2763_v61 = vld [vmem:[%s4172_s1 + $0x2e0] ss:$8 sps:$4 sm:$0xff]   ;;  %v2764_v62 = vld [vmem:[%s4172_s1 + $0xf4] ss:$8 sps:$4 sm:$0xff]  }
  0x16   :  { %v2766_v63 = vld [vmem:[%s4172_s1 + $0x2f4] ss:$8 sps:$4 sm:$0xff]   ;;  %v2768_v0 = vld [vmem:[%s4172_s1 + $0xf0] ss:$8 sps:$4 sm:$0xff]   ;;  %v2778_v2 = vld [vmem:[%s4172_s1 + $0x104] ss:$8 sps:$4 sm:$0xff]  }
  0x17   :  { %1335 = vmatpush1.bf16.msra.mxu1 %v2708_v22  ;;  %v2769_v1 = vld [vmem:[%s4172_s1 + $0x2f0] ss:$8 sps:$4 sm:$0xff]   ;;  %v3217_v3 = vld [vmem:[%s4172_s1 + $0x304] ss:$8 sps:$4 sm:$0xff]   ;;  %v2776_v6 = vld [vmem:[%s4172_s1 + $0x100] ss:$8 sps:$4 sm:$0xff]  }
  0x18   :  { %1561 = vmatpush1.bf16.msra.mxu0 %v2709_v23  ;;  %1336 = vmatprep.subr.bf16.mxu1 %v2710_v24  ;;  %v2770_v4 = vld [vmem:[%s4173_s0] ss:$36 sps:$4 sm:$0xff]   ;;  %v2773_v5 = vld [vmem:[%s4173_s0 + $0x10] ss:$36 sps:$4 sm:$0xff]   ;;  %v2792_v16 = vld [vmem:[%s4173_s0 + $0x48] ss:$36 sps:$4 sm:$0xff]  }
  0x19   :  { %1562 = vmatprep.subr.bf16.mxu0 %v2712_v25  ;;  %v3231_v7 = vld [vmem:[%s4172_s1 + $0x300] ss:$8 sps:$4 sm:$0xff]   ;;  %v2784_v8 = vld [vmem:[%s4172_s1 + $0x114] ss:$8 sps:$4 sm:$0xff]   ;;  %v2788_v10 = vld [vmem:[%s4173_s0 + $0x4c] ss:$36 sps:$4 sm:$0xff]  }
  0x1a   :  { %v3240_v9 = vld [vmem:[%s4172_s1 + $0x314] ss:$8 sps:$4 sm:$0xff]   ;;  %v2782_v12 = vld [vmem:[%s4172_s1 + $0x110] ss:$8 sps:$4 sm:$0xff]   ;;  %v2795_v14 = vld [vmem:[%s4172_s1 + $0x124] ss:$8 sps:$4 sm:$0xff]  }
  0x1b   :  { %1337 = vmatpush1.bf16.msra.mxu1 %v2714_v26  ;;  %v2790_v11 = vld [vmem:[%s4173_s0 + $0x5c] ss:$36 sps:$4 sm:$0xff]   ;;  %v3255_v13 = vld [vmem:[%s4172_s1 + $0x310] ss:$8 sps:$4 sm:$0xff]   ;;  %v3264_v15 = vld [vmem:[%s4172_s1 + $0x324] ss:$8 sps:$4 sm:$0xff]  }
  0x1c   :  { %1563 = vmatpush1.bf16.msra.mxu0 %v2715_v27  ;;  %1338 = vmatprep.subr.bf16.mxu1 %v2716_v28  ;;  %v2793_v17 = vld [vmem:[%s4172_s1 + $0x120] ss:$8 sps:$4 sm:$0xff]   ;;  %v2796_v18 = vld [vmem:[%s4173_s0 + $0x58] ss:$36 sps:$4 sm:$0xff]   ;;  %v2813_v26 = vld [vmem:[%s4172_s1 + $0x144] ss:$8 sps:$4 sm:$0xff]  }
  0x1d   :  { %1564 = vmatprep.subr.bf16.mxu0 %v2718_v29  ;;  %v3278_v19 = vld [vmem:[%s4172_s1 + $0x320] ss:$8 sps:$4 sm:$0xff]   ;;  %v2802_v20 = vld [vmem:[%s4172_s1 + $0x134] ss:$8 sps:$4 sm:$0xff]   ;;  %v2800_v24 = vld [vmem:[%s4172_s1 + $0x130] ss:$8 sps:$4 sm:$0xff]  }
  0x1e   :  { %v3288_v21 = vld [vmem:[%s4172_s1 + $0x334] ss:$8 sps:$4 sm:$0xff]   ;;  %v2808_v23 = vld [vmem:[%s4173_s0 + $0xa4] ss:$36 sps:$4 sm:$0xff]   ;;  %v3303_v25 = vld [vmem:[%s4172_s1 + $0x330] ss:$8 sps:$4 sm:$0xff]  }
  0x1f   :  { %1339 = vmatpush1.bf16.msra.mxu1 %v2720_v30  ;;  %v2806_v22 = vld [vmem:[%s4173_s0 + $0x94] ss:$36 sps:$4 sm:$0xff]   ;;  %v3312_v27 = vld [vmem:[%s4172_s1 + $0x344] ss:$8 sps:$4 sm:$0xff]   ;;  %v2811_v29 = vld [vmem:[%s4172_s1 + $0x140] ss:$8 sps:$4 sm:$0xff]  }
  0x20   :  { %1565 = vmatpush1.bf16.msra.mxu0 %v2721_v31  ;;  %1340 = vmatprep.subr.bf16.mxu1 %v2722_v32  ;;  %v2810_v28 = vld [vmem:[%s4173_s0 + $0x90] ss:$36 sps:$4 sm:$0xff]   ;;  %v2814_v30 = vld [vmem:[%s4173_s0 + $0xa0] ss:$36 sps:$4 sm:$0xff]  }
  0x21   :  { %1566 = vmatprep.subr.bf16.mxu0 %v2724_v33  ;;  %v3326_v31 = vld [vmem:[%s4172_s1 + $0x340] ss:$8 sps:$4 sm:$0xff]   ;;  %v2820_v32 = vld [vmem:[%s4172_s1 + $0x154] ss:$8 sps:$4 sm:$0xff]   ;;  %v3399_v49 = vld [vmem:[%s4172_s1 + $0x370] ss:$8 sps:$4 sm:$0xff]  }
  0x22   :  { %v3336_v33 = vld [vmem:[%s4172_s1 + $0x354] ss:$8 sps:$4 sm:$0xff]   ;;  %v3408_v51 = vld [vmem:[%s4172_s1 + $0x384] ss:$8 sps:$4 sm:$0xff]  }
  0x23   :  { %1341 = vmatpush1.bf16.msra.mxu1 %v2726_v34  ;;  %v2824_v34 = vld [vmem:[%s4173_s0 + $0xdc] ss:$36 sps:$4 sm:$0xff]  }
  0x24   :  { %1567 = vmatpush1.bf16.msra.mxu0 %v2727_v35  ;;  %1342 = vmatprep.subr.bf16.mxu1 %v2728_v36  ;;  %v2826_v35 = vld [vmem:[%s4173_s0 + $0xec] ss:$36 sps:$4 sm:$0xff]  }
  0x25   :  { %1568 = vmatprep.subr.bf16.mxu0 %v2730_v37  ;;  %v2818_v36 = vld [vmem:[%s4172_s1 + $0x150] ss:$8 sps:$4 sm:$0xff]  }
  0x26   :  { %v3351_v37 = vld [vmem:[%s4172_s1 + $0x350] ss:$8 sps:$4 sm:$0xff]  }
  0x27   :  { %1343 = vmatpush1.bf16.msra.mxu1 %v2732_v38  ;;  %v2831_v38 = vld [vmem:[%s4172_s1 + $0x164] ss:$8 sps:$4 sm:$0xff]  }
  0x28   :  { %1569 = vmatpush1.bf16.msra.mxu0 %v2733_v39  ;;  %1344 = vmatprep.subr.bf16.mxu1 %v2734_v40  ;;  %v3360_v39 = vld [vmem:[%s4172_s1 + $0x364] ss:$8 sps:$4 sm:$0xff]   ;;  %v2828_v40 = vld [vmem:[%s4173_s0 + $0xd8] ss:$36 sps:$4 sm:$0xff]  }
  0x29   :  { %1570 = vmatprep.subr.bf16.mxu0 %v2736_v41  ;;  %v2829_v41 = vld [vmem:[%s4172_s1 + $0x160] ss:$8 sps:$4 sm:$0xff]  }
  0x2b   :  { %1345 = vmatpush1.bf16.msra.mxu1 %v2738_v42  ;;  %v2832_v42 = vld [vmem:[%s4173_s0 + $0xe8] ss:$36 sps:$4 sm:$0xff]  }
  0x2c   :  { %1571 = vmatpush1.bf16.msra.mxu0 %v2739_v43  ;;  %1346 = vmatprep.subr.bf16.mxu1 %v2740_v44  ;;  %v3374_v43 = vld [vmem:[%s4172_s1 + $0x360] ss:$8 sps:$4 sm:$0xff]   ;;  %v2838_v44 = vld [vmem:[%s4172_s1 + $0x174] ss:$8 sps:$4 sm:$0xff]  }
  0x2d   :  { %1572 = vmatprep.subr.bf16.mxu0 %v2742_v45  ;;  %v3384_v45 = vld [vmem:[%s4172_s1 + $0x374] ss:$8 sps:$4 sm:$0xff]  }
  0x2f   :  { %1347 = vmatpush1.bf16.msra.mxu1 %v2744_v46  ;;  %v2842_v46 = vld [vmem:[%s4173_s0 + $0x124] ss:$36 sps:$4 sm:$0xff]  }
  0x30   :  { %1573 = vmatpush1.bf16.msra.mxu0 %v2745_v47  ;;  %1348 = vmatprep.subr.bf16.mxu1 %v2746_v48  ;;  %v2844_v47 = vld [vmem:[%s4173_s0 + $0x134] ss:$36 sps:$4 sm:$0xff]  }
  0x31   :  { %1574 = vmatprep.subr.bf16.mxu0 %v2748_v50  ;;  %v2836_v48 = vld [vmem:[%s4172_s1 + $0x170] ss:$8 sps:$4 sm:$0xff]   ;;  %v2849_v50 = vld [vmem:[%s4172_s1 + $0x184] ss:$8 sps:$4 sm:$0xff]  }
  0x33   :  { %1349 = vmatpush1.bf16.msra.mxu1 %v2750_v52  ;;  %v2846_v52 = vld [vmem:[%s4173_s0 + $0x120] ss:$36 sps:$4 sm:$0xff]  }
  0x34   :  { %1575 = vmatpush1.bf16.msra.mxu0 %v2751_v53  ;;  %1350 = vmatprep.subr.bf16.mxu1 %v2752_v54  ;;  %v2847_v53 = vld [vmem:[%s4172_s1 + $0x180] ss:$8 sps:$4 sm:$0xff]   ;;  %v2850_v54 = vld [vmem:[%s4173_s0 + $0x130] ss:$36 sps:$4 sm:$0xff]  }
  0x35   :  { %1576 = vmatprep.subr.bf16.mxu0 %v2754_v55  ;;  %v3422_v55 = vld [vmem:[%s4172_s1 + $0x380] ss:$8 sps:$4 sm:$0xff]  }
  0x37   :  { %1351 = vmatpush1.bf16.msra.mxu1 %v2756_v56  ;;  %v2856_v56 = vld [vmem:[%s4172_s1 + $0x194] ss:$8 sps:$4 sm:$0xff]  }
  0x38   :  { %1577 = vmatpush1.bf16.msra.mxu0 %v2757_v57  ;;  %1352 = vmatprep.subr.bf16.mxu1 %v2758_v58  ;;  %v3432_v57 = vld [vmem:[%s4172_s1 + $0x394] ss:$8 sps:$4 sm:$0xff]   ;;  %v2860_v58 = vld [vmem:[%s4173_s0 + $0x16c] ss:$36 sps:$4 sm:$0xff]  }
  0x39   :  { %1578 = vmatprep.subr.bf16.mxu0 %v2760_v59  ;;  %v2862_v59 = vld [vmem:[%s4173_s0 + $0x17c] ss:$36 sps:$4 sm:$0xff]  }
  0x3b   :  { %1353 = vmatpush1.bf16.msra.mxu1 %v2762_v60  ;;  %v2854_v60 = vld [vmem:[%s4172_s1 + $0x190] ss:$8 sps:$4 sm:$0xff]  }
  0x3c   :  { %1579 = vmatpush1.bf16.msra.mxu0 %v2763_v61  ;;  %1354 = vmatprep.subr.bf16.mxu1 %v2764_v62  ;;  %v3447_v61 = vld [vmem:[%s4172_s1 + $0x390] ss:$8 sps:$4 sm:$0xff]   ;;  %v2867_v62 = vld [vmem:[%s4172_s1 + $0x1a4] ss:$8 sps:$4 sm:$0xff]  }
  0x3d   :  { %1580 = vmatprep.subr.bf16.mxu0 %v2766_v63  ;;  %v3456_v63 = vld [vmem:[%s4172_s1 + $0x3a4] ss:$8 sps:$4 sm:$0xff]  }
  0x3f   :  { %1355 = vmatpush1.bf16.msra.mxu1 %v2768_v0  ;;  %v2864_v0 = vld [vmem:[%s4173_s0 + $0x168] ss:$36 sps:$4 sm:$0xff]  }
  0x40   :  { %1581 = vmatpush1.bf16.msra.mxu0 %v2769_v1  ;;  %1437 = vmatprep.subr.bf16.mxu1 %v2778_v2  ;;  %v2865_v1 = vld [vmem:[%s4172_s1 + $0x1a0] ss:$8 sps:$4 sm:$0xff]   ;;  %v2868_v2 = vld [vmem:[%s4173_s0 + $0x178] ss:$36 sps:$4 sm:$0xff]  }
  0x41   :  { %1663 = vmatprep.subr.bf16.mxu0 %v3217_v3 }
  0x42   :  { %1357 = vmatmul.mubr.bf16.vlgmr.msra.gmra.mrb[0].mxu1 %v2770_v4  ;;  %v3470_v4 = vld [vmem:[%s4172_s1 + $0x3a0] ss:$8 sps:$4 sm:$0xff]  }
  0x43   :  { %1583 = vmatmul.mubr.bf16.vlgmr.msra.gmra.mrb[0].mxu0 %v2773_v5  ;;  %1438 = vmatpush1.bf16.msra.mxu1 %v2776_v6  ;;  %v2874_v5 = vld [vmem:[%s4172_s1 + $0x1b4] ss:$8 sps:$4 sm:$0xff]  }
  0x44   :  { %1664 = vmatpush1.bf16.msra.mxu0 %v3231_v7  ;;  %1439 = vmatprep.subr.bf16.mxu1 %v2784_v8  ;;  %v3480_v6 = vld [vmem:[%s4172_s1 + $0x3b4] ss:$8 sps:$4 sm:$0xff]  }
  0x45   :  { %1665 = vmatprep.subr.bf16.mxu0 %v3240_v9  ;;  %1366 = vmatprep.mubr.bf16.mxu1 %v2788_v10  ;;  %v2878_v8 = vld [vmem:[%s4173_s0 + $0x1b4] ss:$36 sps:$4 sm:$0xff]   ;;  %v2880_v10 = vld [vmem:[%s4173_s0 + $0x1c4] ss:$36 sps:$4 sm:$0xff]  }
  0x46   :  { %1592 = vmatprep.mubr.bf16.mxu0 %v2790_v11  ;;  %v2872_v11 = vld [vmem:[%s4172_s1 + $0x1b0] ss:$8 sps:$4 sm:$0xff]  }
  0x47   :  { %1440 = vmatpush1.bf16.msra.mxu1 %v2782_v12  ;;  %v3494_v12 = vld [vmem:[%s4172_s1 + $0x3b0] ss:$8 sps:$4 sm:$0xff]  }
  0x48   :  { %1666 = vmatpush1.bf16.msra.mxu0 %v3255_v13  ;;  %1441 = vmatprep.subr.bf16.mxu1 %v2795_v14  ;;  %v2885_v14 = vld [vmem:[%s4172_s1 + $0x1c4] ss:$8 sps:$4 sm:$0xff]  }
  0x49   :  { %1667 = vmatprep.subr.bf16.mxu0 %v3264_v15 }
  0x4a   :  { %1367 = vmatmul.mubr.bf16.gmra.mrb[4].mxu1 %v2792_v16  ;;  %v3504_v16 = vld [vmem:[%s4172_s1 + $0x3c4] ss:$8 sps:$4 sm:$0xff]  }
  0x4b   :  { %1593 = vmatmul.mubr.bf16.gmra.mrb[4].mxu0 %v2796_v18  ;;  %1442 = vmatpush1.bf16.msra.mxu1 %v2793_v17  ;;  %v2882_v17 = vld [vmem:[%s4173_s0 + $0x1b0] ss:$36 sps:$4 sm:$0xff]   ;;  %v2883_v18 = vld [vmem:[%s4172_s1 + $0x1c0] ss:$8 sps:$4 sm:$0xff]  }
  0x4c   :  { %1668 = vmatpush1.bf16.msra.mxu0 %v3278_v19  ;;  %1443 = vmatprep.subr.bf16.mxu1 %v2802_v20  ;;  %v2886_v20 = vld [vmem:[%s4173_s0 + $0x1c0] ss:$36 sps:$4 sm:$0xff]  }
  0x4d   :  { %1669 = vmatprep.subr.bf16.mxu0 %v3288_v21  ;;  %1376 = vmatprep.mubr.bf16.mxu1 %v2806_v22  ;;  %v3518_v22 = vld [vmem:[%s4172_s1 + $0x3c0] ss:$8 sps:$4 sm:$0xff]  }
  0x4e   :  { %1602 = vmatprep.mubr.bf16.mxu0 %v2808_v23  ;;  %v2892_v23 = vld [vmem:[%s4172_s1 + $0x1d4] ss:$8 sps:$4 sm:$0xff]  }
  0x4f   :  { %1444 = vmatpush1.bf16.msra.mxu1 %v2800_v24  ;;  %v3528_v24 = vld [vmem:[%s4172_s1 + $0x3d4] ss:$8 sps:$4 sm:$0xff]  }
  0x50   :  { %1670 = vmatpush1.bf16.msra.mxu0 %v3303_v25  ;;  %1445 = vmatprep.subr.bf16.mxu1 %v2813_v26  ;;  %v2896_v26 = vld [vmem:[%s4173_s0 + $0x1fc] ss:$36 sps:$4 sm:$0xff]  }
  0x51   :  { %1671 = vmatprep.subr.bf16.mxu0 %v3312_v27 }
  0x52   :  { %1377 = vmatmul.mubr.bf16.gmra.mrb[8].mxu1 %v2810_v28  ;;  %v2898_v28 = vld [vmem:[%s4173_s0 + $0x20c] ss:$36 sps:$4 sm:$0xff]  }
  0x53   :  { %1603 = vmatmul.mubr.bf16.gmra.mrb[8].mxu0 %v2814_v30  ;;  %1446 = vmatpush1.bf16.msra.mxu1 %v2811_v29  ;;  %v2890_v29 = vld [vmem:[%s4172_s1 + $0x1d0] ss:$8 sps:$4 sm:$0xff]  }
  0x54   :  { %1672 = vmatpush1.bf16.msra.mxu0 %v3326_v31  ;;  %1447 = vmatprep.subr.bf16.mxu1 %v2820_v32  ;;  %v3542_v30 = vld [vmem:[%s4172_s1 + $0x3d0] ss:$8 sps:$4 sm:$0xff]   ;;  %v2903_v32 = vld [vmem:[%s4172_s1 + $0x1e4] ss:$8 sps:$4 sm:$0xff]  }
  0x55   :  { %1673 = vmatprep.subr.bf16.mxu0 %v3336_v33  ;;  %1386 = vmatprep.mubr.bf16.mxu1 %v2824_v34  ;;  %v3552_v34 = vld [vmem:[%s4172_s1 + $0x3e4] ss:$8 sps:$4 sm:$0xff]  }
  0x56   :  { %1612 = vmatprep.mubr.bf16.mxu0 %v2826_v35  ;;  %v2900_v35 = vld [vmem:[%s4173_s0 + $0x1f8] ss:$36 sps:$4 sm:$0xff]  }
  0x57   :  { %1448 = vmatpush1.bf16.msra.mxu1 %v2818_v36  ;;  %v2901_v36 = vld [vmem:[%s4172_s1 + $0x1e0] ss:$8 sps:$4 sm:$0xff]  }
  0x58   :  { %1674 = vmatpush1.bf16.msra.mxu0 %v3351_v37  ;;  %1449 = vmatprep.subr.bf16.mxu1 %v2831_v38  ;;  %v2904_v38 = vld [vmem:[%s4173_s0 + $0x208] ss:$36 sps:$4 sm:$0xff]  }
  0x59   :  { %1675 = vmatprep.subr.bf16.mxu0 %v3360_v39 }
  0x5a   :  { %1387 = vmatmul.mubr.bf16.gmra.mrb[12].mxu1 %v2828_v40  ;;  %v3566_v40 = vld [vmem:[%s4172_s1 + $0x3e0] ss:$8 sps:$4 sm:$0xff]  }
  0x5b   :  { %1613 = vmatmul.mubr.bf16.gmra.mrb[12].mxu0 %v2832_v42  ;;  %1450 = vmatpush1.bf16.msra.mxu1 %v2829_v41  ;;  %v2910_v41 = vld [vmem:[%s4172_s1 + $0x1f4] ss:$8 sps:$4 sm:$0xff]  }
  0x5c   :  { %1676 = vmatpush1.bf16.msra.mxu0 %v3374_v43  ;;  %1451 = vmatprep.subr.bf16.mxu1 %v2838_v44  ;;  %v3576_v42 = vld [vmem:[%s4172_s1 + $0x3f4] ss:$8 sps:$4 sm:$0xff]   ;;  %v2916_v44 = vld [vmem:[%s4173_s0 + $0xc] ss:$36 sps:$4 sm:$0xff]  }
  0x5d   :  { %1677 = vmatprep.subr.bf16.mxu0 %v3384_v45  ;;  %1396 = vmatprep.mubr.bf16.mxu1 %v2842_v46  ;;  %v2919_v46 = vld [vmem:[%s4173_s0 + $0x1c] ss:$36 sps:$4 sm:$0xff]  }
  0x5e   :  { %1622 = vmatprep.mubr.bf16.mxu0 %v2844_v47  ;;  %v2908_v47 = vld [vmem:[%s4172_s1 + $0x1f0] ss:$8 sps:$4 sm:$0xff]  }
  0x5f   :  { %1452 = vmatpush1.bf16.msra.mxu1 %v2836_v48  ;;  %v3591_v48 = vld [vmem:[%s4172_s1 + $0x3f0] ss:$8 sps:$4 sm:$0xff]  }
  0x60   :  { %1678 = vmatpush1.bf16.msra.mxu0 %v3399_v49  ;;  %1453 = vmatprep.subr.bf16.mxu1 %v2849_v50  ;;  %v2922_v50 = vld [vmem:[%s4172_s1 + $0x404] ss:$8 sps:$4 sm:$0xff]  }
  0x61   :  { %1679 = vmatprep.subr.bf16.mxu0 %v3408_v51 }
  0x62   :  { %1397 = vmatmul.mubr.bf16.gmra.mrb[16].mxu1 %v2846_v52  ;;  %v2914_v52 = vld [vmem:[%s4173_s0 + $0x8] ss:$36 sps:$4 sm:$0xff]  }
  0x63   :  { %1623 = vmatmul.mubr.bf16.gmra.mrb[16].mxu0 %v2850_v54  ;;  %1454 = vmatpush1.bf16.msra.mxu1 %v2847_v53  ;;  %v2917_v53 = vld [vmem:[%s4173_s0 + $0x18] ss:$36 sps:$4 sm:$0xff]   ;;  %v2920_v54 = vld [vmem:[%s4172_s1 + $0x400] ss:$8 sps:$4 sm:$0xff]  }
  0x64   :  { %1680 = vmatpush1.bf16.msra.mxu0 %v3422_v55  ;;  %1455 = vmatprep.subr.bf16.mxu1 %v2856_v56  ;;  %v2925_v56 = vld [vmem:[%s4172_s1 + $0x414] ss:$8 sps:$4 sm:$0xff]  }
  0x65   :  { %1681 = vmatprep.subr.bf16.mxu0 %v3432_v57  ;;  %1406 = vmatprep.mubr.bf16.mxu1 %v2860_v58  ;;  %v2926_v58 = vld [vmem:[%s4173_s0 + $0x54] ss:$36 sps:$4 sm:$0xff]  }
  0x66   :  { %1632 = vmatprep.mubr.bf16.mxu0 %v2862_v59  ;;  %v2928_v59 = vld [vmem:[%s4173_s0 + $0x64] ss:$36 sps:$4 sm:$0xff]  }
  0x67   :  { %1456 = vmatpush1.bf16.msra.mxu1 %v2854_v60  ;;  %v2923_v60 = vld [vmem:[%s4172_s1 + $0x410] ss:$8 sps:$4 sm:$0xff]  }
  0x68   :  { %1682 = vmatpush1.bf16.msra.mxu0 %v3447_v61  ;;  %1457 = vmatprep.subr.bf16.mxu1 %v2867_v62  ;;  %v2930_v62 = vld [vmem:[%s4173_s0 + $0x50] ss:$36 sps:$4 sm:$0xff]  }
  0x69   :  { %1683 = vmatprep.subr.bf16.mxu0 %v3456_v63 }
  0x6a   :  { %1407 = vmatmul.mubr.bf16.gmra.mrb[20].mxu1 %v2864_v0  ;;  %v2937_v0 = vld [vmem:[%s4172_s1 + $0x434] ss:$8 sps:$4 sm:$0xff]  }
  0x6b   :  { %1633 = vmatmul.mubr.bf16.gmra.mrb[20].mxu0 %v2868_v2  ;;  %1458 = vmatpush1.bf16.msra.mxu1 %v2865_v1  ;;  %v2938_v1 = vld [vmem:[%s4173_s0 + $0x9c] ss:$36 sps:$4 sm:$0xff]   ;;  %v2946_v2 = vld [vmem:[%s4172_s1 + $0x444] ss:$8 sps:$4 sm:$0xff]  }
  0x6c   :  { %1684 = vmatpush1.bf16.msra.mxu0 %v3470_v4  ;;  %1459 = vmatprep.subr.bf16.mxu1 %v2874_v5  ;;  %v2942_v5 = vld [vmem:[%s4173_s0 + $0x98] ss:$36 sps:$4 sm:$0xff]  }
  0x6d   :  { %1685 = vmatprep.subr.bf16.mxu0 %v3480_v6  ;;  %1416 = vmatprep.mubr.bf16.mxu1 %v2878_v8  ;;  %v2949_v8 = vld [vmem:[%s4172_s1 + $0x454] ss:$8 sps:$4 sm:$0xff]  }
  0x6e   :  { %1642 = vmatprep.mubr.bf16.mxu0 %v2880_v10  ;;  %v2950_v10 = vld [vmem:[%s4173_s0 + $0xe4] ss:$36 sps:$4 sm:$0xff]  }
  0x6f   :  { %1460 = vmatpush1.bf16.msra.mxu1 %v2872_v11  ;;  %v2958_v11 = vld [vmem:[%s4172_s1 + $0x464] ss:$8 sps:$4 sm:$0xff]  }
  0x70   :  { %1686 = vmatpush1.bf16.msra.mxu0 %v3494_v12  ;;  %1461 = vmatprep.subr.bf16.mxu1 %v2885_v14  ;;  %v2954_v14 = vld [vmem:[%s4173_s0 + $0xe0] ss:$36 sps:$4 sm:$0xff]  }
  0x71   :  { %1687 = vmatprep.subr.bf16.mxu0 %v3504_v16 }
  0x72   :  { %1417 = vmatmul.mubr.bf16.gmra.mrb[24].mxu1 %v2882_v17  ;;  %v2961_v17 = vld [vmem:[%s4172_s1 + $0x474] ss:$8 sps:$4 sm:$0xff]  }
  0x73   :  { %1643 = vmatmul.mubr.bf16.gmra.mrb[24].mxu0 %v2886_v20  ;;  %1462 = vmatpush1.bf16.msra.mxu1 %v2883_v18  ;;  %v2962_v18 = vld [vmem:[%s4173_s0 + $0x12c] ss:$36 sps:$4 sm:$0xff]  }
  0x74   :  { %1688 = vmatpush1.bf16.msra.mxu0 %v3518_v22  ;;  %1463 = vmatprep.subr.bf16.mxu1 %v2892_v23  ;;  %v2964_v20 = vld [vmem:[%s4173_s0 + $0x128] ss:$36 sps:$4 sm:$0xff]  }
  0x75   :  { %1689 = vmatprep.subr.bf16.mxu0 %v3528_v24  ;;  %1426 = vmatprep.mubr.bf16.mxu1 %v2896_v26  ;;  %v2969_v23 = vld [vmem:[%s4173_s0 + $0x68] ss:$36 sps:$4 sm:$0xff]  }
  0x76   :  { %1652 = vmatprep.mubr.bf16.mxu0 %v2898_v28  ;;  %v2985_v26 = vld [vmem:[%s4173_s0 + $0x188] ss:$36 sps:$4 sm:$0xff]  }
  0x77   :  { %1464 = vmatpush1.bf16.msra.mxu1 %v2890_v29  ;;  %v2986_v28 = vld [vmem:[%s4173_s0 + $0x1cc] ss:$36 sps:$4 sm:$0xff]  }
  0x78   :  { %1690 = vmatpush1.bf16.msra.mxu0 %v3542_v30  ;;  %1465 = vmatprep.subr.bf16.mxu1 %v2903_v32  ;;  %v2988_v29 = vld [vmem:[%s4173_s0 + $0x1c8] ss:$36 sps:$4 sm:$0xff]   ;;  %v2990_v32 = vld [vmem:[%s4173_s0 + $0x214] ss:$36 sps:$4 sm:$0xff]  }
  0x79   :  { %1691 = vmatprep.subr.bf16.mxu0 %v3552_v34 }
  0x7a   :  { %1427 = vmatmul.mubr.bf16.gmra.mrb[28].mxu1 %v2900_v35  ;;  %v2993_v35 = vld [vmem:[%s4173_s0 + $0x218] ss:$36 sps:$4 sm:$0xff]  }
  0x7b   :  { %1653 = vmatmul.mubr.bf16.gmra.mrb[28].mxu0 %v2904_v38  ;;  %1466 = vmatpush1.bf16.msra.mxu1 %v2901_v36 }
  0x7c   :  { %1692 = vmatpush1.bf16.msra.mxu0 %v3566_v40  ;;  %1467 = vmatprep.subr.bf16.mxu1 %v2910_v41 }
  0x7d   :  { %1693 = vmatprep.subr.bf16.mxu0 %v3576_v42  ;;  %1469 = vmatprep.mubr.bf16.mxu1 %v2916_v44 }
  0x7e   :  { %1695 = vmatprep.mubr.bf16.mxu0 %v2919_v46 }
  0x7f   :  { %1468 = vmatpush1.bf16.msra.mxu1 %v2908_v47 }
  0x80   :  { %1694 = vmatpush1.bf16.msra.mxu0 %v3591_v48  ;;  %2512 = vmatprep.subr.bf16.mxu1 %v3217_v3  ;;  %v2934_v3 = vld [vmem:[%s4172_s1 + $0x424] ss:$8 sps:$4 sm:$0xff]  }
  0x81   :  { %1776 = vmatprep.subr.bf16.mxu0 %v2922_v50 }
  0x82   :  { %1470 = vmatmul.mubr.bf16.vlgmr.msra.gmra.mrb[0].mxu1 %v2914_v52 }
  0x83   :  { %1696 = vmatmul.mubr.bf16.vlgmr.msra.gmra.mrb[0].mxu0 %v2917_v53  ;;  %2528 = vmatpush1.bf16.msra.mxu1 %v3231_v7  ;;  %v2931_v7 = vld [vmem:[%s4173_s0 + $0x60] ss:$36 sps:$4 sm:$0xff]  }
  0x84   :  { %1777 = vmatpush1.bf16.msra.mxu0 %v2920_v54  ;;  %2513 = vmatprep.subr.bf16.mxu1 %v3240_v9  ;;  %v2932_v9 = vld [vmem:[%s4172_s1 + $0x420] ss:$8 sps:$4 sm:$0xff]  }
  0x85   :  { %1778 = vmatprep.subr.bf16.mxu0 %v2925_v56  ;;  %1479 = vmatprep.mubr.bf16.mxu1 %v2926_v58 }
  0x86   :  { %1705 = vmatprep.mubr.bf16.mxu0 %v2928_v59 }
  0x87   :  { %2529 = vmatpush1.bf16.msra.mxu1 %v3255_v13  ;;  %v2940_v13 = vld [vmem:[%s4173_s0 + $0xac] ss:$36 sps:$4 sm:$0xff]  }
  0x88   :  { %1779 = vmatpush1.bf16.msra.mxu0 %v2923_v60  ;;  %2514 = vmatprep.subr.bf16.mxu1 %v3264_v15  ;;  %v2935_v15 = vld [vmem:[%s4172_s1 + $0x430] ss:$8 sps:$4 sm:$0xff]  }
  0x89   :  { %1780 = vmatprep.subr.bf16.mxu0 %v2934_v3 }
  0x8a   :  { %1480 = vmatmul.mubr.bf16.gmra.mrb[4].mxu1 %v2930_v62 }
  0x8b   :  { %1706 = vmatmul.mubr.bf16.gmra.mrb[4].mxu0 %v2931_v7  ;;  %2530 = vmatpush1.bf16.msra.mxu1 %v3278_v19  ;;  %v2943_v19 = vld [vmem:[%s4173_s0 + $0xa8] ss:$36 sps:$4 sm:$0xff]  }
  0x8c   :  { %1781 = vmatpush1.bf16.msra.mxu0 %v2932_v9  ;;  %2515 = vmatprep.subr.bf16.mxu1 %v3288_v21  ;;  %v2944_v21 = vld [vmem:[%s4172_s1 + $0x440] ss:$8 sps:$4 sm:$0xff]  }
  0x8d   :  { %1782 = vmatprep.subr.bf16.mxu0 %v2937_v0  ;;  %1489 = vmatprep.mubr.bf16.mxu1 %v2938_v1 }
  0x8e   :  { %1715 = vmatprep.mubr.bf16.mxu0 %v2940_v13 }
  0x8f   :  { %2531 = vmatpush1.bf16.msra.mxu1 %v3303_v25  ;;  %v2952_v25 = vld [vmem:[%s4173_s0 + $0xf4] ss:$36 sps:$4 sm:$0xff]  }
  0x90   :  { %1783 = vmatpush1.bf16.msra.mxu0 %v2935_v15  ;;  %2516 = vmatprep.subr.bf16.mxu1 %v3312_v27  ;;  %v2947_v27 = vld [vmem:[%s4172_s1 + $0x450] ss:$8 sps:$4 sm:$0xff]  }
  0x91   :  { %1784 = vmatprep.subr.bf16.mxu0 %v2946_v2 }
  0x92   :  { %1490 = vmatmul.mubr.bf16.gmra.mrb[8].mxu1 %v2942_v5 }
  0x93   :  { %1716 = vmatmul.mubr.bf16.gmra.mrb[8].mxu0 %v2943_v19  ;;  %2532 = vmatpush1.bf16.msra.mxu1 %v3326_v31  ;;  %v2955_v31 = vld [vmem:[%s4173_s0 + $0xf0] ss:$36 sps:$4 sm:$0xff]  }
  0x94   :  { %1785 = vmatpush1.bf16.msra.mxu0 %v2944_v21  ;;  %2517 = vmatprep.subr.bf16.mxu1 %v3336_v33  ;;  %v2956_v33 = vld [vmem:[%s4172_s1 + $0x460] ss:$8 sps:$4 sm:$0xff]  }
  0x95   :  { %1786 = vmatprep.subr.bf16.mxu0 %v2949_v8  ;;  %1499 = vmatprep.mubr.bf16.mxu1 %v2950_v10 }
  0x96   :  { %1725 = vmatprep.mubr.bf16.mxu0 %v2952_v25 }
  0x97   :  { %2533 = vmatpush1.bf16.msra.mxu1 %v3351_v37  ;;  %v2959_v37 = vld [vmem:[%s4172_s1 + $0x470] ss:$8 sps:$4 sm:$0xff]  }
  0x98   :  { %1787 = vmatpush1.bf16.msra.mxu0 %v2947_v27  ;;  %2518 = vmatprep.subr.bf16.mxu1 %v3360_v39  ;;  %v2996_v39 = vmov 0  }
  0x99   :  { %1788 = vmatprep.subr.bf16.mxu0 %v2958_v11 }
  0x9a   :  { %1500 = vmatmul.mubr.bf16.gmra.mrb[12].mxu1 %v2954_v14 }
  0x9b   :  { %1726 = vmatmul.mubr.bf16.gmra.mrb[12].mxu0 %v2955_v31  ;;  %2534 = vmatpush1.bf16.msra.mxu1 %v3374_v43  ;;  %v2965_v43 = vld [vmem:[%s4173_s0 + $0x20] ss:$36 sps:$4 sm:$0xff]  }
  0x9c   :  { %1789 = vmatpush1.bf16.msra.mxu0 %v2956_v33  ;;  %2519 = vmatprep.subr.bf16.mxu1 %v3384_v45  ;;  %v2966_v45 = vld [vmem:[%s4173_s0 + $0x174] ss:$36 sps:$4 sm:$0xff]  }
  0x9d   :  { %1790 = vmatprep.subr.bf16.mxu0 %v2961_v17  ;;  %1509 = vmatprep.mubr.bf16.mxu1 %v2962_v18 }
  0x9e   :  { %1808 = vmatprep.mubr.bf16.mxu0 %v2996_v39 }
  0x9f   :  { %2535 = vmatpush1.bf16.msra.mxu1 %v3399_v49  ;;  %v2968_v49 = vld [vmem:[%s4173_s0 + $0x170] ss:$36 sps:$4 sm:$0xff]  }
  0xa0   :  { %1791 = vmatpush1.bf16.msra.mxu0 %v2959_v37  ;;  %2520 = vmatprep.subr.bf16.mxu1 %v3408_v51  ;;  %v2970_v51 = vld [vmem:[%s4173_s0 + $0x1bc] ss:$36 sps:$4 sm:$0xff]  }
  0xa2   :  { %1510 = vmatmul.mubr.bf16.gmra.mrb[16].mxu1 %v2964_v20 }
  0xa3   :  { %1809 = vmatmul.mubr.bf16.vlgmr.msra.gmra.mrb[0].mxu0 %v2965_v43  ;;  %2536 = vmatpush1.bf16.msra.mxu1 %v3422_v55  ;;  %v2972_v55 = vld [vmem:[%s4173_s0 + $0x1b8] ss:$36 sps:$4 sm:$0xff]  }
  0xa4   :  { %1519 = vmatprep.mubr.bf16.mxu1 %v2966_v45  ;;  %2521 = vmatprep.subr.bf16.mxu1 %v3432_v57  ;;  %v2973_v57 = vld [vmem:[%s4173_s0 + $0xb0] ss:$36 sps:$4 sm:$0xff]  }
  0xa5   :  { %1818 = vmatprep.mubr.bf16.mxu0 %v2996_v39 }
  0xa7   :  { %2537 = vmatpush1.bf16.msra.mxu1 %v3447_v61  ;;  %v2974_v61 = vld [vmem:[%s4173_s0 + $0x204] ss:$36 sps:$4 sm:$0xff]  }
  0xa8   :  { %2522 = vmatprep.subr.bf16.mxu1 %v3456_v63  ;;  %v2976_v63 = vld [vmem:[%s4173_s0 + $0x200] ss:$36 sps:$4 sm:$0xff]  }
  0xaa   :  { %1520 = vmatmul.mubr.bf16.gmra.mrb[20].mxu1 %v2968_v49 }
  0xab   :  { %1819 = vmatmul.mubr.bf16.gmra.mrb[4].mxu0 %v2969_v23  ;;  %2538 = vmatpush1.bf16.msra.mxu1 %v3470_v4  ;;  %v2977_v4 = vld [vmem:[%s4173_s0 + $0xf8] ss:$36 sps:$4 sm:$0xff]  }
  0xac   :  { %1529 = vmatprep.mubr.bf16.mxu1 %v2970_v51  ;;  %2523 = vmatprep.subr.bf16.mxu1 %v3480_v6  ;;  %v2980_v6 = vld [vmem:[%s4173_s0 + $0x13c] ss:$36 sps:$4 sm:$0xff]  }
  0xad   :  { %1828 = vmatprep.mubr.bf16.mxu0 %v2996_v39 }
  0xaf   :  { %2539 = vmatpush1.bf16.msra.mxu1 %v3494_v12  ;;  %v2978_v12 = vld [vmem:[%s4173_s0 + $0x138] ss:$36 sps:$4 sm:$0xff]  }
  0xb0   :  { %2524 = vmatprep.subr.bf16.mxu1 %v3504_v16  ;;  %v2981_v16 = vld [vmem:[%s4173_s0 + $0x140] ss:$36 sps:$4 sm:$0xff]  }
  0xb2   :  { %1530 = vmatmul.mubr.bf16.gmra.mrb[24].mxu1 %v2972_v55 }
  0xb3   :  { %1829 = vmatmul.mubr.bf16.gmra.mrb[8].mxu0 %v2973_v57  ;;  %2540 = vmatpush1.bf16.msra.mxu1 %v3518_v22  ;;  %v2982_v22 = vld [vmem:[%s4173_s0 + $0x184] ss:$36 sps:$4 sm:$0xff]  }
  0xb4   :  { %1539 = vmatprep.mubr.bf16.mxu1 %v2974_v61  ;;  %2525 = vmatprep.subr.bf16.mxu1 %v3528_v24  ;;  %v2984_v24 = vld [vmem:[%s4173_s0 + $0x180] ss:$36 sps:$4 sm:$0xff]  }
  0xb5   :  { %1838 = vmatprep.mubr.bf16.mxu0 %v2996_v39 }
  0xb7   :  { %2541 = vmatpush1.bf16.msra.mxu1 %v3542_v30  ;;  %v2989_v30 = vld [vmem:[%s4173_s0 + $0x1d0] ss:$36 sps:$4 sm:$0xff]  }
  0xb8   :  { %2526 = vmatprep.subr.bf16.mxu1 %v3552_v34  ;;  %v2992_v34 = vld [vmem:[%s4173_s0 + $0x210] ss:$36 sps:$4 sm:$0xff]   ;;  %s2997_s0 = smov 64  }
  0xba   :  { %1540 = vmatmul.mubr.bf16.gmra.mrb[28].mxu1 %v2976_v63 }
  0xbb   :  { %1839 = vmatmul.mubr.bf16.gmra.mrb[12].mxu0 %v2977_v4  ;;  %2542 = vmatpush1.bf16.msra.mxu1 %v3566_v40 }
  0xbc   :  { %1735 = vmatprep.mubr.bf16.mxu1 %v2980_v6  ;;  %2527 = vmatprep.subr.bf16.mxu1 %v3576_v42 }
  0xbd   :  { %1848 = vmatprep.mubr.bf16.mxu0 %v2996_v39 }
  0xbf   :  { %2543 = vmatpush1.bf16.msra.mxu1 %v3591_v48 }
  0xc2   :  { %1736 = vmatmul.mubr.bf16.vlgmr.msra.gmra.mrb[32].mxu1 %v2978_v12 }
  0xc3   :  { %1849 = vmatmul.mubr.bf16.gmra.mrb[32].mxu0 %v2981_v16  ;;  %1745 = vmatprep.mubr.bf16.mxu1 %v2982_v22 }
  0xc4   :  { %1858 = vmatprep.mubr.bf16.mxu0 %v2996_v39 }
  0xca   :  { %1746 = vmatmul.mubr.bf16.gmra.mrb[36].mxu1 %v2984_v24 }
  0xcb   :  { %1859 = vmatmul.mubr.bf16.gmra.mrb[36].mxu0 %v2985_v26  ;;  %1755 = vmatprep.mubr.bf16.mxu1 %v2986_v28 }
  0xcc   :  { %1868 = vmatprep.mubr.bf16.mxu0 %v2996_v39 }
  0xd2   :  { %1756 = vmatmul.mubr.bf16.gmra.mrb[40].mxu1 %v2988_v29 }
  0xd3   :  { %1869 = vmatmul.mubr.bf16.gmra.mrb[40].mxu0 %v2989_v30  ;;  %1765 = vmatprep.mubr.bf16.mxu1 %v2990_v32 }
  0xd4   :  { %1878 = vmatprep.mubr.bf16.mxu0 %v2996_v39 }
  0xda   :  { %1766 = vmatmul.mubr.bf16.gmra.mrb[44].mxu1 %v2992_v34 }
  0xdb   :  { %1879 = vmatmul.mubr.bf16.gmra.mrb[44].mxu0 %v2993_v35 }
 0x136   :  { %v1624_v36 = vpop.f32.mrb[16].mxu0 }
 0x137   :  { %v1626_v38 = vpop.f32.mrb[17].mxu0 }
 0x138   :  { %v1628_v40 = vpop.f32.mrb[18].mxu0 }
 0x139   :  { %v1630_v41 = vpop.f32.mrb[19].mxu0 }
 0x13e   :  { %v1634_v42 = vpop.f32.mrb[20].mxu0 }
 0x13f   :  { %v1636_v44 = vpop.f32.mrb[21].mxu0 }
 0x140   :  { %v1638_v46 = vpop.f32.mrb[22].mxu0 }
 0x141   :  { %v1640_v47 = vpop.f32.mrb[23].mxu0 }
 0x146   :  { %v1644_v48 = vpop.f32.mrb[24].mxu0 }
 0x147   :  { %v1646_v50 = vpop.f32.mrb[25].mxu0 }
 0x148   :  { %v3797_v52 = vpop.f32.mrb[26].mxu0 }
 0x149   :  { %v3799_v53 = vpop.f32.mrb[27].mxu0 }
 0x14e   :  { %v3801_v54 = vpop.f32.mrb[28].mxu0 }
 0x14f   :  { %v3803_v56 = vpop.f32.mrb[29].mxu0 }
 0x150   :  { %v3805_v58 = vpop.f32.mrb[30].mxu0 }
 0x151   :  { %v3807_v59 = vpop.f32.mrb[31].mxu0 }
 0x155   :  { %v1471_v60 = vpop.f32.mrb[0].mxu1 }
 0x156   :  { %v1473_v3 = vpop.f32.mrb[1].mxu1 }
 0x157   :  { %v1475_v62 = vpop.f32.mrb[2].mxu1 }
 0x158   :  { %v1477_v7 = vpop.f32.mrb[3].mxu1 }
 0x15d   :  { %v1481_v9 = vpop.f32.mrb[4].mxu1 }
 0x15e   :  { %v1483_v0 = vpop.f32.mrb[5].mxu1 }
 0x15f   :  { %v1485_v1 = vpop.f32.mrb[6].mxu1 }
 0x160   :  { %v1487_v13 = vpop.f32.mrb[7].mxu1 }
 0x165   :  { %v1491_v15 = vpop.f32.mrb[8].mxu1 }
 0x166   :  { %v1493_v2 = vpop.f32.mrb[9].mxu1 }
 0x167   :  { %v1495_v5 = vpop.f32.mrb[10].mxu1 }
 0x168   :  { %v1497_v19 = vpop.f32.mrb[11].mxu1 }
 0x16d   :  { %v3809_v21 = vpop.f32.mrb[12].mxu1 }
 0x16e   :  { %v3811_v8 = vpop.f32.mrb[13].mxu1 }
 0x16f   :  { %v3813_v10 = vpop.f32.mrb[14].mxu1 }
 0x170   :  { %v3815_v25 = vpop.f32.mrb[15].mxu1 }
 0x175   :  { %v1511_v27 = vpop.f32.mrb[16].mxu1 }
 0x176   :  { %v1810_v11 = vpop.f32.mrb[0].mxu0  ;;  %v3817_v14 = vadd.f32 %v1624_v36, %v1511_v27  ;;  %v1513_v33 = vpop.f32.mrb[17].mxu1 }
 0x177   :  { %v3819_v31 = vadd.f32 %v1810_v11, %v1471_v60  ;;  %v1812_v17 = vpop.f32.mrb[1].mxu0  ;;  %v3821_v18 = vadd.f32 %v1626_v38, %v1513_v33  ;;  %v1515_v39 = vpop.f32.mrb[18].mxu1 }
 0x178   :  { %v3823_v37 = vadd.f32 %v1812_v17, %v1473_v3  ;;  %v1814_v20 = vpop.f32.mrb[2].mxu0  ;;  %v3825_v43 = vadd.f32 %v1628_v40, %v1515_v39  ;;  %v1517_v49 = vpop.f32.mrb[19].mxu1 }
 0x179   :  { %v3827_v45 = vadd.f32 %v1814_v20, %v1475_v62  ;;  %v1816_v23 = vpop.f32.mrb[3].mxu0  ;;  %v3829_v51 = vadd.f32 %v1630_v41, %v1517_v49 }
 0x17a   :  { %v3831_v55 = vadd.f32 %v1816_v23, %v1477_v7 }
 0x17d   :  { %v1521_v57 = vpop.f32.mrb[20].mxu1 }
 0x17e   :  { %v1820_v61 = vpop.f32.mrb[4].mxu0  ;;  %v3833_v63 = vadd.f32 %v1634_v42, %v1521_v57  ;;  %v1523_v6 = vpop.f32.mrb[21].mxu1 }
 0x17f   :  { %v3835_v4 = vadd.f32 %v1820_v61, %v1481_v9  ;;  %v1822_v12 = vpop.f32.mrb[5].mxu0  ;;  %v3837_v16 = vadd.f32 %v1636_v44, %v1523_v6  ;;  %v1525_v24 = vpop.f32.mrb[22].mxu1 }
 0x180   :  { %v3839_v22 = vadd.f32 %v1822_v12, %v1483_v0  ;;  %v1824_v26 = vpop.f32.mrb[6].mxu0  ;;  %v3841_v28 = vadd.f32 %v1638_v46, %v1525_v24  ;;  %v1527_v30 = vpop.f32.mrb[23].mxu1 }
 0x181   :  { %v3843_v29 = vadd.f32 %v1824_v26, %v1485_v1  ;;  %v1826_v32 = vpop.f32.mrb[7].mxu0  ;;  %v3845_v34 = vadd.f32 %v1640_v47, %v1527_v30 }
 0x182   :  { %v3847_v35 = vadd.f32 %v1826_v32, %v1487_v13  ;;  %v1934_v13 = vmul.f32 %v3831_v55, %v3831_v55 }
 0x185   :  { %v1531_v36 = vpop.f32.mrb[24].mxu1 }
 0x186   :  { %v1830_v38 = vpop.f32.mrb[8].mxu0  ;;  %v3849_v40 = vadd.f32 %v1644_v48, %v1531_v36  ;;  %v1533_v42 = vpop.f32.mrb[25].mxu1 }
 0x187   :  { %v3851_v41 = vadd.f32 %v1830_v38, %v1491_v15  ;;  %v1832_v44 = vpop.f32.mrb[9].mxu0  ;;  %v3853_v60 = vadd.f32 %v1646_v50, %v1533_v42  ;;  %v1535_v3 = vpop.f32.mrb[26].mxu1  ;;  %v1933_v50 = vmul.f32 %v3827_v45, %v3827_v45  ;;  %v1931_v15 = vmul.f32 %v3819_v31, %v3819_v31 }
 0x188   :  { %v3855_v46 = vadd.f32 %v1832_v44, %v1493_v2  ;;  %v1834_v62 = vpop.f32.mrb[10].mxu0  ;;  %v3858_v7 = vadd.f32 %v3797_v52, %v1535_v3  ;;  %v1537_v9 = vpop.f32.mrb[27].mxu1  ;;  %v1889_v52 = vadd.f32 %v3827_v45, %v3819_v31  ;;  %v1935_v2 = vmul.f32 %v3835_v4, %v3835_v4 }
 0x189   :  { %v3860_v47 = vadd.f32 %v1834_v62, %v1495_v5  ;;  %v1836_v0 = vpop.f32.mrb[11].mxu0  ;;  %v3863_v48 = vadd.f32 %v3799_v53, %v1537_v9  ;;  %v1932_v53 = vmul.f32 %v3823_v37, %v3823_v37  ;;  %v1910_v5 = vadd.f32 %v3831_v55, %v3823_v37 }
 0x18a   :  { %v3865_v1 = vadd.f32 %v1836_v0, %v1497_v19  ;;  %v1936_v19 = vmul.f32 %v3839_v22, %v3839_v22  ;;  %v1963_v33 = vadd.f32 %v1933_v50, %v1931_v15  ;;  %v1890_v17 = vadd.f32 %v3835_v4, %v1889_v52 }
 0x18b   :  { %v1984_v57 = vadd.f32 %v1934_v13, %v1932_v53  ;;  %v1911_v61 = vadd.f32 %v3839_v22, %v1910_v5  ;;  %v1940_v62 = vmul.f32 %v3855_v46, %v3855_v46  ;;  %v1941_v52 = vmul.f32 %v3860_v47, %v3860_v47 }
 0x18c   :  { %v1964_v30 = vadd.f32 %v1963_v33, %v1935_v2  ;;  %v1891_v3 = vadd.f32 %v3843_v29, %v1890_v17 }
 0x18d   :  { %v1541_v27 = vpop.f32.mrb[28].mxu1  ;;  %v1985_v42 = vadd.f32 %v1984_v57, %v1936_v19 }
 0x18e   :  { %v1840_v11 = vpop.f32.mrb[12].mxu0  ;;  %v3885_v39 = vadd.f32 %v3801_v54, %v1541_v27  ;;  %v1543_v49 = vpop.f32.mrb[29].mxu1  ;;  %v1937_v54 = vmul.f32 %v3843_v29, %v3843_v29  ;;  %v1892_v0 = vadd.f32 %v3851_v41, %v1891_v3  ;;  %v1942_v27 = vmul.f32 %v3865_v1, %v3865_v1 }
 0x18f   :  { %v3888_v20 = vadd.f32 %v1840_v11, %v3809_v21  ;;  %v1842_v23 = vpop.f32.mrb[13].mxu0  ;;  %v3892_v6 = vadd.f32 %v3803_v56, %v1543_v49  ;;  %v1545_v24 = vpop.f32.mrb[30].mxu1  ;;  %v1938_v56 = vmul.f32 %v3847_v35, %v3847_v35 }
 0x190   :  { %v3895_v12 = vadd.f32 %v1842_v23, %v3811_v8  ;;  %v1844_v26 = vpop.f32.mrb[14].mxu0  ;;  %v3900_v21 = vadd.f32 %v3805_v58, %v1545_v24  ;;  %v1547_v36 = vpop.f32.mrb[31].mxu1  ;;  %v1939_v58 = vmul.f32 %v3851_v41, %v3851_v41  ;;  %v1965_v9 = vadd.f32 %v1964_v30, %v1937_v54 }
 0x191   :  { %v3903_v32 = vadd.f32 %v1844_v26, %v3813_v10  ;;  %v1846_v38 = vpop.f32.mrb[15].mxu0  ;;  %v3908_v8 = vadd.f32 %v3807_v59, %v1547_v36  ;;  %v1912_v10 = vadd.f32 %v3847_v35, %v1911_v61  ;;  %v1986_v50 = vadd.f32 %v1985_v42, %v1938_v56 }
 0x192   :  { %v3911_v44 = vadd.f32 %v1846_v38, %v3815_v25  ;;  %v1966_v25 = vadd.f32 %v1965_v9, %v1939_v58  ;;  %v1893_v49 = vadd.f32 %v3860_v47, %v1892_v0  ;;  %v1943_v23 = vmul.f32 %v3888_v20, %v3888_v20 }
 0x193   :  { %v1913_v59 = vadd.f32 %v3855_v46, %v1912_v10  ;;  %v1987_v19 = vadd.f32 %v1986_v50, %v1940_v62  ;;  %v1944_v30 = vmul.f32 %v3895_v12, %v3895_v12  ;;  %v1945_v10 = vmul.f32 %v3903_v32, %v3903_v32 }
 0x194   :  { %v1967_v36 = vadd.f32 %v1966_v25, %v1941_v52  ;;  %v1894_v38 = vadd.f32 %v3888_v20, %v1893_v49  ;;  %v1946_v9 = vmul.f32 %v3911_v44, %v3911_v44 }
 0x195   :  { %v1737_v13 = vpop.f32.mrb[32].mxu1  ;;  %v1914_v26 = vadd.f32 %v3865_v1, %v1913_v59  ;;  %v1988_v56 = vadd.f32 %v1987_v19, %v1942_v27 }
 0x196   :  { %v1850_v15 = vpop.f32.mrb[32].mxu0  ;;  %v2561_v2 = vadd.f32 %v3817_v14, %v1737_v13  ;;  %v1739_v53 = vpop.f32.mrb[33].mxu1  ;;  %v1968_v58 = vadd.f32 %v1967_v36, %v1943_v23  ;;  %v1895_v50 = vadd.f32 %v3903_v32, %v1894_v38 }
 0x197   :  { %v1852_v5 = vpop.f32.mrb[33].mxu0  ;;  %v2564_v11 = vadd.f32 %v3821_v18, %v1739_v53  ;;  %v1741_v33 = vpop.f32.mrb[34].mxu1  ;;  %v1915_v3 = vadd.f32 %v3895_v12, %v1914_v26  ;;  %v1989_v62 = vadd.f32 %v1988_v56, %v1944_v30 }
 0x198   :  { %v1854_v17 = vpop.f32.mrb[34].mxu0  ;;  %v3930_v57 = vadd.f32 %v2561_v2, %v1850_v15  ;;  %v2567_v61 = vadd.f32 %v3825_v43, %v1741_v33  ;;  %v1743_v14 = vpop.f32.mrb[35].mxu1  ;;  %v1969_v27 = vadd.f32 %v1968_v58, %v1945_v10 }
 0x199   :  { %v1856_v24 = vpop.f32.mrb[35].mxu0  ;;  %v3936_v54 = vadd.f32 %v2564_v11, %v1852_v5  ;;  %v2570_v18 = vadd.f32 %v3829_v51, %v1743_v14  ;;  %v1916_v52 = vadd.f32 %v3911_v44, %v1915_v3  ;;  %v1990_v23 = vadd.f32 %v1989_v62, %v1946_v9 }
 0x19a   :  { %v3940_v42 = vadd.f32 %v2567_v61, %v1854_v17  ;;  %v1947_v59 = vmul.f32 %v3930_v57, %v3930_v57  ;;  %v1896_v11 = vadd.f32 %v3930_v57, %v1895_v50 }
 0x19b   :  { %v3943_v43 = vadd.f32 %v2570_v18, %v1856_v24  ;;  %v1948_v2 = vmul.f32 %v3936_v54, %v3936_v54  ;;  %v1917_v61 = vadd.f32 %v3936_v54, %v1916_v52 }
 0x19c   :  { %v1970_v26 = vadd.f32 %v1969_v27, %v1947_v59  ;;  %v1897_v38 = vadd.f32 %v3940_v42, %v1896_v11 }
 0x19d   :  { %v1747_v0 = vpop.f32.mrb[36].mxu1  ;;  %v1991_v18 = vadd.f32 %v1990_v23, %v1948_v2  ;;  %v1950_v36 = vmul.f32 %v3943_v43, %v3943_v43  ;;  %v1918_v3 = vadd.f32 %v3943_v43, %v1917_v61 }
 0x19e   :  { %v1860_v51 = vpop.f32.mrb[36].mxu0  ;;  %v2573_v13 = vadd.f32 %v3833_v63, %v1747_v0  ;;  %v1749_v15 = vpop.f32.mrb[37].mxu1 }
 0x19f   :  { %v1862_v25 = vpop.f32.mrb[37].mxu0  ;;  %v2576_v53 = vadd.f32 %v3837_v16, %v1749_v15  ;;  %v1751_v5 = vpop.f32.mrb[38].mxu1  ;;  %v1949_v16 = vmul.f32 %v3940_v42, %v3940_v42  ;;  %v1992_v59 = vadd.f32 %v1991_v18, %v1950_v36 }
 0x1a0   :  { %v1864_v19 = vpop.f32.mrb[38].mxu0  ;;  %v3958_v33 = vadd.f32 %v2573_v13, %v1860_v51  ;;  %v2579_v17 = vadd.f32 %v3841_v28, %v1751_v5  ;;  %v1753_v49 = vpop.f32.mrb[39].mxu1 }
 0x1a1   :  { %v1866_v63 = vpop.f32.mrb[39].mxu0  ;;  %v3962_v14 = vadd.f32 %v2576_v53, %v1862_v25  ;;  %v2582_v24 = vadd.f32 %v3845_v34, %v1753_v49  ;;  %v1971_v62 = vadd.f32 %v1970_v26, %v1949_v16 }
 0x1a2   :  { %v3967_v30 = vadd.f32 %v2579_v17, %v1864_v19  ;;  %v1951_v56 = vmul.f32 %v3958_v33, %v3958_v33  ;;  %v1898_v9 = vadd.f32 %v3958_v33, %v1897_v38 }
 0x1a3   :  { %v3971_v28 = vadd.f32 %v2582_v24, %v1866_v63  ;;  %v1952_v34 = vmul.f32 %v3962_v14, %v3962_v14  ;;  %v1919_v13 = vadd.f32 %v3962_v14, %v1918_v3 }
 0x1a4   :  { %v1972_v2 = vadd.f32 %v1971_v62, %v1951_v56  ;;  %v1953_v53 = vmul.f32 %v3967_v30, %v3967_v30  ;;  %v1899_v63 = vadd.f32 %v3967_v30, %v1898_v9 }
 0x1a5   :  { %v1757_v58 = vpop.f32.mrb[40].mxu1  ;;  %v1954_v17 = vmul.f32 %v3971_v28, %v3971_v28  ;;  %v1920_v24 = vadd.f32 %v3971_v28, %v1919_v13 }
 0x1a6   :  { %v1870_v10 = vpop.f32.mrb[40].mxu0  ;;  %v2585_v0 = vadd.f32 %v3849_v40, %v1757_v58  ;;  %v1759_v51 = vpop.f32.mrb[41].mxu1  ;;  %v1993_v40 = vadd.f32 %v1992_v59, %v1952_v34  ;;  %v1973_v16 = vadd.f32 %v1972_v2, %v1953_v53 }
 0x1a7   :  { %v1872_v50 = vpop.f32.mrb[41].mxu0  ;;  %v2588_v15 = vadd.f32 %v3853_v60, %v1759_v51  ;;  %v1761_v25 = vpop.f32.mrb[42].mxu1 }
 0x1a8   :  { %v1874_v52 = vpop.f32.mrb[42].mxu0  ;;  %v3985_v5 = vadd.f32 %v2585_v0, %v1870_v10  ;;  %v2591_v19 = vadd.f32 %v3858_v7, %v1761_v25  ;;  %v1763_v27 = vpop.f32.mrb[43].mxu1  ;;  %v1994_v36 = vadd.f32 %v1993_v40, %v1954_v17 }
 0x1a9   :  { %v1876_v11 = vpop.f32.mrb[43].mxu0  ;;  %v3990_v49 = vadd.f32 %v2588_v15, %v1872_v50  ;;  %v2594_v60 = vadd.f32 %v3863_v48, %v1763_v27 }
 0x1aa   :  { %v1955_v23 = vmul.f32 %v3985_v5, %v3985_v5  ;;  %v3996_v61 = vadd.f32 %v2591_v19, %v1874_v52  ;;  %v1900_v18 = vadd.f32 %v3985_v5, %v1899_v63 }
 0x1ab   :  { %v1956_v7 = vmul.f32 %v3990_v49, %v3990_v49  ;;  %v4001_v26 = vadd.f32 %v2594_v60, %v1876_v11  ;;  %v1921_v48 = vadd.f32 %v3990_v49, %v1920_v24 }
 0x1ac   :  { %v1974_v3 = vadd.f32 %v1973_v16, %v1955_v23  ;;  %v1957_v34 = vmul.f32 %v3996_v61, %v3996_v61  ;;  %v1901_v13 = vadd.f32 %v3996_v61, %v1900_v18 }
 0x1ad   :  { %v1767_v38 = vpop.f32.mrb[44].mxu1  ;;  %v1995_v9 = vadd.f32 %v1994_v36, %v1956_v7  ;;  %v1958_v0 = vmul.f32 %v4001_v26, %v4001_v26 }
 0x1ae   :  { %v1880_v56 = vpop.f32.mrb[44].mxu0  ;;  %v2597_v58 = vadd.f32 %v3885_v39, %v1767_v38  ;;  %v1769_v10 = vpop.f32.mrb[45].mxu1  ;;  %v1922_v39 = vadd.f32 %v4001_v26, %v1921_v48  ;;  %v1975_v27 = vadd.f32 %v1974_v3, %v1957_v34 }
 0x1af   :  { %v1882_v62 = vpop.f32.mrb[45].mxu0  ;;  %v2600_v51 = vadd.f32 %v3892_v6, %v1769_v10  ;;  %v1771_v50 = vpop.f32.mrb[46].mxu1  ;;  %v1996_v17 = vadd.f32 %v1995_v9, %v1958_v0 }
 0x1b0   :  { %v1884_v59 = vpop.f32.mrb[46].mxu0  ;;  %v4012_v15 = vadd.f32 %v2597_v58, %v1880_v56  ;;  %v2603_v25 = vadd.f32 %v3900_v21, %v1771_v50  ;;  %v1773_v52 = vpop.f32.mrb[47].mxu1 }
 0x1b1   :  { %v1886_v2 = vpop.f32.mrb[47].mxu0  ;;  %v4016_v53 = vadd.f32 %v2600_v51, %v1882_v62  ;;  %v2606_v19 = vadd.f32 %v3908_v8, %v1773_v52 }
 0x1b2   :  { %v1902_v11 = vadd.f32 %v4012_v15, %v1901_v13  ;;  %v1959_v6 = vmul.f32 %v4012_v15, %v4012_v15  ;;  %v4022_v40 = vadd.f32 %v2603_v25, %v1884_v59 }
 0x1b3   :  { %v1923_v60 = vadd.f32 %v4016_v53, %v1922_v39  ;;  %v1960_v21 = vmul.f32 %v4016_v53, %v4016_v53  ;;  %v4027_v63 = vadd.f32 %v2606_v19, %v1886_v2 }
 0x1b4   :  { %v1976_v23 = vadd.f32 %v1975_v27, %v1959_v6  ;;  %v1903_v24 = vadd.f32 %v4022_v40, %v1902_v11  ;;  %v1961_v8 = vmul.f32 %v4022_v40, %v4022_v40 }
 0x1b5   :  { %v1997_v7 = vadd.f32 %v1996_v17, %v1960_v21  ;;  %v1924_v16 = vadd.f32 %v4027_v63, %v1923_v60  ;;  %v1962_v18 = vmul.f32 %v4027_v63, %v4027_v63 }
 0x1b6   :  { %v1904_v36 = vrot.slane %v1903_v24, 4  ;;  %v1977_v48 = vadd.f32 %v1976_v23, %v1961_v8 }
 0x1b7   :  { %v1925_v38 = vrot.slane %v1924_v16, 4  ;;  %v1998_v56 = vadd.f32 %v1997_v7, %v1962_v18 }
 0x1b8   :  { %v1978_v3 = vrot.slane %v1977_v48, 4  ;;  %v1905_v34 = vadd.f32 %v1904_v36, %v1903_v24 }
 0x1b9   :  { %v1999_v58 = vrot.slane %v1998_v56, 4  ;;  %v1926_v10 = vadd.f32 %v1925_v38, %v1924_v16 }
 0x1ba   :  { %v1906_v62 = vrot.slane %v1905_v34, 2  ;;  %v1979_v9 = vadd.f32 %v1978_v3, %v1977_v48 }
 0x1bb   :  { %v1927_v0 = vrot.slane %v1926_v10, 2  ;;  %v2000_v51 = vadd.f32 %v1999_v58, %v1998_v56 }
 0x1bc   :  { %v1907_v50 = vadd.f32 %v1906_v62, %v1905_v34  ;;  %v1980_v59 = vrot.slane %v1979_v9, 2 }
 0x1bd   :  { %v1928_v13 = vadd.f32 %v1927_v0, %v1926_v10  ;;  %v2001_v25 = vrot.slane %v2000_v51, 2  ;;  %v2044_v0 = vlaneseq }
 0x1be   :  { %v1908_v52 = vrot.slane %v1907_v50, 1  ;;  %v1981_v2 = vadd.f32 %v1980_v59, %v1979_v9 }
 0x1bf   :  { %v1929_v39 = vrot.slane %v1928_v13, 1  ;;  %v2002_v19 = vadd.f32 %v2001_v25, %v2000_v51  ;;  %v2045_v51 = vshrl.u32 %v2044_v0, 7 }
 0x1c0   :  { %v1909_v27 = vadd.f32 %v1908_v52, %v1907_v50  ;;  %v1982_v11 = vrot.slane %v1981_v2, 1 }
 0x1c1   :  { %v1930_v6 = vadd.f32 %v1929_v39, %v1928_v13  ;;  %v2003_v17 = vrot.slane %v2002_v19, 1  ;;  %v2046_v59 = vsub.s32 0, %v2045_v51 }
 0x1c2   :  { %2006 = vrot.lane.b32.xlu0 %v1909_v27, %s2997_s0  ;;  %v1983_v60 = vadd.f32 %v1982_v11, %v1981_v2 }
 0x1c3   :  { %2018 = vrot.lane.b32.xlu1 %v1930_v6, %s2997_s0  ;;  %v2004_v21 = vadd.f32 %v2003_v17, %v2002_v19 }
 0x1c6   :  { %2011 = vrot.lane.b32.xlu0 %v1983_v60, %s2997_s0 }
 0x1c7   :  { %2023 = vrot.lane.b32.xlu1 %v2004_v21, %s2997_s0 }
 0x234   :  { %v2007_v23 = vpop.permute.xlu0 %2006 }
 0x235   :  { %v2009_v24 = vadd.f32 %v2007_v23, %v1909_v27  ;;  %v2019_v8 = vpop.permute.xlu1 %2018 }
 0x237   :  { %v2015_v7 = vadd.f32 %v2009_v24, %v1930_v6 }
 0x238   :  { %v2012_v16 = vpop.permute.xlu0 %2011 }
 0x239   :  { %v2021_v18 = vadd.f32 %v2019_v8, %v2015_v7  ;;  %v2014_v36 = vadd.f32 %v2012_v16, %v1983_v60  ;;  %v2024_v56 = vpop.permute.xlu1 %2023 }
 0x23b   :  { %v2027_v48 = vmul.f32 0.001953125, %v2021_v18  ;;  %v2016_v38 = vadd.f32 %v2014_v36, %v2004_v21 }
 0x23d   :  { %v2026_v3 = vadd.f32 %v2024_v56, %v2016_v38  ;;  %2034 = vrot.lane.b32.xlu0 %v2027_v48, %s2997_s0  ;;  %v2029_v58 = vmul.f32 %v2027_v48, %v2027_v48 }
 0x23f   :  { %v2028_v34 = vmul.f32 0.001953125, %v2026_v3 }
 0x241   :  { %v2030_v10 = vsub.f32 %v2028_v34, %v2029_v58 }
 0x243   :  { %v2031_v62 = vadd.f32 1e-05, %v2030_v10 }
 0x245   :  { %2994 = vrsqrt.f32 %v2031_v62 }
 0x24f   :  { %v2995_v9 = vpop.eup %2994 }
 0x250   :  { %2040 = vrot.lane.b32.xlu1 %v2995_v9, %s2997_s0 }
 0x2af   :  { %v2035_v50 = vpop.permute.xlu0 %2034 }
 0x2b0   :  { %v2038_v13 = vsel %vm2037_vm0, %v2027_v48, %v2035_v50 }
 0x2b1   :  { %v4036_v25 = vrot.slane %v2038_v13, %v2046_v59 }
 0x2b3   :  { %v2048_v52 = vsub.f32 %v3819_v31, %v4036_v25  ;;  %v2049_v2 = vsub.f32 %v3823_v37, %v4036_v25  ;;  %v2050_v39 = vsub.f32 %v3827_v45, %v4036_v25  ;;  %v2051_v19 = vsub.f32 %v3831_v55, %v4036_v25 }
 0x2b4   :  { %v2052_v27 = vsub.f32 %v3835_v4, %v4036_v25  ;;  %v2053_v11 = vsub.f32 %v3839_v22, %v4036_v25  ;;  %v2054_v6 = vsub.f32 %v3843_v29, %v4036_v25  ;;  %v2055_v31 = vsub.f32 %v3847_v35, %v4036_v25 }
 0x2b5   :  { %v2056_v37 = vsub.f32 %v3851_v41, %v4036_v25  ;;  %v2057_v45 = vsub.f32 %v3855_v46, %v4036_v25  ;;  %v2058_v55 = vsub.f32 %v3860_v47, %v4036_v25  ;;  %v2059_v4 = vsub.f32 %v3865_v1, %v4036_v25 }
 0x2b6   :  { %v2060_v22 = vsub.f32 %v3888_v20, %v4036_v25  ;;  %v2061_v29 = vsub.f32 %v3895_v12, %v4036_v25  ;;  %v2062_v35 = vsub.f32 %v3903_v32, %v4036_v25  ;;  %v2063_v41 = vsub.f32 %v3911_v44, %v4036_v25 }
 0x2b7   :  { %v2064_v46 = vsub.f32 %v3930_v57, %v4036_v25  ;;  %v2065_v47 = vsub.f32 %v3936_v54, %v4036_v25  ;;  %v2066_v1 = vsub.f32 %v3940_v42, %v4036_v25  ;;  %v2067_v20 = vsub.f32 %v3943_v43, %v4036_v25 }
 0x2b8   :  { %v2068_v12 = vsub.f32 %v3958_v33, %v4036_v25  ;;  %v2069_v32 = vsub.f32 %v3962_v14, %v4036_v25  ;;  %v2070_v44 = vsub.f32 %v3967_v30, %v4036_v25  ;;  %v2071_v57 = vsub.f32 %v3971_v28, %v4036_v25 }
 0x2b9   :  { %v2072_v54 = vsub.f32 %v3985_v5, %v4036_v25  ;;  %v2073_v43 = vsub.f32 %v3990_v49, %v4036_v25  ;;  %v2074_v33 = vsub.f32 %v3996_v61, %v4036_v25  ;;  %v2075_v14 = vsub.f32 %v4001_v26, %v4036_v25 }
 0x2ba   :  { %v2076_v30 = vsub.f32 %v4012_v15, %v4036_v25  ;;  %v2077_v28 = vsub.f32 %v4016_v53, %v4036_v25  ;;  %v2078_v5 = vsub.f32 %v4022_v40, %v4036_v25  ;;  %v2079_v21 = vsub.f32 %v4027_v63, %v4036_v25 }
 0x2c2   :  { %v2041_v17 = vpop.permute.xlu1 %2040 }
 0x2c3   :  { %v2043_v42 = vsel %vm2037_vm0, %v2995_v9, %v2041_v17 }
 0x2c4   :  { %v2083_v60 = vrot.slane %v2043_v42, %v2046_v59 }
 0x2c6   :  { %v4103_v49 = vmul.f32 %v2083_v60, %v2048_v52  ;;  %v4105_v23 = vmul.f32 %v2083_v60, %v2049_v2  ;;  %v4107_v61 = vmul.f32 %v2083_v60, %v2050_v39  ;;  %v4109_v26 = vmul.f32 %v2083_v60, %v2051_v19 }
 0x2c7   :  { %v4111_v24 = vmul.f32 %v2083_v60, %v2052_v27  ;;  %v4113_v15 = vmul.f32 %v2083_v60, %v2053_v11  ;;  %v4115_v8 = vmul.f32 %v2083_v60, %v2054_v6  ;;  %v2091_v53 = vmul.f32 %v2083_v60, %v2055_v31 }
 0x2c8   :  { %v2092_v7 = vmul.f32 %v2083_v60, %v2056_v37  ;;  %v2093_v40 = vmul.f32 %v2083_v60, %v2057_v45  ;;  %v2094_v16 = vmul.f32 %v2083_v60, %v2058_v55  ;;  %v2095_v18 = vmul.f32 %v2083_v60, %v2059_v4 }
 0x2c9   :  { %v2096_v63 = vmul.f32 %v2083_v60, %v2060_v22  ;;  %v2097_v36 = vmul.f32 %v2083_v60, %v2061_v29  ;;  %v2098_v48 = vmul.f32 %v2083_v60, %v2062_v35  ;;  %v2099_v38 = vmul.f32 %v2083_v60, %v2063_v41 }
 0x2ca   :  { %v2100_v56 = vmul.f32 %v2083_v60, %v2064_v46  ;;  %v2101_v3 = vmul.f32 %v2083_v60, %v2065_v47  ;;  %v2102_v34 = vmul.f32 %v2083_v60, %v2066_v1  ;;  %v2103_v58 = vmul.f32 %v2083_v60, %v2067_v20 }
 0x2cb   :  { %v2104_v10 = vmul.f32 %v2083_v60, %v2068_v12  ;;  %v2105_v62 = vmul.f32 %v2083_v60, %v2069_v32  ;;  %v2106_v9 = vmul.f32 %v2083_v60, %v2070_v44  ;;  %v2107_v0 = vmul.f32 %v2083_v60, %v2071_v57 }
 0x2cc   :  { %v2108_v51 = vmul.f32 %v2083_v60, %v2072_v54  ;;  %v2109_v50 = vmul.f32 %v2083_v60, %v2073_v43  ;;  %v2110_v59 = vmul.f32 %v2083_v60, %v2074_v33  ;;  %v2111_v13 = vmul.f32 %v2083_v60, %v2075_v14 }
 0x2cd   :  { %v2112_v25 = vmul.f32 %v2083_v60, %v2076_v30  ;;  %v2113_v52 = vmul.f32 %v2083_v60, %v2077_v28  ;;  %v2114_v2 = vmul.f32 %v2083_v60, %v2078_v5  ;;  %v2115_v39 = vmul.f32 %v2083_v60, %v2079_v21 }
 0x2ce   :  { %v2116_v19 = vmax.f32 %v4103_v49, 0.0  ;;  %v2117_v27 = vmax.f32 %v4105_v23, 0.0  ;;  %v2118_v11 = vmax.f32 %v4107_v61, 0.0  ;;  %v2119_v6 = vmax.f32 %v4109_v26, 0.0 }
 0x2cf   :  { %v2120_v31 = vmax.f32 %v4111_v24, 0.0  ;;  %v2121_v37 = vmax.f32 %v4113_v15, 0.0  ;;  %v2122_v45 = vmax.f32 %v4115_v8, 0.0  ;;  %v2123_v55 = vmax.f32 %v2091_v53, 0.0 }
 0x2d0   :  { %v2124_v4 = vmax.f32 %v2092_v7, 0.0  ;;  %v2125_v22 = vmax.f32 %v2093_v40, 0.0  ;;  %v2126_v29 = vmax.f32 %v2094_v16, 0.0  ;;  %v2127_v35 = vmax.f32 %v2095_v18, 0.0 }
 0x2d1   :  { %v2128_v41 = vmax.f32 %v2096_v63, 0.0  ;;  %v2129_v46 = vmax.f32 %v2097_v36, 0.0  ;;  %v2130_v47 = vmax.f32 %v2098_v48, 0.0  ;;  %v2131_v1 = vmax.f32 %v2099_v38, 0.0 }
 0x2d2   :  { %v2132_v20 = vmax.f32 %v2100_v56, 0.0  ;;  %v2133_v12 = vmax.f32 %v2101_v3, 0.0  ;;  %v2134_v32 = vmax.f32 %v2102_v34, 0.0  ;;  %v2135_v17 = vmax.f32 %v2103_v58, 0.0 }
 0x2d3   :  { %v2136_v44 = vmax.f32 %v2104_v10, 0.0  ;;  %v2137_v57 = vmax.f32 %v2105_v62, 0.0  ;;  %v2138_v54 = vmax.f32 %v2106_v9, 0.0  ;;  %v2139_v42 = vmax.f32 %v2107_v0, 0.0 }
 0x2d4   :  { %v2140_v43 = vmax.f32 %v2108_v51, 0.0  ;;  %v2141_v33 = vmax.f32 %v2109_v50, 0.0  ;;  %v2142_v14 = vmax.f32 %v2110_v59, 0.0  ;;  %v2143_v60 = vmax.f32 %v2111_v13, 0.0 }
 0x2d5   :  { %v2144_v30 = vmax.f32 %v2112_v25, 0.0  ;;  %v2145_v28 = vmax.f32 %v2113_v52, 0.0  ;;  %v2146_v5 = vmax.f32 %v2114_v2, 0.0  ;;  %v2147_v21 = vmax.f32 %v2115_v39, 0.0 }
 0x2d6   :  { %v2496_v49 = vpack.c.bf16 %v2117_v27, %v2116_v19  ;;  %v2497_v23 = vpack.c.bf16 %v2119_v6, %v2118_v11  ;;  %v2498_v61 = vpack.c.bf16 %v2121_v37, %v2120_v31  ;;  %v2499_v26 = vpack.c.bf16 %v2123_v55, %v2122_v45 }
 0x2d7   :  { %v2500_v24 = vpack.c.bf16 %v2125_v22, %v2124_v4  ;;  %v2501_v15 = vpack.c.bf16 %v2127_v35, %v2126_v29  ;;  %v2502_v8 = vpack.c.bf16 %v2129_v46, %v2128_v41  ;;  %v2503_v53 = vpack.c.bf16 %v2131_v1, %v2130_v47 }
 0x2d8   :  { %v2504_v7 = vpack.c.bf16 %v2133_v12, %v2132_v20  ;;  %v2505_v40 = vpack.c.bf16 %v2135_v17, %v2134_v32  ;;  %v2506_v16 = vpack.c.bf16 %v2137_v57, %v2136_v44  ;;  %v2507_v18 = vpack.c.bf16 %v2139_v42, %v2138_v54  ;;  %2244 = vst [vmem:[%s4174_s2] sm:$0xff] %v2496_v49 }
 0x2d9   :  { %2245 = vst [vmem:[%s4174_s2 + $0x8] sm:$0xff] %v2497_v23  ;;  %2246 = vst [vmem:[%s4174_s2 + $0x10] sm:$0xff] %v2498_v61  ;;  %v2508_v63 = vpack.c.bf16 %v2141_v33, %v2140_v43  ;;  %v2509_v36 = vpack.c.bf16 %v2143_v60, %v2142_v14  ;;  %v2510_v48 = vpack.c.bf16 %v2145_v28, %v2144_v30 }
 0x2da   :  { %2247 = vst [vmem:[%s4174_s2 + $0x18] sm:$0xff] %v2499_v26  ;;  %v2511_v38 = vpack.c.bf16 %v2147_v21, %v2146_v5  ;;  %2248 = vst [vmem:[%s4174_s2 + $0x20] sm:$0xff] %v2500_v24 }
 0x2db   :  { %2249 = vst [vmem:[%s4174_s2 + $0x28] sm:$0xff] %v2501_v15  ;;  %2250 = vst [vmem:[%s4174_s2 + $0x30] sm:$0xff] %v2502_v8 }
 0x2dc   :  { %2251 = vst [vmem:[%s4174_s2 + $0x38] sm:$0xff] %v2503_v53  ;;  %2252 = vst [vmem:[%s4174_s2 + $0x40] sm:$0xff] %v2504_v7 }
 0x2dd   :  { %2253 = vst [vmem:[%s4174_s2 + $0x48] sm:$0xff] %v2505_v40  ;;  %2254 = vst [vmem:[%s4174_s2 + $0x50] sm:$0xff] %v2506_v16 }
 0x2de   :  { %2255 = vst [vmem:[%s4174_s2 + $0x58] sm:$0xff] %v2507_v18  ;;  %2256 = vst [vmem:[%s4174_s2 + $0x60] sm:$0xff] %v2508_v63 }
 0x2df   :  { %2257 = vst [vmem:[%s4174_s2 + $0x68] sm:$0xff] %v2509_v36  ;;  %2258 = vst [vmem:[%s4174_s2 + $0x70] sm:$0xff] %v2510_v48 }
 0x2e0   :  { %2259 = vst [vmem:[%s4174_s2 + $0x78] sm:$0xff] %v2511_v38 }

// kernel: _forward.5
= control target key start
LH: loop header
LB: loop body
LE: loop exit
PB: predicated region body
PF: predicated region fallthrough
CT: control target
= control target key end

     0   :  { %7 = vsyncpa [#allocation3], 0  ;;  %s6571_s9 = smov [#allocation2]   ;;  %s6830_s0 = inlined_call_operand.vmem [shape: bf16[32,2304], index: 0, kind: input, shape index: {}]   ;;  %s6831_s1 = inlined_call_operand.hbm [shape: bf16[2304,512], index: 1, kind: input, shape index: {}]   ;;  %s6832_s2 = inlined_call_operand.vmem [shape: bf16[32,512], index: 2, kind: output, shape index: {}]  }
   0x1   :  { %s15_s10 = sshll.u32 %s6571_s9, 4  ;;  %s6547_s13 = scalar_lea.hbm %s6831_s1, 73728  ;;  %s16_s10 = int_to_ptr.vmem [resolvable:$true] %s15_s10 }
   0x2   :  { %p6548_p0 = scmp.ne.s32.totalorder %s6831_s1, %s6547_s13  ;;  %p6551_p1 = scmp.lt.u32.totalorder %s6547_s13, %s6831_s1 }
   0x4   :  { %p6553_p2 = pnand %p6551_p1, %p6548_p0 }
   0x6   :  { %6556 = shalt.err (!%p6553_p2)
}
   0x7   :  { %s6557_s18 = scalar_lea.vmem %s16_s10, 73728  ;;  %p6562_p4 = scmp.lt.s32.totalorder %s16_s10, %s16_s10 }
   0x8   :  { %p6558_p3 = scmp.ne.s32.totalorder %s16_s10, %s6557_s18  ;;  %p6563_p5 = scmp.lt.s32.totalorder %s6557_s18, %s6557_s18 }
   0xa   :  { %p6564_p6 = por %p6563_p5, %p6562_p4 }
   0xc   :  { %p6565_p7 = pnand %p6564_p6, %p6558_p3 }
   0xe   :  { %6568 = shalt.err (!%p6565_p7)
}
   0xf   :  { %s6572_s19 = smov 256   ;;  %s6573_s20 = smov 16  }
  0x10   :  { %21 = dma.hbm_to_vmem [thread:$0]  %s6831_s1, 73728, %s16_s10, [#allocation3], %s6572_s19, %s6572_s19, %s6573_s20  }
  0x11   :  { %6569 = dma.done.wait [#allocation3], 73728  }
  0x12   :  { %6570 = vsyncadd [#allocation3], 4294893568  ;;  %v5627_v0 = vld [vmem:[#allocation2 + $0x4] ss:$16 sps:$4 sm:$0xff]   ;;  %v5629_v1 = vld [vmem:[#allocation2 + $0xc] ss:$16 sps:$4 sm:$0xff]  }
  0x13   :  { %3697 = vmatprep.subr.bf16.mxu0 %v5627_v0  ;;  %v5631_v2 = vld [vmem:[#allocation2] ss:$16 sps:$4 sm:$0xff]   ;;  %v5632_v3 = vld [vmem:[#allocation2 + $0x8] ss:$16 sps:$4 sm:$0xff]   ;;  %4174 = vmatprep.subr.bf16.mxu1 %v5629_v1  ;;  %v5633_v4 = vld [vmem:[#allocation2 + $0x24] ss:$16 sps:$4 sm:$0xff]  }
  0x14   :  { %3698 = vmatpush1.bf16.msra.mxu0 %v5631_v2  ;;  %4175 = vmatpush1.bf16.msra.mxu1 %v5632_v3  ;;  %v5635_v5 = vld [vmem:[#allocation2 + $0x2c] ss:$16 sps:$4 sm:$0xff]   ;;  %v5637_v6 = vld [vmem:[#allocation2 + $0x20] ss:$16 sps:$4 sm:$0xff]   ;;  %v5638_v7 = vld [vmem:[#allocation2 + $0x28] ss:$16 sps:$4 sm:$0xff]  }
  0x15   :  { %3699 = vmatprep.subr.bf16.mxu0 %v5633_v4  ;;  %4176 = vmatprep.subr.bf16.mxu1 %v5635_v5  ;;  %v5639_v8 = vld [vmem:[#allocation2 + $0x44] ss:$16 sps:$4 sm:$0xff]   ;;  %v5641_v9 = vld [vmem:[#allocation2 + $0x4c] ss:$16 sps:$4 sm:$0xff]   ;;  %v5643_v10 = vld [vmem:[#allocation2 + $0x40] ss:$16 sps:$4 sm:$0xff]  }
  0x16   :  { %v5644_v11 = vld [vmem:[#allocation2 + $0x48] ss:$16 sps:$4 sm:$0xff]   ;;  %v5645_v12 = vld [vmem:[#allocation2 + $0x64] ss:$16 sps:$4 sm:$0xff]   ;;  %v5647_v13 = vld [vmem:[#allocation2 + $0x6c] ss:$16 sps:$4 sm:$0xff]  }
  0x17   :  { %v5649_v14 = vld [vmem:[#allocation2 + $0x60] ss:$16 sps:$4 sm:$0xff]   ;;  %v5650_v15 = vld [vmem:[#allocation2 + $0x68] ss:$16 sps:$4 sm:$0xff]   ;;  %v5651_v16 = vld [vmem:[#allocation2 + $0x84] ss:$16 sps:$4 sm:$0xff]  }
  0x18   :  { %3700 = vmatpush1.bf16.msra.mxu0 %v5637_v6  ;;  %4177 = vmatpush1.bf16.msra.mxu1 %v5638_v7  ;;  %v5653_v17 = vld [vmem:[#allocation2 + $0x8c] ss:$16 sps:$4 sm:$0xff]   ;;  %v5655_v18 = vld [vmem:[#allocation2 + $0x80] ss:$16 sps:$4 sm:$0xff]   ;;  %v5656_v19 = vld [vmem:[#allocation2 + $0x88] ss:$16 sps:$4 sm:$0xff]  }
  0x19   :  { %3701 = vmatprep.subr.bf16.mxu0 %v5639_v8  ;;  %4178 = vmatprep.subr.bf16.mxu1 %v5641_v9  ;;  %v5657_v20 = vld [vmem:[#allocation2 + $0xa4] ss:$16 sps:$4 sm:$0xff]   ;;  %v5659_v21 = vld [vmem:[#allocation2 + $0xac] ss:$16 sps:$4 sm:$0xff]   ;;  %v5661_v22 = vld [vmem:[#allocation2 + $0xa0] ss:$16 sps:$4 sm:$0xff]  }
  0x1a   :  { %v5662_v23 = vld [vmem:[#allocation2 + $0xa8] ss:$16 sps:$4 sm:$0xff]   ;;  %v5663_v24 = vld [vmem:[#allocation2 + $0xc4] ss:$16 sps:$4 sm:$0xff]   ;;  %v5665_v25 = vld [vmem:[#allocation2 + $0xcc] ss:$16 sps:$4 sm:$0xff]  }
  0x1b   :  { %v5667_v26 = vld [vmem:[#allocation2 + $0xc0] ss:$16 sps:$4 sm:$0xff]   ;;  %v5668_v27 = vld [vmem:[#allocation2 + $0xc8] ss:$16 sps:$4 sm:$0xff]   ;;  %v5669_v28 = vld [vmem:[#allocation2 + $0xe4] ss:$16 sps:$4 sm:$0xff]  }
  0x1c   :  { %3702 = vmatpush1.bf16.msra.mxu0 %v5643_v10  ;;  %4179 = vmatpush1.bf16.msra.mxu1 %v5644_v11  ;;  %v5671_v29 = vld [vmem:[#allocation2 + $0xec] ss:$16 sps:$4 sm:$0xff]   ;;  %v5673_v30 = vld [vmem:[#allocation2 + $0xe0] ss:$16 sps:$4 sm:$0xff]   ;;  %v5674_v31 = vld [vmem:[#allocation2 + $0xe8] ss:$16 sps:$4 sm:$0xff]  }
  0x1d   :  { %3703 = vmatprep.subr.bf16.mxu0 %v5645_v12  ;;  %4180 = vmatprep.subr.bf16.mxu1 %v5647_v13  ;;  %v5675_v32 = vld [vmem:[#allocation2 + $0x104] ss:$16 sps:$4 sm:$0xff]   ;;  %v5677_v33 = vld [vmem:[#allocation2 + $0x10c] ss:$16 sps:$4 sm:$0xff]   ;;  %v5679_v34 = vld [vmem:[#allocation2 + $0x100] ss:$16 sps:$4 sm:$0xff]  }
  0x1e   :  { %v5680_v35 = vld [vmem:[#allocation2 + $0x108] ss:$16 sps:$4 sm:$0xff]   ;;  %v5681_v36 = vld [vmem:[#allocation2 + $0x124] ss:$16 sps:$4 sm:$0xff]   ;;  %v5683_v37 = vld [vmem:[#allocation2 + $0x12c] ss:$16 sps:$4 sm:$0xff]  }
  0x1f   :  { %v5685_v38 = vld [vmem:[#allocation2 + $0x120] ss:$16 sps:$4 sm:$0xff]   ;;  %v5686_v39 = vld [vmem:[#allocation2 + $0x128] ss:$16 sps:$4 sm:$0xff]   ;;  %v5687_v40 = vld [vmem:[#allocation2 + $0x144] ss:$16 sps:$4 sm:$0xff]  }
  0x20   :  { %3704 = vmatpush1.bf16.msra.mxu0 %v5649_v14  ;;  %4181 = vmatpush1.bf16.msra.mxu1 %v5650_v15  ;;  %v5689_v41 = vld [vmem:[#allocation2 + $0x14c] ss:$16 sps:$4 sm:$0xff]   ;;  %v5691_v42 = vld [vmem:[#allocation2 + $0x140] ss:$16 sps:$4 sm:$0xff]   ;;  %v5692_v43 = vld [vmem:[#allocation2 + $0x148] ss:$16 sps:$4 sm:$0xff]  }
  0x21   :  { %3705 = vmatprep.subr.bf16.mxu0 %v5651_v16  ;;  %4182 = vmatprep.subr.bf16.mxu1 %v5653_v17  ;;  %v5693_v44 = vld [vmem:[#allocation2 + $0x164] ss:$16 sps:$4 sm:$0xff]   ;;  %v5695_v45 = vld [vmem:[#allocation2 + $0x16c] ss:$16 sps:$4 sm:$0xff]   ;;  %v5697_v46 = vld [vmem:[#allocation2 + $0x160] ss:$16 sps:$4 sm:$0xff]  }
  0x22   :  { %v5698_v47 = vld [vmem:[#allocation2 + $0x168] ss:$16 sps:$4 sm:$0xff]   ;;  %v5725_v48 = vld [vmem:[%s6830_s0 + $0x4] ss:$72 sps:$4 sm:$0xff]   ;;  %v5703_v51 = vld [vmem:[#allocation2 + $0x180] ss:$16 sps:$4 sm:$0xff]  }
  0x23   :  { %v5699_v49 = vld [vmem:[#allocation2 + $0x184] ss:$16 sps:$4 sm:$0xff]   ;;  %v5701_v50 = vld [vmem:[#allocation2 + $0x18c] ss:$16 sps:$4 sm:$0xff]   ;;  %3729 = vmatprep.mubr.bf16.mxu0 %v5725_v48  ;;  %4206 = vmatprep.mubr.bf16.mxu1 %v5725_v48  ;;  %v5704_v52 = vld [vmem:[#allocation2 + $0x188] ss:$16 sps:$4 sm:$0xff]  }
  0x24   :  { %3706 = vmatpush1.bf16.msra.mxu0 %v5655_v18  ;;  %4183 = vmatpush1.bf16.msra.mxu1 %v5656_v19  ;;  %v5705_v53 = vld [vmem:[#allocation2 + $0x1a4] ss:$16 sps:$4 sm:$0xff]   ;;  %v5707_v54 = vld [vmem:[#allocation2 + $0x1ac] ss:$16 sps:$4 sm:$0xff]   ;;  %v5709_v55 = vld [vmem:[#allocation2 + $0x1a0] ss:$16 sps:$4 sm:$0xff]  }
  0x25   :  { %3707 = vmatprep.subr.bf16.mxu0 %v5657_v20  ;;  %4184 = vmatprep.subr.bf16.mxu1 %v5659_v21  ;;  %v5710_v56 = vld [vmem:[#allocation2 + $0x1a8] ss:$16 sps:$4 sm:$0xff]   ;;  %v5711_v57 = vld [vmem:[#allocation2 + $0x1c4] ss:$16 sps:$4 sm:$0xff]   ;;  %v5713_v58 = vld [vmem:[#allocation2 + $0x1cc] ss:$16 sps:$4 sm:$0xff]  }
  0x26   :  { %v5715_v59 = vld [vmem:[#allocation2 + $0x1c0] ss:$16 sps:$4 sm:$0xff]   ;;  %v5716_v60 = vld [vmem:[#allocation2 + $0x1c8] ss:$16 sps:$4 sm:$0xff]   ;;  %v5717_v61 = vld [vmem:[#allocation2 + $0x1e4] ss:$16 sps:$4 sm:$0xff]  }
  0x27   :  { %v5719_v62 = vld [vmem:[#allocation2 + $0x1ec] ss:$16 sps:$4 sm:$0xff]   ;;  %v5721_v63 = vld [vmem:[#allocation2 + $0x1e0] ss:$16 sps:$4 sm:$0xff]   ;;  %v5722_v0 = vld [vmem:[#allocation2 + $0x1e8] ss:$16 sps:$4 sm:$0xff]  }
  0x28   :  { %3708 = vmatpush1.bf16.msra.mxu0 %v5661_v22  ;;  %4185 = vmatpush1.bf16.msra.mxu1 %v5662_v23  ;;  %v5728_v1 = vld [vmem:[#allocation2 + $0x204] ss:$16 sps:$4 sm:$0xff]   ;;  %v5731_v2 = vld [vmem:[#allocation2 + $0x20c] ss:$16 sps:$4 sm:$0xff]   ;;  %v5723_v3 = vld [vmem:[%s6830_s0] ss:$72 sps:$4 sm:$0xff]  }
  0x29   :  { %3709 = vmatprep.subr.bf16.mxu0 %v5663_v24  ;;  %4186 = vmatprep.subr.bf16.mxu1 %v5665_v25  ;;  %v5726_v4 = vld [vmem:[#allocation2 + $0x200] ss:$16 sps:$4 sm:$0xff]   ;;  %v5729_v5 = vld [vmem:[#allocation2 + $0x208] ss:$16 sps:$4 sm:$0xff]   ;;  %v5734_v6 = vld [vmem:[#allocation2 + $0x224] ss:$16 sps:$4 sm:$0xff]  }
  0x2a   :  { %v5737_v7 = vld [vmem:[#allocation2 + $0x22c] ss:$16 sps:$4 sm:$0xff]   ;;  %v5732_v8 = vld [vmem:[#allocation2 + $0x220] ss:$16 sps:$4 sm:$0xff]   ;;  %v5735_v9 = vld [vmem:[#allocation2 + $0x228] ss:$16 sps:$4 sm:$0xff]  }
  0x2b   :  { %v5740_v10 = vld [vmem:[#allocation2 + $0x244] ss:$16 sps:$4 sm:$0xff]   ;;  %v5743_v11 = vld [vmem:[#allocation2 + $0x24c] ss:$16 sps:$4 sm:$0xff]   ;;  %v5738_v12 = vld [vmem:[#allocation2 + $0x240] ss:$16 sps:$4 sm:$0xff]  }
  0x2c   :  { %3710 = vmatpush1.bf16.msra.mxu0 %v5667_v26  ;;  %4187 = vmatpush1.bf16.msra.mxu1 %v5668_v27  ;;  %v5741_v13 = vld [vmem:[#allocation2 + $0x248] ss:$16 sps:$4 sm:$0xff]   ;;  %v5746_v14 = vld [vmem:[#allocation2 + $0x264] ss:$16 sps:$4 sm:$0xff]   ;;  %v5749_v15 = vld [vmem:[#allocation2 + $0x26c] ss:$16 sps:$4 sm:$0xff]  }
  0x2d   :  { %3711 = vmatprep.subr.bf16.mxu0 %v5669_v28  ;;  %4188 = vmatprep.subr.bf16.mxu1 %v5671_v29  ;;  %v5744_v16 = vld [vmem:[#allocation2 + $0x260] ss:$16 sps:$4 sm:$0xff]   ;;  %v5747_v17 = vld [vmem:[#allocation2 + $0x268] ss:$16 sps:$4 sm:$0xff]   ;;  %v5752_v18 = vld [vmem:[#allocation2 + $0x284] ss:$16 sps:$4 sm:$0xff]  }
  0x2e   :  { %v5755_v19 = vld [vmem:[#allocation2 + $0x28c] ss:$16 sps:$4 sm:$0xff]   ;;  %v5750_v20 = vld [vmem:[#allocation2 + $0x280] ss:$16 sps:$4 sm:$0xff]   ;;  %v5753_v21 = vld [vmem:[#allocation2 + $0x288] ss:$16 sps:$4 sm:$0xff]  }
  0x2f   :  { %v5758_v22 = vld [vmem:[#allocation2 + $0x2a4] ss:$16 sps:$4 sm:$0xff]   ;;  %v5761_v23 = vld [vmem:[#allocation2 + $0x2ac] ss:$16 sps:$4 sm:$0xff]   ;;  %v5756_v25 = vld [vmem:[#allocation2 + $0x2a0] ss:$16 sps:$4 sm:$0xff]  }
  0x30   :  { %3712 = vmatpush1.bf16.msra.mxu0 %v5673_v30  ;;  %4189 = vmatpush1.bf16.msra.mxu1 %v5674_v31  ;;  %v5810_v24 = vld [vmem:[%s6830_s0 + $0x94] ss:$72 sps:$4 sm:$0xff]   ;;  %v5759_v26 = vld [vmem:[#allocation2 + $0x2a8] ss:$16 sps:$4 sm:$0xff]   ;;  %v5762_v30 = vld [vmem:[#allocation2 + $0x2c0] ss:$16 sps:$4 sm:$0xff]  }
  0x31   :  { %3713 = vmatprep.subr.bf16.mxu0 %v5675_v32  ;;  %4190 = vmatprep.subr.bf16.mxu1 %v5677_v33  ;;  %v5764_v27 = vld [vmem:[#allocation2 + $0x2c4] ss:$16 sps:$4 sm:$0xff]   ;;  %v5767_v28 = vld [vmem:[#allocation2 + $0x2cc] ss:$16 sps:$4 sm:$0xff]   ;;  %v5818_v29 = vld [vmem:[%s6830_s0 + $0x90] ss:$72 sps:$4 sm:$0xff]  }
  0x32   :  { %v5765_v31 = vld [vmem:[#allocation2 + $0x2c8] ss:$16 sps:$4 sm:$0xff]   ;;  %v5770_v32 = vld [vmem:[#allocation2 + $0x2e4] ss:$16 sps:$4 sm:$0xff]   ;;  %v5773_v33 = vld [vmem:[#allocation2 + $0x2ec] ss:$16 sps:$4 sm:$0xff]  }
  0x33   :  { %v5789_v48 = vld [vmem:[#allocation2 + $0x348] ss:$16 sps:$4 sm:$0xff]  }
  0x34   :  { %3714 = vmatpush1.bf16.msra.mxu0 %v5679_v34  ;;  %4191 = vmatpush1.bf16.msra.mxu1 %v5680_v35  ;;  %v5827_v34 = vld [vmem:[%s6830_s0 + $0xc] ss:$72 sps:$4 sm:$0xff]   ;;  %v5768_v35 = vld [vmem:[#allocation2 + $0x2e0] ss:$16 sps:$4 sm:$0xff]  }
  0x35   :  { %3715 = vmatprep.subr.bf16.mxu0 %v5681_v36  ;;  %4192 = vmatprep.subr.bf16.mxu1 %v5683_v37  ;;  %v5771_v36 = vld [vmem:[#allocation2 + $0x2e8] ss:$16 sps:$4 sm:$0xff]   ;;  %v5776_v37 = vld [vmem:[#allocation2 + $0x304] ss:$16 sps:$4 sm:$0xff]  }
  0x38   :  { %3716 = vmatpush1.bf16.msra.mxu0 %v5685_v38  ;;  %4193 = vmatpush1.bf16.msra.mxu1 %v5686_v39  ;;  %v5779_v38 = vld [vmem:[#allocation2 + $0x30c] ss:$16 sps:$4 sm:$0xff]   ;;  %v5774_v39 = vld [vmem:[#allocation2 + $0x300] ss:$16 sps:$4 sm:$0xff]  }
  0x39   :  { %3717 = vmatprep.subr.bf16.mxu0 %v5687_v40  ;;  %4194 = vmatprep.subr.bf16.mxu1 %v5689_v41  ;;  %v5777_v40 = vld [vmem:[#allocation2 + $0x308] ss:$16 sps:$4 sm:$0xff]   ;;  %v5782_v41 = vld [vmem:[#allocation2 + $0x324] ss:$16 sps:$4 sm:$0xff]  }
  0x3c   :  { %3718 = vmatpush1.bf16.msra.mxu0 %v5691_v42  ;;  %4195 = vmatpush1.bf16.msra.mxu1 %v5692_v43  ;;  %v5785_v42 = vld [vmem:[#allocation2 + $0x32c] ss:$16 sps:$4 sm:$0xff]   ;;  %v5780_v43 = vld [vmem:[#allocation2 + $0x320] ss:$16 sps:$4 sm:$0xff]  }
  0x3d   :  { %3719 = vmatprep.subr.bf16.mxu0 %v5693_v44  ;;  %4196 = vmatprep.subr.bf16.mxu1 %v5695_v45  ;;  %v5783_v44 = vld [vmem:[#allocation2 + $0x328] ss:$16 sps:$4 sm:$0xff]   ;;  %v5788_v45 = vld [vmem:[#allocation2 + $0x344] ss:$16 sps:$4 sm:$0xff]  }
  0x40   :  { %3720 = vmatpush1.bf16.msra.mxu0 %v5697_v46  ;;  %4197 = vmatpush1.bf16.msra.mxu1 %v5698_v47  ;;  %v5791_v46 = vld [vmem:[#allocation2 + $0x34c] ss:$16 sps:$4 sm:$0xff]   ;;  %v5786_v47 = vld [vmem:[#allocation2 + $0x340] ss:$16 sps:$4 sm:$0xff]  }
  0x41   :  { %3721 = vmatprep.subr.bf16.mxu0 %v5699_v49  ;;  %4198 = vmatprep.subr.bf16.mxu1 %v5701_v50  ;;  %v5794_v49 = vld [vmem:[#allocation2 + $0x364] ss:$16 sps:$4 sm:$0xff]   ;;  %v5797_v50 = vld [vmem:[#allocation2 + $0x36c] ss:$16 sps:$4 sm:$0xff]  }
  0x44   :  { %3722 = vmatpush1.bf16.msra.mxu0 %v5703_v51  ;;  %4199 = vmatpush1.bf16.msra.mxu1 %v5704_v52  ;;  %v5792_v51 = vld [vmem:[#allocation2 + $0x360] ss:$16 sps:$4 sm:$0xff]   ;;  %v5795_v52 = vld [vmem:[#allocation2 + $0x368] ss:$16 sps:$4 sm:$0xff]  }
  0x45   :  { %3723 = vmatprep.subr.bf16.mxu0 %v5705_v53  ;;  %4200 = vmatprep.subr.bf16.mxu1 %v5707_v54  ;;  %v5800_v53 = vld [vmem:[#allocation2 + $0x384] ss:$16 sps:$4 sm:$0xff]   ;;  %v5803_v54 = vld [vmem:[#allocation2 + $0x38c] ss:$16 sps:$4 sm:$0xff]  }
  0x48   :  { %3724 = vmatpush1.bf16.msra.mxu0 %v5709_v55  ;;  %4201 = vmatpush1.bf16.msra.mxu1 %v5710_v56  ;;  %v5798_v55 = vld [vmem:[#allocation2 + $0x380] ss:$16 sps:$4 sm:$0xff]   ;;  %v5801_v56 = vld [vmem:[#allocation2 + $0x388] ss:$16 sps:$4 sm:$0xff]  }
  0x49   :  { %3725 = vmatprep.subr.bf16.mxu0 %v5711_v57  ;;  %4202 = vmatprep.subr.bf16.mxu1 %v5713_v58  ;;  %v5806_v57 = vld [vmem:[#allocation2 + $0x3a4] ss:$16 sps:$4 sm:$0xff]   ;;  %v5809_v58 = vld [vmem:[#allocation2 + $0x3ac] ss:$16 sps:$4 sm:$0xff]  }
  0x4c   :  { %3726 = vmatpush1.bf16.msra.mxu0 %v5715_v59  ;;  %4203 = vmatpush1.bf16.msra.mxu1 %v5716_v60  ;;  %v5804_v59 = vld [vmem:[#allocation2 + $0x3a0] ss:$16 sps:$4 sm:$0xff]   ;;  %v5807_v60 = vld [vmem:[#allocation2 + $0x3a8] ss:$16 sps:$4 sm:$0xff]  }
  0x4d   :  { %3727 = vmatprep.subr.bf16.mxu0 %v5717_v61  ;;  %4204 = vmatprep.subr.bf16.mxu1 %v5719_v62  ;;  %v5814_v61 = vld [vmem:[#allocation2 + $0x3c4] ss:$16 sps:$4 sm:$0xff]   ;;  %v5817_v62 = vld [vmem:[#allocation2 + $0x3cc] ss:$16 sps:$4 sm:$0xff]  }
  0x50   :  { %3728 = vmatpush1.bf16.msra.mxu0 %v5721_v63  ;;  %4205 = vmatpush1.bf16.msra.mxu1 %v5722_v0  ;;  %v5812_v63 = vld [vmem:[#allocation2 + $0x3c0] ss:$16 sps:$4 sm:$0xff]   ;;  %v5815_v0 = vld [vmem:[#allocation2 + $0x3c8] ss:$16 sps:$4 sm:$0xff]  }
  0x51   :  { %3750 = vmatprep.subr.bf16.mxu0 %v5728_v1  ;;  %4227 = vmatprep.subr.bf16.mxu1 %v5731_v2  ;;  %v5821_v1 = vld [vmem:[#allocation2 + $0x3e4] ss:$16 sps:$4 sm:$0xff]   ;;  %v5824_v2 = vld [vmem:[#allocation2 + $0x3ec] ss:$16 sps:$4 sm:$0xff]  }
  0x53   :  { %3730 = vmatmul.mubr.bf16.vlgmr.msra.gmra.mrb[0].mxu0 %v5723_v3  ;;  %4207 = vmatmul.mubr.bf16.vlgmr.msra.gmra.mrb[0].mxu1 %v5723_v3  ;;  %v5819_v3 = vld [vmem:[#allocation2 + $0x3e0] ss:$16 sps:$4 sm:$0xff]  }
  0x54   :  { %3751 = vmatpush1.bf16.msra.mxu0 %v5726_v4  ;;  %4228 = vmatpush1.bf16.msra.mxu1 %v5729_v5  ;;  %v5822_v4 = vld [vmem:[#allocation2 + $0x3e8] ss:$16 sps:$4 sm:$0xff]   ;;  %v5830_v5 = vld [vmem:[#allocation2 + $0x404] ss:$16 sps:$4 sm:$0xff]  }
  0x55   :  { %3752 = vmatprep.subr.bf16.mxu0 %v5734_v6  ;;  %4229 = vmatprep.subr.bf16.mxu1 %v5737_v7  ;;  %v5833_v6 = vld [vmem:[#allocation2 + $0x40c] ss:$16 sps:$4 sm:$0xff]   ;;  %v5825_v7 = vld [vmem:[%s6830_s0 + $0x8] ss:$72 sps:$4 sm:$0xff]  }
  0x56   :  { %3739 = vmatprep.mubr.bf16.mxu0 %v5810_v24  ;;  %4216 = vmatprep.mubr.bf16.mxu1 %v5810_v24  ;;  %v5849_v24 = vld [vmem:[#allocation2 + $0x468] ss:$16 sps:$4 sm:$0xff]  }
  0x58   :  { %3753 = vmatpush1.bf16.msra.mxu0 %v5732_v8  ;;  %4230 = vmatpush1.bf16.msra.mxu1 %v5735_v9  ;;  %v5828_v8 = vld [vmem:[#allocation2 + $0x400] ss:$16 sps:$4 sm:$0xff]   ;;  %v5831_v9 = vld [vmem:[#allocation2 + $0x408] ss:$16 sps:$4 sm:$0xff]  }
  0x59   :  { %3754 = vmatprep.subr.bf16.mxu0 %v5740_v10  ;;  %4231 = vmatprep.subr.bf16.mxu1 %v5743_v11  ;;  %v5836_v10 = vld [vmem:[#allocation2 + $0x424] ss:$16 sps:$4 sm:$0xff]   ;;  %v5839_v11 = vld [vmem:[#allocation2 + $0x42c] ss:$16 sps:$4 sm:$0xff]  }
  0x5b   :  { %3740 = vmatmul.mubr.bf16.gmra.mrb[4].mxu0 %v5818_v29  ;;  %4217 = vmatmul.mubr.bf16.gmra.mrb[4].mxu1 %v5818_v29  ;;  %v5860_v29 = vld [vmem:[#allocation2 + $0x4a4] ss:$16 sps:$4 sm:$0xff]  }
  0x5c   :  { %3755 = vmatpush1.bf16.msra.mxu0 %v5738_v12  ;;  %4232 = vmatpush1.bf16.msra.mxu1 %v5741_v13  ;;  %v5912_v12 = vld [vmem:[%s6830_s0 + $0x9c] ss:$72 sps:$4 sm:$0xff]   ;;  %v5834_v13 = vld [vmem:[#allocation2 + $0x420] ss:$16 sps:$4 sm:$0xff]  }
  0x5d   :  { %3756 = vmatprep.subr.bf16.mxu0 %v5746_v14  ;;  %4233 = vmatprep.subr.bf16.mxu1 %v5749_v15  ;;  %v5837_v14 = vld [vmem:[#allocation2 + $0x428] ss:$16 sps:$4 sm:$0xff]   ;;  %v5842_v15 = vld [vmem:[#allocation2 + $0x444] ss:$16 sps:$4 sm:$0xff]  }
  0x5e   :  { %3782 = vmatprep.mubr.bf16.mxu0 %v5827_v34  ;;  %4259 = vmatprep.mubr.bf16.mxu1 %v5827_v34  ;;  %v5869_v34 = vld [vmem:[#allocation2 + $0x4cc] ss:$16 sps:$4 sm:$0xff]  }
  0x60   :  { %3757 = vmatpush1.bf16.msra.mxu0 %v5744_v16  ;;  %4234 = vmatpush1.bf16.msra.mxu1 %v5747_v17  ;;  %v5845_v16 = vld [vmem:[#allocation2 + $0x44c] ss:$16 sps:$4 sm:$0xff]   ;;  %v5840_v17 = vld [vmem:[#allocation2 + $0x440] ss:$16 sps:$4 sm:$0xff]  }
  0x61   :  { %3758 = vmatprep.subr.bf16.mxu0 %v5752_v18  ;;  %4235 = vmatprep.subr.bf16.mxu1 %v5755_v19  ;;  %v5843_v18 = vld [vmem:[#allocation2 + $0x448] ss:$16 sps:$4 sm:$0xff]  }
  0x62   :  { %v5920_v19 = vld [vmem:[%s6830_s0 + $0x98] ss:$72 sps:$4 sm:$0xff]  }
  0x64   :  { %3759 = vmatpush1.bf16.msra.mxu0 %v5750_v20  ;;  %4236 = vmatpush1.bf16.msra.mxu1 %v5753_v21  ;;  %v5848_v20 = vld [vmem:[#allocation2 + $0x464] ss:$16 sps:$4 sm:$0xff]   ;;  %v5851_v21 = vld [vmem:[#allocation2 + $0x46c] ss:$16 sps:$4 sm:$0xff]  }
  0x65   :  { %3760 = vmatprep.subr.bf16.mxu0 %v5758_v22  ;;  %4237 = vmatprep.subr.bf16.mxu1 %v5761_v23  ;;  %v5929_v22 = vld [vmem:[%s6830_s0 + $0x14] ss:$72 sps:$4 sm:$0xff]   ;;  %v5846_v23 = vld [vmem:[#allocation2 + $0x460] ss:$16 sps:$4 sm:$0xff]  }
  0x68   :  { %3761 = vmatpush1.bf16.msra.mxu0 %v5756_v25  ;;  %4238 = vmatpush1.bf16.msra.mxu1 %v5759_v26  ;;  %v5854_v25 = vld [vmem:[#allocation2 + $0x484] ss:$16 sps:$4 sm:$0xff]   ;;  %v5857_v26 = vld [vmem:[#allocation2 + $0x48c] ss:$16 sps:$4 sm:$0xff]  }
  0x69   :  { %3762 = vmatprep.subr.bf16.mxu0 %v5764_v27  ;;  %4239 = vmatprep.subr.bf16.mxu1 %v5767_v28  ;;  %v5852_v27 = vld [vmem:[#allocation2 + $0x480] ss:$16 sps:$4 sm:$0xff]   ;;  %v5855_v28 = vld [vmem:[#allocation2 + $0x488] ss:$16 sps:$4 sm:$0xff]  }
  0x6c   :  { %3763 = vmatpush1.bf16.msra.mxu0 %v5762_v30  ;;  %4240 = vmatpush1.bf16.msra.mxu1 %v5765_v31  ;;  %v5863_v30 = vld [vmem:[#allocation2 + $0x4ac] ss:$16 sps:$4 sm:$0xff]   ;;  %v5858_v31 = vld [vmem:[#allocation2 + $0x4a0] ss:$16 sps:$4 sm:$0xff]  }
  0x6d   :  { %3764 = vmatprep.subr.bf16.mxu0 %v5770_v32  ;;  %4241 = vmatprep.subr.bf16.mxu1 %v5773_v33  ;;  %v5861_v32 = vld [vmem:[#allocation2 + $0x4a8] ss:$16 sps:$4 sm:$0xff]   ;;  %v5866_v33 = vld [vmem:[#allocation2 + $0x4c4] ss:$16 sps:$4 sm:$0xff]  }
  0x70   :  { %3765 = vmatpush1.bf16.msra.mxu0 %v5768_v35  ;;  %4242 = vmatpush1.bf16.msra.mxu1 %v5771_v36  ;;  %v5864_v35 = vld [vmem:[#allocation2 + $0x4c0] ss:$16 sps:$4 sm:$0xff]   ;;  %v5867_v36 = vld [vmem:[#allocation2 + $0x4c8] ss:$16 sps:$4 sm:$0xff]  }
  0x71   :  { %3766 = vmatprep.subr.bf16.mxu0 %v5776_v37  ;;  %4243 = vmatprep.subr.bf16.mxu1 %v5779_v38  ;;  %v5872_v37 = vld [vmem:[#allocation2 + $0x4e4] ss:$16 sps:$4 sm:$0xff]   ;;  %v5875_v38 = vld [vmem:[#allocation2 + $0x4ec] ss:$16 sps:$4 sm:$0xff]  }
  0x74   :  { %3767 = vmatpush1.bf16.msra.mxu0 %v5774_v39  ;;  %4244 = vmatpush1.bf16.msra.mxu1 %v5777_v40  ;;  %v5870_v39 = vld [vmem:[#allocation2 + $0x4e0] ss:$16 sps:$4 sm:$0xff]   ;;  %v5873_v40 = vld [vmem:[#allocation2 + $0x4e8] ss:$16 sps:$4 sm:$0xff]  }
  0x75   :  { %3768 = vmatprep.subr.bf16.mxu0 %v5782_v41  ;;  %4245 = vmatprep.subr.bf16.mxu1 %v5785_v42  ;;  %v5878_v41 = vld [vmem:[#allocation2 + $0x504] ss:$16 sps:$4 sm:$0xff]   ;;  %v5881_v42 = vld [vmem:[#allocation2 + $0x50c] ss:$16 sps:$4 sm:$0xff]  }
  0x78   :  { %3769 = vmatpush1.bf16.msra.mxu0 %v5780_v43  ;;  %4246 = vmatpush1.bf16.msra.mxu1 %v5783_v44  ;;  %v5876_v43 = vld [vmem:[#allocation2 + $0x500] ss:$16 sps:$4 sm:$0xff]   ;;  %v5879_v44 = vld [vmem:[#allocation2 + $0x508] ss:$16 sps:$4 sm:$0xff]  }
  0x79   :  { %3770 = vmatprep.subr.bf16.mxu0 %v5788_v45  ;;  %4247 = vmatprep.subr.bf16.mxu1 %v5791_v46  ;;  %v5884_v45 = vld [vmem:[#allocation2 + $0x524] ss:$16 sps:$4 sm:$0xff]   ;;  %v5887_v46 = vld [vmem:[#allocation2 + $0x52c] ss:$16 sps:$4 sm:$0xff]  }
  0x7c   :  { %3771 = vmatpush1.bf16.msra.mxu0 %v5786_v47  ;;  %4248 = vmatpush1.bf16.msra.mxu1 %v5789_v48  ;;  %v5882_v47 = vld [vmem:[#allocation2 + $0x520] ss:$16 sps:$4 sm:$0xff]   ;;  %v5885_v48 = vld [vmem:[#allocation2 + $0x528] ss:$16 sps:$4 sm:$0xff]  }
  0x7d   :  { %3772 = vmatprep.subr.bf16.mxu0 %v5794_v49  ;;  %4249 = vmatprep.subr.bf16.mxu1 %v5797_v50  ;;  %v5890_v49 = vld [vmem:[#allocation2 + $0x544] ss:$16 sps:$4 sm:$0xff]   ;;  %v5893_v50 = vld [vmem:[#allocation2 + $0x54c] ss:$16 sps:$4 sm:$0xff]  }
  0x80   :  { %3773 = vmatpush1.bf16.msra.mxu0 %v5792_v51  ;;  %4250 = vmatpush1.bf16.msra.mxu1 %v5795_v52  ;;  %v5888_v51 = vld [vmem:[#allocation2 + $0x540] ss:$16 sps:$4 sm:$0xff]   ;;  %v5891_v52 = vld [vmem:[#allocation2 + $0x548] ss:$16 sps:$4 sm:$0xff]  }
  0x81   :  { %3774 = vmatprep.subr.bf16.mxu0 %v5800_v53  ;;  %4251 = vmatprep.subr.bf16.mxu1 %v5803_v54  ;;  %v5896_v53 = vld [vmem:[#allocation2 + $0x564] ss:$16 sps:$4 sm:$0xff]   ;;  %v5899_v54 = vld [vmem:[#allocation2 + $0x56c] ss:$16 sps:$4 sm:$0xff]  }
  0x84   :  { %3775 = vmatpush1.bf16.msra.mxu0 %v5798_v55  ;;  %4252 = vmatpush1.bf16.msra.mxu1 %v5801_v56  ;;  %v5894_v55 = vld [vmem:[#allocation2 + $0x560] ss:$16 sps:$4 sm:$0xff]   ;;  %v5897_v56 = vld [vmem:[#allocation2 + $0x568] ss:$16 sps:$4 sm:$0xff]  }
  0x85   :  { %3776 = vmatprep.subr.bf16.mxu0 %v5806_v57  ;;  %4253 = vmatprep.subr.bf16.mxu1 %v5809_v58  ;;  %v5902_v57 = vld [vmem:[#allocation2 + $0x584] ss:$16 sps:$4 sm:$0xff]   ;;  %v5905_v58 = vld [vmem:[#allocation2 + $0x58c] ss:$16 sps:$4 sm:$0xff]  }
  0x88   :  { %3777 = vmatpush1.bf16.msra.mxu0 %v5804_v59  ;;  %4254 = vmatpush1.bf16.msra.mxu1 %v5807_v60  ;;  %v5900_v59 = vld [vmem:[#allocation2 + $0x580] ss:$16 sps:$4 sm:$0xff]   ;;  %v5903_v60 = vld [vmem:[#allocation2 + $0x588] ss:$16 sps:$4 sm:$0xff]  }
  0x89   :  { %3778 = vmatprep.subr.bf16.mxu0 %v5814_v61  ;;  %4255 = vmatprep.subr.bf16.mxu1 %v5817_v62  ;;  %v5908_v61 = vld [vmem:[#allocation2 + $0x5a4] ss:$16 sps:$4 sm:$0xff]   ;;  %v5911_v62 = vld [vmem:[#allocation2 + $0x5ac] ss:$16 sps:$4 sm:$0xff]  }
  0x8c   :  { %3779 = vmatpush1.bf16.msra.mxu0 %v5812_v63  ;;  %4256 = vmatpush1.bf16.msra.mxu1 %v5815_v0  ;;  %v5906_v63 = vld [vmem:[#allocation2 + $0x5a0] ss:$16 sps:$4 sm:$0xff]   ;;  %v5909_v0 = vld [vmem:[#allocation2 + $0x5a8] ss:$16 sps:$4 sm:$0xff]  }
  0x8d   :  { %3780 = vmatprep.subr.bf16.mxu0 %v5821_v1  ;;  %4257 = vmatprep.subr.bf16.mxu1 %v5824_v2  ;;  %v5916_v1 = vld [vmem:[#allocation2 + $0x5c4] ss:$16 sps:$4 sm:$0xff]   ;;  %v5919_v2 = vld [vmem:[#allocation2 + $0x5cc] ss:$16 sps:$4 sm:$0xff]  }
  0x90   :  { %3781 = vmatpush1.bf16.msra.mxu0 %v5819_v3  ;;  %4258 = vmatpush1.bf16.msra.mxu1 %v5822_v4  ;;  %v5914_v3 = vld [vmem:[#allocation2 + $0x5c0] ss:$16 sps:$4 sm:$0xff]   ;;  %v5917_v4 = vld [vmem:[#allocation2 + $0x5c8] ss:$16 sps:$4 sm:$0xff]  }
  0x91   :  { %3803 = vmatprep.subr.bf16.mxu0 %v5830_v5  ;;  %4280 = vmatprep.subr.bf16.mxu1 %v5833_v6  ;;  %v5923_v5 = vld [vmem:[#allocation2 + $0x5e4] ss:$16 sps:$4 sm:$0xff]   ;;  %v5926_v6 = vld [vmem:[#allocation2 + $0x5ec] ss:$16 sps:$4 sm:$0xff]  }
  0x93   :  { %3783 = vmatmul.mubr.bf16.vlgmr.msra.gmra.mrb[0].mxu0 %v5825_v7  ;;  %4260 = vmatmul.mubr.bf16.vlgmr.msra.gmra.mrb[0].mxu1 %v5825_v7  ;;  %v5921_v7 = vld [vmem:[#allocation2 + $0x5e0] ss:$16 sps:$4 sm:$0xff]  }
  0x94   :  { %3804 = vmatpush1.bf16.msra.mxu0 %v5828_v8  ;;  %4281 = vmatpush1.bf16.msra.mxu1 %v5831_v9  ;;  %v5924_v8 = vld [vmem:[#allocation2 + $0x5e8] ss:$16 sps:$4 sm:$0xff]   ;;  %v5932_v9 = vld [vmem:[#allocation2 + $0x604] ss:$16 sps:$4 sm:$0xff]  }
  0x95   :  { %3805 = vmatprep.subr.bf16.mxu0 %v5836_v10  ;;  %4282 = vmatprep.subr.bf16.mxu1 %v5839_v11  ;;  %v5935_v10 = vld [vmem:[#allocation2 + $0x60c] ss:$16 sps:$4 sm:$0xff]   ;;  %v5927_v11 = vld [vmem:[%s6830_s0 + $0x10] ss:$72 sps:$4 sm:$0xff]  }
  0x96   :  { %3792 = vmatprep.mubr.bf16.mxu0 %v5912_v12  ;;  %4269 = vmatprep.mubr.bf16.mxu1 %v5912_v12  ;;  %v5930_v12 = vld [vmem:[#allocation2 + $0x600] ss:$16 sps:$4 sm:$0xff]  }
  0x98   :  { %3806 = vmatpush1.bf16.msra.mxu0 %v5834_v13  ;;  %4283 = vmatpush1.bf16.msra.mxu1 %v5837_v14  ;;  %v5933_v13 = vld [vmem:[#allocation2 + $0x608] ss:$16 sps:$4 sm:$0xff]   ;;  %v5938_v14 = vld [vmem:[#allocation2 + $0x624] ss:$16 sps:$4 sm:$0xff]  }
  0x99   :  { %3807 = vmatprep.subr.bf16.mxu0 %v5842_v15  ;;  %4284 = vmatprep.subr.bf16.mxu1 %v5845_v16  ;;  %v5941_v15 = vld [vmem:[#allocation2 + $0x62c] ss:$16 sps:$4 sm:$0xff]  }
  0x9a   :  { %v6014_v16 = vld [vmem:[%s6830_s0 + $0xa4] ss:$72 sps:$4 sm:$0xff]  }
  0x9b   :  { %3793 = vmatmul.mubr.bf16.gmra.mrb[4].mxu0 %v5920_v19  ;;  %4270 = vmatmul.mubr.bf16.gmra.mrb[4].mxu1 %v5920_v19  ;;  %v5944_v19 = vld [vmem:[#allocation2 + $0x644] ss:$16 sps:$4 sm:$0xff]  }
  0x9c   :  { %3808 = vmatpush1.bf16.msra.mxu0 %v5840_v17  ;;  %4285 = vmatpush1.bf16.msra.mxu1 %v5843_v18  ;;  %v5936_v17 = vld [vmem:[#allocation2 + $0x620] ss:$16 sps:$4 sm:$0xff]   ;;  %v5939_v18 = vld [vmem:[#allocation2 + $0x628] ss:$16 sps:$4 sm:$0xff]  }
  0x9d   :  { %3809 = vmatprep.subr.bf16.mxu0 %v5848_v20  ;;  %4286 = vmatprep.subr.bf16.mxu1 %v5851_v21  ;;  %v5947_v20 = vld [vmem:[#allocation2 + $0x64c] ss:$16 sps:$4 sm:$0xff]   ;;  %v5942_v21 = vld [vmem:[#allocation2 + $0x640] ss:$16 sps:$4 sm:$0xff]  }
  0x9e   :  { %3835 = vmatprep.mubr.bf16.mxu0 %v5929_v22  ;;  %4312 = vmatprep.mubr.bf16.mxu1 %v5929_v22  ;;  %v5945_v22 = vld [vmem:[#allocation2 + $0x648] ss:$16 sps:$4 sm:$0xff]  }
  0xa0   :  { %3810 = vmatpush1.bf16.msra.mxu0 %v5846_v23  ;;  %4287 = vmatpush1.bf16.msra.mxu1 %v5849_v24  ;;  %v6022_v23 = vld [vmem:[%s6830_s0 + $0xa0] ss:$72 sps:$4 sm:$0xff]   ;;  %v5950_v24 = vld [vmem:[#allocation2 + $0x664] ss:$16 sps:$4 sm:$0xff]  }
  0xa1   :  { %3811 = vmatprep.subr.bf16.mxu0 %v5854_v25  ;;  %4288 = vmatprep.subr.bf16.mxu1 %v5857_v26  ;;  %v5953_v25 = vld [vmem:[#allocation2 + $0x66c] ss:$16 sps:$4 sm:$0xff]  }
  0xa2   :  { %v6031_v26 = vld [vmem:[%s6830_s0 + $0x1c] ss:$72 sps:$4 sm:$0xff]  }
  0xa4   :  { %3812 = vmatpush1.bf16.msra.mxu0 %v5852_v27  ;;  %4289 = vmatpush1.bf16.msra.mxu1 %v5855_v28  ;;  %v5948_v27 = vld [vmem:[#allocation2 + $0x660] ss:$16 sps:$4 sm:$0xff]   ;;  %v5951_v28 = vld [vmem:[#allocation2 + $0x668] ss:$16 sps:$4 sm:$0xff]  }
  0xa5   :  { %3813 = vmatprep.subr.bf16.mxu0 %v5860_v29  ;;  %4290 = vmatprep.subr.bf16.mxu1 %v5863_v30  ;;  %v5956_v29 = vld [vmem:[#allocation2 + $0x684] ss:$16 sps:$4 sm:$0xff]   ;;  %v5959_v30 = vld [vmem:[#allocation2 + $0x68c] ss:$16 sps:$4 sm:$0xff]  }
  0xa8   :  { %3814 = vmatpush1.bf16.msra.mxu0 %v5858_v31  ;;  %4291 = vmatpush1.bf16.msra.mxu1 %v5861_v32  ;;  %v5954_v31 = vld [vmem:[#allocation2 + $0x680] ss:$16 sps:$4 sm:$0xff]   ;;  %v5957_v32 = vld [vmem:[#allocation2 + $0x688] ss:$16 sps:$4 sm:$0xff]  }
  0xa9   :  { %3815 = vmatprep.subr.bf16.mxu0 %v5866_v33  ;;  %4292 = vmatprep.subr.bf16.mxu1 %v5869_v34  ;;  %v5962_v33 = vld [vmem:[#allocation2 + $0x6a4] ss:$16 sps:$4 sm:$0xff]   ;;  %v5965_v34 = vld [vmem:[#allocation2 + $0x6ac] ss:$16 sps:$4 sm:$0xff]  }
  0xac   :  { %3816 = vmatpush1.bf16.msra.mxu0 %v5864_v35  ;;  %4293 = vmatpush1.bf16.msra.mxu1 %v5867_v36  ;;  %v5960_v35 = vld [vmem:[#allocation2 + $0x6a0] ss:$16 sps:$4 sm:$0xff]   ;;  %v5963_v36 = vld [vmem:[#allocation2 + $0x6a8] ss:$16 sps:$4 sm:$0xff]  }
  0xad   :  { %3817 = vmatprep.subr.bf16.mxu0 %v5872_v37  ;;  %4294 = vmatprep.subr.bf16.mxu1 %v5875_v38  ;;  %v5968_v37 = vld [vmem:[#allocation2 + $0x6c4] ss:$16 sps:$4 sm:$0xff]   ;;  %v5971_v38 = vld [vmem:[#allocation2 + $0x6cc] ss:$16 sps:$4 sm:$0xff]  }
  0xb0   :  { %3818 = vmatpush1.bf16.msra.mxu0 %v5870_v39  ;;  %4295 = vmatpush1.bf16.msra.mxu1 %v5873_v40  ;;  %v5966_v39 = vld [vmem:[#allocation2 + $0x6c0] ss:$16 sps:$4 sm:$0xff]   ;;  %v5969_v40 = vld [vmem:[#allocation2 + $0x6c8] ss:$16 sps:$4 sm:$0xff]  }
  0xb1   :  { %3819 = vmatprep.subr.bf16.mxu0 %v5878_v41  ;;  %4296 = vmatprep.subr.bf16.mxu1 %v5881_v42  ;;  %v5974_v41 = vld [vmem:[#allocation2 + $0x6e4] ss:$16 sps:$4 sm:$0xff]   ;;  %v5977_v42 = vld [vmem:[#allocation2 + $0x6ec] ss:$16 sps:$4 sm:$0xff]  }
  0xb4   :  { %3820 = vmatpush1.bf16.msra.mxu0 %v5876_v43  ;;  %4297 = vmatpush1.bf16.msra.mxu1 %v5879_v44  ;;  %v5972_v43 = vld [vmem:[#allocation2 + $0x6e0] ss:$16 sps:$4 sm:$0xff]   ;;  %v5975_v44 = vld [vmem:[#allocation2 + $0x6e8] ss:$16 sps:$4 sm:$0xff]  }
  0xb5   :  { %3821 = vmatprep.subr.bf16.mxu0 %v5884_v45  ;;  %4298 = vmatprep.subr.bf16.mxu1 %v5887_v46  ;;  %v5980_v45 = vld [vmem:[#allocation2 + $0x704] ss:$16 sps:$4 sm:$0xff]   ;;  %v5983_v46 = vld [vmem:[#allocation2 + $0x70c] ss:$16 sps:$4 sm:$0xff]  }
  0xb8   :  { %3822 = vmatpush1.bf16.msra.mxu0 %v5882_v47  ;;  %4299 = vmatpush1.bf16.msra.mxu1 %v5885_v48  ;;  %v5978_v47 = vld [vmem:[#allocation2 + $0x700] ss:$16 sps:$4 sm:$0xff]   ;;  %v5981_v48 = vld [vmem:[#allocation2 + $0x708] ss:$16 sps:$4 sm:$0xff]  }
  0xb9   :  { %3823 = vmatprep.subr.bf16.mxu0 %v5890_v49  ;;  %4300 = vmatprep.subr.bf16.mxu1 %v5893_v50  ;;  %v5986_v49 = vld [vmem:[#allocation2 + $0x724] ss:$16 sps:$4 sm:$0xff]   ;;  %v5989_v50 = vld [vmem:[#allocation2 + $0x72c] ss:$16 sps:$4 sm:$0xff]  }
  0xbc   :  { %3824 = vmatpush1.bf16.msra.mxu0 %v5888_v51  ;;  %4301 = vmatpush1.bf16.msra.mxu1 %v5891_v52  ;;  %v5984_v51 = vld [vmem:[#allocation2 + $0x720] ss:$16 sps:$4 sm:$0xff]   ;;  %v5987_v52 = vld [vmem:[#allocation2 + $0x728] ss:$16 sps:$4 sm:$0xff]  }
  0xbd   :  { %3825 = vmatprep.subr.bf16.mxu0 %v5896_v53  ;;  %4302 = vmatprep.subr.bf16.mxu1 %v5899_v54  ;;  %v5992_v53 = vld [vmem:[#allocation2 + $0x744] ss:$16 sps:$4 sm:$0xff]   ;;  %v5995_v54 = vld [vmem:[#allocation2 + $0x74c] ss:$16 sps:$4 sm:$0xff]  }
  0xc0   :  { %3826 = vmatpush1.bf16.msra.mxu0 %v5894_v55  ;;  %4303 = vmatpush1.bf16.msra.mxu1 %v5897_v56  ;;  %v5990_v55 = vld [vmem:[#allocation2 + $0x740] ss:$16 sps:$4 sm:$0xff]   ;;  %v5993_v56 = vld [vmem:[#allocation2 + $0x748] ss:$16 sps:$4 sm:$0xff]  }
  0xc1   :  { %3827 = vmatprep.subr.bf16.mxu0 %v5902_v57  ;;  %4304 = vmatprep.subr.bf16.mxu1 %v5905_v58  ;;  %v5998_v57 = vld [vmem:[#allocation2 + $0x764] ss:$16 sps:$4 sm:$0xff]   ;;  %v6001_v58 = vld [vmem:[#allocation2 + $0x76c] ss:$16 sps:$4 sm:$0xff]  }
  0xc4   :  { %3828 = vmatpush1.bf16.msra.mxu0 %v5900_v59  ;;  %4305 = vmatpush1.bf16.msra.mxu1 %v5903_v60  ;;  %v5996_v59 = vld [vmem:[#allocation2 + $0x760] ss:$16 sps:$4 sm:$0xff]   ;;  %v5999_v60 = vld [vmem:[#allocation2 + $0x768] ss:$16 sps:$4 sm:$0xff]  }
  0xc5   :  { %3829 = vmatprep.subr.bf16.mxu0 %v5908_v61  ;;  %4306 = vmatprep.subr.bf16.mxu1 %v5911_v62  ;;  %v6004_v61 = vld [vmem:[#allocation2 + $0x784] ss:$16 sps:$4 sm:$0xff]   ;;  %v6007_v62 = vld [vmem:[#allocation2 + $0x78c] ss:$16 sps:$4 sm:$0xff]  }
  0xc8   :  { %3830 = vmatpush1.bf16.msra.mxu0 %v5906_v63  ;;  %4307 = vmatpush1.bf16.msra.mxu1 %v5909_v0  ;;  %v6002_v63 = vld [vmem:[#allocation2 + $0x780] ss:$16 sps:$4 sm:$0xff]   ;;  %v6005_v0 = vld [vmem:[#allocation2 + $0x788] ss:$16 sps:$4 sm:$0xff]  }
  0xc9   :  { %3831 = vmatprep.subr.bf16.mxu0 %v5916_v1  ;;  %4308 = vmatprep.subr.bf16.mxu1 %v5919_v2  ;;  %v6010_v1 = vld [vmem:[#allocation2 + $0x7a4] ss:$16 sps:$4 sm:$0xff]   ;;  %v6013_v2 = vld [vmem:[#allocation2 + $0x7ac] ss:$16 sps:$4 sm:$0xff]  }
  0xcc   :  { %3832 = vmatpush1.bf16.msra.mxu0 %v5914_v3  ;;  %4309 = vmatpush1.bf16.msra.mxu1 %v5917_v4  ;;  %v6008_v3 = vld [vmem:[#allocation2 + $0x7a0] ss:$16 sps:$4 sm:$0xff]   ;;  %v6011_v4 = vld [vmem:[#allocation2 + $0x7a8] ss:$16 sps:$4 sm:$0xff]  }
  0xcd   :  { %3833 = vmatprep.subr.bf16.mxu0 %v5923_v5  ;;  %4310 = vmatprep.subr.bf16.mxu1 %v5926_v6  ;;  %v6018_v5 = vld [vmem:[#allocation2 + $0x7c4] ss:$16 sps:$4 sm:$0xff]   ;;  %v6021_v6 = vld [vmem:[#allocation2 + $0x7cc] ss:$16 sps:$4 sm:$0xff]  }
  0xd0   :  { %3834 = vmatpush1.bf16.msra.mxu0 %v5921_v7  ;;  %4311 = vmatpush1.bf16.msra.mxu1 %v5924_v8  ;;  %v6016_v7 = vld [vmem:[#allocation2 + $0x7c0] ss:$16 sps:$4 sm:$0xff]   ;;  %v6019_v8 = vld [vmem:[#allocation2 + $0x7c8] ss:$16 sps:$4 sm:$0xff]  }
  0xd1   :  { %3856 = vmatprep.subr.bf16.mxu0 %v5932_v9  ;;  %4333 = vmatprep.subr.bf16.mxu1 %v5935_v10  ;;  %v6025_v9 = vld [vmem:[#allocation2 + $0x7e4] ss:$16 sps:$4 sm:$0xff]   ;;  %v6028_v10 = vld [vmem:[#allocation2 + $0x7ec] ss:$16 sps:$4 sm:$0xff]  }
  0xd3   :  { %3836 = vmatmul.mubr.bf16.vlgmr.msra.gmra.mrb[0].mxu0 %v5927_v11  ;;  %4313 = vmatmul.mubr.bf16.vlgmr.msra.gmra.mrb[0].mxu1 %v5927_v11  ;;  %v6023_v11 = vld [vmem:[#allocation2 + $0x7e0] ss:$16 sps:$4 sm:$0xff]  }
  0xd4   :  { %3857 = vmatpush1.bf16.msra.mxu0 %v5930_v12  ;;  %4334 = vmatpush1.bf16.msra.mxu1 %v5933_v13  ;;  %v6026_v12 = vld [vmem:[#allocation2 + $0x7e8] ss:$16 sps:$4 sm:$0xff]   ;;  %v6034_v13 = vld [vmem:[#allocation2 + $0x804] ss:$16 sps:$4 sm:$0xff]  }
  0xd5   :  { %3858 = vmatprep.subr.bf16.mxu0 %v5938_v14  ;;  %4335 = vmatprep.subr.bf16.mxu1 %v5941_v15  ;;  %v6037_v14 = vld [vmem:[#allocation2 + $0x80c] ss:$16 sps:$4 sm:$0xff]   ;;  %v6029_v15 = vld [vmem:[%s6830_s0 + $0x18] ss:$72 sps:$4 sm:$0xff]  }
  0xd6   :  { %3845 = vmatprep.mubr.bf16.mxu0 %v6014_v16  ;;  %4322 = vmatprep.mubr.bf16.mxu1 %v6014_v16  ;;  %v6032_v16 = vld [vmem:[#allocation2 + $0x800] ss:$16 sps:$4 sm:$0xff]  }
  0xd8   :  { %3859 = vmatpush1.bf16.msra.mxu0 %v5936_v17  ;;  %4336 = vmatpush1.bf16.msra.mxu1 %v5939_v18  ;;  %v6035_v17 = vld [vmem:[#allocation2 + $0x808] ss:$16 sps:$4 sm:$0xff]   ;;  %v6040_v18 = vld [vmem:[#allocation2 + $0x824] ss:$16 sps:$4 sm:$0xff]  }
  0xd9   :  { %3860 = vmatprep.subr.bf16.mxu0 %v5944_v19  ;;  %4337 = vmatprep.subr.bf16.mxu1 %v5947_v20  ;;  %v6043_v19 = vld [vmem:[#allocation2 + $0x82c] ss:$16 sps:$4 sm:$0xff]  }
  0xda   :  { %v6116_v20 = vld [vmem:[%s6830_s0 + $0xac] ss:$72 sps:$4 sm:$0xff]  }
  0xdb   :  { %3846 = vmatmul.mubr.bf16.gmra.mrb[4].mxu0 %v6022_v23  ;;  %4323 = vmatmul.mubr.bf16.gmra.mrb[4].mxu1 %v6022_v23  ;;  %v6046_v23 = vld [vmem:[#allocation2 + $0x844] ss:$16 sps:$4 sm:$0xff]  }
  0xdc   :  { %3861 = vmatpush1.bf16.msra.mxu0 %v5942_v21  ;;  %4338 = vmatpush1.bf16.msra.mxu1 %v5945_v22  ;;  %v6038_v21 = vld [vmem:[#allocation2 + $0x820] ss:$16 sps:$4 sm:$0xff]   ;;  %v6041_v22 = vld [vmem:[#allocation2 + $0x828] ss:$16 sps:$4 sm:$0xff]  }
  0xdd   :  { %3862 = vmatprep.subr.bf16.mxu0 %v5950_v24  ;;  %4339 = vmatprep.subr.bf16.mxu1 %v5953_v25  ;;  %v6049_v24 = vld [vmem:[#allocation2 + $0x84c] ss:$16 sps:$4 sm:$0xff]   ;;  %v6044_v25 = vld [vmem:[#allocation2 + $0x840] ss:$16 sps:$4 sm:$0xff]  }
  0xde   :  { %3888 = vmatprep.mubr.bf16.mxu0 %v6031_v26  ;;  %4365 = vmatprep.mubr.bf16.mxu1 %v6031_v26  ;;  %v6124_v26 = vld [vmem:[%s6830_s0 + $0xa8] ss:$72 sps:$4 sm:$0xff]  }
  0xe0   :  { %3863 = vmatpush1.bf16.msra.mxu0 %v5948_v27  ;;  %4340 = vmatpush1.bf16.msra.mxu1 %v5951_v28  ;;  %v6047_v27 = vld [vmem:[#allocation2 + $0x848] ss:$16 sps:$4 sm:$0xff]   ;;  %v6052_v28 = vld [vmem:[#allocation2 + $0x864] ss:$16 sps:$4 sm:$0xff]  }
  0xe1   :  { %3864 = vmatprep.subr.bf16.mxu0 %v5956_v29  ;;  %4341 = vmatprep.subr.bf16.mxu1 %v5959_v30  ;;  %v6055_v29 = vld [vmem:[#allocation2 + $0x86c] ss:$16 sps:$4 sm:$0xff]  }
  0xe2   :  { %v6133_v30 = vld [vmem:[%s6830_s0 + $0x24] ss:$72 sps:$4 sm:$0xff]  }
  0xe4   :  { %3865 = vmatpush1.bf16.msra.mxu0 %v5954_v31  ;;  %4342 = vmatpush1.bf16.msra.mxu1 %v5957_v32  ;;  %v6050_v31 = vld [vmem:[#allocation2 + $0x860] ss:$16 sps:$4 sm:$0xff]   ;;  %v6053_v32 = vld [vmem:[#allocation2 + $0x868] ss:$16 sps:$4 sm:$0xff]  }
  0xe5   :  { %3866 = vmatprep.subr.bf16.mxu0 %v5962_v33  ;;  %4343 = vmatprep.subr.bf16.mxu1 %v5965_v34  ;;  %v6058_v33 = vld [vmem:[#allocation2 + $0x884] ss:$16 sps:$4 sm:$0xff]   ;;  %v6061_v34 = vld [vmem:[#allocation2 + $0x88c] ss:$16 sps:$4 sm:$0xff]  }
  0xe8   :  { %3867 = vmatpush1.bf16.msra.mxu0 %v5960_v35  ;;  %4344 = vmatpush1.bf16.msra.mxu1 %v5963_v36  ;;  %v6056_v35 = vld [vmem:[#allocation2 + $0x880] ss:$16 sps:$4 sm:$0xff]   ;;  %v6059_v36 = vld [vmem:[#allocation2 + $0x888] ss:$16 sps:$4 sm:$0xff]  }
  0xe9   :  { %3868 = vmatprep.subr.bf16.mxu0 %v5968_v37  ;;  %4345 = vmatprep.subr.bf16.mxu1 %v5971_v38  ;;  %v6064_v37 = vld [vmem:[#allocation2 + $0x8a4] ss:$16 sps:$4 sm:$0xff]   ;;  %v6067_v38 = vld [vmem:[#allocation2 + $0x8ac] ss:$16 sps:$4 sm:$0xff]  }
  0xec   :  { %3869 = vmatpush1.bf16.msra.mxu0 %v5966_v39  ;;  %4346 = vmatpush1.bf16.msra.mxu1 %v5969_v40  ;;  %v6062_v39 = vld [vmem:[#allocation2 + $0x8a0] ss:$16 sps:$4 sm:$0xff]   ;;  %v6065_v40 = vld [vmem:[#allocation2 + $0x8a8] ss:$16 sps:$4 sm:$0xff]  }
  0xed   :  { %3870 = vmatprep.subr.bf16.mxu0 %v5974_v41  ;;  %4347 = vmatprep.subr.bf16.mxu1 %v5977_v42  ;;  %v6070_v41 = vld [vmem:[#allocation2 + $0x8c4] ss:$16 sps:$4 sm:$0xff]   ;;  %v6073_v42 = vld [vmem:[#allocation2 + $0x8cc] ss:$16 sps:$4 sm:$0xff]  }
  0xf0   :  { %3871 = vmatpush1.bf16.msra.mxu0 %v5972_v43  ;;  %4348 = vmatpush1.bf16.msra.mxu1 %v5975_v44  ;;  %v6068_v43 = vld [vmem:[#allocation2 + $0x8c0] ss:$16 sps:$4 sm:$0xff]   ;;  %v6071_v44 = vld [vmem:[#allocation2 + $0x8c8] ss:$16 sps:$4 sm:$0xff]  }
  0xf1   :  { %3872 = vmatprep.subr.bf16.mxu0 %v5980_v45  ;;  %4349 = vmatprep.subr.bf16.mxu1 %v5983_v46  ;;  %v6076_v45 = vld [vmem:[#allocation2 + $0x8e4] ss:$16 sps:$4 sm:$0xff]   ;;  %v6079_v46 = vld [vmem:[#allocation2 + $0x8ec] ss:$16 sps:$4 sm:$0xff]  }
  0xf4   :  { %3873 = vmatpush1.bf16.msra.mxu0 %v5978_v47  ;;  %4350 = vmatpush1.bf16.msra.mxu1 %v5981_v48  ;;  %v6074_v47 = vld [vmem:[#allocation2 + $0x8e0] ss:$16 sps:$4 sm:$0xff]   ;;  %v6077_v48 = vld [vmem:[#allocation2 + $0x8e8] ss:$16 sps:$4 sm:$0xff]  }
  0xf5   :  { %3874 = vmatprep.subr.bf16.mxu0 %v5986_v49  ;;  %4351 = vmatprep.subr.bf16.mxu1 %v5989_v50  ;;  %v6082_v49 = vld [vmem:[#allocation2 + $0x904] ss:$16 sps:$4 sm:$0xff]   ;;  %v6085_v50 = vld [vmem:[#allocation2 + $0x90c] ss:$16 sps:$4 sm:$0xff]  }
  0xf8   :  { %3875 = vmatpush1.bf16.msra.mxu0 %v5984_v51  ;;  %4352 = vmatpush1.bf16.msra.mxu1 %v5987_v52  ;;  %v6080_v51 = vld [vmem:[#allocation2 + $0x900] ss:$16 sps:$4 sm:$0xff]   ;;  %v6083_v52 = vld [vmem:[#allocation2 + $0x908] ss:$16 sps:$4 sm:$0xff]  }
  0xf9   :  { %3876 = vmatprep.subr.bf16.mxu0 %v5992_v53  ;;  %4353 = vmatprep.subr.bf16.mxu1 %v5995_v54  ;;  %v6088_v53 = vld [vmem:[#allocation2 + $0x924] ss:$16 sps:$4 sm:$0xff]   ;;  %v6091_v54 = vld [vmem:[#allocation2 + $0x92c] ss:$16 sps:$4 sm:$0xff]  }
  0xfc   :  { %3877 = vmatpush1.bf16.msra.mxu0 %v5990_v55  ;;  %4354 = vmatpush1.bf16.msra.mxu1 %v5993_v56  ;;  %v6086_v55 = vld [vmem:[#allocation2 + $0x920] ss:$16 sps:$4 sm:$0xff]   ;;  %v6089_v56 = vld [vmem:[#allocation2 + $0x928] ss:$16 sps:$4 sm:$0xff]  }
  0xfd   :  { %3878 = vmatprep.subr.bf16.mxu0 %v5998_v57  ;;  %4355 = vmatprep.subr.bf16.mxu1 %v6001_v58  ;;  %v6094_v57 = vld [vmem:[#allocation2 + $0x944] ss:$16 sps:$4 sm:$0xff]   ;;  %v6097_v58 = vld [vmem:[#allocation2 + $0x94c] ss:$16 sps:$4 sm:$0xff]  }
 0x100   :  { %3879 = vmatpush1.bf16.msra.mxu0 %v5996_v59  ;;  %4356 = vmatpush1.bf16.msra.mxu1 %v5999_v60  ;;  %v6092_v59 = vld [vmem:[#allocation2 + $0x940] ss:$16 sps:$4 sm:$0xff]   ;;  %v6095_v60 = vld [vmem:[#allocation2 + $0x948] ss:$16 sps:$4 sm:$0xff]  }
 0x101   :  { %3880 = vmatprep.subr.bf16.mxu0 %v6004_v61  ;;  %4357 = vmatprep.subr.bf16.mxu1 %v6007_v62  ;;  %v6100_v61 = vld [vmem:[#allocation2 + $0x964] ss:$16 sps:$4 sm:$0xff]   ;;  %v6103_v62 = vld [vmem:[#allocation2 + $0x96c] ss:$16 sps:$4 sm:$0xff]  }
 0x104   :  { %3881 = vmatpush1.bf16.msra.mxu0 %v6002_v63  ;;  %4358 = vmatpush1.bf16.msra.mxu1 %v6005_v0  ;;  %v6098_v63 = vld [vmem:[#allocation2 + $0x960] ss:$16 sps:$4 sm:$0xff]   ;;  %v6101_v0 = vld [vmem:[#allocation2 + $0x968] ss:$16 sps:$4 sm:$0xff]  }
 0x105   :  { %3882 = vmatprep.subr.bf16.mxu0 %v6010_v1  ;;  %4359 = vmatprep.subr.bf16.mxu1 %v6013_v2  ;;  %v6106_v1 = vld [vmem:[#allocation2 + $0x984] ss:$16 sps:$4 sm:$0xff]   ;;  %v6109_v2 = vld [vmem:[#allocation2 + $0x98c] ss:$16 sps:$4 sm:$0xff]  }
 0x108   :  { %3883 = vmatpush1.bf16.msra.mxu0 %v6008_v3  ;;  %4360 = vmatpush1.bf16.msra.mxu1 %v6011_v4  ;;  %v6104_v3 = vld [vmem:[#allocation2 + $0x980] ss:$16 sps:$4 sm:$0xff]   ;;  %v6107_v4 = vld [vmem:[#allocation2 + $0x988] ss:$16 sps:$4 sm:$0xff]  }
 0x109   :  { %3884 = vmatprep.subr.bf16.mxu0 %v6018_v5  ;;  %4361 = vmatprep.subr.bf16.mxu1 %v6021_v6  ;;  %v6112_v5 = vld [vmem:[#allocation2 + $0x9a4] ss:$16 sps:$4 sm:$0xff]   ;;  %v6115_v6 = vld [vmem:[#allocation2 + $0x9ac] ss:$16 sps:$4 sm:$0xff]  }
 0x10c   :  { %3885 = vmatpush1.bf16.msra.mxu0 %v6016_v7  ;;  %4362 = vmatpush1.bf16.msra.mxu1 %v6019_v8  ;;  %v6110_v7 = vld [vmem:[#allocation2 + $0x9a0] ss:$16 sps:$4 sm:$0xff]   ;;  %v6113_v8 = vld [vmem:[#allocation2 + $0x9a8] ss:$16 sps:$4 sm:$0xff]  }
 0x10d   :  { %3886 = vmatprep.subr.bf16.mxu0 %v6025_v9  ;;  %4363 = vmatprep.subr.bf16.mxu1 %v6028_v10  ;;  %v6120_v9 = vld [vmem:[#allocation2 + $0x9c4] ss:$16 sps:$4 sm:$0xff]   ;;  %v6123_v10 = vld [vmem:[#allocation2 + $0x9cc] ss:$16 sps:$4 sm:$0xff]  }
 0x110   :  { %3887 = vmatpush1.bf16.msra.mxu0 %v6023_v11  ;;  %4364 = vmatpush1.bf16.msra.mxu1 %v6026_v12  ;;  %v6118_v11 = vld [vmem:[#allocation2 + $0x9c0] ss:$16 sps:$4 sm:$0xff]   ;;  %v6121_v12 = vld [vmem:[#allocation2 + $0x9c8] ss:$16 sps:$4 sm:$0xff]  }
 0x111   :  { %3909 = vmatprep.subr.bf16.mxu0 %v6034_v13  ;;  %4386 = vmatprep.subr.bf16.mxu1 %v6037_v14  ;;  %v6127_v13 = vld [vmem:[#allocation2 + $0x9e4] ss:$16 sps:$4 sm:$0xff]   ;;  %v6130_v14 = vld [vmem:[#allocation2 + $0x9ec] ss:$16 sps:$4 sm:$0xff]  }
 0x113   :  { %3889 = vmatmul.mubr.bf16.vlgmr.msra.gmra.mrb[0].mxu0 %v6029_v15  ;;  %4366 = vmatmul.mubr.bf16.vlgmr.msra.gmra.mrb[0].mxu1 %v6029_v15  ;;  %v6125_v15 = vld [vmem:[#allocation2 + $0x9e0] ss:$16 sps:$4 sm:$0xff]  }
 0x114   :  { %3910 = vmatpush1.bf16.msra.mxu0 %v6032_v16  ;;  %4387 = vmatpush1.bf16.msra.mxu1 %v6035_v17  ;;  %v6128_v16 = vld [vmem:[#allocation2 + $0x9e8] ss:$16 sps:$4 sm:$0xff]  }
 0x115   :  { %3911 = vmatprep.subr.bf16.mxu0 %v6040_v18  ;;  %4388 = vmatprep.subr.bf16.mxu1 %v6043_v19  ;;  %v6131_v17 = vld [vmem:[%s6830_s0 + $0x20] ss:$72 sps:$4 sm:$0xff]   ;;  %v6136_v18 = vld [vmem:[#allocation2 + $0xa04] ss:$16 sps:$4 sm:$0xff]   ;;  %v6139_v19 = vld [vmem:[#allocation2 + $0xa0c] ss:$16 sps:$4 sm:$0xff]  }
 0x116   :  { %3898 = vmatprep.mubr.bf16.mxu0 %v6116_v20  ;;  %4375 = vmatprep.mubr.bf16.mxu1 %v6116_v20  ;;  %v6134_v20 = vld [vmem:[#allocation2 + $0xa00] ss:$16 sps:$4 sm:$0xff]  }
 0x118   :  { %3912 = vmatpush1.bf16.msra.mxu0 %v6038_v21  ;;  %4389 = vmatpush1.bf16.msra.mxu1 %v6041_v22  ;;  %v6137_v21 = vld [vmem:[#allocation2 + $0xa08] ss:$16 sps:$4 sm:$0xff]   ;;  %v6142_v22 = vld [vmem:[#allocation2 + $0xa24] ss:$16 sps:$4 sm:$0xff]  }
 0x119   :  { %3913 = vmatprep.subr.bf16.mxu0 %v6046_v23  ;;  %4390 = vmatprep.subr.bf16.mxu1 %v6049_v24  ;;  %v6145_v23 = vld [vmem:[#allocation2 + $0xa2c] ss:$16 sps:$4 sm:$0xff]  }
 0x11a   :  { %v6218_v24 = vld [vmem:[%s6830_s0 + $0xb4] ss:$72 sps:$4 sm:$0xff]  }
 0x11b   :  { %3899 = vmatmul.mubr.bf16.gmra.mrb[4].mxu0 %v6124_v26  ;;  %4376 = vmatmul.mubr.bf16.gmra.mrb[4].mxu1 %v6124_v26  ;;  %v6143_v26 = vld [vmem:[#allocation2 + $0xa28] ss:$16 sps:$4 sm:$0xff]  }
 0x11c   :  { %3914 = vmatpush1.bf16.msra.mxu0 %v6044_v25  ;;  %4391 = vmatpush1.bf16.msra.mxu1 %v6047_v27  ;;  %v6140_v25 = vld [vmem:[#allocation2 + $0xa20] ss:$16 sps:$4 sm:$0xff]   ;;  %v6148_v27 = vld [vmem:[#allocation2 + $0xa44] ss:$16 sps:$4 sm:$0xff]  }
 0x11d   :  { %3915 = vmatprep.subr.bf16.mxu0 %v6052_v28  ;;  %4392 = vmatprep.subr.bf16.mxu1 %v6055_v29  ;;  %v6151_v28 = vld [vmem:[#allocation2 + $0xa4c] ss:$16 sps:$4 sm:$0xff]   ;;  %v6226_v29 = vld [vmem:[%s6830_s0 + $0xb0] ss:$72 sps:$4 sm:$0xff]  }
 0x11e   :  { %3941 = vmatprep.mubr.bf16.mxu0 %v6133_v30  ;;  %4418 = vmatprep.mubr.bf16.mxu1 %v6133_v30  ;;  %v6146_v30 = vld [vmem:[#allocation2 + $0xa40] ss:$16 sps:$4 sm:$0xff]  }
 0x120   :  { %3916 = vmatpush1.bf16.msra.mxu0 %v6050_v31  ;;  %4393 = vmatpush1.bf16.msra.mxu1 %v6053_v32  ;;  %v6149_v31 = vld [vmem:[#allocation2 + $0xa48] ss:$16 sps:$4 sm:$0xff]   ;;  %v6154_v32 = vld [vmem:[#allocation2 + $0xa64] ss:$16 sps:$4 sm:$0xff]  }
 0x121   :  { %3917 = vmatprep.subr.bf16.mxu0 %v6058_v33  ;;  %4394 = vmatprep.subr.bf16.mxu1 %v6061_v34  ;;  %v6157_v33 = vld [vmem:[#allocation2 + $0xa6c] ss:$16 sps:$4 sm:$0xff]  }
 0x122   :  { %v6235_v34 = vld [vmem:[%s6830_s0 + $0x2c] ss:$72 sps:$4 sm:$0xff]  }
 0x124   :  { %3918 = vmatpush1.bf16.msra.mxu0 %v6056_v35  ;;  %4395 = vmatpush1.bf16.msra.mxu1 %v6059_v36  ;;  %v6152_v35 = vld [vmem:[#allocation2 + $0xa60] ss:$16 sps:$4 sm:$0xff]   ;;  %v6155_v36 = vld [vmem:[#allocation2 + $0xa68] ss:$16 sps:$4 sm:$0xff]  }
 0x125   :  { %3919 = vmatprep.subr.bf16.mxu0 %v6064_v37  ;;  %4396 = vmatprep.subr.bf16.mxu1 %v6067_v38  ;;  %v6160_v37 = vld [vmem:[#allocation2 + $0xa84] ss:$16 sps:$4 sm:$0xff]   ;;  %v6163_v38 = vld [vmem:[#allocation2 + $0xa8c] ss:$16 sps:$4 sm:$0xff]  }
 0x128   :  { %3920 = vmatpush1.bf16.msra.mxu0 %v6062_v39  ;;  %4397 = vmatpush1.bf16.msra.mxu1 %v6065_v40  ;;  %v6158_v39 = vld [vmem:[#allocation2 + $0xa80] ss:$16 sps:$4 sm:$0xff]   ;;  %v6161_v40 = vld [vmem:[#allocation2 + $0xa88] ss:$16 sps:$4 sm:$0xff]  }
 0x129   :  { %3921 = vmatprep.subr.bf16.mxu0 %v6070_v41  ;;  %4398 = vmatprep.subr.bf16.mxu1 %v6073_v42  ;;  %v6166_v41 = vld [vmem:[#allocation2 + $0xaa4] ss:$16 sps:$4 sm:$0xff]   ;;  %v6169_v42 = vld [vmem:[#allocation2 + $0xaac] ss:$16 sps:$4 sm:$0xff]  }
 0x12c   :  { %3922 = vmatpush1.bf16.msra.mxu0 %v6068_v43  ;;  %4399 = vmatpush1.bf16.msra.mxu1 %v6071_v44  ;;  %v6164_v43 = vld [vmem:[#allocation2 + $0xaa0] ss:$16 sps:$4 sm:$0xff]   ;;  %v6167_v44 = vld [vmem:[#allocation2 + $0xaa8] ss:$16 sps:$4 sm:$0xff]  }
 0x12d   :  { %3923 = vmatprep.subr.bf16.mxu0 %v6076_v45  ;;  %4400 = vmatprep.subr.bf16.mxu1 %v6079_v46  ;;  %v6172_v45 = vld [vmem:[#allocation2 + $0xac4] ss:$16 sps:$4 sm:$0xff]   ;;  %v6175_v46 = vld [vmem:[#allocation2 + $0xacc] ss:$16 sps:$4 sm:$0xff]  }
 0x130   :  { %3924 = vmatpush1.bf16.msra.mxu0 %v6074_v47  ;;  %4401 = vmatpush1.bf16.msra.mxu1 %v6077_v48  ;;  %v6170_v47 = vld [vmem:[#allocation2 + $0xac0] ss:$16 sps:$4 sm:$0xff]   ;;  %v6173_v48 = vld [vmem:[#allocation2 + $0xac8] ss:$16 sps:$4 sm:$0xff]  }
 0x131   :  { %3925 = vmatprep.subr.bf16.mxu0 %v6082_v49  ;;  %4402 = vmatprep.subr.bf16.mxu1 %v6085_v50  ;;  %v6178_v49 = vld [vmem:[#allocation2 + $0xae4] ss:$16 sps:$4 sm:$0xff]   ;;  %v6181_v50 = vld [vmem:[#allocation2 + $0xaec] ss:$16 sps:$4 sm:$0xff]  }
 0x134   :  { %3926 = vmatpush1.bf16.msra.mxu0 %v6080_v51  ;;  %4403 = vmatpush1.bf16.msra.mxu1 %v6083_v52  ;;  %v6176_v51 = vld [vmem:[#allocation2 + $0xae0] ss:$16 sps:$4 sm:$0xff]   ;;  %v6179_v52 = vld [vmem:[#allocation2 + $0xae8] ss:$16 sps:$4 sm:$0xff]  }
 0x135   :  { %3927 = vmatprep.subr.bf16.mxu0 %v6088_v53  ;;  %4404 = vmatprep.subr.bf16.mxu1 %v6091_v54  ;;  %v6184_v53 = vld [vmem:[#allocation2 + $0xb04] ss:$16 sps:$4 sm:$0xff]   ;;  %v6187_v54 = vld [vmem:[#allocation2 + $0xb0c] ss:$16 sps:$4 sm:$0xff]  }
 0x138   :  { %3928 = vmatpush1.bf16.msra.mxu0 %v6086_v55  ;;  %4405 = vmatpush1.bf16.msra.mxu1 %v6089_v56  ;;  %v6182_v55 = vld [vmem:[#allocation2 + $0xb00] ss:$16 sps:$4 sm:$0xff]   ;;  %v6185_v56 = vld [vmem:[#allocation2 + $0xb08] ss:$16 sps:$4 sm:$0xff]  }
 0x139   :  { %3929 = vmatprep.subr.bf16.mxu0 %v6094_v57  ;;  %4406 = vmatprep.subr.bf16.mxu1 %v6097_v58  ;;  %v6190_v57 = vld [vmem:[#allocation2 + $0xb24] ss:$16 sps:$4 sm:$0xff]   ;;  %v6193_v58 = vld [vmem:[#allocation2 + $0xb2c] ss:$16 sps:$4 sm:$0xff]  }
 0x13c   :  { %3930 = vmatpush1.bf16.msra.mxu0 %v6092_v59  ;;  %4407 = vmatpush1.bf16.msra.mxu1 %v6095_v60  ;;  %v6188_v59 = vld [vmem:[#allocation2 + $0xb20] ss:$16 sps:$4 sm:$0xff]   ;;  %v6191_v60 = vld [vmem:[#allocation2 + $0xb28] ss:$16 sps:$4 sm:$0xff]  }
 0x13d   :  { %3931 = vmatprep.subr.bf16.mxu0 %v6100_v61  ;;  %4408 = vmatprep.subr.bf16.mxu1 %v6103_v62  ;;  %v6196_v61 = vld [vmem:[#allocation2 + $0xb44] ss:$16 sps:$4 sm:$0xff]   ;;  %v6199_v62 = vld [vmem:[#allocation2 + $0xb4c] ss:$16 sps:$4 sm:$0xff]  }
 0x140   :  { %3932 = vmatpush1.bf16.msra.mxu0 %v6098_v63  ;;  %4409 = vmatpush1.bf16.msra.mxu1 %v6101_v0  ;;  %v6194_v63 = vld [vmem:[#allocation2 + $0xb40] ss:$16 sps:$4 sm:$0xff]   ;;  %v6197_v0 = vld [vmem:[#allocation2 + $0xb48] ss:$16 sps:$4 sm:$0xff]  }
 0x141   :  { %3933 = vmatprep.subr.bf16.mxu0 %v6106_v1  ;;  %4410 = vmatprep.subr.bf16.mxu1 %v6109_v2  ;;  %v6202_v1 = vld [vmem:[#allocation2 + $0xb64] ss:$16 sps:$4 sm:$0xff]   ;;  %v6205_v2 = vld [vmem:[#allocation2 + $0xb6c] ss:$16 sps:$4 sm:$0xff]  }
 0x144   :  { %3934 = vmatpush1.bf16.msra.mxu0 %v6104_v3  ;;  %4411 = vmatpush1.bf16.msra.mxu1 %v6107_v4  ;;  %v6200_v3 = vld [vmem:[#allocation2 + $0xb60] ss:$16 sps:$4 sm:$0xff]   ;;  %v6203_v4 = vld [vmem:[#allocation2 + $0xb68] ss:$16 sps:$4 sm:$0xff]  }
 0x145   :  { %3935 = vmatprep.subr.bf16.mxu0 %v6112_v5  ;;  %4412 = vmatprep.subr.bf16.mxu1 %v6115_v6  ;;  %v6208_v5 = vld [vmem:[#allocation2 + $0xb84] ss:$16 sps:$4 sm:$0xff]   ;;  %v6211_v6 = vld [vmem:[#allocation2 + $0xb8c] ss:$16 sps:$4 sm:$0xff]  }
 0x148   :  { %3936 = vmatpush1.bf16.msra.mxu0 %v6110_v7  ;;  %4413 = vmatpush1.bf16.msra.mxu1 %v6113_v8  ;;  %v6206_v7 = vld [vmem:[#allocation2 + $0xb80] ss:$16 sps:$4 sm:$0xff]   ;;  %v6209_v8 = vld [vmem:[#allocation2 + $0xb88] ss:$16 sps:$4 sm:$0xff]  }
 0x149   :  { %3937 = vmatprep.subr.bf16.mxu0 %v6120_v9  ;;  %4414 = vmatprep.subr.bf16.mxu1 %v6123_v10  ;;  %v6214_v9 = vld [vmem:[#allocation2 + $0xba4] ss:$16 sps:$4 sm:$0xff]   ;;  %v6217_v10 = vld [vmem:[#allocation2 + $0xbac] ss:$16 sps:$4 sm:$0xff]  }
 0x14c   :  { %3938 = vmatpush1.bf16.msra.mxu0 %v6118_v11  ;;  %4415 = vmatpush1.bf16.msra.mxu1 %v6121_v12  ;;  %v6212_v11 = vld [vmem:[#allocation2 + $0xba0] ss:$16 sps:$4 sm:$0xff]   ;;  %v6215_v12 = vld [vmem:[#allocation2 + $0xba8] ss:$16 sps:$4 sm:$0xff]  }
 0x14d   :  { %3939 = vmatprep.subr.bf16.mxu0 %v6127_v13  ;;  %4416 = vmatprep.subr.bf16.mxu1 %v6130_v14  ;;  %v6222_v13 = vld [vmem:[#allocation2 + $0xbc4] ss:$16 sps:$4 sm:$0xff]   ;;  %v6225_v14 = vld [vmem:[#allocation2 + $0xbcc] ss:$16 sps:$4 sm:$0xff]  }
 0x150   :  { %3940 = vmatpush1.bf16.msra.mxu0 %v6125_v15  ;;  %4417 = vmatpush1.bf16.msra.mxu1 %v6128_v16  ;;  %v6220_v15 = vld [vmem:[#allocation2 + $0xbc0] ss:$16 sps:$4 sm:$0xff]   ;;  %v6223_v16 = vld [vmem:[#allocation2 + $0xbc8] ss:$16 sps:$4 sm:$0xff]  }
 0x151   :  { %3962 = vmatprep.subr.bf16.mxu0 %v6136_v18  ;;  %4439 = vmatprep.subr.bf16.mxu1 %v6139_v19  ;;  %v6232_v18 = vld [vmem:[#allocation2 + $0xbec] ss:$16 sps:$4 sm:$0xff]   ;;  %v6227_v19 = vld [vmem:[#allocation2 + $0xbe0] ss:$16 sps:$4 sm:$0xff]  }
 0x153   :  { %3942 = vmatmul.mubr.bf16.vlgmr.msra.gmra.mrb[0].mxu0 %v6131_v17  ;;  %4419 = vmatmul.mubr.bf16.vlgmr.msra.gmra.mrb[0].mxu1 %v6131_v17  ;;  %v6229_v17 = vld [vmem:[#allocation2 + $0xbe4] ss:$16 sps:$4 sm:$0xff]  }
 0x154   :  { %3963 = vmatpush1.bf16.msra.mxu0 %v6134_v20  ;;  %4440 = vmatpush1.bf16.msra.mxu1 %v6137_v21  ;;  %v6230_v20 = vld [vmem:[#allocation2 + $0xbe8] ss:$16 sps:$4 sm:$0xff]  }
 0x155   :  { %3964 = vmatprep.subr.bf16.mxu0 %v6142_v22  ;;  %4441 = vmatprep.subr.bf16.mxu1 %v6145_v23  ;;  %v6233_v21 = vld [vmem:[%s6830_s0 + $0x28] ss:$72 sps:$4 sm:$0xff]   ;;  %v6238_v22 = vld [vmem:[#allocation2 + $0xc04] ss:$16 sps:$4 sm:$0xff]   ;;  %v6241_v23 = vld [vmem:[#allocation2 + $0xc0c] ss:$16 sps:$4 sm:$0xff]  }
 0x156   :  { %3951 = vmatprep.mubr.bf16.mxu0 %v6218_v24  ;;  %4428 = vmatprep.mubr.bf16.mxu1 %v6218_v24  ;;  %v6236_v24 = vld [vmem:[#allocation2 + $0xc00] ss:$16 sps:$4 sm:$0xff]  }
 0x158   :  { %3965 = vmatpush1.bf16.msra.mxu0 %v6140_v25  ;;  %4442 = vmatpush1.bf16.msra.mxu1 %v6143_v26  ;;  %v6239_v25 = vld [vmem:[#allocation2 + $0xc08] ss:$16 sps:$4 sm:$0xff]   ;;  %v6244_v26 = vld [vmem:[#allocation2 + $0xc24] ss:$16 sps:$4 sm:$0xff]  }
 0x159   :  { %3966 = vmatprep.subr.bf16.mxu0 %v6148_v27  ;;  %4443 = vmatprep.subr.bf16.mxu1 %v6151_v28  ;;  %v6247_v27 = vld [vmem:[#allocation2 + $0xc2c] ss:$16 sps:$4 sm:$0xff]  }
 0x15a   :  { %v6320_v28 = vld [vmem:[%s6830_s0 + $0xbc] ss:$72 sps:$4 sm:$0xff]  }
 0x15b   :  { %3952 = vmatmul.mubr.bf16.gmra.mrb[4].mxu0 %v6226_v29  ;;  %4429 = vmatmul.mubr.bf16.gmra.mrb[4].mxu1 %v6226_v29  ;;  %v6242_v29 = vld [vmem:[#allocation2 + $0xc20] ss:$16 sps:$4 sm:$0xff]  }
 0x15c   :  { %3967 = vmatpush1.bf16.msra.mxu0 %v6146_v30  ;;  %4444 = vmatpush1.bf16.msra.mxu1 %v6149_v31  ;;  %v6245_v30 = vld [vmem:[#allocation2 + $0xc28] ss:$16 sps:$4 sm:$0xff]   ;;  %v6250_v31 = vld [vmem:[#allocation2 + $0xc44] ss:$16 sps:$4 sm:$0xff]  }
 0x15d   :  { %3968 = vmatprep.subr.bf16.mxu0 %v6154_v32  ;;  %4445 = vmatprep.subr.bf16.mxu1 %v6157_v33  ;;  %v6253_v32 = vld [vmem:[#allocation2 + $0xc4c] ss:$16 sps:$4 sm:$0xff]   ;;  %v6328_v33 = vld [vmem:[%s6830_s0 + $0xb8] ss:$72 sps:$4 sm:$0xff]  }
 0x15e   :  { %3994 = vmatprep.mubr.bf16.mxu0 %v6235_v34  ;;  %4471 = vmatprep.mubr.bf16.mxu1 %v6235_v34  ;;  %v6248_v34 = vld [vmem:[#allocation2 + $0xc40] ss:$16 sps:$4 sm:$0xff]  }
 0x160   :  { %3969 = vmatpush1.bf16.msra.mxu0 %v6152_v35  ;;  %4446 = vmatpush1.bf16.msra.mxu1 %v6155_v36  ;;  %v6251_v35 = vld [vmem:[#allocation2 + $0xc48] ss:$16 sps:$4 sm:$0xff]   ;;  %v6256_v36 = vld [vmem:[#allocation2 + $0xc64] ss:$16 sps:$4 sm:$0xff]  }
 0x161   :  { %3970 = vmatprep.subr.bf16.mxu0 %v6160_v37  ;;  %4447 = vmatprep.subr.bf16.mxu1 %v6163_v38  ;;  %v6259_v37 = vld [vmem:[#allocation2 + $0xc6c] ss:$16 sps:$4 sm:$0xff]  }
 0x162   :  { %v6337_v38 = vld [vmem:[%s6830_s0 + $0x34] ss:$72 sps:$4 sm:$0xff]  }
 0x164   :  { %3971 = vmatpush1.bf16.msra.mxu0 %v6158_v39  ;;  %4448 = vmatpush1.bf16.msra.mxu1 %v6161_v40  ;;  %v6254_v39 = vld [vmem:[#allocation2 + $0xc60] ss:$16 sps:$4 sm:$0xff]   ;;  %v6257_v40 = vld [vmem:[#allocation2 + $0xc68] ss:$16 sps:$4 sm:$0xff]  }
 0x165   :  { %3972 = vmatprep.subr.bf16.mxu0 %v6166_v41  ;;  %4449 = vmatprep.subr.bf16.mxu1 %v6169_v42  ;;  %v6262_v41 = vld [vmem:[#allocation2 + $0xc84] ss:$16 sps:$4 sm:$0xff]   ;;  %v6265_v42 = vld [vmem:[#allocation2 + $0xc8c] ss:$16 sps:$4 sm:$0xff]  }
 0x168   :  { %3973 = vmatpush1.bf16.msra.mxu0 %v6164_v43  ;;  %4450 = vmatpush1.bf16.msra.mxu1 %v6167_v44  ;;  %v6260_v43 = vld [vmem:[#allocation2 + $0xc80] ss:$16 sps:$4 sm:$0xff]   ;;  %v6263_v44 = vld [vmem:[#allocation2 + $0xc88] ss:$16 sps:$4 sm:$0xff]  }
 0x169   :  { %3974 = vmatprep.subr.bf16.mxu0 %v6172_v45  ;;  %4451 = vmatprep.subr.bf16.mxu1 %v6175_v46  ;;  %v6268_v45 = vld [vmem:[#allocation2 + $0xca4] ss:$16 sps:$4 sm:$0xff]   ;;  %v6271_v46 = vld [vmem:[#allocation2 + $0xcac] ss:$16 sps:$4 sm:$0xff]  }
 0x16c   :  { %3975 = vmatpush1.bf16.msra.mxu0 %v6170_v47  ;;  %4452 = vmatpush1.bf16.msra.mxu1 %v6173_v48  ;;  %v6266_v47 = vld [vmem:[#allocation2 + $0xca0] ss:$16 sps:$4 sm:$0xff]   ;;  %v6269_v48 = vld [vmem:[#allocation2 + $0xca8] ss:$16 sps:$4 sm:$0xff]  }
 0x16d   :  { %3976 = vmatprep.subr.bf16.mxu0 %v6178_v49  ;;  %4453 = vmatprep.subr.bf16.mxu1 %v6181_v50  ;;  %v6274_v49 = vld [vmem:[#allocation2 + $0xcc4] ss:$16 sps:$4 sm:$0xff]   ;;  %v6277_v50 = vld [vmem:[#allocation2 + $0xccc] ss:$16 sps:$4 sm:$0xff]  }
 0x170   :  { %3977 = vmatpush1.bf16.msra.mxu0 %v6176_v51  ;;  %4454 = vmatpush1.bf16.msra.mxu1 %v6179_v52  ;;  %v6272_v51 = vld [vmem:[#allocation2 + $0xcc0] ss:$16 sps:$4 sm:$0xff]   ;;  %v6275_v52 = vld [vmem:[#allocation2 + $0xcc8] ss:$16 sps:$4 sm:$0xff]  }
 0x171   :  { %3978 = vmatprep.subr.bf16.mxu0 %v6184_v53  ;;  %4455 = vmatprep.subr.bf16.mxu1 %v6187_v54  ;;  %v6280_v53 = vld [vmem:[#allocation2 + $0xce4] ss:$16 sps:$4 sm:$0xff]   ;;  %v6283_v54 = vld [vmem:[#allocation2 + $0xcec] ss:$16 sps:$4 sm:$0xff]  }
 0x174   :  { %3979 = vmatpush1.bf16.msra.mxu0 %v6182_v55  ;;  %4456 = vmatpush1.bf16.msra.mxu1 %v6185_v56  ;;  %v6278_v55 = vld [vmem:[#allocation2 + $0xce0] ss:$16 sps:$4 sm:$0xff]   ;;  %v6281_v56 = vld [vmem:[#allocation2 + $0xce8] ss:$16 sps:$4 sm:$0xff]  }
 0x175   :  { %3980 = vmatprep.subr.bf16.mxu0 %v6190_v57  ;;  %4457 = vmatprep.subr.bf16.mxu1 %v6193_v58  ;;  %v6286_v57 = vld [vmem:[#allocation2 + $0xd04] ss:$16 sps:$4 sm:$0xff]   ;;  %v6289_v58 = vld [vmem:[#allocation2 + $0xd0c] ss:$16 sps:$4 sm:$0xff]  }
 0x178   :  { %3981 = vmatpush1.bf16.msra.mxu0 %v6188_v59  ;;  %4458 = vmatpush1.bf16.msra.mxu1 %v6191_v60  ;;  %v6284_v59 = vld [vmem:[#allocation2 + $0xd00] ss:$16 sps:$4 sm:$0xff]   ;;  %v6287_v60 = vld [vmem:[#allocation2 + $0xd08] ss:$16 sps:$4 sm:$0xff]  }
 0x179   :  { %3982 = vmatprep.subr.bf16.mxu0 %v6196_v61  ;;  %4459 = vmatprep.subr.bf16.mxu1 %v6199_v62  ;;  %v6292_v61 = vld [vmem:[#allocation2 + $0xd24] ss:$16 sps:$4 sm:$0xff]   ;;  %v6295_v62 = vld [vmem:[#allocation2 + $0xd2c] ss:$16 sps:$4 sm:$0xff]  }
 0x17c   :  { %3983 = vmatpush1.bf16.msra.mxu0 %v6194_v63  ;;  %4460 = vmatpush1.bf16.msra.mxu1 %v6197_v0  ;;  %v6290_v63 = vld [vmem:[#allocation2 + $0xd20] ss:$16 sps:$4 sm:$0xff]   ;;  %v6293_v0 = vld [vmem:[#allocation2 + $0xd28] ss:$16 sps:$4 sm:$0xff]  }
 0x17d   :  { %3984 = vmatprep.subr.bf16.mxu0 %v6202_v1  ;;  %4461 = vmatprep.subr.bf16.mxu1 %v6205_v2  ;;  %v6298_v1 = vld [vmem:[#allocation2 + $0xd44] ss:$16 sps:$4 sm:$0xff]   ;;  %v6301_v2 = vld [vmem:[#allocation2 + $0xd4c] ss:$16 sps:$4 sm:$0xff]  }
 0x180   :  { %3985 = vmatpush1.bf16.msra.mxu0 %v6200_v3  ;;  %4462 = vmatpush1.bf16.msra.mxu1 %v6203_v4  ;;  %v6296_v3 = vld [vmem:[#allocation2 + $0xd40] ss:$16 sps:$4 sm:$0xff]   ;;  %v6299_v4 = vld [vmem:[#allocation2 + $0xd48] ss:$16 sps:$4 sm:$0xff]  }
 0x181   :  { %3986 = vmatprep.subr.bf16.mxu0 %v6208_v5  ;;  %4463 = vmatprep.subr.bf16.mxu1 %v6211_v6  ;;  %v6304_v5 = vld [vmem:[#allocation2 + $0xd64] ss:$16 sps:$4 sm:$0xff]   ;;  %v6307_v6 = vld [vmem:[#allocation2 + $0xd6c] ss:$16 sps:$4 sm:$0xff]  }
 0x184   :  { %3987 = vmatpush1.bf16.msra.mxu0 %v6206_v7  ;;  %4464 = vmatpush1.bf16.msra.mxu1 %v6209_v8  ;;  %v6302_v7 = vld [vmem:[#allocation2 + $0xd60] ss:$16 sps:$4 sm:$0xff]   ;;  %v6305_v8 = vld [vmem:[#allocation2 + $0xd68] ss:$16 sps:$4 sm:$0xff]  }
 0x185   :  { %3988 = vmatprep.subr.bf16.mxu0 %v6214_v9  ;;  %4465 = vmatprep.subr.bf16.mxu1 %v6217_v10  ;;  %v6310_v9 = vld [vmem:[#allocation2 + $0xd84] ss:$16 sps:$4 sm:$0xff]   ;;  %v6313_v10 = vld [vmem:[#allocation2 + $0xd8c] ss:$16 sps:$4 sm:$0xff]  }
 0x188   :  { %3989 = vmatpush1.bf16.msra.mxu0 %v6212_v11  ;;  %4466 = vmatpush1.bf16.msra.mxu1 %v6215_v12  ;;  %v6308_v11 = vld [vmem:[#allocation2 + $0xd80] ss:$16 sps:$4 sm:$0xff]   ;;  %v6311_v12 = vld [vmem:[#allocation2 + $0xd88] ss:$16 sps:$4 sm:$0xff]  }
 0x189   :  { %3990 = vmatprep.subr.bf16.mxu0 %v6222_v13  ;;  %4467 = vmatprep.subr.bf16.mxu1 %v6225_v14  ;;  %v6316_v13 = vld [vmem:[#allocation2 + $0xda4] ss:$16 sps:$4 sm:$0xff]   ;;  %v6319_v14 = vld [vmem:[#allocation2 + $0xdac] ss:$16 sps:$4 sm:$0xff]  }
 0x18c   :  { %3991 = vmatpush1.bf16.msra.mxu0 %v6220_v15  ;;  %4468 = vmatpush1.bf16.msra.mxu1 %v6223_v16  ;;  %v6314_v15 = vld [vmem:[#allocation2 + $0xda0] ss:$16 sps:$4 sm:$0xff]   ;;  %v6317_v16 = vld [vmem:[#allocation2 + $0xda8] ss:$16 sps:$4 sm:$0xff]  }
 0x18d   :  { %3992 = vmatprep.subr.bf16.mxu0 %v6229_v17  ;;  %4469 = vmatprep.subr.bf16.mxu1 %v6232_v18  ;;  %v6324_v17 = vld [vmem:[#allocation2 + $0xdc4] ss:$16 sps:$4 sm:$0xff]   ;;  %v6327_v18 = vld [vmem:[#allocation2 + $0xdcc] ss:$16 sps:$4 sm:$0xff]  }
 0x190   :  { %3993 = vmatpush1.bf16.msra.mxu0 %v6227_v19  ;;  %4470 = vmatpush1.bf16.msra.mxu1 %v6230_v20  ;;  %v6322_v19 = vld [vmem:[#allocation2 + $0xdc0] ss:$16 sps:$4 sm:$0xff]   ;;  %v6325_v20 = vld [vmem:[#allocation2 + $0xdc8] ss:$16 sps:$4 sm:$0xff]  }
 0x191   :  { %4015 = vmatprep.subr.bf16.mxu0 %v6238_v22  ;;  %4492 = vmatprep.subr.bf16.mxu1 %v6241_v23  ;;  %v6334_v22 = vld [vmem:[#allocation2 + $0xdec] ss:$16 sps:$4 sm:$0xff]   ;;  %v6329_v23 = vld [vmem:[#allocation2 + $0xde0] ss:$16 sps:$4 sm:$0xff]  }
 0x193   :  { %3995 = vmatmul.mubr.bf16.vlgmr.msra.gmra.mrb[0].mxu0 %v6233_v21  ;;  %4472 = vmatmul.mubr.bf16.vlgmr.msra.gmra.mrb[0].mxu1 %v6233_v21  ;;  %v6331_v21 = vld [vmem:[#allocation2 + $0xde4] ss:$16 sps:$4 sm:$0xff]  }
 0x194   :  { %4016 = vmatpush1.bf16.msra.mxu0 %v6236_v24  ;;  %4493 = vmatpush1.bf16.msra.mxu1 %v6239_v25  ;;  %v6332_v24 = vld [vmem:[#allocation2 + $0xde8] ss:$16 sps:$4 sm:$0xff]   ;;  %v6340_v25 = vld [vmem:[#allocation2 + $0xe04] ss:$16 sps:$4 sm:$0xff]  }
 0x195   :  { %4017 = vmatprep.subr.bf16.mxu0 %v6244_v26  ;;  %4494 = vmatprep.subr.bf16.mxu1 %v6247_v27  ;;  %v6343_v26 = vld [vmem:[#allocation2 + $0xe0c] ss:$16 sps:$4 sm:$0xff]   ;;  %v6335_v27 = vld [vmem:[%s6830_s0 + $0x30] ss:$72 sps:$4 sm:$0xff]  }
 0x196   :  { %4004 = vmatprep.mubr.bf16.mxu0 %v6320_v28  ;;  %4481 = vmatprep.mubr.bf16.mxu1 %v6320_v28  ;;  %v6338_v28 = vld [vmem:[#allocation2 + $0xe00] ss:$16 sps:$4 sm:$0xff]  }
 0x198   :  { %4018 = vmatpush1.bf16.msra.mxu0 %v6242_v29  ;;  %4495 = vmatpush1.bf16.msra.mxu1 %v6245_v30  ;;  %v6341_v29 = vld [vmem:[#allocation2 + $0xe08] ss:$16 sps:$4 sm:$0xff]   ;;  %v6346_v30 = vld [vmem:[#allocation2 + $0xe24] ss:$16 sps:$4 sm:$0xff]  }
 0x199   :  { %4019 = vmatprep.subr.bf16.mxu0 %v6250_v31  ;;  %4496 = vmatprep.subr.bf16.mxu1 %v6253_v32  ;;  %v6349_v31 = vld [vmem:[#allocation2 + $0xe2c] ss:$16 sps:$4 sm:$0xff]  }
 0x19a   :  { %v6422_v32 = vld [vmem:[%s6830_s0 + $0xc4] ss:$72 sps:$4 sm:$0xff]  }
 0x19b   :  { %4005 = vmatmul.mubr.bf16.gmra.mrb[4].mxu0 %v6328_v33  ;;  %4482 = vmatmul.mubr.bf16.gmra.mrb[4].mxu1 %v6328_v33  ;;  %v6344_v33 = vld [vmem:[#allocation2 + $0xe20] ss:$16 sps:$4 sm:$0xff]  }
 0x19c   :  { %4020 = vmatpush1.bf16.msra.mxu0 %v6248_v34  ;;  %4497 = vmatpush1.bf16.msra.mxu1 %v6251_v35  ;;  %v6347_v34 = vld [vmem:[#allocation2 + $0xe28] ss:$16 sps:$4 sm:$0xff]   ;;  %v6352_v35 = vld [vmem:[#allocation2 + $0xe44] ss:$16 sps:$4 sm:$0xff]  }
 0x19d   :  { %4021 = vmatprep.subr.bf16.mxu0 %v6256_v36  ;;  %4498 = vmatprep.subr.bf16.mxu1 %v6259_v37  ;;  %v6355_v36 = vld [vmem:[#allocation2 + $0xe4c] ss:$16 sps:$4 sm:$0xff]   ;;  %v6430_v37 = vld [vmem:[%s6830_s0 + $0xc0] ss:$72 sps:$4 sm:$0xff]  }
 0x19e   :  { %4047 = vmatprep.mubr.bf16.mxu0 %v6337_v38  ;;  %4524 = vmatprep.mubr.bf16.mxu1 %v6337_v38  ;;  %v6350_v38 = vld [vmem:[#allocation2 + $0xe40] ss:$16 sps:$4 sm:$0xff]  }
 0x1a0   :  { %4022 = vmatpush1.bf16.msra.mxu0 %v6254_v39  ;;  %4499 = vmatpush1.bf16.msra.mxu1 %v6257_v40  ;;  %v6353_v39 = vld [vmem:[#allocation2 + $0xe48] ss:$16 sps:$4 sm:$0xff]   ;;  %v6358_v40 = vld [vmem:[#allocation2 + $0xe64] ss:$16 sps:$4 sm:$0xff]  }
 0x1a1   :  { %4023 = vmatprep.subr.bf16.mxu0 %v6262_v41  ;;  %4500 = vmatprep.subr.bf16.mxu1 %v6265_v42  ;;  %v6361_v41 = vld [vmem:[#allocation2 + $0xe6c] ss:$16 sps:$4 sm:$0xff]  }
 0x1a2   :  { %v6439_v42 = vld [vmem:[%s6830_s0 + $0x3c] ss:$72 sps:$4 sm:$0xff]  }
 0x1a4   :  { %4024 = vmatpush1.bf16.msra.mxu0 %v6260_v43  ;;  %4501 = vmatpush1.bf16.msra.mxu1 %v6263_v44  ;;  %v6356_v43 = vld [vmem:[#allocation2 + $0xe60] ss:$16 sps:$4 sm:$0xff]   ;;  %v6359_v44 = vld [vmem:[#allocation2 + $0xe68] ss:$16 sps:$4 sm:$0xff]  }
 0x1a5   :  { %4025 = vmatprep.subr.bf16.mxu0 %v6268_v45  ;;  %4502 = vmatprep.subr.bf16.mxu1 %v6271_v46  ;;  %v6364_v45 = vld [vmem:[#allocation2 + $0xe84] ss:$16 sps:$4 sm:$0xff]   ;;  %v6367_v46 = vld [vmem:[#allocation2 + $0xe8c] ss:$16 sps:$4 sm:$0xff]  }
 0x1a8   :  { %4026 = vmatpush1.bf16.msra.mxu0 %v6266_v47  ;;  %4503 = vmatpush1.bf16.msra.mxu1 %v6269_v48  ;;  %v6362_v47 = vld [vmem:[#allocation2 + $0xe80] ss:$16 sps:$4 sm:$0xff]   ;;  %v6365_v48 = vld [vmem:[#allocation2 + $0xe88] ss:$16 sps:$4 sm:$0xff]  }
 0x1a9   :  { %4027 = vmatprep.subr.bf16.mxu0 %v6274_v49  ;;  %4504 = vmatprep.subr.bf16.mxu1 %v6277_v50  ;;  %v6370_v49 = vld [vmem:[#allocation2 + $0xea4] ss:$16 sps:$4 sm:$0xff]   ;;  %v6373_v50 = vld [vmem:[#allocation2 + $0xeac] ss:$16 sps:$4 sm:$0xff]  }
 0x1ac   :  { %4028 = vmatpush1.bf16.msra.mxu0 %v6272_v51  ;;  %4505 = vmatpush1.bf16.msra.mxu1 %v6275_v52  ;;  %v6368_v51 = vld [vmem:[#allocation2 + $0xea0] ss:$16 sps:$4 sm:$0xff]   ;;  %v6371_v52 = vld [vmem:[#allocation2 + $0xea8] ss:$16 sps:$4 sm:$0xff]  }
 0x1ad   :  { %4029 = vmatprep.subr.bf16.mxu0 %v6280_v53  ;;  %4506 = vmatprep.subr.bf16.mxu1 %v6283_v54  ;;  %v6376_v53 = vld [vmem:[#allocation2 + $0xec4] ss:$16 sps:$4 sm:$0xff]   ;;  %v6379_v54 = vld [vmem:[#allocation2 + $0xecc] ss:$16 sps:$4 sm:$0xff]  }
 0x1b0   :  { %4030 = vmatpush1.bf16.msra.mxu0 %v6278_v55  ;;  %4507 = vmatpush1.bf16.msra.mxu1 %v6281_v56  ;;  %v6374_v55 = vld [vmem:[#allocation2 + $0xec0] ss:$16 sps:$4 sm:$0xff]   ;;  %v6377_v56 = vld [vmem:[#allocation2 + $0xec8] ss:$16 sps:$4 sm:$0xff]  }
 0x1b1   :  { %4031 = vmatprep.subr.bf16.mxu0 %v6286_v57  ;;  %4508 = vmatprep.subr.bf16.mxu1 %v6289_v58  ;;  %v6382_v57 = vld [vmem:[#allocation2 + $0xee4] ss:$16 sps:$4 sm:$0xff]   ;;  %v6385_v58 = vld [vmem:[#allocation2 + $0xeec] ss:$16 sps:$4 sm:$0xff]  }
 0x1b4   :  { %4032 = vmatpush1.bf16.msra.mxu0 %v6284_v59  ;;  %4509 = vmatpush1.bf16.msra.mxu1 %v6287_v60  ;;  %v6380_v59 = vld [vmem:[#allocation2 + $0xee0] ss:$16 sps:$4 sm:$0xff]   ;;  %v6383_v60 = vld [vmem:[#allocation2 + $0xee8] ss:$16 sps:$4 sm:$0xff]  }
 0x1b5   :  { %4033 = vmatprep.subr.bf16.mxu0 %v6292_v61  ;;  %4510 = vmatprep.subr.bf16.mxu1 %v6295_v62  ;;  %v6388_v61 = vld [vmem:[#allocation2 + $0xf04] ss:$16 sps:$4 sm:$0xff]   ;;  %v6391_v62 = vld [vmem:[#allocation2 + $0xf0c] ss:$16 sps:$4 sm:$0xff]  }
 0x1b8   :  { %4034 = vmatpush1.bf16.msra.mxu0 %v6290_v63  ;;  %4511 = vmatpush1.bf16.msra.mxu1 %v6293_v0  ;;  %v6386_v63 = vld [vmem:[#allocation2 + $0xf00] ss:$16 sps:$4 sm:$0xff]   ;;  %v6389_v0 = vld [vmem:[#allocation2 + $0xf08] ss:$16 sps:$4 sm:$0xff]  }
 0x1b9   :  { %4035 = vmatprep.subr.bf16.mxu0 %v6298_v1  ;;  %4512 = vmatprep.subr.bf16.mxu1 %v6301_v2  ;;  %v6394_v1 = vld [vmem:[#allocation2 + $0xf24] ss:$16 sps:$4 sm:$0xff]   ;;  %v6397_v2 = vld [vmem:[#allocation2 + $0xf2c] ss:$16 sps:$4 sm:$0xff]  }
 0x1bc   :  { %4036 = vmatpush1.bf16.msra.mxu0 %v6296_v3  ;;  %4513 = vmatpush1.bf16.msra.mxu1 %v6299_v4  ;;  %v6392_v3 = vld [vmem:[#allocation2 + $0xf20] ss:$16 sps:$4 sm:$0xff]   ;;  %v6395_v4 = vld [vmem:[#allocation2 + $0xf28] ss:$16 sps:$4 sm:$0xff]  }
 0x1bd   :  { %4037 = vmatprep.subr.bf16.mxu0 %v6304_v5  ;;  %4514 = vmatprep.subr.bf16.mxu1 %v6307_v6  ;;  %v6400_v5 = vld [vmem:[#allocation2 + $0xf44] ss:$16 sps:$4 sm:$0xff]   ;;  %v6403_v6 = vld [vmem:[#allocation2 + $0xf4c] ss:$16 sps:$4 sm:$0xff]  }
 0x1c0   :  { %4038 = vmatpush1.bf16.msra.mxu0 %v6302_v7  ;;  %4515 = vmatpush1.bf16.msra.mxu1 %v6305_v8  ;;  %v6398_v7 = vld [vmem:[#allocation2 + $0xf40] ss:$16 sps:$4 sm:$0xff]   ;;  %v6401_v8 = vld [vmem:[#allocation2 + $0xf48] ss:$16 sps:$4 sm:$0xff]  }
 0x1c1   :  { %4039 = vmatprep.subr.bf16.mxu0 %v6310_v9  ;;  %4516 = vmatprep.subr.bf16.mxu1 %v6313_v10  ;;  %v6406_v9 = vld [vmem:[#allocation2 + $0xf64] ss:$16 sps:$4 sm:$0xff]   ;;  %v6409_v10 = vld [vmem:[#allocation2 + $0xf6c] ss:$16 sps:$4 sm:$0xff]  }
 0x1c4   :  { %4040 = vmatpush1.bf16.msra.mxu0 %v6308_v11  ;;  %4517 = vmatpush1.bf16.msra.mxu1 %v6311_v12  ;;  %v6404_v11 = vld [vmem:[#allocation2 + $0xf60] ss:$16 sps:$4 sm:$0xff]   ;;  %v6407_v12 = vld [vmem:[#allocation2 + $0xf68] ss:$16 sps:$4 sm:$0xff]  }
 0x1c5   :  { %4041 = vmatprep.subr.bf16.mxu0 %v6316_v13  ;;  %4518 = vmatprep.subr.bf16.mxu1 %v6319_v14  ;;  %v6412_v13 = vld [vmem:[#allocation2 + $0xf84] ss:$16 sps:$4 sm:$0xff]   ;;  %v6415_v14 = vld [vmem:[#allocation2 + $0xf8c] ss:$16 sps:$4 sm:$0xff]  }
 0x1c8   :  { %4042 = vmatpush1.bf16.msra.mxu0 %v6314_v15  ;;  %4519 = vmatpush1.bf16.msra.mxu1 %v6317_v16  ;;  %v6410_v15 = vld [vmem:[#allocation2 + $0xf80] ss:$16 sps:$4 sm:$0xff]   ;;  %v6413_v16 = vld [vmem:[#allocation2 + $0xf88] ss:$16 sps:$4 sm:$0xff]  }
 0x1c9   :  { %4043 = vmatprep.subr.bf16.mxu0 %v6324_v17  ;;  %4520 = vmatprep.subr.bf16.mxu1 %v6327_v18  ;;  %v6418_v17 = vld [vmem:[#allocation2 + $0xfa4] ss:$16 sps:$4 sm:$0xff]   ;;  %v6421_v18 = vld [vmem:[#allocation2 + $0xfac] ss:$16 sps:$4 sm:$0xff]  }
 0x1cc   :  { %4044 = vmatpush1.bf16.msra.mxu0 %v6322_v19  ;;  %4521 = vmatpush1.bf16.msra.mxu1 %v6325_v20  ;;  %v6416_v19 = vld [vmem:[#allocation2 + $0xfa0] ss:$16 sps:$4 sm:$0xff]   ;;  %v6419_v20 = vld [vmem:[#allocation2 + $0xfa8] ss:$16 sps:$4 sm:$0xff]  }
 0x1cd   :  { %4045 = vmatprep.subr.bf16.mxu0 %v6331_v21  ;;  %4522 = vmatprep.subr.bf16.mxu1 %v6334_v22  ;;  %v6426_v21 = vld [vmem:[#allocation2 + $0xfc4] ss:$16 sps:$4 sm:$0xff]   ;;  %v6429_v22 = vld [vmem:[#allocation2 + $0xfcc] ss:$16 sps:$4 sm:$0xff]  }
 0x1d0   :  { %4046 = vmatpush1.bf16.msra.mxu0 %v6329_v23  ;;  %4523 = vmatpush1.bf16.msra.mxu1 %v6332_v24  ;;  %v6424_v23 = vld [vmem:[#allocation2 + $0xfc0] ss:$16 sps:$4 sm:$0xff]   ;;  %v6427_v24 = vld [vmem:[#allocation2 + $0xfc8] ss:$16 sps:$4 sm:$0xff]  }
 0x1d1   :  { %4068 = vmatprep.subr.bf16.mxu0 %v6340_v25  ;;  %4545 = vmatprep.subr.bf16.mxu1 %v6343_v26  ;;  %v6433_v25 = vld [vmem:[#allocation2 + $0xfe4] ss:$16 sps:$4 sm:$0xff]   ;;  %v6436_v26 = vld [vmem:[#allocation2 + $0xfec] ss:$16 sps:$4 sm:$0xff]  }
 0x1d3   :  { %4048 = vmatmul.mubr.bf16.vlgmr.msra.gmra.mrb[0].mxu0 %v6335_v27  ;;  %4525 = vmatmul.mubr.bf16.vlgmr.msra.gmra.mrb[0].mxu1 %v6335_v27  ;;  %v6431_v27 = vld [vmem:[#allocation2 + $0xfe0] ss:$16 sps:$4 sm:$0xff]  }
 0x1d4   :  { %4069 = vmatpush1.bf16.msra.mxu0 %v6338_v28  ;;  %4546 = vmatpush1.bf16.msra.mxu1 %v6341_v29  ;;  %v6434_v28 = vld [vmem:[#allocation2 + $0xfe8] ss:$16 sps:$4 sm:$0xff]   ;;  %v6442_v29 = vld [vmem:[#allocation2 + $0x1004] ss:$16 sps:$4 sm:$0xff]  }
 0x1d5   :  { %4070 = vmatprep.subr.bf16.mxu0 %v6346_v30  ;;  %4547 = vmatprep.subr.bf16.mxu1 %v6349_v31  ;;  %v6445_v30 = vld [vmem:[#allocation2 + $0x100c] ss:$16 sps:$4 sm:$0xff]   ;;  %v6437_v31 = vld [vmem:[%s6830_s0 + $0x38] ss:$72 sps:$4 sm:$0xff]  }
 0x1d6   :  { %4057 = vmatprep.mubr.bf16.mxu0 %v6422_v32  ;;  %4534 = vmatprep.mubr.bf16.mxu1 %v6422_v32  ;;  %v6440_v32 = vld [vmem:[#allocation2 + $0x1000] ss:$16 sps:$4 sm:$0xff]  }
 0x1d8   :  { %4071 = vmatpush1.bf16.msra.mxu0 %v6344_v33  ;;  %4548 = vmatpush1.bf16.msra.mxu1 %v6347_v34  ;;  %v6443_v33 = vld [vmem:[#allocation2 + $0x1008] ss:$16 sps:$4 sm:$0xff]   ;;  %v6448_v34 = vld [vmem:[#allocation2 + $0x1024] ss:$16 sps:$4 sm:$0xff]  }
 0x1d9   :  { %4072 = vmatprep.subr.bf16.mxu0 %v6352_v35  ;;  %4549 = vmatprep.subr.bf16.mxu1 %v6355_v36  ;;  %v6451_v35 = vld [vmem:[#allocation2 + $0x102c] ss:$16 sps:$4 sm:$0xff]  }
 0x1da   :  { %v6524_v36 = vld [vmem:[%s6830_s0 + $0xcc] ss:$72 sps:$4 sm:$0xff]  }
 0x1db   :  { %4058 = vmatmul.mubr.bf16.gmra.mrb[4].mxu0 %v6430_v37  ;;  %4535 = vmatmul.mubr.bf16.gmra.mrb[4].mxu1 %v6430_v37  ;;  %v6446_v37 = vld [vmem:[#allocation2 + $0x1020] ss:$16 sps:$4 sm:$0xff]  }
 0x1dc   :  { %4073 = vmatpush1.bf16.msra.mxu0 %v6350_v38  ;;  %4550 = vmatpush1.bf16.msra.mxu1 %v6353_v39  ;;  %v6449_v38 = vld [vmem:[#allocation2 + $0x1028] ss:$16 sps:$4 sm:$0xff]   ;;  %v6454_v39 = vld [vmem:[#allocation2 + $0x1044] ss:$16 sps:$4 sm:$0xff]  }
 0x1dd   :  { %4074 = vmatprep.subr.bf16.mxu0 %v6358_v40  ;;  %4551 = vmatprep.subr.bf16.mxu1 %v6361_v41  ;;  %v6457_v40 = vld [vmem:[#allocation2 + $0x104c] ss:$16 sps:$4 sm:$0xff]   ;;  %v6526_v41 = vld [vmem:[%s6830_s0 + $0xc8] ss:$72 sps:$4 sm:$0xff]  }
 0x1de   :  { %4100 = vmatprep.mubr.bf16.mxu0 %v6439_v42  ;;  %4577 = vmatprep.mubr.bf16.mxu1 %v6439_v42  ;;  %v6452_v42 = vld [vmem:[#allocation2 + $0x1040] ss:$16 sps:$4 sm:$0xff]  }
 0x1e0   :  { %4075 = vmatpush1.bf16.msra.mxu0 %v6356_v43  ;;  %4552 = vmatpush1.bf16.msra.mxu1 %v6359_v44  ;;  %v6455_v43 = vld [vmem:[#allocation2 + $0x1048] ss:$16 sps:$4 sm:$0xff]   ;;  %v6460_v44 = vld [vmem:[#allocation2 + $0x1064] ss:$16 sps:$4 sm:$0xff]  }
 0x1e1   :  { %4076 = vmatprep.subr.bf16.mxu0 %v6364_v45  ;;  %4553 = vmatprep.subr.bf16.mxu1 %v6367_v46  ;;  %v6463_v45 = vld [vmem:[#allocation2 + $0x106c] ss:$16 sps:$4 sm:$0xff]  }
 0x1e2   :  { %v6541_v46 = vld [vmem:[%s6830_s0 + $0x44] ss:$72 sps:$4 sm:$0xff]  }
 0x1e4   :  { %4077 = vmatpush1.bf16.msra.mxu0 %v6362_v47  ;;  %4554 = vmatpush1.bf16.msra.mxu1 %v6365_v48  ;;  %v6458_v47 = vld [vmem:[#allocation2 + $0x1060] ss:$16 sps:$4 sm:$0xff]   ;;  %v6461_v48 = vld [vmem:[#allocation2 + $0x1068] ss:$16 sps:$4 sm:$0xff]  }
 0x1e5   :  { %4078 = vmatprep.subr.bf16.mxu0 %v6370_v49  ;;  %4555 = vmatprep.subr.bf16.mxu1 %v6373_v50  ;;  %v6466_v49 = vld [vmem:[#allocation2 + $0x1084] ss:$16 sps:$4 sm:$0xff]   ;;  %v6469_v50 = vld [vmem:[#allocation2 + $0x108c] ss:$16 sps:$4 sm:$0xff]  }
 0x1e8   :  { %4079 = vmatpush1.bf16.msra.mxu0 %v6368_v51  ;;  %4556 = vmatpush1.bf16.msra.mxu1 %v6371_v52  ;;  %v6464_v51 = vld [vmem:[#allocation2 + $0x1080] ss:$16 sps:$4 sm:$0xff]   ;;  %v6467_v52 = vld [vmem:[#allocation2 + $0x1088] ss:$16 sps:$4 sm:$0xff]  }
 0x1e9   :  { %4080 = vmatprep.subr.bf16.mxu0 %v6376_v53  ;;  %4557 = vmatprep.subr.bf16.mxu1 %v6379_v54  ;;  %v6472_v53 = vld [vmem:[#allocation2 + $0x10a4] ss:$16 sps:$4 sm:$0xff]   ;;  %v6475_v54 = vld [vmem:[#allocation2 + $0x10ac] ss:$16 sps:$4 sm:$0xff]  }
 0x1ec   :  { %4081 = vmatpush1.bf16.msra.mxu0 %v6374_v55  ;;  %4558 = vmatpush1.bf16.msra.mxu1 %v6377_v56  ;;  %v6470_v55 = vld [vmem:[#allocation2 + $0x10a0] ss:$16 sps:$4 sm:$0xff]   ;;  %v6473_v56 = vld [vmem:[#allocation2 + $0x10a8] ss:$16 sps:$4 sm:$0xff]  }
 0x1ed   :  { %4082 = vmatprep.subr.bf16.mxu0 %v6382_v57  ;;  %4559 = vmatprep.subr.bf16.mxu1 %v6385_v58  ;;  %v6478_v57 = vld [vmem:[#allocation2 + $0x10c4] ss:$16 sps:$4 sm:$0xff]   ;;  %v6481_v58 = vld [vmem:[#allocation2 + $0x10cc] ss:$16 sps:$4 sm:$0xff]  }
 0x1f0   :  { %4083 = vmatpush1.bf16.msra.mxu0 %v6380_v59  ;;  %4560 = vmatpush1.bf16.msra.mxu1 %v6383_v60  ;;  %v6476_v59 = vld [vmem:[#allocation2 + $0x10c0] ss:$16 sps:$4 sm:$0xff]   ;;  %v6479_v60 = vld [vmem:[#allocation2 + $0x10c8] ss:$16 sps:$4 sm:$0xff]  }
 0x1f1   :  { %4084 = vmatprep.subr.bf16.mxu0 %v6388_v61  ;;  %4561 = vmatprep.subr.bf16.mxu1 %v6391_v62  ;;  %v6484_v61 = vld [vmem:[#allocation2 + $0x10e4] ss:$16 sps:$4 sm:$0xff]   ;;  %v6487_v62 = vld [vmem:[#allocation2 + $0x10ec] ss:$16 sps:$4 sm:$0xff]  }
 0x1f4   :  { %4085 = vmatpush1.bf16.msra.mxu0 %v6386_v63  ;;  %4562 = vmatpush1.bf16.msra.mxu1 %v6389_v0  ;;  %v6482_v63 = vld [vmem:[#allocation2 + $0x10e0] ss:$16 sps:$4 sm:$0xff]   ;;  %v6485_v0 = vld [vmem:[#allocation2 + $0x10e8] ss:$16 sps:$4 sm:$0xff]  }
 0x1f5   :  { %4086 = vmatprep.subr.bf16.mxu0 %v6394_v1  ;;  %4563 = vmatprep.subr.bf16.mxu1 %v6397_v2  ;;  %v6490_v1 = vld [vmem:[#allocation2 + $0x1104] ss:$16 sps:$4 sm:$0xff]   ;;  %v6493_v2 = vld [vmem:[#allocation2 + $0x110c] ss:$16 sps:$4 sm:$0xff]  }
 0x1f8   :  { %4087 = vmatpush1.bf16.msra.mxu0 %v6392_v3  ;;  %4564 = vmatpush1.bf16.msra.mxu1 %v6395_v4  ;;  %v6488_v3 = vld [vmem:[#allocation2 + $0x1100] ss:$16 sps:$4 sm:$0xff]   ;;  %v6491_v4 = vld [vmem:[#allocation2 + $0x1108] ss:$16 sps:$4 sm:$0xff]  }
 0x1f9   :  { %4088 = vmatprep.subr.bf16.mxu0 %v6400_v5  ;;  %4565 = vmatprep.subr.bf16.mxu1 %v6403_v6  ;;  %v6496_v5 = vld [vmem:[#allocation2 + $0x1124] ss:$16 sps:$4 sm:$0xff]   ;;  %v6499_v6 = vld [vmem:[#allocation2 + $0x112c] ss:$16 sps:$4 sm:$0xff]  }
 0x1fc   :  { %4089 = vmatpush1.bf16.msra.mxu0 %v6398_v7  ;;  %4566 = vmatpush1.bf16.msra.mxu1 %v6401_v8  ;;  %v6494_v7 = vld [vmem:[#allocation2 + $0x1120] ss:$16 sps:$4 sm:$0xff]   ;;  %v6497_v8 = vld [vmem:[#allocation2 + $0x1128] ss:$16 sps:$4 sm:$0xff]  }
 0x1fd   :  { %4090 = vmatprep.subr.bf16.mxu0 %v6406_v9  ;;  %4567 = vmatprep.subr.bf16.mxu1 %v6409_v10  ;;  %v6502_v9 = vld [vmem:[#allocation2 + $0x1144] ss:$16 sps:$4 sm:$0xff]   ;;  %v6505_v10 = vld [vmem:[#allocation2 + $0x114c] ss:$16 sps:$4 sm:$0xff]  }
 0x200   :  { %4091 = vmatpush1.bf16.msra.mxu0 %v6404_v11  ;;  %4568 = vmatpush1.bf16.msra.mxu1 %v6407_v12  ;;  %v6500_v11 = vld [vmem:[#allocation2 + $0x1140] ss:$16 sps:$4 sm:$0xff]   ;;  %v6503_v12 = vld [vmem:[#allocation2 + $0x1148] ss:$16 sps:$4 sm:$0xff]  }
 0x201   :  { %4092 = vmatprep.subr.bf16.mxu0 %v6412_v13  ;;  %4569 = vmatprep.subr.bf16.mxu1 %v6415_v14  ;;  %v6508_v13 = vld [vmem:[#allocation2 + $0x1164] ss:$16 sps:$4 sm:$0xff]   ;;  %v6511_v14 = vld [vmem:[#allocation2 + $0x116c] ss:$16 sps:$4 sm:$0xff]  }
 0x204   :  { %4093 = vmatpush1.bf16.msra.mxu0 %v6410_v15  ;;  %4570 = vmatpush1.bf16.msra.mxu1 %v6413_v16  ;;  %v6506_v15 = vld [vmem:[#allocation2 + $0x1160] ss:$16 sps:$4 sm:$0xff]   ;;  %v6509_v16 = vld [vmem:[#allocation2 + $0x1168] ss:$16 sps:$4 sm:$0xff]  }
 0x205   :  { %4094 = vmatprep.subr.bf16.mxu0 %v6418_v17  ;;  %4571 = vmatprep.subr.bf16.mxu1 %v6421_v18  ;;  %v6514_v17 = vld [vmem:[#allocation2 + $0x1184] ss:$16 sps:$4 sm:$0xff]   ;;  %v6517_v18 = vld [vmem:[#allocation2 + $0x118c] ss:$16 sps:$4 sm:$0xff]  }
 0x208   :  { %4095 = vmatpush1.bf16.msra.mxu0 %v6416_v19  ;;  %4572 = vmatpush1.bf16.msra.mxu1 %v6419_v20  ;;  %v6512_v19 = vld [vmem:[#allocation2 + $0x1180] ss:$16 sps:$4 sm:$0xff]   ;;  %v6515_v20 = vld [vmem:[#allocation2 + $0x1188] ss:$16 sps:$4 sm:$0xff]  }
 0x209   :  { %4096 = vmatprep.subr.bf16.mxu0 %v6426_v21  ;;  %4573 = vmatprep.subr.bf16.mxu1 %v6429_v22  ;;  %v6520_v21 = vld [vmem:[#allocation2 + $0x11a4] ss:$16 sps:$4 sm:$0xff]   ;;  %v6523_v22 = vld [vmem:[#allocation2 + $0x11ac] ss:$16 sps:$4 sm:$0xff]  }
 0x20c   :  { %4097 = vmatpush1.bf16.msra.mxu0 %v6424_v23  ;;  %4574 = vmatpush1.bf16.msra.mxu1 %v6427_v24  ;;  %v6518_v23 = vld [vmem:[#allocation2 + $0x11a0] ss:$16 sps:$4 sm:$0xff]   ;;  %v6521_v24 = vld [vmem:[#allocation2 + $0x11a8] ss:$16 sps:$4 sm:$0xff]  }
 0x20d   :  { %4098 = vmatprep.subr.bf16.mxu0 %v6433_v25  ;;  %4575 = vmatprep.subr.bf16.mxu1 %v6436_v26  ;;  %v6529_v25 = vld [vmem:[#allocation2 + $0x11c4] ss:$16 sps:$4 sm:$0xff]   ;;  %v6532_v26 = vld [vmem:[#allocation2 + $0x11cc] ss:$16 sps:$4 sm:$0xff]  }
 0x210   :  { %4099 = vmatpush1.bf16.msra.mxu0 %v6431_v27  ;;  %4576 = vmatpush1.bf16.msra.mxu1 %v6434_v28  ;;  %v6527_v27 = vld [vmem:[#allocation2 + $0x11c0] ss:$16 sps:$4 sm:$0xff]   ;;  %v6530_v28 = vld [vmem:[#allocation2 + $0x11c8] ss:$16 sps:$4 sm:$0xff]  }
 0x211   :  { %4121 = vmatprep.subr.bf16.mxu0 %v6442_v29  ;;  %4598 = vmatprep.subr.bf16.mxu1 %v6445_v30  ;;  %v6535_v29 = vld [vmem:[#allocation2 + $0x11e4] ss:$16 sps:$4 sm:$0xff]   ;;  %v6538_v30 = vld [vmem:[#allocation2 + $0x11ec] ss:$16 sps:$4 sm:$0xff]  }
 0x213   :  { %4101 = vmatmul.mubr.bf16.vlgmr.msra.gmra.mrb[0].mxu0 %v6437_v31  ;;  %4578 = vmatmul.mubr.bf16.vlgmr.msra.gmra.mrb[0].mxu1 %v6437_v31  ;;  %v6533_v31 = vld [vmem:[#allocation2 + $0x11e0] ss:$16 sps:$4 sm:$0xff]  }
 0x214   :  { %4122 = vmatpush1.bf16.msra.mxu0 %v6440_v32  ;;  %4599 = vmatpush1.bf16.msra.mxu1 %v6443_v33  ;;  %v6536_v32 = vld [vmem:[#allocation2 + $0x11e8] ss:$16 sps:$4 sm:$0xff]  }
 0x215   :  { %4123 = vmatprep.subr.bf16.mxu0 %v6448_v34  ;;  %4600 = vmatprep.subr.bf16.mxu1 %v6451_v35  ;;  %v6539_v33 = vld [vmem:[%s6830_s0 + $0x40] ss:$72 sps:$4 sm:$0xff]   ;;  %v6542_v34 = vld [vmem:[%s6830_s0 + $0xd4] ss:$72 sps:$4 sm:$0xff]   ;;  %v6544_v35 = vld [vmem:[%s6830_s0 + $0xd0] ss:$72 sps:$4 sm:$0xff]  }
 0x216   :  { %4110 = vmatprep.mubr.bf16.mxu0 %v6524_v36  ;;  %4587 = vmatprep.mubr.bf16.mxu1 %v6524_v36 }
 0x218   :  { %4124 = vmatpush1.bf16.msra.mxu0 %v6446_v37  ;;  %4601 = vmatpush1.bf16.msra.mxu1 %v6449_v38 }
 0x219   :  { %4125 = vmatprep.subr.bf16.mxu0 %v6454_v39  ;;  %4602 = vmatprep.subr.bf16.mxu1 %v6457_v40 }
 0x21b   :  { %4111 = vmatmul.mubr.bf16.gmra.mrb[4].mxu0 %v6526_v41  ;;  %4588 = vmatmul.mubr.bf16.gmra.mrb[4].mxu1 %v6526_v41 }
 0x21c   :  { %4126 = vmatpush1.bf16.msra.mxu0 %v6452_v42  ;;  %4603 = vmatpush1.bf16.msra.mxu1 %v6455_v43 }
 0x21d   :  { %4127 = vmatprep.subr.bf16.mxu0 %v6460_v44  ;;  %4604 = vmatprep.subr.bf16.mxu1 %v6463_v45 }
 0x21e   :  { %4153 = vmatprep.mubr.bf16.mxu0 %v6541_v46  ;;  %4630 = vmatprep.mubr.bf16.mxu1 %v6541_v46 }
 0x220   :  { %4128 = vmatpush1.bf16.msra.mxu0 %v6458_v47  ;;  %4605 = vmatpush1.bf16.msra.mxu1 %v6461_v48 }
 0x221   :  { %4129 = vmatprep.subr.bf16.mxu0 %v6466_v49  ;;  %4606 = vmatprep.subr.bf16.mxu1 %v6469_v50 }
 0x224   :  { %4130 = vmatpush1.bf16.msra.mxu0 %v6464_v51  ;;  %4607 = vmatpush1.bf16.msra.mxu1 %v6467_v52 }
 0x225   :  { %4131 = vmatprep.subr.bf16.mxu0 %v6472_v53  ;;  %4608 = vmatprep.subr.bf16.mxu1 %v6475_v54 }
 0x228   :  { %4132 = vmatpush1.bf16.msra.mxu0 %v6470_v55  ;;  %4609 = vmatpush1.bf16.msra.mxu1 %v6473_v56 }
 0x229   :  { %4133 = vmatprep.subr.bf16.mxu0 %v6478_v57  ;;  %4610 = vmatprep.subr.bf16.mxu1 %v6481_v58 }
 0x22c   :  { %4134 = vmatpush1.bf16.msra.mxu0 %v6476_v59  ;;  %4611 = vmatpush1.bf16.msra.mxu1 %v6479_v60 }
 0x22d   :  { %4135 = vmatprep.subr.bf16.mxu0 %v6484_v61  ;;  %4612 = vmatprep.subr.bf16.mxu1 %v6487_v62  ;;  %v4751_v62 = vlaneseq }
 0x230   :  { %4136 = vmatpush1.bf16.msra.mxu0 %v6482_v63  ;;  %4613 = vmatpush1.bf16.msra.mxu1 %v6485_v0 }
 0x231   :  { %4137 = vmatprep.subr.bf16.mxu0 %v6490_v1  ;;  %4614 = vmatprep.subr.bf16.mxu1 %v6493_v2 }
 0x234   :  { %4138 = vmatpush1.bf16.msra.mxu0 %v6488_v3  ;;  %4615 = vmatpush1.bf16.msra.mxu1 %v6491_v4 }
 0x235   :  { %4139 = vmatprep.subr.bf16.mxu0 %v6496_v5  ;;  %4616 = vmatprep.subr.bf16.mxu1 %v6499_v6 }
 0x238   :  { %4140 = vmatpush1.bf16.msra.mxu0 %v6494_v7  ;;  %4617 = vmatpush1.bf16.msra.mxu1 %v6497_v8 }
 0x239   :  { %4141 = vmatprep.subr.bf16.mxu0 %v6502_v9  ;;  %4618 = vmatprep.subr.bf16.mxu1 %v6505_v10 }
 0x23c   :  { %4142 = vmatpush1.bf16.msra.mxu0 %v6500_v11  ;;  %4619 = vmatpush1.bf16.msra.mxu1 %v6503_v12 }
 0x23d   :  { %4143 = vmatprep.subr.bf16.mxu0 %v6508_v13  ;;  %4620 = vmatprep.subr.bf16.mxu1 %v6511_v14 }
 0x240   :  { %4144 = vmatpush1.bf16.msra.mxu0 %v6506_v15  ;;  %4621 = vmatpush1.bf16.msra.mxu1 %v6509_v16 }
 0x241   :  { %4145 = vmatprep.subr.bf16.mxu0 %v6514_v17  ;;  %4622 = vmatprep.subr.bf16.mxu1 %v6517_v18 }
 0x244   :  { %4146 = vmatpush1.bf16.msra.mxu0 %v6512_v19  ;;  %4623 = vmatpush1.bf16.msra.mxu1 %v6515_v20 }
 0x245   :  { %4147 = vmatprep.subr.bf16.mxu0 %v6520_v21  ;;  %4624 = vmatprep.subr.bf16.mxu1 %v6523_v22 }
 0x248   :  { %4148 = vmatpush1.bf16.msra.mxu0 %v6518_v23  ;;  %4625 = vmatpush1.bf16.msra.mxu1 %v6521_v24 }
 0x249   :  { %4149 = vmatprep.subr.bf16.mxu0 %v6529_v25  ;;  %4626 = vmatprep.subr.bf16.mxu1 %v6532_v26 }
 0x24c   :  { %4150 = vmatpush1.bf16.msra.mxu0 %v6527_v27  ;;  %4627 = vmatpush1.bf16.msra.mxu1 %v6530_v28 }
 0x24d   :  { %4151 = vmatprep.subr.bf16.mxu0 %v6535_v29  ;;  %4628 = vmatprep.subr.bf16.mxu1 %v6538_v30 }
 0x250   :  { %4152 = vmatpush1.bf16.msra.mxu0 %v6533_v31  ;;  %4629 = vmatpush1.bf16.msra.mxu1 %v6536_v32 }
 0x253   :  { %4154 = vmatmul.mubr.bf16.vlgmr.msra.gmra.mrb[0].mxu0 %v6539_v33  ;;  %4631 = vmatmul.mubr.bf16.vlgmr.msra.gmra.mrb[0].mxu1 %v6539_v33 }
 0x254   :  { %4163 = vmatprep.mubr.bf16.mxu0 %v6542_v34  ;;  %4640 = vmatprep.mubr.bf16.mxu1 %v6542_v34 }
 0x25b   :  { %4164 = vmatmul.mubr.bf16.gmra.mrb[4].mxu0 %v6544_v35  ;;  %4641 = vmatmul.mubr.bf16.gmra.mrb[4].mxu1 %v6544_v35 }
 0x326   :  { %v6709_v36 = vpop.f32.mrb[0].mxu0  ;;  %v6711_v37 = vpop.f32.mrb[0].mxu1 }
 0x327   :  { %v6713_v38 = vpop.f32.mrb[1].mxu0  ;;  %v6715_v39 = vpop.f32.mrb[1].mxu1  ;;  %v4687_v40 = vmul.f32 %v6709_v36, %v6709_v36  ;;  %v4689_v41 = vmul.f32 %v6711_v37, %v6711_v37 }
 0x328   :  { %v4688_v42 = vmul.f32 %v6713_v38, %v6713_v38  ;;  %v4690_v43 = vmul.f32 %v6715_v39, %v6715_v39  ;;  %v6725_v44 = vpop.f32.mrb[2].mxu0  ;;  %v6727_v45 = vpop.f32.mrb[2].mxu1 }
 0x329   :  { %v4651_v46 = vadd.f32 %v6725_v44, %v6709_v36  ;;  %v4691_v47 = vmul.f32 %v6725_v44, %v6725_v44  ;;  %v4669_v48 = vadd.f32 %v6727_v45, %v6711_v37  ;;  %v4693_v49 = vmul.f32 %v6727_v45, %v6727_v45  ;;  %v6737_v50 = vpop.f32.mrb[3].mxu0  ;;  %v6739_v51 = vpop.f32.mrb[3].mxu1 }
 0x32a   :  { %v4660_v52 = vadd.f32 %v6737_v50, %v6713_v38  ;;  %v4692_v53 = vmul.f32 %v6737_v50, %v6737_v50  ;;  %v4678_v54 = vadd.f32 %v6739_v51, %v6715_v39  ;;  %v4694_v55 = vmul.f32 %v6739_v51, %v6739_v51 }
 0x32b   :  { %v4703_v56 = vadd.f32 %v4691_v47, %v4687_v40  ;;  %v4721_v57 = vadd.f32 %v4693_v49, %v4689_v41 }
 0x32c   :  { %v4712_v58 = vadd.f32 %v4692_v53, %v4688_v42  ;;  %v4730_v59 = vadd.f32 %v4694_v55, %v4690_v43 }
 0x32e   :  { %v6749_v60 = vpop.f32.mrb[4].mxu0  ;;  %v6751_v61 = vpop.f32.mrb[4].mxu1 }
 0x32f   :  { %v4652_v63 = vadd.f32 %v4651_v46, %v6749_v60  ;;  %v4695_v0 = vmul.f32 %v6749_v60, %v6749_v60  ;;  %v4670_v1 = vadd.f32 %v4669_v48, %v6751_v61  ;;  %v4697_v2 = vmul.f32 %v6751_v61, %v6751_v61  ;;  %v6759_v3 = vpop.f32.mrb[5].mxu0  ;;  %v6761_v4 = vpop.f32.mrb[5].mxu1 }
 0x330   :  { %v4661_v5 = vadd.f32 %v4660_v52, %v6759_v3  ;;  %v4696_v6 = vmul.f32 %v6759_v3, %v6759_v3  ;;  %v4679_v7 = vadd.f32 %v4678_v54, %v6761_v4  ;;  %v4698_v8 = vmul.f32 %v6761_v4, %v6761_v4  ;;  %v6769_v9 = vpop.f32.mrb[6].mxu0  ;;  %v6771_v10 = vpop.f32.mrb[6].mxu1 }
 0x331   :  { %v4704_v11 = vadd.f32 %v4703_v56, %v4695_v0  ;;  %v4722_v12 = vadd.f32 %v4721_v57, %v4697_v2  ;;  %v4653_v13 = vadd.f32 %v4652_v63, %v6769_v9  ;;  %v4699_v14 = vmul.f32 %v6769_v9, %v6769_v9  ;;  %v6776_v15 = vpop.f32.mrb[7].mxu0  ;;  %v6778_v16 = vpop.f32.mrb[7].mxu1 }
 0x332   :  { %v4713_v17 = vadd.f32 %v4712_v58, %v4696_v6  ;;  %v4731_v18 = vadd.f32 %v4730_v59, %v4698_v8  ;;  %v4671_v19 = vadd.f32 %v4670_v1, %v6771_v10  ;;  %v4701_v20 = vmul.f32 %v6771_v10, %v6771_v10 }
 0x333   :  { %v4654_v21 = vrot.slane %v4653_v13, 4  ;;  %v4705_v22 = vadd.f32 %v4704_v11, %v4699_v14  ;;  %v4662_v23 = vadd.f32 %v4661_v5, %v6776_v15  ;;  %v4700_v24 = vmul.f32 %v6776_v15, %v6776_v15 }
 0x334   :  { %v4672_v25 = vrot.slane %v4671_v19, 4  ;;  %v4723_v26 = vadd.f32 %v4722_v12, %v4701_v20  ;;  %v4680_v27 = vadd.f32 %v4679_v7, %v6778_v16  ;;  %v4702_v28 = vmul.f32 %v6778_v16, %v6778_v16 }
 0x335   :  { %v4655_v29 = vadd.f32 %v4654_v21, %v4653_v13  ;;  %v4706_v30 = vrot.slane %v4705_v22, 4  ;;  %v4663_v31 = vrot.slane %v4662_v23, 4  ;;  %v4714_v32 = vadd.f32 %v4713_v17, %v4700_v24 }
 0x336   :  { %v4673_v33 = vadd.f32 %v4672_v25, %v4671_v19  ;;  %v4724_v34 = vrot.slane %v4723_v26, 4  ;;  %v4681_v35 = vrot.slane %v4680_v27, 4  ;;  %v4732_v40 = vadd.f32 %v4731_v18, %v4702_v28 }
 0x337   :  { %v4656_v41 = vrot.slane %v4655_v29, 2  ;;  %v4707_v42 = vadd.f32 %v4706_v30, %v4705_v22  ;;  %v4664_v43 = vadd.f32 %v4663_v31, %v4662_v23  ;;  %v4715_v46 = vrot.slane %v4714_v32, 4 }
 0x338   :  { %v4674_v47 = vrot.slane %v4673_v33, 2  ;;  %v4725_v48 = vadd.f32 %v4724_v34, %v4723_v26  ;;  %v4682_v49 = vadd.f32 %v4681_v35, %v4680_v27  ;;  %v4733_v52 = vrot.slane %v4732_v40, 4 }
 0x339   :  { %v4657_v53 = vadd.f32 %v4656_v41, %v4655_v29  ;;  %v4708_v54 = vrot.slane %v4707_v42, 2  ;;  %v4665_v55 = vrot.slane %v4664_v43, 2  ;;  %v4716_v56 = vadd.f32 %v4715_v46, %v4714_v32 }
 0x33a   :  { %v4675_v57 = vadd.f32 %v4674_v47, %v4673_v33  ;;  %v4726_v58 = vrot.slane %v4725_v48, 2  ;;  %v4683_v59 = vrot.slane %v4682_v49, 2  ;;  %v4734_v63 = vadd.f32 %v4733_v52, %v4732_v40 }
 0x33b   :  { %v4658_v0 = vrot.slane %v4657_v53, 1  ;;  %v4709_v1 = vadd.f32 %v4708_v54, %v4707_v42  ;;  %v4666_v2 = vadd.f32 %v4665_v55, %v4664_v43  ;;  %v4717_v5 = vrot.slane %v4716_v56, 2 }
 0x33c   :  { %v4676_v6 = vrot.slane %v4675_v57, 1  ;;  %v4727_v7 = vadd.f32 %v4726_v58, %v4725_v48  ;;  %v4684_v8 = vadd.f32 %v4683_v59, %v4682_v49  ;;  %v4735_v11 = vrot.slane %v4734_v63, 2 }
 0x33d   :  { %v4659_v12 = vadd.f32 %v4658_v0, %v4657_v53  ;;  %v4710_v13 = vrot.slane %v4709_v1, 1  ;;  %v4667_v14 = vrot.slane %v4666_v2, 1  ;;  %v4718_v17 = vadd.f32 %v4717_v5, %v4716_v56 }
 0x33e   :  { %v4728_v18 = vrot.slane %v4727_v7, 1  ;;  %v4736_v19 = vadd.f32 %v4735_v11, %v4734_v63  ;;  %v4685_v23 = vrot.slane %v4684_v8, 1  ;;  %v4752_v24 = vshrl.u32 %v4751_v62, 7 }
 0x33f   :  { %v4711_v20 = vadd.f32 %v4710_v13, %v4709_v1  ;;  %v4668_v21 = vadd.f32 %v4667_v14, %v4666_v2  ;;  %v4719_v22 = vrot.slane %v4718_v17, 1  ;;  %v4677_v25 = vadd.f32 %v4676_v6, %v4675_v57 }
 0x340   :  { %v4737_v28 = vrot.slane %v4736_v19, 1  ;;  %v4729_v29 = vadd.f32 %v4728_v18, %v4727_v7  ;;  %v4686_v31 = vadd.f32 %v4685_v23, %v4684_v8  ;;  %v4753_v40 = vsub.s32 0, %v4752_v24 }
 0x341   :  { %v4720_v26 = vadd.f32 %v4719_v22, %v4718_v17  ;;  %v4739_v27 = vadd.f32 %v4668_v21, %v4659_v12 }
 0x342   :  { %v4738_v33 = vadd.f32 %v4737_v28, %v4736_v19 }
 0x343   :  { %v4740_v30 = vadd.f32 %v4720_v26, %v4711_v20  ;;  %v4741_v32 = vadd.f32 %v4739_v27, %v4677_v25 }
 0x345   :  { %v4742_v34 = vadd.f32 %v4740_v30, %v4729_v29  ;;  %v4743_v35 = vadd.f32 %v4741_v32, %v4686_v31 }
 0x347   :  { %v4744_v41 = vadd.f32 %v4742_v34, %v4738_v33  ;;  %v4745_v42 = vmul.f32 0.0078125, %v4743_v35 }
 0x349   :  { %v4746_v43 = vmul.f32 0.0078125, %v4744_v41  ;;  %v4747_v46 = vmul.f32 %v4745_v42, %v4745_v42  ;;  %v4754_v47 = vrot.slane %v4745_v42, %v4753_v40 }
 0x34b   :  { %v4748_v48 = vsub.f32 %v4746_v43, %v4747_v46  ;;  %v4755_v62 = vsub.f32 %v6709_v36, %v4754_v47  ;;  %v4756_v49 = vsub.f32 %v6713_v38, %v4754_v47  ;;  %v4757_v52 = vsub.f32 %v6711_v37, %v4754_v47 }
 0x34c   :  { %v4758_v53 = vsub.f32 %v6715_v39, %v4754_v47  ;;  %v4759_v54 = vsub.f32 %v6725_v44, %v4754_v47  ;;  %v4760_v55 = vsub.f32 %v6737_v50, %v4754_v47  ;;  %v4761_v56 = vsub.f32 %v6727_v45, %v4754_v47 }
 0x34d   :  { %v4749_v57 = vadd.f32 1e-05, %v4748_v48  ;;  %v4762_v58 = vsub.f32 %v6739_v51, %v4754_v47  ;;  %v4763_v59 = vsub.f32 %v6749_v60, %v4754_v47  ;;  %v4764_v63 = vsub.f32 %v6759_v3, %v4754_v47 }
 0x34e   :  { %v4765_v36 = vsub.f32 %v6751_v61, %v4754_v47  ;;  %v4766_v38 = vsub.f32 %v6761_v4, %v4754_v47  ;;  %v4767_v37 = vsub.f32 %v6769_v9, %v4754_v47  ;;  %v4768_v39 = vsub.f32 %v6776_v15, %v4754_v47 }
 0x34f   :  { %6545 = vrsqrt.f32 %v4749_v57  ;;  %v4769_v44 = vsub.f32 %v6771_v10, %v4754_v47  ;;  %v4770_v45 = vsub.f32 %v6778_v16, %v4754_v47 }
 0x359   :  { %v6546_v50 = vpop.eup %6545 }
 0x35a   :  { %v4774_v0 = vrot.slane %v6546_v50, %v4753_v40 }
 0x35c   :  { %v4775_v51 = vmul.f32 %v4774_v0, %v4755_v62  ;;  %v4776_v1 = vmul.f32 %v4774_v0, %v4756_v49  ;;  %v4777_v60 = vmul.f32 %v4774_v0, %v4757_v52  ;;  %v4778_v2 = vmul.f32 %v4774_v0, %v4758_v53 }
 0x35d   :  { %v4779_v3 = vmul.f32 %v4774_v0, %v4759_v54  ;;  %v4780_v5 = vmul.f32 %v4774_v0, %v4760_v55  ;;  %v4781_v61 = vmul.f32 %v4774_v0, %v4761_v56  ;;  %v4782_v6 = vmul.f32 %v4774_v0, %v4762_v58 }
 0x35e   :  { %v4783_v4 = vmul.f32 %v4774_v0, %v4763_v59  ;;  %v4784_v7 = vmul.f32 %v4774_v0, %v4764_v63  ;;  %v4785_v9 = vmul.f32 %v4774_v0, %v4765_v36  ;;  %v4786_v8 = vmul.f32 %v4774_v0, %v4766_v38 }
 0x35f   :  { %v4787_v15 = vmul.f32 %v4774_v0, %v4767_v37  ;;  %v4788_v11 = vmul.f32 %v4774_v0, %v4768_v39  ;;  %v4789_v12 = vmul.f32 %v4774_v0, %v4769_v44  ;;  %v4790_v10 = vmul.f32 %v4774_v0, %v4770_v45 }
 0x360   :  { %v4791_v13 = vmax.f32 %v4775_v51, 0.0  ;;  %v4792_v16 = vmax.f32 %v4776_v1, 0.0  ;;  %v4793_v14 = vmax.f32 %v4777_v60, 0.0  ;;  %v4794_v17 = vmax.f32 %v4778_v2, 0.0 }
 0x361   :  { %v4795_v18 = vmax.f32 %v4779_v3, 0.0  ;;  %v4796_v19 = vmax.f32 %v4780_v5, 0.0  ;;  %v4797_v20 = vmax.f32 %v4781_v61, 0.0  ;;  %v4798_v21 = vmax.f32 %v4782_v6, 0.0 }
 0x362   :  { %v4799_v22 = vmax.f32 %v4783_v4, 0.0  ;;  %v4800_v23 = vmax.f32 %v4784_v7, 0.0  ;;  %v4801_v24 = vmax.f32 %v4785_v9, 0.0  ;;  %v4802_v25 = vmax.f32 %v4786_v8, 0.0 }
 0x363   :  { %v4803_v26 = vmax.f32 %v4787_v15, 0.0  ;;  %v4804_v27 = vmax.f32 %v4788_v11, 0.0  ;;  %v4805_v28 = vmax.f32 %v4789_v12, 0.0  ;;  %v4806_v29 = vmax.f32 %v4790_v10, 0.0 }
 0x364   :  { %v5488_v30 = vpack.c.bf16 %v4792_v16, %v4791_v13  ;;  %v5489_v31 = vpack.c.bf16 %v4794_v17, %v4793_v14  ;;  %v5490_v32 = vpack.c.bf16 %v4796_v19, %v4795_v18  ;;  %v5491_v33 = vpack.c.bf16 %v4798_v21, %v4797_v20 }
 0x365   :  { %v5492_v34 = vpack.c.bf16 %v4800_v23, %v4799_v22  ;;  %v5493_v35 = vpack.c.bf16 %v4802_v25, %v4801_v24  ;;  %v5494_v40 = vpack.c.bf16 %v4804_v27, %v4803_v26  ;;  %v5495_v41 = vpack.c.bf16 %v4806_v29, %v4805_v28 }
 0x366   :  { %4855 = vst [vmem:[%s6832_s2] sm:$0xff] %v5488_v30  ;;  %4856 = vst [vmem:[%s6832_s2 + $0x8] sm:$0xff] %v5489_v31 }
 0x367   :  { %4857 = vst [vmem:[%s6832_s2 + $0x10] sm:$0xff] %v5490_v32  ;;  %4858 = vst [vmem:[%s6832_s2 + $0x18] sm:$0xff] %v5491_v33 }
 0x368   :  { %4859 = vst [vmem:[%s6832_s2 + $0x20] sm:$0xff] %v5492_v34  ;;  %4860 = vst [vmem:[%s6832_s2 + $0x28] sm:$0xff] %v5493_v35 }
 0x369   :  { %4861 = vst [vmem:[%s6832_s2 + $0x30] sm:$0xff] %v5494_v40  ;;  %4862 = vst [vmem:[%s6832_s2 + $0x38] sm:$0xff] %v5495_v41 }
 0x36a   :  { %4867 = vsyncpa [#allocation3], 1 }

// kernel: _forward.7
= control target key start
LH: loop header
LB: loop body
LE: loop exit
PB: predicated region body
PF: predicated region fallthrough
CT: control target
= control target key end

     0   :  { %s2274_s9 = smov 0   ;;  %s2649_s0 = inlined_call_operand.vmem [shape: bf16[512,576], index: 0, kind: input, shape index: {}]   ;;  %s2650_s1 = inlined_call_operand.vmem [shape: bf16[576,128], index: 1, kind: input, shape index: {}]   ;;  %s2651_s2 = inlined_call_operand.vmem [shape: f32[512,128], index: 2, kind: output, shape index: {}]  }
   0x1 LB: > { %s1587_s10 = sadd.s32 4294967295, %s2257_s9   ;;  %p1591_p0 = scmp.ge.s32.totalorder %s2257_s9, 1  ;;  %s2257_s9 = sphi %s2274_s9, %s12_s9  }
   0x2   : > { %p114_p1 = scmp.lt.s32.totalorder %s2257_s9, 3 }
   0x4   : > { %p115_p2 = pnand %p1591_p0, %p114_p1 }
   0x5   : > { %v2039_v0 = vld [vmem:[%s2650_s1 + $0x40] sm:$0xff] (!%p115_p2)   ;;  %s1592_s13 = sshll.u32 (!%p115_p2), %s1587_s10, 5  ;;  %v2041_v2 = vld [vmem:[%s2650_s1 + $0x48] sm:$0xff] (!%p115_p2)   ;;  %v2043_v4 = vld [vmem:[%s2650_s1 + $0x50] sm:$0xff] (!%p115_p2)   ;;  %vm935_vm0 = vcmask (!%p115_p2), 523264  }
   0x6   : > { %118 = sbr.rel (%p115_p2) target bundleno = 424 (0x1a8), region = 28  ;;  %v2040_v1 = vld [vmem:[%s2650_s1] sm:$0xff] (!%p115_p2)   ;;  %1730 = vmatprep.subr.bf16.mxu0 (!%p115_p2), %v2039_v0  ;;  %2014 = vmatprep.subr.bf16.mxu1 (!%p115_p2), %v2039_v0  ;;  %p138_p3 = scmp.lt.s32.totalorder (!%p115_p2), %s1592_s13, 63  ;;  %v2042_v3 = vld [vmem:[%s2650_s1 + $0x8] sm:$0xff] (!%p115_p2)   ;;  %v2044_v5 = vld [vmem:[%s2650_s1 + $0x10] sm:$0xff] (!%p115_p2)  }
   0x7   : > { %1731 = vmatpush3.bf16.msra.mxu0 (!%p115_p2), %v2040_v1  ;;  %2022 = vmatpush3.bf16.msra.mxu1 (!%p115_p2), %v2040_v1  ;;  %v2045_v6 = vld [vmem:[%s2650_s1 + $0x58] sm:$0xff] (!%p115_p2)   ;;  %v2047_v8 = vld [vmem:[%s2650_s1 + $0x60] sm:$0xff] (!%p115_p2)   ;;  %v2049_v10 = vld [vmem:[%s2650_s1 + $0x68] sm:$0xff] (!%p115_p2)  }
   0x8   : > { %1732 = vmatprep.subr.bf16.mxu0 (!%p115_p2), %v2041_v2  ;;  %2015 = vmatprep.subr.bf16.mxu1 (!%p115_p2), %v2041_v2  ;;  %v2046_v7 = vld [vmem:[%s2650_s1 + $0x18] sm:$0xff] (!%p115_p2)   ;;  %v2048_v9 = vld [vmem:[%s2650_s1 + $0x20] sm:$0xff] (!%p115_p2)   ;;  %v2050_v13 = vld [vmem:[%s2650_s1 + $0x28] sm:$0xff] (!%p115_p2)  }
   0x9   : > { %v2051_v14 = vld [vmem:[%s2650_s1 + $0x70] sm:$0xff] (!%p115_p2)   ;;  %v2053_v16 = vld [vmem:[%s2650_s1 + $0x78] sm:$0xff] (!%p115_p2)   ;;  %v2061_v18 = vld [vmem:[%s2650_s1 + $0xc0] sm:$0xff] (!%p115_p2)  }
   0xa   : > { %v2052_v15 = vld [vmem:[%s2650_s1 + $0x30] sm:$0xff] (!%p115_p2)   ;;  %v2054_v17 = vld [vmem:[%s2650_s1 + $0x38] sm:$0xff] (!%p115_p2)   ;;  %v2064_v19 = vld [vmem:[%s2650_s1 + $0x100] sm:$0xff] (!%p115_p2)  }
   0xb   : > { %1733 = vmatpush3.bf16.msra.mxu0 (!%p115_p2), %v2042_v3  ;;  %2023 = vmatpush3.bf16.msra.mxu1 (!%p115_p2), %v2042_v3  ;;  %v2062_v22 = vld [vmem:[%s2650_s1 + $0x80] sm:$0xff] (!%p115_p2)   ;;  %v2063_v23 = vld [vmem:[%s2650_s1 + $0xc8] sm:$0xff] (!%p115_p2)   ;;  %v2072_v28 = vld [vmem:[%s2650_s1 + $0xd0] sm:$0xff] (!%p115_p2)  }
   0xc   : > { %1734 = vmatprep.subr.bf16.mxu0 (!%p115_p2), %v2043_v4  ;;  %2016 = vmatprep.subr.bf16.mxu1 (!%p115_p2), %v2043_v4  ;;  %v2065_v26 = vld [vmem:[%s2650_s1 + $0x88] sm:$0xff] (!%p115_p2)   ;;  %v2073_v30 = vld [vmem:[%s2650_s1 + $0x90] sm:$0xff] (!%p115_p2)   ;;  %v2074_v31 = vld [vmem:[%s2650_s1 + $0xd8] sm:$0xff] (!%p115_p2)  }
   0xd   : > { %s2653_s13 = smov (!%p138_p3, %s1592_s13), 63  ;;  %v2075_v34 = vld [vmem:[%s2650_s1 + $0x98] sm:$0xff]   ;;  %v2095_v35 = vld [vmem:[%s2650_s1 + $0x108] sm:$0xff]   ;;  %v2082_v37 = vld [vmem:[%s2650_s1 + $0xe0] sm:$0xff]  }
   0xe   : > { %s2030_s26 = smul.u32 20, %s2653_s13  ;;  %v2083_v39 = vld [vmem:[%s2650_s1 + $0xa0] sm:$0xff]   ;;  %v2084_v40 = vld [vmem:[%s2650_s1 + $0xe8] sm:$0xff]   ;;  %v2092_v46 = vld [vmem:[%s2650_s1 + $0xf0] sm:$0xff]  }
   0xf   : > { %1735 = vmatpush3.bf16.msra.mxu0 %v2044_v5  ;;  %2024 = vmatpush3.bf16.msra.mxu1 %v2044_v5  ;;  %v2085_v43 = vld [vmem:[%s2650_s1 + $0xa8] sm:$0xff]   ;;  %v2115_v47 = vld [vmem:[%s2650_s1 + $0x110] sm:$0xff]   ;;  %v2094_v49 = vld [vmem:[%s2650_s1 + $0xf8] sm:$0xff]  }
  0x10   : > { %1736 = vmatprep.subr.bf16.mxu0 %v2045_v6  ;;  %2017 = vmatprep.subr.bf16.mxu1 %v2045_v6  ;;  %s2315_s5 = scalar_lea.vmem %s2649_s0, %s2030_s26  ;;  %v2093_v48 = vld [vmem:[%s2650_s1 + $0xb0] sm:$0xff]   ;;  %v2096_v52 = vld [vmem:[%s2650_s1 + $0xb8] sm:$0xff]  }
  0x11   : > { %v2057_v11 = vld [vmem:[%s2315_s5 + $0x4] ss:$20 sps:$4 sm:$0xff]   ;;  %v2055_v20 = vld [vmem:[%s2315_s5] ss:$20 sps:$4 sm:$0xff]   ;;  %v2070_v27 = vld [vmem:[%s2315_s5 + $0x28] ss:$20 sps:$4 sm:$0xff]  }
  0x12   : > { %v2060_v12 = vld [vmem:[%s2315_s5 + $0x1e4] ss:$20 sps:$4 sm:$0xff]   ;;  %1016 = vmatprep.mubr.bf16.mxu0 %v2057_v11  ;;  %v2058_v21 = vld [vmem:[%s2315_s5 + $0x1e0] ss:$20 sps:$4 sm:$0xff]   ;;  %v2071_v29 = vld [vmem:[%s2315_s5 + $0x208] ss:$20 sps:$4 sm:$0xff]  }
  0x13   : > { %1737 = vmatpush3.bf16.msra.mxu0 %v2046_v7  ;;  %2025 = vmatpush3.bf16.msra.mxu1 %v2046_v7  ;;  %v2066_v24 = vld [vmem:[%s2315_s5 + $0x2c] ss:$20 sps:$4 sm:$0xff]   ;;  %v2076_v32 = vld [vmem:[%s2315_s5 + $0x54] ss:$20 sps:$4 sm:$0xff]   ;;  %v2080_v36 = vld [vmem:[%s2315_s5 + $0x50] ss:$20 sps:$4 sm:$0xff]  }
  0x14   : > { %1738 = vmatprep.subr.bf16.mxu0 %v2047_v8  ;;  %2018 = vmatprep.subr.bf16.mxu1 %v2047_v8  ;;  %v2068_v25 = vld [vmem:[%s2315_s5 + $0x20c] ss:$20 sps:$4 sm:$0xff]   ;;  %v2078_v33 = vld [vmem:[%s2315_s5 + $0x234] ss:$20 sps:$4 sm:$0xff]   ;;  %v2081_v38 = vld [vmem:[%s2315_s5 + $0x230] ss:$20 sps:$4 sm:$0xff]  }
  0x15   : > { %1112 = vmatprep.mubr.bf16.mxu1 %v2060_v12  ;;  %v2086_v41 = vld [vmem:[%s2315_s5 + $0x7c] ss:$20 sps:$4 sm:$0xff]   ;;  %v2090_v44 = vld [vmem:[%s2315_s5 + $0x78] ss:$20 sps:$4 sm:$0xff]   ;;  %v2102_v54 = vld [vmem:[%s2315_s5 + $0xa0] ss:$20 sps:$4 sm:$0xff]  }
  0x16   : > { %v2088_v42 = vld [vmem:[%s2315_s5 + $0x25c] ss:$20 sps:$4 sm:$0xff]   ;;  %v2091_v45 = vld [vmem:[%s2315_s5 + $0x258] ss:$20 sps:$4 sm:$0xff]   ;;  %v2105_v57 = vld [vmem:[%s2315_s5 + $0x34] ss:$20 sps:$4 sm:$0xff]  }
  0x17   : > { %1739 = vmatpush3.bf16.msra.mxu0 %v2048_v9  ;;  %2026 = vmatpush3.bf16.msra.mxu1 %v2048_v9  ;;  %v2097_v50 = vld [vmem:[%s2315_s5 + $0xa4] ss:$20 sps:$4 sm:$0xff]   ;;  %v2101_v51 = vld [vmem:[%s2315_s5 + $0xc] ss:$20 sps:$4 sm:$0xff]   ;;  %v2099_v53 = vld [vmem:[%s2315_s5 + $0x8] ss:$20 sps:$4 sm:$0xff]  }
  0x18   : > { %1740 = vmatprep.subr.bf16.mxu0 %v2049_v10  ;;  %2019 = vmatprep.subr.bf16.mxu1 %v2049_v10  ;;  %v2103_v55 = vld [vmem:[%s2315_s5 + $0xcc] ss:$20 sps:$4 sm:$0xff]   ;;  %v2134_v56 = vld [vmem:[%s2650_s1 + $0x118] sm:$0xff]   ;;  %v2108_v59 = vld [vmem:[%s2315_s5 + $0x30] ss:$20 sps:$4 sm:$0xff]  }
  0x19   : > { %v2107_v58 = vld [vmem:[%s2315_s5 + $0xc8] ss:$20 sps:$4 sm:$0xff]   ;;  %v2113_v62 = vld [vmem:[%s2315_s5 + $0xf0] ss:$20 sps:$4 sm:$0xff]   ;;  %v2114_v63 = vld [vmem:[%s2315_s5 + $0x58] ss:$20 sps:$4 sm:$0xff]  }
  0x1a   : > { %v2109_v60 = vld [vmem:[%s2315_s5 + $0xf4] ss:$20 sps:$4 sm:$0xff]   ;;  %v2111_v61 = vld [vmem:[%s2315_s5 + $0x5c] ss:$20 sps:$4 sm:$0xff]   ;;  %v2118_v1 = vld [vmem:[%s2315_s5 + $0x84] ss:$20 sps:$4 sm:$0xff]  }
  0x1b   : > { %1741 = vmatpush3.bf16.msra.mxu0 %v2050_v13  ;;  %2027 = vmatpush3.bf16.msra.mxu1 %v2050_v13  ;;  %v2116_v0 = vld [vmem:[%s2315_s5 + $0x11c] ss:$20 sps:$4 sm:$0xff]   ;;  %v2120_v2 = vld [vmem:[%s2315_s5 + $0x118] ss:$20 sps:$4 sm:$0xff]   ;;  %v2121_v3 = vld [vmem:[%s2315_s5 + $0x80] ss:$20 sps:$4 sm:$0xff]  }
  0x1c   : > { %1742 = vmatprep.subr.bf16.mxu0 %v2051_v14  ;;  %2020 = vmatprep.subr.bf16.mxu1 %v2051_v14  ;;  %v2122_v4 = vld [vmem:[%s2315_s5 + $0x144] ss:$20 sps:$4 sm:$0xff]   ;;  %v2124_v5 = vld [vmem:[%s2315_s5 + $0xac] ss:$20 sps:$4 sm:$0xff]   ;;  %v2127_v7 = vld [vmem:[%s2315_s5 + $0xa8] ss:$20 sps:$4 sm:$0xff]  }
  0x1d   : > { %v2126_v6 = vld [vmem:[%s2315_s5 + $0x140] ss:$20 sps:$4 sm:$0xff]   ;;  %v2132_v10 = vld [vmem:[%s2315_s5 + $0x168] ss:$20 sps:$4 sm:$0xff]   ;;  %v2133_v11 = vld [vmem:[%s2315_s5 + $0xd0] ss:$20 sps:$4 sm:$0xff]  }
  0x1e   : > { %v2128_v8 = vld [vmem:[%s2315_s5 + $0x16c] ss:$20 sps:$4 sm:$0xff]   ;;  %v2130_v9 = vld [vmem:[%s2315_s5 + $0xd4] ss:$20 sps:$4 sm:$0xff]   ;;  %v2137_v13 = vld [vmem:[%s2315_s5 + $0xfc] ss:$20 sps:$4 sm:$0xff]  }
  0x1f   : > { %1743 = vmatpush3.bf16.msra.mxu0 %v2052_v15  ;;  %2028 = vmatpush3.bf16.msra.mxu1 %v2052_v15  ;;  %v2135_v12 = vld [vmem:[%s2315_s5 + $0x194] ss:$20 sps:$4 sm:$0xff]   ;;  %v2139_v14 = vld [vmem:[%s2315_s5 + $0x190] ss:$20 sps:$4 sm:$0xff]   ;;  %v2140_v15 = vld [vmem:[%s2315_s5 + $0xf8] ss:$20 sps:$4 sm:$0xff]  }
  0x20   : > { %1744 = vmatprep.subr.bf16.mxu0 %v2053_v16  ;;  %2021 = vmatprep.subr.bf16.mxu1 %v2053_v16  ;;  %v2141_v16 = vld [vmem:[%s2315_s5 + $0x1bc] ss:$20 sps:$4 sm:$0xff]  }
  0x23   : > { %1745 = vmatpush3.bf16.msra.mxu0 %v2054_v17  ;;  %2029 = vmatpush3.bf16.msra.mxu1 %v2054_v17  ;;  %v2143_v17 = vld [vmem:[%s2315_s5 + $0x124] ss:$20 sps:$4 sm:$0xff]  }
  0x24   : > { %1842 = vmatprep.subr.bf16.mxu1 %v2061_v18  ;;  %1974 = vmatprep.subr.bf16.mxu0 %v2064_v19  ;;  %v2145_v18 = vld [vmem:[%s2315_s5 + $0x1b8] ss:$20 sps:$4 sm:$0xff]  }
  0x26   : > { %1017 = vmatmul.mubr.bf16.vlgmr.msra.gmra.mrb[0].mxu0 %v2055_v20  ;;  %1113 = vmatmul.mubr.bf16.vlgmr.msra.gmra.mrb[0].mxu1 %v2058_v21  ;;  %v2147_v20 = vld [vmem:[%s2315_s5 + $0x14c] ss:$20 sps:$4 sm:$0xff]   ;;  %v2149_v21 = vld [vmem:[%s2315_s5 + $0x10] ss:$20 sps:$4 sm:$0xff]  }
  0x27   : > { %1843 = vmatpush3.bf16.msra.mxu1 %v2062_v22  ;;  %1975 = vmatpush3.bf16.msra.mxu0 %v2064_v19  ;;  %v2146_v19 = vld [vmem:[%s2315_s5 + $0x120] ss:$20 sps:$4 sm:$0xff]   ;;  %v2150_v22 = vld [vmem:[%s2315_s5 + $0x148] ss:$20 sps:$4 sm:$0xff]  }
  0x28   : > { %1844 = vmatprep.subr.bf16.mxu1 %v2063_v23  ;;  %1024 = vmatprep.mubr.bf16.mxu0 %v2066_v24  ;;  %v2151_v23 = vld [vmem:[%s2315_s5 + $0x38] ss:$20 sps:$4 sm:$0xff]   ;;  %v2152_v24 = vld [vmem:[%s2315_s5 + $0x174] ss:$20 sps:$4 sm:$0xff]  }
  0x29   : > { %1120 = vmatprep.mubr.bf16.mxu1 %v2068_v25  ;;  %1976 = vmatprep.subr.bf16.mxu0 %v2095_v35  ;;  %v2154_v25 = vld [vmem:[%s2315_s5 + $0x60] ss:$20 sps:$4 sm:$0xff]  }
  0x2b   : > { %1845 = vmatpush3.bf16.msra.mxu1 %v2065_v26  ;;  %1977 = vmatpush3.bf16.msra.mxu0 %v2095_v35  ;;  %v2155_v26 = vld [vmem:[%s2315_s5 + $0x170] ss:$20 sps:$4 sm:$0xff]   ;;  %v2166_v35 = vld [vmem:[%s2315_s5 + $0x128] ss:$20 sps:$4 sm:$0xff]  }
  0x2c   : > { %1846 = vmatprep.subr.bf16.mxu1 %v2072_v28  ;;  %1978 = vmatprep.subr.bf16.mxu0 %v2115_v47  ;;  %v2157_v28 = vld [vmem:[%s2315_s5 + $0x19c] ss:$20 sps:$4 sm:$0xff]  }
  0x2e   : > { %1025 = vmatmul.mubr.bf16.gmra.mrb[4].mxu0 %v2070_v27  ;;  %1121 = vmatmul.mubr.bf16.gmra.mrb[4].mxu1 %v2071_v29  ;;  %v2156_v27 = vld [vmem:[%s2315_s5 + $0x88] ss:$20 sps:$4 sm:$0xff]   ;;  %v2159_v29 = vld [vmem:[%s2315_s5 + $0xb0] ss:$20 sps:$4 sm:$0xff]  }
  0x2f   : > { %1847 = vmatpush3.bf16.msra.mxu1 %v2073_v30  ;;  %1032 = vmatprep.mubr.bf16.mxu0 %v2076_v32  ;;  %v2160_v30 = vld [vmem:[%s2315_s5 + $0x198] ss:$20 sps:$4 sm:$0xff]  }
  0x30   : > { %1848 = vmatprep.subr.bf16.mxu1 %v2074_v31  ;;  %1128 = vmatprep.mubr.bf16.mxu1 %v2078_v33  ;;  %v2161_v31 = vld [vmem:[%s2315_s5 + $0xd8] ss:$20 sps:$4 sm:$0xff]   ;;  %v2164_v33 = vld [vmem:[%s2315_s5 + $0x100] ss:$20 sps:$4 sm:$0xff]  }
  0x31   : > { %1979 = vmatpush3.bf16.msra.mxu0 %v2115_v47  ;;  %v2162_v32 = vld [vmem:[%s2315_s5 + $0x1c4] ss:$20 sps:$4 sm:$0xff]  }
  0x32   : > { %1980 = vmatprep.subr.bf16.mxu0 %v2134_v56  ;;  %v2181_v47 = vld [vmem:[%s2315_s5 + $0x218] ss:$20 sps:$4 sm:$0xff]  }
  0x33   : > { %1849 = vmatpush3.bf16.msra.mxu1 %v2075_v34  ;;  %v2165_v34 = vld [vmem:[%s2315_s5 + $0x1c0] ss:$20 sps:$4 sm:$0xff]  }
  0x34   : > { %1850 = vmatprep.subr.bf16.mxu1 %v2082_v37  ;;  %v2169_v37 = vld [vmem:[%s2315_s5 + $0x150] ss:$20 sps:$4 sm:$0xff]  }
  0x35   : > { %1981 = vmatpush3.bf16.msra.mxu0 %v2134_v56 }
  0x36   : > { %1033 = vmatmul.mubr.bf16.gmra.mrb[8].mxu0 %v2080_v36  ;;  %1129 = vmatmul.mubr.bf16.gmra.mrb[8].mxu1 %v2081_v38  ;;  %v2167_v36 = vld [vmem:[%s2315_s5 + $0x1ec] ss:$20 sps:$4 sm:$0xff]   ;;  %v2170_v38 = vld [vmem:[%s2315_s5 + $0x1e8] ss:$20 sps:$4 sm:$0xff]  }
  0x37   : > { %1851 = vmatpush3.bf16.msra.mxu1 %v2083_v39  ;;  %1040 = vmatprep.mubr.bf16.mxu0 %v2086_v41  ;;  %v2171_v39 = vld [vmem:[%s2315_s5 + $0x178] ss:$20 sps:$4 sm:$0xff]   ;;  %v2174_v41 = vld [vmem:[%s2315_s5 + $0x1a0] ss:$20 sps:$4 sm:$0xff]  }
  0x38   : > { %1852 = vmatprep.subr.bf16.mxu1 %v2084_v40  ;;  %1136 = vmatprep.mubr.bf16.mxu1 %v2088_v42  ;;  %v2172_v40 = vld [vmem:[%s2315_s5 + $0x214] ss:$20 sps:$4 sm:$0xff]   ;;  %v2175_v42 = vld [vmem:[%s2315_s5 + $0x210] ss:$20 sps:$4 sm:$0xff]  }
  0x3b   : > { %1853 = vmatpush3.bf16.msra.mxu1 %v2085_v43  ;;  %v2176_v43 = vld [vmem:[%s2315_s5 + $0x1c8] ss:$20 sps:$4 sm:$0xff]  }
  0x3c   : > { %1854 = vmatprep.subr.bf16.mxu1 %v2092_v46  ;;  %v2180_v46 = vld [vmem:[%s2315_s5 + $0x238] ss:$20 sps:$4 sm:$0xff]  }
  0x3e   : > { %1041 = vmatmul.mubr.bf16.gmra.mrb[12].mxu0 %v2090_v44  ;;  %1137 = vmatmul.mubr.bf16.gmra.mrb[12].mxu1 %v2091_v45  ;;  %v2177_v44 = vld [vmem:[%s2315_s5 + $0x23c] ss:$20 sps:$4 sm:$0xff]  }
  0x3f   : > { %1855 = vmatpush3.bf16.msra.mxu1 %v2093_v48  ;;  %1048 = vmatprep.mubr.bf16.mxu0 %v2097_v50  ;;  %v2179_v45 = vld [vmem:[%s2315_s5 + $0x1f0] ss:$20 sps:$4 sm:$0xff]   ;;  %v2185_v50 = vld [vmem:[%s2315_s5 + $0x260] ss:$20 sps:$4 sm:$0xff]  }
  0x40   : > { %1856 = vmatprep.subr.bf16.mxu1 %v2094_v49  ;;  %1177 = vmatprep.mubr.bf16.mxu1 %v2101_v51  ;;  %v2182_v48 = vld [vmem:[%s2315_s5 + $0x264] ss:$20 sps:$4 sm:$0xff]   ;;  %v2184_v49 = vld [vmem:[%s2315_s5 + $0x240] ss:$20 sps:$4 sm:$0xff]   ;;  %v2186_v51 = vld [vmem:[%s2315_s5 + $0x268] ss:$20 sps:$4 sm:$0xff]  }
  0x41   : > { %s1595_s5 = sshll.u32 %s2653_s13, 3 }
  0x42   : > { %s2574_s14 = scalar_lea.vmem %s2651_s2, %s1595_s5 }
  0x43   : > { %1857 = vmatpush3.bf16.msra.mxu1 %v2096_v52 }
  0x46   : > { %1049 = vmatmul.mubr.bf16.gmra.mrb[16].mxu0 %v2102_v54  ;;  %1178 = vmatmul.mubr.bf16.vlgmr.msra.gmra.mrb[16].mxu1 %v2099_v53 }
  0x47   : > { %1056 = vmatprep.mubr.bf16.mxu0 %v2103_v55  ;;  %1185 = vmatprep.mubr.bf16.mxu1 %v2105_v57 }
  0x4e   : > { %1057 = vmatmul.mubr.bf16.gmra.mrb[20].mxu0 %v2107_v58  ;;  %1186 = vmatmul.mubr.bf16.gmra.mrb[20].mxu1 %v2108_v59 }
  0x4f   : > { %1064 = vmatprep.mubr.bf16.mxu0 %v2109_v60  ;;  %1193 = vmatprep.mubr.bf16.mxu1 %v2111_v61 }
  0x56   : > { %1065 = vmatmul.mubr.bf16.gmra.mrb[24].mxu0 %v2113_v62  ;;  %1194 = vmatmul.mubr.bf16.gmra.mrb[24].mxu1 %v2114_v63 }
  0x57   : > { %1072 = vmatprep.mubr.bf16.mxu0 %v2116_v0  ;;  %1201 = vmatprep.mubr.bf16.mxu1 %v2118_v1 }
  0x5e   : > { %1073 = vmatmul.mubr.bf16.gmra.mrb[28].mxu0 %v2120_v2  ;;  %1202 = vmatmul.mubr.bf16.gmra.mrb[28].mxu1 %v2121_v3 }
  0x5f   : > { %1080 = vmatprep.mubr.bf16.mxu0 %v2122_v4  ;;  %1209 = vmatprep.mubr.bf16.mxu1 %v2124_v5 }
  0x66   : > { %1081 = vmatmul.mubr.bf16.gmra.mrb[32].mxu0 %v2126_v6  ;;  %1210 = vmatmul.mubr.bf16.gmra.mrb[32].mxu1 %v2127_v7 }
  0x67   : > { %1088 = vmatprep.mubr.bf16.mxu0 %v2128_v8  ;;  %1217 = vmatprep.mubr.bf16.mxu1 %v2130_v9 }
  0x6e   : > { %1089 = vmatmul.mubr.bf16.gmra.mrb[36].mxu0 %v2132_v10  ;;  %1218 = vmatmul.mubr.bf16.gmra.mrb[36].mxu1 %v2133_v11 }
  0x6f   : > { %1096 = vmatprep.mubr.bf16.mxu0 %v2135_v12  ;;  %1225 = vmatprep.mubr.bf16.mxu1 %v2137_v13 }
  0x76   : > { %1097 = vmatmul.mubr.bf16.gmra.mrb[40].mxu0 %v2139_v14  ;;  %1226 = vmatmul.mubr.bf16.gmra.mrb[40].mxu1 %v2140_v15 }
  0x77   : > { %1104 = vmatprep.mubr.bf16.mxu0 %v2141_v16  ;;  %1233 = vmatprep.mubr.bf16.mxu1 %v2143_v17 }
  0x7e   : > { %1105 = vmatmul.mubr.bf16.gmra.mrb[44].mxu0 %v2145_v18  ;;  %1234 = vmatmul.mubr.bf16.gmra.mrb[44].mxu1 %v2146_v19 }
  0x7f   : > { %1241 = vmatprep.mubr.bf16.mxu1 %v2147_v20  ;;  %1982 = vmatprep.mubr.msk.bf16.mxu0 %vm935_vm0, %v2149_v21 }
  0x86   : > { %1242 = vmatmul.mubr.bf16.gmra.mrb[48].mxu1 %v2150_v22  ;;  %1983 = vmatmul.mubr.msk.bf16.vlgmr.msra.gmra.mrb[48].mxu0 %vm935_vm0, %v2151_v23 }
  0x87   : > { %1249 = vmatprep.mubr.bf16.mxu1 %v2152_v24  ;;  %1986 = vmatprep.mubr.msk.bf16.mxu0 %vm935_vm0, %v2154_v25 }
  0x8e   : > { %1250 = vmatmul.mubr.bf16.gmra.mrb[52].mxu1 %v2155_v26  ;;  %1987 = vmatmul.mubr.msk.bf16.gmra.mrb[52].mxu0 %vm935_vm0, %v2156_v27 }
  0x8f   : > { %1257 = vmatprep.mubr.bf16.mxu1 %v2157_v28  ;;  %1990 = vmatprep.mubr.msk.bf16.mxu0 %vm935_vm0, %v2159_v29 }
  0x96   : > { %1258 = vmatmul.mubr.bf16.gmra.mrb[56].mxu1 %v2160_v30  ;;  %1991 = vmatmul.mubr.msk.bf16.gmra.mrb[56].mxu0 %vm935_vm0, %v2161_v31 }
  0x97   : > { %1265 = vmatprep.mubr.bf16.mxu1 %v2162_v32  ;;  %1994 = vmatprep.mubr.msk.bf16.mxu0 %vm935_vm0, %v2164_v33 }
  0x9e   : > { %1266 = vmatmul.mubr.bf16.gmra.mrb[60].mxu1 %v2165_v34  ;;  %1995 = vmatmul.mubr.msk.bf16.gmra.mrb[60].mxu0 %vm935_vm0, %v2166_v35 }
  0x9f   : > { %1273 = vmatprep.mubr.bf16.mxu1 %v2167_v36  ;;  %1998 = vmatprep.mubr.msk.bf16.mxu0 %vm935_vm0, %v2169_v37 }
  0xa6   : > { %1274 = vmatmul.mubr.bf16.gmra.mrb[64].mxu1 %v2170_v38  ;;  %1999 = vmatmul.mubr.msk.bf16.gmra.mrb[64].mxu0 %vm935_vm0, %v2171_v39 }
  0xa7   : > { %1281 = vmatprep.mubr.bf16.mxu1 %v2172_v40  ;;  %2002 = vmatprep.mubr.msk.bf16.mxu0 %vm935_vm0, %v2174_v41 }
  0xae   : > { %1282 = vmatmul.mubr.bf16.gmra.mrb[68].mxu1 %v2175_v42  ;;  %2003 = vmatmul.mubr.msk.bf16.gmra.mrb[68].mxu0 %vm935_vm0, %v2176_v43 }
  0xaf   : > { %1289 = vmatprep.mubr.bf16.mxu1 %v2177_v44  ;;  %2006 = vmatprep.mubr.msk.bf16.mxu0 %vm935_vm0, %v2179_v45 }
  0xb6   : > { %1290 = vmatmul.mubr.bf16.gmra.mrb[72].mxu1 %v2180_v46  ;;  %2007 = vmatmul.mubr.msk.bf16.gmra.mrb[72].mxu0 %vm935_vm0, %v2181_v47 }
  0xb7   : > { %1297 = vmatprep.mubr.bf16.mxu1 %v2182_v48  ;;  %2010 = vmatprep.mubr.msk.bf16.mxu0 %vm935_vm0, %v2184_v49 }
  0xbe   : > { %1298 = vmatmul.mubr.bf16.gmra.mrb[76].mxu1 %v2185_v50  ;;  %2011 = vmatmul.mubr.msk.bf16.gmra.mrb[76].mxu0 %vm935_vm0, %v2186_v51 }
  0xf9   : > { %v1818_v52 = vpop.f32.mrb[0].mxu1  ;;  %v1746_v53 = vpop.f32.mrb[0].mxu0 }
  0xfa   : > { %v1819_v54 = vpop.f32.mrb[1].mxu1  ;;  %v1747_v55 = vpop.f32.mrb[1].mxu0 }
  0xfb   : > { %v2494_v56 = vadd.f32 %v1819_v54, %v1818_v52  ;;  %v1821_v57 = vpop.f32.mrb[2].mxu1  ;;  %v1748_v58 = vadd.f32 %v1747_v55, %v1746_v53  ;;  %v1749_v59 = vpop.f32.mrb[2].mxu0 }
  0xfc   : > { %v1822_v60 = vpop.f32.mrb[3].mxu1  ;;  %v1750_v61 = vpop.f32.mrb[3].mxu0 }
  0xfd   : > { %v2496_v62 = vadd.f32 %v1822_v60, %v1821_v57  ;;  %v1751_v63 = vadd.f32 %v1750_v61, %v1749_v59 }
 0x101   : > { %v1824_v0 = vpop.f32.mrb[4].mxu1  ;;  %v1752_v1 = vpop.f32.mrb[4].mxu0 }
 0x102   : > { %v1825_v2 = vpop.f32.mrb[5].mxu1  ;;  %v1753_v3 = vpop.f32.mrb[5].mxu0 }
 0x103   : > { %v2498_v4 = vadd.f32 %v1825_v2, %v1824_v0  ;;  %v1827_v5 = vpop.f32.mrb[6].mxu1  ;;  %v1754_v6 = vadd.f32 %v1753_v3, %v1752_v1  ;;  %v1755_v7 = vpop.f32.mrb[6].mxu0 }
 0x104   : > { %v1828_v8 = vpop.f32.mrb[7].mxu1  ;;  %v1756_v9 = vpop.f32.mrb[7].mxu0 }
 0x105   : > { %v2500_v10 = vadd.f32 %v1828_v8, %v1827_v5  ;;  %v1757_v11 = vadd.f32 %v1756_v9, %v1755_v7 }
 0x109   : > { %v1830_v12 = vpop.f32.mrb[8].mxu1  ;;  %v1758_v13 = vpop.f32.mrb[8].mxu0 }
 0x10a   : > { %v1831_v14 = vpop.f32.mrb[9].mxu1  ;;  %v1759_v15 = vpop.f32.mrb[9].mxu0 }
 0x10b   : > { %v2502_v16 = vadd.f32 %v1831_v14, %v1830_v12  ;;  %v1833_v17 = vpop.f32.mrb[10].mxu1  ;;  %v1760_v18 = vadd.f32 %v1759_v15, %v1758_v13  ;;  %v1761_v19 = vpop.f32.mrb[10].mxu0 }
 0x10c   : > { %v1834_v20 = vpop.f32.mrb[11].mxu1  ;;  %v1762_v21 = vpop.f32.mrb[11].mxu0 }
 0x10d   : > { %v2504_v22 = vadd.f32 %v1834_v20, %v1833_v17  ;;  %v1763_v23 = vadd.f32 %v1762_v21, %v1761_v19 }
 0x111   : > { %v1836_v24 = vpop.f32.mrb[12].mxu1  ;;  %v1764_v25 = vpop.f32.mrb[12].mxu0 }
 0x112   : > { %v1837_v26 = vpop.f32.mrb[13].mxu1  ;;  %v1765_v27 = vpop.f32.mrb[13].mxu0 }
 0x113   : > { %v2506_v28 = vadd.f32 %v1837_v26, %v1836_v24  ;;  %v1839_v29 = vpop.f32.mrb[14].mxu1  ;;  %v1766_v30 = vadd.f32 %v1765_v27, %v1764_v25  ;;  %v1767_v31 = vpop.f32.mrb[14].mxu0 }
 0x114   : > { %v1840_v32 = vpop.f32.mrb[15].mxu1  ;;  %v1768_v33 = vpop.f32.mrb[15].mxu0 }
 0x115   : > { %v2508_v34 = vadd.f32 %v1840_v32, %v1839_v29  ;;  %v1769_v35 = vadd.f32 %v1768_v33, %v1767_v31 }
 0x119   : > { %v1858_v36 = vpop.f32.mrb[16].mxu1  ;;  %v1770_v37 = vpop.f32.mrb[16].mxu0 }
 0x11a   : > { %v1859_v38 = vpop.f32.mrb[17].mxu1  ;;  %v1771_v39 = vpop.f32.mrb[17].mxu0 }
 0x11b   : > { %v1860_v40 = vadd.f32 %v1859_v38, %v1858_v36  ;;  %v1861_v41 = vpop.f32.mrb[18].mxu1  ;;  %v1772_v42 = vadd.f32 %v1771_v39, %v1770_v37  ;;  %v1773_v43 = vpop.f32.mrb[18].mxu0 }
 0x11c   : > { %v1862_v44 = vpop.f32.mrb[19].mxu1  ;;  %v1774_v45 = vpop.f32.mrb[19].mxu0 }
 0x11d   : > { %v1863_v46 = vadd.f32 %v1862_v44, %v1861_v41  ;;  %v1775_v47 = vadd.f32 %v1774_v45, %v1773_v43  ;;  %v2510_v48 = vadd.f32 %v1860_v40, %v1748_v58 }
 0x11f   : > { %v2512_v49 = vadd.f32 %v1863_v46, %v1751_v63 }
 0x121   : > { %v1864_v50 = vpop.f32.mrb[20].mxu1  ;;  %v1776_v51 = vpop.f32.mrb[20].mxu0 }
 0x122   : > { %v1865_v52 = vpop.f32.mrb[21].mxu1  ;;  %v1777_v53 = vpop.f32.mrb[21].mxu0 }
 0x123   : > { %v1866_v54 = vadd.f32 %v1865_v52, %v1864_v50  ;;  %v1867_v55 = vpop.f32.mrb[22].mxu1  ;;  %v1778_v57 = vadd.f32 %v1777_v53, %v1776_v51  ;;  %v1779_v59 = vpop.f32.mrb[22].mxu0 }
 0x124   : > { %v1868_v60 = vpop.f32.mrb[23].mxu1  ;;  %v1780_v61 = vpop.f32.mrb[23].mxu0 }
 0x125   : > { %v1869_v0 = vadd.f32 %v1868_v60, %v1867_v55  ;;  %v1781_v1 = vadd.f32 %v1780_v61, %v1779_v59  ;;  %v2514_v2 = vadd.f32 %v1866_v54, %v1754_v6 }
 0x127   : > { %v2516_v3 = vadd.f32 %v1869_v0, %v1757_v11 }
 0x129   : > { %v1870_v58 = vpop.f32.mrb[24].mxu1  ;;  %v1782_v5 = vpop.f32.mrb[24].mxu0 }
 0x12a   : > { %v1871_v63 = vpop.f32.mrb[25].mxu1  ;;  %v1783_v7 = vpop.f32.mrb[25].mxu0 }
 0x12b   : > { %v1872_v8 = vadd.f32 %v1871_v63, %v1870_v58  ;;  %v1873_v9 = vpop.f32.mrb[26].mxu1  ;;  %v1784_v12 = vadd.f32 %v1783_v7, %v1782_v5  ;;  %v1785_v13 = vpop.f32.mrb[26].mxu0 }
 0x12c   : > { %v1874_v14 = vpop.f32.mrb[27].mxu1  ;;  %v1786_v15 = vpop.f32.mrb[27].mxu0 }
 0x12d   : > { %v1875_v17 = vadd.f32 %v1874_v14, %v1873_v9  ;;  %v1787_v19 = vadd.f32 %v1786_v15, %v1785_v13  ;;  %v2518_v20 = vadd.f32 %v1872_v8, %v1760_v18 }
 0x12f   : > { %v2520_v21 = vadd.f32 %v1875_v17, %v1763_v23 }
 0x131   : > { %v1876_v6 = vpop.f32.mrb[28].mxu1  ;;  %v1788_v24 = vpop.f32.mrb[28].mxu0 }
 0x132   : > { %v1877_v11 = vpop.f32.mrb[29].mxu1  ;;  %v1789_v25 = vpop.f32.mrb[29].mxu0 }
 0x133   : > { %v1878_v26 = vadd.f32 %v1877_v11, %v1876_v6  ;;  %v1879_v27 = vpop.f32.mrb[30].mxu1  ;;  %v1790_v29 = vadd.f32 %v1789_v25, %v1788_v24  ;;  %v1791_v31 = vpop.f32.mrb[30].mxu0 }
 0x134   : > { %v1880_v32 = vpop.f32.mrb[31].mxu1  ;;  %v1792_v33 = vpop.f32.mrb[31].mxu0 }
 0x135   : > { %v1881_v36 = vadd.f32 %v1880_v32, %v1879_v27  ;;  %v1793_v37 = vadd.f32 %v1792_v33, %v1791_v31  ;;  %v2522_v38 = vadd.f32 %v1878_v26, %v1766_v30 }
 0x137   : > { %v2524_v39 = vadd.f32 %v1881_v36, %v1769_v35 }
 0x139   : > { %v1882_v18 = vpop.f32.mrb[32].mxu1  ;;  %v1794_v40 = vpop.f32.mrb[32].mxu0 }
 0x13a   : > { %v1883_v23 = vpop.f32.mrb[33].mxu1  ;;  %v1795_v41 = vpop.f32.mrb[33].mxu0 }
 0x13b   : > { %v1884_v43 = vadd.f32 %v1883_v23, %v1882_v18  ;;  %v1885_v44 = vpop.f32.mrb[34].mxu1  ;;  %v2526_v45 = vadd.f32 %v1795_v41, %v1794_v40  ;;  %v1797_v46 = vpop.f32.mrb[34].mxu0 }
 0x13c   : > { %v1886_v50 = vpop.f32.mrb[35].mxu1  ;;  %v1798_v51 = vpop.f32.mrb[35].mxu0 }
 0x13d   : > { %v1887_v52 = vadd.f32 %v1886_v50, %v1885_v44  ;;  %v2528_v53 = vadd.f32 %v1798_v51, %v1797_v46  ;;  %v2530_v54 = vadd.f32 %v1884_v43, %v1772_v42 }
 0x13f   : > { %v2532_v30 = vadd.f32 %v1887_v52, %v1775_v47 }
 0x141   : > { %v1888_v35 = vpop.f32.mrb[36].mxu1  ;;  %v1800_v55 = vpop.f32.mrb[36].mxu0 }
 0x142   : > { %v1889_v59 = vpop.f32.mrb[37].mxu1  ;;  %v1801_v60 = vpop.f32.mrb[37].mxu0 }
 0x143   : > { %v1890_v61 = vadd.f32 %v1889_v59, %v1888_v35  ;;  %v1891_v0 = vpop.f32.mrb[38].mxu1  ;;  %v2534_v58 = vadd.f32 %v1801_v60, %v1800_v55  ;;  %v1803_v5 = vpop.f32.mrb[38].mxu0 }
 0x144   : > { %v1892_v63 = vpop.f32.mrb[39].mxu1  ;;  %v1804_v7 = vpop.f32.mrb[39].mxu0 }
 0x145   : > { %v1893_v8 = vadd.f32 %v1892_v63, %v1891_v0  ;;  %v2536_v9 = vadd.f32 %v1804_v7, %v1803_v5  ;;  %v2538_v13 = vadd.f32 %v1890_v61, %v1778_v57 }
 0x147   : > { %v2540_v42 = vadd.f32 %v1893_v8, %v1781_v1 }
 0x149   : > { %v1894_v47 = vpop.f32.mrb[40].mxu1  ;;  %v1806_v14 = vpop.f32.mrb[40].mxu0 }
 0x14a   : > { %v1895_v15 = vpop.f32.mrb[41].mxu1  ;;  %v1807_v17 = vpop.f32.mrb[41].mxu0 }
 0x14b   : > { %v1896_v6 = vadd.f32 %v1895_v15, %v1894_v47  ;;  %v1897_v24 = vpop.f32.mrb[42].mxu1  ;;  %v2542_v11 = vadd.f32 %v1807_v17, %v1806_v14  ;;  %v1809_v25 = vpop.f32.mrb[42].mxu0 }
 0x14c   : > { %v1898_v26 = vpop.f32.mrb[43].mxu1  ;;  %v1810_v27 = vpop.f32.mrb[43].mxu0 }
 0x14d   : > { %v1899_v31 = vadd.f32 %v1898_v26, %v1897_v24  ;;  %v2544_v32 = vadd.f32 %v1810_v27, %v1809_v25  ;;  %v2546_v33 = vadd.f32 %v1896_v6, %v1784_v12 }
 0x14f   : > { %v2548_v57 = vadd.f32 %v1899_v31, %v1787_v19 }
 0x151   : > { %v1900_v1 = vpop.f32.mrb[44].mxu1  ;;  %v1812_v36 = vpop.f32.mrb[44].mxu0 }
 0x152   : > { %v1901_v18 = vpop.f32.mrb[45].mxu1  ;;  %v1813_v40 = vpop.f32.mrb[45].mxu0 }
 0x153   : > { %v1902_v23 = vadd.f32 %v1901_v18, %v1900_v1  ;;  %v1903_v41 = vpop.f32.mrb[46].mxu1  ;;  %v2550_v43 = vadd.f32 %v1813_v40, %v1812_v36  ;;  %v1815_v44 = vpop.f32.mrb[46].mxu0 }
 0x154   : > { %v1904_v46 = vpop.f32.mrb[47].mxu1  ;;  %v1816_v50 = vpop.f32.mrb[47].mxu0 }
 0x155   : > { %v1905_v51 = vadd.f32 %v1904_v46, %v1903_v41  ;;  %v2552_v52 = vadd.f32 %v1816_v50, %v1815_v44  ;;  %v2554_v35 = vadd.f32 %v1902_v23, %v1790_v29 }
 0x157   : > { %v2556_v12 = vadd.f32 %v1905_v51, %v1793_v37 }
 0x159   : > { %v1906_v19 = vpop.f32.mrb[48].mxu1  ;;  %v1984_v55 = vpop.f32.mrb[48].mxu0 }
 0x15a   : > { %v1349_v59 = vadd.f32 %v1984_v55, %v2514_v2  ;;  %v1907_v60 = vpop.f32.mrb[49].mxu1  ;;  %v1340_v61 = vpop.f32.mrb[49].mxu0 }
 0x15b   : > { %v1908_v0 = vadd.f32 %v1907_v60, %v1906_v19  ;;  %v1341_v5 = vadd.f32 %v1340_v61, %v2510_v48  ;;  %v1909_v63 = vpop.f32.mrb[50].mxu1  ;;  %v1985_v7 = vpop.f32.mrb[50].mxu0 }
 0x15c   : > { %2187 = vtanh.f32 %v1349_v59  ;;  %v1352_v8 = vadd.f32 %v1985_v7, %v2516_v3  ;;  %v1910_v47 = vpop.f32.mrb[51].mxu1  ;;  %v1343_v29 = vpop.f32.mrb[51].mxu0 }
 0x15d   : > { %2189 = vtanh.f32 %v1341_v5  ;;  %v1911_v37 = vadd.f32 %v1910_v47, %v1909_v63  ;;  %v1344_v14 = vadd.f32 %v1343_v29, %v2512_v49  ;;  %v2563_v15 = vadd.f32 %v1908_v0, %v2526_v45 }
 0x15e   : > { %2191 = vtanh.f32 %v1352_v8 }
 0x15f   : > { %2193 = vtanh.f32 %v1344_v14  ;;  %v2566_v2 = vadd.f32 %v1911_v37, %v2528_v53 }
 0x161   : > { %v1912_v48 = vpop.f32.mrb[52].mxu1  ;;  %v1988_v17 = vpop.f32.mrb[52].mxu0 }
 0x162   : > { %v1365_v6 = vadd.f32 %v1988_v17, %v2522_v38  ;;  %v1913_v3 = vpop.f32.mrb[53].mxu1  ;;  %v1356_v24 = vpop.f32.mrb[53].mxu0 }
 0x163   : > { %v1914_v25 = vadd.f32 %v1913_v3, %v1912_v48  ;;  %v1357_v26 = vadd.f32 %v1356_v24, %v2518_v20  ;;  %v1915_v27 = vpop.f32.mrb[54].mxu1  ;;  %v1989_v49 = vpop.f32.mrb[54].mxu0 }
 0x164   : > { %2195 = vtanh.f32 %v1365_v6  ;;  %v1368_v45 = vadd.f32 %v1989_v49, %v2524_v39  ;;  %v1916_v53 = vpop.f32.mrb[55].mxu1  ;;  %v1359_v38 = vpop.f32.mrb[55].mxu0 }
 0x165   : > { %2197 = vtanh.f32 %v1357_v26  ;;  %v1917_v31 = vadd.f32 %v1916_v53, %v1915_v27  ;;  %v1360_v20 = vadd.f32 %v1359_v38, %v2520_v21  ;;  %v2579_v1 = vadd.f32 %v1914_v25, %v2534_v58 }
 0x166   : > { %v2188_v36 = vpop.eup %2187  ;;  %2199 = vtanh.f32 %v1368_v45 }
 0x167   : > { %v2190_v18 = vpop.eup %2189  ;;  %1501 = vst [vmem:[%s2574_s14 + $0x10] sm:$0xff] %v2188_v36  ;;  %2201 = vtanh.f32 %v1360_v20  ;;  %v2583_v40 = vadd.f32 %v1917_v31, %v2536_v9 }
 0x168   : > { %v2192_v39 = vpop.eup %2191  ;;  %1499 = vst [vmem:[%s2574_s14] sm:$0xff] %v2190_v18 }
 0x169   : > { %v2194_v23 = vpop.eup %2193  ;;  %1502 = vst [vmem:[%s2574_s14 + $0x18] sm:$0xff] %v2192_v39  ;;  %v1918_v41 = vpop.f32.mrb[56].mxu1 }
 0x16a   : > { %v1992_v44 = vpop.f32.mrb[56].mxu0  ;;  %1500 = vst [vmem:[%s2574_s14 + $0x8] sm:$0xff] %v2194_v23  ;;  %v1919_v46 = vpop.f32.mrb[57].mxu1 }
 0x16b   : > { %v1381_v21 = vadd.f32 %v1992_v44, %v2538_v13  ;;  %v1372_v58 = vpop.f32.mrb[57].mxu0  ;;  %v1920_v50 = vadd.f32 %v1919_v46, %v1918_v41  ;;  %v1921_v19 = vpop.f32.mrb[58].mxu1 }
 0x16c   : > { %v1373_v51 = vadd.f32 %v1372_v58, %v2530_v54  ;;  %v1993_v55 = vpop.f32.mrb[58].mxu0  ;;  %v1922_v59 = vpop.f32.mrb[59].mxu1 }
 0x16d   : > { %2203 = vtanh.f32 %v1381_v21  ;;  %v1384_v9 = vadd.f32 %v1993_v55, %v2540_v42  ;;  %v1375_v60 = vpop.f32.mrb[59].mxu0  ;;  %v1923_v61 = vadd.f32 %v1922_v59, %v1921_v19  ;;  %v2593_v0 = vadd.f32 %v1920_v50, %v2542_v11 }
 0x16e   : > { %2205 = vtanh.f32 %v1373_v51  ;;  %v1376_v13 = vadd.f32 %v1375_v60, %v2532_v30  ;;  %v2196_v5 = vpop.eup %2195 }
 0x16f   : > { %2207 = vtanh.f32 %v1384_v9  ;;  %v2198_v54 = vpop.eup %2197  ;;  %1505 = vst [vmem:[%s2574_s14 + $0x30] sm:$0xff] %v2196_v5  ;;  %v2597_v63 = vadd.f32 %v1923_v61, %v2544_v32 }
 0x170   : > { %2209 = vtanh.f32 %v1376_v13  ;;  %v2200_v42 = vpop.eup %2199  ;;  %1503 = vst [vmem:[%s2574_s14 + $0x20] sm:$0xff] %v2198_v54 }
 0x171   : > { %v2202_v7 = vpop.eup %2201  ;;  %1506 = vst [vmem:[%s2574_s14 + $0x38] sm:$0xff] %v2200_v42  ;;  %v1924_v8 = vpop.f32.mrb[60].mxu1 }
 0x172   : > { %v1996_v47 = vpop.f32.mrb[60].mxu0  ;;  %1504 = vst [vmem:[%s2574_s14 + $0x28] sm:$0xff] %v2202_v7  ;;  %v1925_v29 = vpop.f32.mrb[61].mxu1 }
 0x173   : > { %v1397_v30 = vadd.f32 %v1996_v47, %v2554_v35  ;;  %v1388_v11 = vpop.f32.mrb[61].mxu0  ;;  %v1926_v37 = vadd.f32 %v1925_v29, %v1924_v8  ;;  %v1927_v48 = vpop.f32.mrb[62].mxu1 }
 0x174   : > { %v1389_v14 = vadd.f32 %v1388_v11, %v2546_v33  ;;  %v1997_v17 = vpop.f32.mrb[62].mxu0  ;;  %v1928_v6 = vpop.f32.mrb[63].mxu1 }
 0x175   : > { %2211 = vtanh.f32 %v1397_v30  ;;  %v1400_v32 = vadd.f32 %v1997_v17, %v2556_v12  ;;  %v1391_v3 = vpop.f32.mrb[63].mxu0  ;;  %v1929_v24 = vadd.f32 %v1928_v6, %v1927_v48  ;;  %v1268_v25 = vadd.f32 %v1926_v37, %v2550_v43 }
 0x176   : > { %2213 = vtanh.f32 %v1389_v14  ;;  %v1392_v35 = vadd.f32 %v1391_v3, %v2548_v57 }
 0x177   : > { %v2204_v26 = vpop.eup %2203  ;;  %2215 = vtanh.f32 %v1400_v32  ;;  %v1271_v33 = vadd.f32 %v1929_v24, %v2552_v52 }
 0x178   : > { %v2206_v27 = vpop.eup %2205  ;;  %1509 = vst [vmem:[%s2574_s14 + $0x50] sm:$0xff] %v2204_v26  ;;  %2217 = vtanh.f32 %v1392_v35 }
 0x179   : > { %v2208_v49 = vpop.eup %2207  ;;  %1507 = vst [vmem:[%s2574_s14 + $0x40] sm:$0xff] %v2206_v27  ;;  %v1930_v45 = vpop.f32.mrb[64].mxu1 }
 0x17a   : > { %v2210_v12 = vpop.eup %2209  ;;  %1510 = vst [vmem:[%s2574_s14 + $0x58] sm:$0xff] %v2208_v49  ;;  %v2000_v53 = vpop.f32.mrb[64].mxu0 }
 0x17b   : > { %1508 = vst [vmem:[%s2574_s14 + $0x48] sm:$0xff] %v2210_v12  ;;  %v1413_v38 = vadd.f32 %v2000_v53, %v2579_v1  ;;  %v1931_v31 = vpop.f32.mrb[65].mxu1  ;;  %v1404_v57 = vpop.f32.mrb[65].mxu0 }
 0x17c   : > { %v1932_v43 = vadd.f32 %v1931_v31, %v1930_v45  ;;  %v1405_v20 = vadd.f32 %v1404_v57, %v2563_v15  ;;  %v1933_v36 = vpop.f32.mrb[66].mxu1  ;;  %v2001_v18 = vpop.f32.mrb[66].mxu0 }
 0x17d   : > { %2219 = vtanh.f32 %v1413_v38  ;;  %v1416_v52 = vadd.f32 %v2001_v18, %v2583_v40  ;;  %v1934_v39 = vpop.f32.mrb[67].mxu1  ;;  %v1407_v23 = vpop.f32.mrb[67].mxu0 }
 0x17e   : > { %2221 = vtanh.f32 %v1405_v20  ;;  %v1935_v41 = vadd.f32 %v1934_v39, %v1933_v36  ;;  %v1408_v1 = vadd.f32 %v1407_v23, %v2566_v2  ;;  %v1276_v44 = vadd.f32 %v1932_v43, %v2494_v56 }
 0x17f   : > { %v2212_v21 = vpop.eup %2211  ;;  %2223 = vtanh.f32 %v1416_v52 }
 0x180   : > { %v2214_v46 = vpop.eup %2213  ;;  %1513 = vst [vmem:[%s2574_s14 + $0x70] sm:$0xff] %v2212_v21  ;;  %2225 = vtanh.f32 %v1408_v1  ;;  %v1279_v15 = vadd.f32 %v1935_v41, %v2496_v62 }
 0x181   : > { %v2216_v58 = vpop.eup %2215  ;;  %1511 = vst [vmem:[%s2574_s14 + $0x60] sm:$0xff] %v2214_v46  ;;  %v1936_v50 = vpop.f32.mrb[68].mxu1 }
 0x182   : > { %v2218_v40 = vpop.eup %2217  ;;  %1514 = vst [vmem:[%s2574_s14 + $0x78] sm:$0xff] %v2216_v58  ;;  %v2004_v51 = vpop.f32.mrb[68].mxu0 }
 0x183   : > { %1512 = vst [vmem:[%s2574_s14 + $0x68] sm:$0xff] %v2218_v40  ;;  %v1429_v19 = vadd.f32 %v2004_v51, %v1268_v25  ;;  %v1937_v55 = vpop.f32.mrb[69].mxu1  ;;  %v1420_v9 = vpop.f32.mrb[69].mxu0 }
 0x184   : > { %v1938_v2 = vadd.f32 %v1937_v55, %v1936_v50  ;;  %v1421_v56 = vadd.f32 %v1420_v9, %v2593_v0  ;;  %v1939_v59 = vpop.f32.mrb[70].mxu1  ;;  %v2005_v60 = vpop.f32.mrb[70].mxu0 }
 0x185   : > { %2227 = vtanh.f32 %v1429_v19  ;;  %v1432_v61 = vadd.f32 %v2005_v60, %v1271_v33  ;;  %v1940_v62 = vpop.f32.mrb[71].mxu1  ;;  %v1423_v13 = vpop.f32.mrb[71].mxu0 }
 0x186   : > { %2229 = vtanh.f32 %v1421_v56  ;;  %v1941_v5 = vadd.f32 %v1940_v62, %v1939_v59  ;;  %v1424_v54 = vadd.f32 %v1423_v13, %v2597_v63  ;;  %v1284_v42 = vadd.f32 %v1938_v2, %v2498_v4 }
 0x187   : > { %v2220_v7 = vpop.eup %2219  ;;  %2231 = vtanh.f32 %v1432_v61 }
 0x188   : > { %v2222_v8 = vpop.eup %2221  ;;  %1517 = vst [vmem:[%s2574_s14 + $0x90] sm:$0xff] %v2220_v7  ;;  %2233 = vtanh.f32 %v1424_v54  ;;  %v1287_v0 = vadd.f32 %v1941_v5, %v2500_v10 }
 0x189   : > { %v2224_v47 = vpop.eup %2223  ;;  %1515 = vst [vmem:[%s2574_s14 + $0x80] sm:$0xff] %v2222_v8  ;;  %v1942_v29 = vpop.f32.mrb[72].mxu1 }
 0x18a   : > { %v2226_v30 = vpop.eup %2225  ;;  %1518 = vst [vmem:[%s2574_s14 + $0x98] sm:$0xff] %v2224_v47  ;;  %v2008_v11 = vpop.f32.mrb[72].mxu0 }
 0x18b   : > { %1516 = vst [vmem:[%s2574_s14 + $0x88] sm:$0xff] %v2226_v30  ;;  %v1445_v37 = vadd.f32 %v2008_v11, %v1284_v42  ;;  %v1943_v14 = vpop.f32.mrb[73].mxu1  ;;  %v1436_v48 = vpop.f32.mrb[73].mxu0 }
 0x18c   : > { %v1944_v63 = vadd.f32 %v1943_v14, %v1942_v29  ;;  %v1437_v4 = vadd.f32 %v1436_v48, %v1276_v44  ;;  %v1945_v17 = vpop.f32.mrb[74].mxu1  ;;  %v2009_v32 = vpop.f32.mrb[74].mxu0 }
 0x18d   : > { %2235 = vtanh.f32 %v1445_v37  ;;  %v1448_v6 = vadd.f32 %v2009_v32, %v1287_v0  ;;  %v1946_v10 = vpop.f32.mrb[75].mxu1  ;;  %v1439_v3 = vpop.f32.mrb[75].mxu0 }
 0x18e   : > { %2237 = vtanh.f32 %v1437_v4  ;;  %v1947_v24 = vadd.f32 %v1946_v10, %v1945_v17  ;;  %v1440_v35 = vadd.f32 %v1439_v3, %v1279_v15  ;;  %v1292_v25 = vadd.f32 %v1944_v63, %v2502_v16 }
 0x18f   : > { %v2228_v26 = vpop.eup %2227  ;;  %2239 = vtanh.f32 %v1448_v6 }
 0x190   : > { %v2230_v27 = vpop.eup %2229  ;;  %1521 = vst [vmem:[%s2574_s14 + $0xb0] sm:$0xff] %v2228_v26  ;;  %2241 = vtanh.f32 %v1440_v35  ;;  %v1295_v33 = vadd.f32 %v1947_v24, %v2504_v22 }
 0x191   : > { %v2232_v49 = vpop.eup %2231  ;;  %1519 = vst [vmem:[%s2574_s14 + $0xa0] sm:$0xff] %v2230_v27  ;;  %v1948_v45 = vpop.f32.mrb[76].mxu1 }
 0x192   : > { %v2234_v12 = vpop.eup %2233  ;;  %1522 = vst [vmem:[%s2574_s14 + $0xb8] sm:$0xff] %v2232_v49  ;;  %v2012_v53 = vpop.f32.mrb[76].mxu0 }
 0x193   : > { %1520 = vst [vmem:[%s2574_s14 + $0xa8] sm:$0xff] %v2234_v12  ;;  %v1949_v38 = vpop.f32.mrb[77].mxu1  ;;  %v1452_v31 = vpop.f32.mrb[77].mxu0 }
 0x194   : > { %v1950_v57 = vadd.f32 %v1949_v38, %v1948_v45  ;;  %v1453_v43 = vadd.f32 %v1452_v31, %v1292_v25  ;;  %v1951_v16 = vpop.f32.mrb[78].mxu1  ;;  %v2013_v20 = vpop.f32.mrb[78].mxu0 }
 0x195   : > { %v1952_v36 = vpop.f32.mrb[79].mxu1  ;;  %v1455_v18 = vpop.f32.mrb[79].mxu0 }
 0x196   : > { %v1300_v22 = vadd.f32 %v1950_v57, %v2506_v28  ;;  %2243 = vtanh.f32 %v1453_v43  ;;  %v1953_v52 = vadd.f32 %v1952_v36, %v1951_v16  ;;  %v1456_v39 = vadd.f32 %v1455_v18, %v1295_v33 }
 0x197   : > { %v2236_v23 = vpop.eup %2235 }
 0x198   : > { %v2238_v41 = vpop.eup %2237  ;;  %1525 = vst [vmem:[%s2574_s14 + $0xd0] sm:$0xff] %v2236_v23  ;;  %v1461_v1 = vadd.f32 %v2012_v53, %v1300_v22  ;;  %v1303_v44 = vadd.f32 %v1953_v52, %v2508_v34  ;;  %2245 = vtanh.f32 %v1456_v39 }
 0x199   : > { %v2240_v21 = vpop.eup %2239  ;;  %1523 = vst [vmem:[%s2574_s14 + $0xc0] sm:$0xff] %v2238_v41 }
 0x19a   : > { %v2242_v46 = vpop.eup %2241  ;;  %1526 = vst [vmem:[%s2574_s14 + $0xd8] sm:$0xff] %v2240_v21  ;;  %2247 = vtanh.f32 %v1461_v1  ;;  %v1464_v28 = vadd.f32 %v2013_v20, %v1303_v44 }
 0x19b   : > { %1524 = vst [vmem:[%s2574_s14 + $0xc8] sm:$0xff] %v2242_v46 }
 0x19c   : > { %2249 = vtanh.f32 %v1464_v28 }
 0x1a0   : > { %v2244_v15 = vpop.eup %2243 }
 0x1a1   : > { %1527 = vst [vmem:[%s2574_s14 + $0xe0] sm:$0xff] %v2244_v15 }
 0x1a2   : > { %v2246_v58 = vpop.eup %2245 }
 0x1a3   : > { %1528 = vst [vmem:[%s2574_s14 + $0xe8] sm:$0xff] %v2246_v58 }
 0x1a4   : > { %v2248_v40 = vpop.eup %2247 }
 0x1a5   : > { %1529 = vst [vmem:[%s2574_s14 + $0xf0] sm:$0xff] %v2248_v40 }
 0x1a6   : > { %v2250_v50 = vpop.eup %2249 }
 0x1a7   : > { %1530 = vst [vmem:[%s2574_s14 + $0xf8] sm:$0xff] %v2250_v50 }
 0x1a8 PF: > { %s12_s9 = sadd.s32 1, %s2257_s9  }
 0x1a9   : > { %p9_p4 = scmp.ge.s32.totalorder %s12_s9, 4  }
 0x1ab   :  { %11 = sbr.rel (!%p9_p4) target bundleno = 1 (0x1), region = 58 }

</bundles_post_ra>
